<compile_context>
chip_gen: v7x
topology: tpu7x:2x2x1
jax: 0.10.0
libtpu: 0.0.40
codegen_flags: <defaults>
</compile_context>

<pallas_src>
import math
from functools import partial

import jax
import jax.numpy as jnp
from jax import lax
from jax.experimental import pallas as pl
from jax.experimental.pallas import tpu as pltpu

EPS = 1e-5        # nn.BatchNorm1d default eps
LANE_MULT = 256   # feature-dim padding: 256-wide MXU on v6e/v7x
ROW_MULT = 8      # sublane multiple for activation rows


def _pad_up(v, mult):
    return ((v + mult - 1) // mult) * mult


# ---------------------------------------------------------------------------
# BatchNorm1d (training mode, biased batch statistics) over one view block.
# Rows >= n_real are zero padding: they are masked out of the statistics; their
# normalized values are garbage but get sliced off by the wrapper.
# ---------------------------------------------------------------------------
def _bn_block(h, n_real, n_rows, gamma=None, beta=None):
    inv_n = 1.0 / float(n_real)
    if n_real == n_rows:
        hm = h                                          # no padded rows -> no mask
    else:
        rows = lax.broadcasted_iota(jnp.int32, h.shape, 0)
        hm = jnp.where(rows < n_real, h, 0.0)
    mean = jnp.sum(hm, axis=0, keepdims=True) * inv_n
    var = jnp.sum(hm * hm, axis=0, keepdims=True) * inv_n - mean * mean
    var = jnp.maximum(var, 0.0)                         # clamp single-pass variance
    h = (h - mean) * lax.rsqrt(var + EPS)               # rsqrt -> EUP slot
    if gamma is not None:
        h = h * gamma + beta
    return h


# ---------------------------------------------------------------------------
# Fused forward kernel (one grid step per view):
#   * momentum EMA in VMEM (folded into the k path), written back in place
#   * q = predictor(base_encoder(x_view))
#   * k = momentum_encoder(x_view) with the freshly updated params
# ---------------------------------------------------------------------------
def _make_forward_kernel(m, n_real, n_rows):
    m = float(m)

    def kernel(x_ref,
               b_bb, b_p1w, b_p1g, b_p1b, b_p2w,        # base encoder (f32 masters)
               pr1w, pr1g, pr1b, pr2w,                  # predictor (bf16 mirrors + f32 BN)
               m_bb, m_p1w, m_p1g, m_p1b, m_p2w,        # momentum encoder (f32)
               q_ref, k_ref,
               o_bb, o_p1w, o_p1g, o_p1b, o_p2w):       # updated momentum (aliased in place)
        x = x_ref[...]                                  # (n_rows, IN_pad) bf16, current view

        # ---- momentum update p_m <- m*p_m + (1-m)*p_b, done in VMEM ----
        new_bb = m_bb[...] * m + b_bb[...] * (1.0 - m)
        new_p1w = m_p1w[...] * m + b_p1w[...] * (1.0 - m)
        new_p1g = m_p1g[...] * m + b_p1g[...] * (1.0 - m)
        new_p1b = m_p1b[...] * m + b_p1b[...] * (1.0 - m)
        new_p2w = m_p2w[...] * m + b_p2w[...] * (1.0 - m)
        o_bb[...] = new_bb
        o_p1w[...] = new_p1w
        o_p1g[...] = new_p1g
        o_p1b[...] = new_p1b
        o_p2w[...] = new_p2w

        def encoder(bb16, p1w16, p1g, p1b, p2w16):
            # backbone: Linear(no bias) + ReLU
            h = jnp.dot(x, bb16, preferred_element_type=jnp.float32)
            h = jnp.maximum(h, 0.0)
            # projector layer 1: Linear + BN(affine) + ReLU
            h = jnp.dot(h.astype(jnp.bfloat16), p1w16,
                        preferred_element_type=jnp.float32)
            h = _bn_block(h, n_real, n_rows, p1g, p1b)
            h = jnp.maximum(h, 0.0)
            # projector layer 2: Linear + BN(affine=False)
            h = jnp.dot(h.astype(jnp.bfloat16), p2w16,
                        preferred_element_type=jnp.float32)
            return _bn_block(h, n_real, n_rows)

        # q = predictor(base_encoder(x)); base f32 masters cast to bf16 in VMEM
        z = encoder(b_bb[...].astype(jnp.bfloat16), b_p1w[...].astype(jnp.bfloat16),
                    b_p1g[...], b_p1b[...], b_p2w[...].astype(jnp.bfloat16))
        h = jnp.dot(z.astype(jnp.bfloat16), pr1w[...],
                    preferred_element_type=jnp.float32)
        h = _bn_block(h, n_real, n_rows, pr1g[...], pr1b[...])
        h = jnp.maximum(h, 0.0)
        q_ref[...] = jnp.dot(h.astype(jnp.bfloat16), pr2w[...],
                             preferred_element_type=jnp.float32)

        # k = momentum_encoder(x), using the freshly updated momentum params
        k_ref[...] = encoder(new_bb.astype(jnp.bfloat16), new_p1w.astype(jnp.bfloat16),
                             new_p1g, new_p1b, new_p2w.astype(jnp.bfloat16))

    return kernel


# ---------------------------------------------------------------------------
# Parameter init (deterministic, zero-padded feature dims).  Padded gamma rows
# are 1 and padded beta rows are 0 so padded BN lanes stay exactly zero.
# ---------------------------------------------------------------------------
def init_params(key, in_features, hidden_dim, mlp_dim, dim):
    in_pad = _pad_up(in_features, LANE_MULT)
    hp, mp, dp = (_pad_up(v, LANE_MULT) for v in (hidden_dim, mlp_dim, dim))
    ks = jax.random.split(key, 5)

    def lin(k, din, dout, din_pad, dout_pad):
        w = (jax.random.normal(k, (din, dout), jnp.float32)
             / jnp.sqrt(jnp.float32(din)))
        return jnp.zeros((din_pad, dout_pad), jnp.float32).at[:din, :dout].set(w)

    base = {
        "backbone_w": lin(ks[0], in_features, hidden_dim, in_pad, hp),
        "proj1_w": lin(ks[1], hidden_dim, mlp_dim, hp, mp),
        "proj1_gamma": jnp.ones((1, mp), jnp.float32),
        "proj1_beta": jnp.zeros((1, mp), jnp.float32),
        "proj2_w": lin(ks[2], mlp_dim, dim, mp, dp),
    }
    predictor = {
        "pred1_w": lin(ks[3], dim, mlp_dim, dp, mp),
        "pred1_gamma": jnp.ones((1, mp), jnp.float32),
        "pred1_beta": jnp.zeros((1, mp), jnp.float32),
        "pred2_w": lin(ks[4], mlp_dim, dim, mp, dp),
    }
    # param_m.data.copy_(param_b.data): real copies so the momentum buffers can
    # be donated / updated in place without aliasing the base masters.
    momentum = jax.tree_util.tree_map(jnp.copy, base)
    # Persistent bf16 mirrors of the predictor weights (in a real training loop
    # these are refreshed at the optimizer step, not re-cast every forward).
    predictor_bf16 = {k: predictor[k].astype(jnp.bfloat16)
                      for k in ("pred1_w", "pred2_w")}
    return base, momentum, predictor, predictor_bf16


# ---------------------------------------------------------------------------
# Forward wrapper: one fused pallas_call, momentum dict donated for the
# in-place EMA write-back (input_output_aliases).
# ---------------------------------------------------------------------------
@partial(jax.jit, static_argnames=("m", "dim"), donate_argnames=("momentum",))
def moco_forward(base, momentum, predictor, predictor_bf16, x1, x2, *, m, dim):
    n = x1.shape[0]
    n_pad = _pad_up(max(n, ROW_MULT), ROW_MULT)
    in_feat = math.prod(x1.shape[1:])
    in_pad = base["backbone_w"].shape[0]
    dp = base["proj2_w"].shape[1]

    def prep(xv):  # flatten, bf16, pad rows + feature lanes
        xf = xv.reshape(n, in_feat).astype(jnp.bfloat16)
        return jnp.pad(xf, ((0, n_pad - n), (0, in_pad - in_feat)))

    x = jnp.concatenate([prep(x1), prep(x2)], axis=0)       # (2*n_pad, in_pad) bf16

    def resident(a):  # weight block: full array, constant index_map -> DMA'd once
        return pl.BlockSpec(a.shape, lambda v: (0, 0))

    x_spec = pl.BlockSpec((n_pad, in_pad), lambda v: (v, 0))    # streamed per view
    qk_spec = pl.BlockSpec((n_pad, dp), lambda v: (v, 0))

    mom_keys = ("backbone_w", "proj1_w", "proj1_gamma", "proj1_beta", "proj2_w")
    base_in = [base[k] for k in mom_keys]
    pred_in = [predictor_bf16["pred1_w"], predictor["pred1_gamma"],
               predictor["pred1_beta"], predictor_bf16["pred2_w"]]
    mom_in = [momentum[k] for k in mom_keys]

    inputs = [x] + base_in + pred_in + mom_in
    in_specs = ([x_spec] + [resident(a) for a in base_in]
                + [resident(a) for a in pred_in] + [resident(a) for a in mom_in])

    out_shape = (
        jax.ShapeDtypeStruct((2 * n_pad, dp), jnp.float32),      # q
        jax.ShapeDtypeStruct((2 * n_pad, dp), jnp.float32),      # k
    ) + tuple(jax.ShapeDtypeStruct(a.shape, a.dtype) for a in mom_in)
    out_specs = (qk_spec, qk_spec) + tuple(resident(a) for a in mom_in)

    # momentum inputs are operands 10..14 and alias outputs 2..6 (in-place EMA)
    n_before_mom = 1 + len(base_in) + len(pred_in)
    aliases = {n_before_mom + i: 2 + i for i in range(len(mom_in))}

    outs = pl.pallas_call(
        _make_forward_kernel(m, n, n_pad),
        grid=(2,),                                   # one grid step per view
        out_shape=out_shape,
        in_specs=in_specs,
        out_specs=out_specs,
        input_output_aliases=aliases,
        compiler_params=pltpu.CompilerParams(
            dimension_semantics=("arbitrary",),      # aliased momentum outputs are revisited
            vmem_limit_bytes=48 * 1024 * 1024),
    )(*inputs)

    q, k = outs[0], outs[1]
    momentum_new = dict(zip(mom_keys, outs[2:]))
    q1, q2 = q[:n, :dim], q[n_pad:n_pad + n, :dim]
    k1, k2 = k[:n, :dim], k[n_pad:n_pad + n, :dim]
    return (q1, q2, k1, k2), momentum_new


if __name__ == "__main__":
    # Small shapes consistent with the module: images NCHW, dim / mlp_dim heads.
    N, C, H, W = 2, 4, 16, 16
    HIDDEN, MLP_DIM, DIM = 32, 64, 16
    IN_FEATURES = C * H * W

    key = jax.random.PRNGKey(0)
    kx1, kx2, kp = jax.random.split(key, 3)
    x1 = jax.random.normal(kx1, (N, C, H, W), jnp.float32)
    x2 = jax.random.normal(kx2, (N, C, H, W), jnp.float32)
    m = 0.99

    base, momentum, predictor, predictor_bf16 = init_params(
        kp, IN_FEATURES, HIDDEN, MLP_DIM, DIM)

    (q1, q2, k1, k2), momentum = moco_forward(
        base, momentum, predictor, predictor_bf16, x1, x2, m=m, dim=DIM)
    jax.block_until_ready((q1, q2, k1, k2, momentum))

    assert q1.shape == (N, DIM) and q2.shape == (N, DIM)
    assert k1.shape == (N, DIM) and k2.shape == (N, DIM)
    assert all(bool(jnp.isfinite(v).all()) for v in (q1, q2, k1, k2))
    print("KERNEL_OK")
</pallas_src>

<mosaic_0001>
module attributes {stable_mosaic.version = 11 : i64} {
  func.func @kernel(%arg0: i32, %arg1: memref<8x1024xbf16, #tpu.memory_space<vmem>>, %arg2: memref<1024x256xf32, #tpu.memory_space<vmem>>, %arg3: memref<256x256xf32, #tpu.memory_space<vmem>>, %arg4: memref<1x256xf32, #tpu.memory_space<vmem>>, %arg5: memref<1x256xf32, #tpu.memory_space<vmem>>, %arg6: memref<256x256xf32, #tpu.memory_space<vmem>>, %arg7: memref<256x256xbf16, #tpu.memory_space<vmem>>, %arg8: memref<1x256xf32, #tpu.memory_space<vmem>>, %arg9: memref<1x256xf32, #tpu.memory_space<vmem>>, %arg10: memref<256x256xbf16, #tpu.memory_space<vmem>>, %arg11: memref<1024x256xf32, #tpu.memory_space<vmem>>, %arg12: memref<256x256xf32, #tpu.memory_space<vmem>>, %arg13: memref<1x256xf32, #tpu.memory_space<vmem>>, %arg14: memref<1x256xf32, #tpu.memory_space<vmem>>, %arg15: memref<256x256xf32, #tpu.memory_space<vmem>>, %arg16: memref<8x256xf32, #tpu.memory_space<vmem>>, %arg17: memref<8x256xf32, #tpu.memory_space<vmem>>, %arg18: memref<1024x256xf32, #tpu.memory_space<vmem>>, %arg19: memref<256x256xf32, #tpu.memory_space<vmem>>, %arg20: memref<1x256xf32, #tpu.memory_space<vmem>>, %arg21: memref<1x256xf32, #tpu.memory_space<vmem>>, %arg22: memref<256x256xf32, #tpu.memory_space<vmem>>) attributes {dimension_semantics = [#tpu.dimension_semantics<arbitrary>], iteration_bounds = array<i64: 2>, scalar_prefetch = 0 : i64, scratch_operands = 0 : i64, tpu.core_type = #tpu.core_type<tc>, window_params = [{transform_indices = @transform_0, window_bounds = array<i64: 8, 1024>}, {pipeline_mode = #tpu.pipeline_mode<synchronous>, transform_indices = @transform_1, window_bounds = array<i64: 1024, 256>}, {pipeline_mode = #tpu.pipeline_mode<synchronous>, transform_indices = @transform_2, window_bounds = array<i64: 256, 256>}, {pipeline_mode = #tpu.pipeline_mode<synchronous>, transform_indices = @transform_3, window_bounds = array<i64: 1, 256>}, {pipeline_mode = #tpu.pipeline_mode<synchronous>, transform_indices = @transform_4, window_bounds = array<i64: 1, 256>}, {pipeline_mode = #tpu.pipeline_mode<synchronous>, transform_indices = @transform_5, window_bounds = array<i64: 256, 256>}, {pipeline_mode = #tpu.pipeline_mode<synchronous>, transform_indices = @transform_6, window_bounds = array<i64: 256, 256>}, {pipeline_mode = #tpu.pipeline_mode<synchronous>, transform_indices = @transform_7, window_bounds = array<i64: 1, 256>}, {pipeline_mode = #tpu.pipeline_mode<synchronous>, transform_indices = @transform_8, window_bounds = array<i64: 1, 256>}, {pipeline_mode = #tpu.pipeline_mode<synchronous>, transform_indices = @transform_9, window_bounds = array<i64: 256, 256>}, {pipeline_mode = #tpu.pipeline_mode<synchronous>, transform_indices = @transform_10, window_bounds = array<i64: 1024, 256>}, {pipeline_mode = #tpu.pipeline_mode<synchronous>, transform_indices = @transform_11, window_bounds = array<i64: 256, 256>}, {pipeline_mode = #tpu.pipeline_mode<synchronous>, transform_indices = @transform_12, window_bounds = array<i64: 1, 256>}, {pipeline_mode = #tpu.pipeline_mode<synchronous>, transform_indices = @transform_13, window_bounds = array<i64: 1, 256>}, {pipeline_mode = #tpu.pipeline_mode<synchronous>, transform_indices = @transform_14, window_bounds = array<i64: 256, 256>}, {transform_indices = @transform_15, window_bounds = array<i64: 8, 256>}, {transform_indices = @transform_16, window_bounds = array<i64: 8, 256>}, {pipeline_mode = #tpu.pipeline_mode<synchronous>, transform_indices = @transform_17, window_bounds = array<i64: 1024, 256>}, {pipeline_mode = #tpu.pipeline_mode<synchronous>, transform_indices = @transform_18, window_bounds = array<i64: 256, 256>}, {pipeline_mode = #tpu.pipeline_mode<synchronous>, transform_indices = @transform_19, window_bounds = array<i64: 1, 256>}, {pipeline_mode = #tpu.pipeline_mode<synchronous>, transform_indices = @transform_20, window_bounds = array<i64: 1, 256>}, {pipeline_mode = #tpu.pipeline_mode<synchronous>, transform_indices = @transform_21, window_bounds = array<i64: 256, 256>}]} {
    %c0 = arith.constant 0 : index
    %c0_0 = arith.constant 0 : index
    %0 = vector.load %arg1[%c0, %c0_0] : memref<8x1024xbf16, #tpu.memory_space<vmem>>, vector<8x1024xbf16>
    %c0_1 = arith.constant 0 : index
    %c0_2 = arith.constant 0 : index
    %1 = vector.load %arg11[%c0_1, %c0_2] : memref<1024x256xf32, #tpu.memory_space<vmem>>, vector<1024x256xf32>
    %cst = arith.constant 9.900000e-01 : f32
    %2 = vector.broadcast %cst : f32 to vector<1024x256xf32>
    %3 = arith.mulf %1, %2 : vector<1024x256xf32>
    %c0_3 = arith.constant 0 : index
    %c0_4 = arith.constant 0 : index
    %4 = vector.load %arg2[%c0_3, %c0_4] : memref<1024x256xf32, #tpu.memory_space<vmem>>, vector<1024x256xf32>
    %cst_5 = arith.constant 0.00999999977 : f32
    %5 = vector.broadcast %cst_5 : f32 to vector<1024x256xf32>
    %6 = arith.mulf %4, %5 : vector<1024x256xf32>
    %7 = arith.addf %3, %6 : vector<1024x256xf32>
    %c0_6 = arith.constant 0 : index
    %c0_7 = arith.constant 0 : index
    %8 = vector.load %arg12[%c0_6, %c0_7] : memref<256x256xf32, #tpu.memory_space<vmem>>, vector<256x256xf32>
    %cst_8 = arith.constant 9.900000e-01 : f32
    %9 = vector.broadcast %cst_8 : f32 to vector<256x256xf32>
    %10 = arith.mulf %8, %9 : vector<256x256xf32>
    %c0_9 = arith.constant 0 : index
    %c0_10 = arith.constant 0 : index
    %11 = vector.load %arg3[%c0_9, %c0_10] : memref<256x256xf32, #tpu.memory_space<vmem>>, vector<256x256xf32>
    %cst_11 = arith.constant 0.00999999977 : f32
    %12 = vector.broadcast %cst_11 : f32 to vector<256x256xf32>
    %13 = arith.mulf %11, %12 : vector<256x256xf32>
    %14 = arith.addf %10, %13 : vector<256x256xf32>
    %c0_12 = arith.constant 0 : index
    %c0_13 = arith.constant 0 : index
    %15 = vector.load %arg13[%c0_12, %c0_13] : memref<1x256xf32, #tpu.memory_space<vmem>>, vector<1x256xf32>
    %cst_14 = arith.constant 9.900000e-01 : f32
    %16 = vector.broadcast %cst_14 : f32 to vector<1x256xf32>
    %17 = arith.mulf %15, %16 : vector<1x256xf32>
    %c0_15 = arith.constant 0 : index
    %c0_16 = arith.constant 0 : index
    %18 = vector.load %arg4[%c0_15, %c0_16] : memref<1x256xf32, #tpu.memory_space<vmem>>, vector<1x256xf32>
    %cst_17 = arith.constant 0.00999999977 : f32
    %19 = vector.broadcast %cst_17 : f32 to vector<1x256xf32>
    %20 = arith.mulf %18, %19 : vector<1x256xf32>
    %21 = arith.addf %17, %20 : vector<1x256xf32>
    %c0_18 = arith.constant 0 : index
    %c0_19 = arith.constant 0 : index
    %22 = vector.load %arg14[%c0_18, %c0_19] : memref<1x256xf32, #tpu.memory_space<vmem>>, vector<1x256xf32>
    %cst_20 = arith.constant 9.900000e-01 : f32
    %23 = vector.broadcast %cst_20 : f32 to vector<1x256xf32>
    %24 = arith.mulf %22, %23 : vector<1x256xf32>
    %c0_21 = arith.constant 0 : index
    %c0_22 = arith.constant 0 : index
    %25 = vector.load %arg5[%c0_21, %c0_22] : memref<1x256xf32, #tpu.memory_space<vmem>>, vector<1x256xf32>
    %cst_23 = arith.constant 0.00999999977 : f32
    %26 = vector.broadcast %cst_23 : f32 to vector<1x256xf32>
    %27 = arith.mulf %25, %26 : vector<1x256xf32>
    %28 = arith.addf %24, %27 : vector<1x256xf32>
    %c0_24 = arith.constant 0 : index
    %c0_25 = arith.constant 0 : index
    %29 = vector.load %arg15[%c0_24, %c0_25] : memref<256x256xf32, #tpu.memory_space<vmem>>, vector<256x256xf32>
    %cst_26 = arith.constant 9.900000e-01 : f32
    %30 = vector.broadcast %cst_26 : f32 to vector<256x256xf32>
    %31 = arith.mulf %29, %30 : vector<256x256xf32>
    %c0_27 = arith.constant 0 : index
    %c0_28 = arith.constant 0 : index
    %32 = vector.load %arg6[%c0_27, %c0_28] : memref<256x256xf32, #tpu.memory_space<vmem>>, vector<256x256xf32>
    %cst_29 = arith.constant 0.00999999977 : f32
    %33 = vector.broadcast %cst_29 : f32 to vector<256x256xf32>
    %34 = arith.mulf %32, %33 : vector<256x256xf32>
    %35 = arith.addf %31, %34 : vector<256x256xf32>
    %c0_30 = arith.constant 0 : index
    %c0_31 = arith.constant 0 : index
    %36 = vector.load %arg18[%c0_30, %c0_31] : memref<1024x256xf32, #tpu.memory_space<vmem>>, vector<1024x256xf32>
    tpu.vector_store %arg18[%c0_30, %c0_31], %7 {strides = array<i32>} : memref<1024x256xf32, #tpu.memory_space<vmem>>, vector<1024x256xf32>,
    %c0_32 = arith.constant 0 : index
    %c0_33 = arith.constant 0 : index
    %37 = vector.load %arg19[%c0_32, %c0_33] : memref<256x256xf32, #tpu.memory_space<vmem>>, vector<256x256xf32>
    tpu.vector_store %arg19[%c0_32, %c0_33], %14 {strides = array<i32>} : memref<256x256xf32, #tpu.memory_space<vmem>>, vector<256x256xf32>,
    %c0_34 = arith.constant 0 : index
    %c0_35 = arith.constant 0 : index
    %38 = vector.load %arg20[%c0_34, %c0_35] : memref<1x256xf32, #tpu.memory_space<vmem>>, vector<1x256xf32>
    tpu.vector_store %arg20[%c0_34, %c0_35], %21 {strides = array<i32>} : memref<1x256xf32, #tpu.memory_space<vmem>>, vector<1x256xf32>,
    %c0_36 = arith.constant 0 : index
    %c0_37 = arith.constant 0 : index
    %39 = vector.load %arg21[%c0_36, %c0_37] : memref<1x256xf32, #tpu.memory_space<vmem>>, vector<1x256xf32>
    tpu.vector_store %arg21[%c0_36, %c0_37], %28 {strides = array<i32>} : memref<1x256xf32, #tpu.memory_space<vmem>>, vector<1x256xf32>,
    %c0_38 = arith.constant 0 : index
    %c0_39 = arith.constant 0 : index
    %40 = vector.load %arg22[%c0_38, %c0_39] : memref<256x256xf32, #tpu.memory_space<vmem>>, vector<256x256xf32>
    tpu.vector_store %arg22[%c0_38, %c0_39], %35 {strides = array<i32>} : memref<256x256xf32, #tpu.memory_space<vmem>>, vector<256x256xf32>,
    %c0_40 = arith.constant 0 : index
    %c0_41 = arith.constant 0 : index
    %41 = vector.load %arg2[%c0_40, %c0_41] : memref<1024x256xf32, #tpu.memory_space<vmem>>, vector<1024x256xf32>
    %42 = arith.truncf %41 : vector<1024x256xf32> to vector<1024x256xbf16>
    %c0_42 = arith.constant 0 : index
    %c0_43 = arith.constant 0 : index
    %43 = vector.load %arg3[%c0_42, %c0_43] : memref<256x256xf32, #tpu.memory_space<vmem>>, vector<256x256xf32>
    %44 = arith.truncf %43 : vector<256x256xf32> to vector<256x256xbf16>
    %c0_44 = arith.constant 0 : index
    %c0_45 = arith.constant 0 : index
    %45 = vector.load %arg4[%c0_44, %c0_45] : memref<1x256xf32, #tpu.memory_space<vmem>>, vector<1x256xf32>
    %c0_46 = arith.constant 0 : index
    %c0_47 = arith.constant 0 : index
    %46 = vector.load %arg5[%c0_46, %c0_47] : memref<1x256xf32, #tpu.memory_space<vmem>>, vector<1x256xf32>
    %c0_48 = arith.constant 0 : index
    %c0_49 = arith.constant 0 : index
    %47 = vector.load %arg6[%c0_48, %c0_49] : memref<256x256xf32, #tpu.memory_space<vmem>>, vector<256x256xf32>
    %48 = arith.truncf %47 : vector<256x256xf32> to vector<256x256xbf16>
    %cst_50 = arith.constant dense<0.000000e+00> : vector<8x256xf32>
    %49 = tpu.matmul %0, %42, %cst_50 {dimension_numbers = #tpu.dot_dimension_numbers<[1], [0], [0], [1], [0, 0, 1, 1], [], []>} : vector<8x1024xbf16>, vector<1024x256xbf16>, vector<8x256xf32> -> vector<8x256xf32>
    %cst_51 = arith.constant 0.000000e+00 : f32
    %50 = vector.broadcast %cst_51 : f32 to vector<8x256xf32>
    %51 = arith.maximumf %49, %50 : vector<8x256xf32>
    %52 = arith.truncf %51 : vector<8x256xf32> to vector<8x256xbf16>
    %cst_52 = arith.constant dense<0.000000e+00> : vector<8x256xf32>
    %53 = tpu.matmul %52, %44, %cst_52 {dimension_numbers = #tpu.dot_dimension_numbers<[1], [0], [0], [1], [0, 0, 1, 1], [], []>} : vector<8x256xbf16>, vector<256x256xbf16>, vector<8x256xf32> -> vector<8x256xf32>
    %54 = tpu.iota {dimensions = array<i32: 0>} : vector<8x256xi32>
    %c2_i32 = arith.constant 2 : i32
    %55 = vector.broadcast %c2_i32 : i32 to vector<8x256xi32>
    %56 = arith.cmpi slt, %54, %55 : vector<8x256xi32>
    %cst_53 = arith.constant 0.000000e+00 : f32
    %57 = vector.broadcast %cst_53 : f32 to vector<8x256xf32>
    %58 = arith.select %56, %53, %57 : vector<8x256xi1>, vector<8x256xf32>
    %cst_54 = arith.constant dense<0.000000e+00> : vector<256xf32>
    %59 = vector.multi_reduction <add>, %58, %cst_54 [0] : vector<8x256xf32> to vector<256xf32>
    %60 = vector.shape_cast %59 : vector<256xf32> to vector<1x256xf32>
    %cst_55 = arith.constant 5.000000e-01 : f32
    %61 = vector.broadcast %cst_55 : f32 to vector<1x256xf32>
    %62 = arith.mulf %60, %61 : vector<1x256xf32>
    %63 = arith.mulf %58, %58 : vector<8x256xf32>
    %cst_56 = arith.constant dense<0.000000e+00> : vector<256xf32>
    %64 = vector.multi_reduction <add>, %63, %cst_56 [0] : vector<8x256xf32> to vector<256xf32>
    %65 = vector.shape_cast %64 : vector<256xf32> to vector<1x256xf32>
    %cst_57 = arith.constant 5.000000e-01 : f32
    %66 = vector.broadcast %cst_57 : f32 to vector<1x256xf32>
    %67 = arith.mulf %65, %66 : vector<1x256xf32>
    %68 = arith.mulf %62, %62 : vector<1x256xf32>
    %69 = arith.subf %67, %68 : vector<1x256xf32>
    %cst_58 = arith.constant 0.000000e+00 : f32
    %70 = vector.broadcast %cst_58 : f32 to vector<1x256xf32>
    %71 = arith.maximumf %69, %70 : vector<1x256xf32>
    %72 = vector.broadcast %62 : vector<1x256xf32> to vector<8x256xf32>
    %73 = arith.subf %53, %72 : vector<8x256xf32>
    %cst_59 = arith.constant 9.99999974E-6 : f32
    %74 = vector.broadcast %cst_59 : f32 to vector<1x256xf32>
    %75 = arith.addf %71, %74 : vector<1x256xf32>
    %76 = math.rsqrt %75 : vector<1x256xf32>
    %77 = vector.broadcast %76 : vector<1x256xf32> to vector<8x256xf32>
    %78 = arith.mulf %73, %77 : vector<8x256xf32>
    %79 = vector.broadcast %45 : vector<1x256xf32> to vector<8x256xf32>
    %80 = arith.mulf %78, %79 : vector<8x256xf32>
    %81 = vector.broadcast %46 : vector<1x256xf32> to vector<8x256xf32>
    %82 = arith.addf %80, %81 : vector<8x256xf32>
    %cst_60 = arith.constant 0.000000e+00 : f32
    %83 = vector.broadcast %cst_60 : f32 to vector<8x256xf32>
    %84 = arith.maximumf %82, %83 : vector<8x256xf32>
    %85 = arith.truncf %84 : vector<8x256xf32> to vector<8x256xbf16>
    %cst_61 = arith.constant dense<0.000000e+00> : vector<8x256xf32>
    %86 = tpu.matmul %85, %48, %cst_61 {dimension_numbers = #tpu.dot_dimension_numbers<[1], [0], [0], [1], [0, 0, 1, 1], [], []>} : vector<8x256xbf16>, vector<256x256xbf16>, vector<8x256xf32> -> vector<8x256xf32>
    %87 = tpu.iota {dimensions = array<i32: 0>} : vector<8x256xi32>
    %c2_i32_62 = arith.constant 2 : i32
    %88 = vector.broadcast %c2_i32_62 : i32 to vector<8x256xi32>
    %89 = arith.cmpi slt, %87, %88 : vector<8x256xi32>
    %cst_63 = arith.constant 0.000000e+00 : f32
    %90 = vector.broadcast %cst_63 : f32 to vector<8x256xf32>
    %91 = arith.select %89, %86, %90 : vector<8x256xi1>, vector<8x256xf32>
    %cst_64 = arith.constant dense<0.000000e+00> : vector<256xf32>
    %92 = vector.multi_reduction <add>, %91, %cst_64 [0] : vector<8x256xf32> to vector<256xf32>
    %93 = vector.shape_cast %92 : vector<256xf32> to vector<1x256xf32>
    %cst_65 = arith.constant 5.000000e-01 : f32
    %94 = vector.broadcast %cst_65 : f32 to vector<1x256xf32>
    %95 = arith.mulf %93, %94 : vector<1x256xf32>
    %96 = arith.mulf %91, %91 : vector<8x256xf32>
    %cst_66 = arith.constant dense<0.000000e+00> : vector<256xf32>
    %97 = vector.multi_reduction <add>, %96, %cst_66 [0] : vector<8x256xf32> to vector<256xf32>
    %98 = vector.shape_cast %97 : vector<256xf32> to vector<1x256xf32>
    %cst_67 = arith.constant 5.000000e-01 : f32
    %99 = vector.broadcast %cst_67 : f32 to vector<1x256xf32>
    %100 = arith.mulf %98, %99 : vector<1x256xf32>
    %101 = arith.mulf %95, %95 : vector<1x256xf32>
    %102 = arith.subf %100, %101 : vector<1x256xf32>
    %cst_68 = arith.constant 0.000000e+00 : f32
    %103 = vector.broadcast %cst_68 : f32 to vector<1x256xf32>
    %104 = arith.maximumf %102, %103 : vector<1x256xf32>
    %105 = vector.broadcast %95 : vector<1x256xf32> to vector<8x256xf32>
    %106 = arith.subf %86, %105 : vector<8x256xf32>
    %cst_69 = arith.constant 9.99999974E-6 : f32
    %107 = vector.broadcast %cst_69 : f32 to vector<1x256xf32>
    %108 = arith.addf %104, %107 : vector<1x256xf32>
    %109 = math.rsqrt %108 : vector<1x256xf32>
    %110 = vector.broadcast %109 : vector<1x256xf32> to vector<8x256xf32>
    %111 = arith.mulf %106, %110 : vector<8x256xf32>
    %112 = arith.truncf %111 : vector<8x256xf32> to vector<8x256xbf16>
    %c0_70 = arith.constant 0 : index
    %c0_71 = arith.constant 0 : index
    %113 = vector.load %arg7[%c0_70, %c0_71] : memref<256x256xbf16, #tpu.memory_space<vmem>>, vector<256x256xbf16>
    %cst_72 = arith.constant dense<0.000000e+00> : vector<8x256xf32>
    %114 = tpu.matmul %112, %113, %cst_72 {dimension_numbers = #tpu.dot_dimension_numbers<[1], [0], [0], [1], [0, 0, 1, 1], [], []>} : vector<8x256xbf16>, vector<256x256xbf16>, vector<8x256xf32> -> vector<8x256xf32>
    %c0_73 = arith.constant 0 : index
    %c0_74 = arith.constant 0 : index
    %115 = vector.load %arg8[%c0_73, %c0_74] : memref<1x256xf32, #tpu.memory_space<vmem>>, vector<1x256xf32>
    %c0_75 = arith.constant 0 : index
    %c0_76 = arith.constant 0 : index
    %116 = vector.load %arg9[%c0_75, %c0_76] : memref<1x256xf32, #tpu.memory_space<vmem>>, vector<1x256xf32>
    %117 = tpu.iota {dimensions = array<i32: 0>} : vector<8x256xi32>
    %c2_i32_77 = arith.constant 2 : i32
    %118 = vector.broadcast %c2_i32_77 : i32 to vector<8x256xi32>
    %119 = arith.cmpi slt, %117, %118 : vector<8x256xi32>
    %cst_78 = arith.constant 0.000000e+00 : f32
    %120 = vector.broadcast %cst_78 : f32 to vector<8x256xf32>
    %121 = arith.select %119, %114, %120 : vector<8x256xi1>, vector<8x256xf32>
    %cst_79 = arith.constant dense<0.000000e+00> : vector<256xf32>
    %122 = vector.multi_reduction <add>, %121, %cst_79 [0] : vector<8x256xf32> to vector<256xf32>
    %123 = vector.shape_cast %122 : vector<256xf32> to vector<1x256xf32>
    %cst_80 = arith.constant 5.000000e-01 : f32
    %124 = vector.broadcast %cst_80 : f32 to vector<1x256xf32>
    %125 = arith.mulf %123, %124 : vector<1x256xf32>
    %126 = arith.mulf %121, %121 : vector<8x256xf32>
    %cst_81 = arith.constant dense<0.000000e+00> : vector<256xf32>
    %127 = vector.multi_reduction <add>, %126, %cst_81 [0] : vector<8x256xf32> to vector<256xf32>
    %128 = vector.shape_cast %127 : vector<256xf32> to vector<1x256xf32>
    %cst_82 = arith.constant 5.000000e-01 : f32
    %129 = vector.broadcast %cst_82 : f32 to vector<1x256xf32>
    %130 = arith.mulf %128, %129 : vector<1x256xf32>
    %131 = arith.mulf %125, %125 : vector<1x256xf32>
    %132 = arith.subf %130, %131 : vector<1x256xf32>
    %cst_83 = arith.constant 0.000000e+00 : f32
    %133 = vector.broadcast %cst_83 : f32 to vector<1x256xf32>
    %134 = arith.maximumf %132, %133 : vector<1x256xf32>
    %135 = vector.broadcast %125 : vector<1x256xf32> to vector<8x256xf32>
    %136 = arith.subf %114, %135 : vector<8x256xf32>
    %cst_84 = arith.constant 9.99999974E-6 : f32
    %137 = vector.broadcast %cst_84 : f32 to vector<1x256xf32>
    %138 = arith.addf %134, %137 : vector<1x256xf32>
    %139 = math.rsqrt %138 : vector<1x256xf32>
    %140 = vector.broadcast %139 : vector<1x256xf32> to vector<8x256xf32>
    %141 = arith.mulf %136, %140 : vector<8x256xf32>
    %142 = vector.broadcast %115 : vector<1x256xf32> to vector<8x256xf32>
    %143 = arith.mulf %141, %142 : vector<8x256xf32>
    %144 = vector.broadcast %116 : vector<1x256xf32> to vector<8x256xf32>
    %145 = arith.addf %143, %144 : vector<8x256xf32>
    %cst_85 = arith.constant 0.000000e+00 : f32
    %146 = vector.broadcast %cst_85 : f32 to vector<8x256xf32>
    %147 = arith.maximumf %145, %146 : vector<8x256xf32>
    %148 = arith.truncf %147 : vector<8x256xf32> to vector<8x256xbf16>
    %c0_86 = arith.constant 0 : index
    %c0_87 = arith.constant 0 : index
    %149 = vector.load %arg10[%c0_86, %c0_87] : memref<256x256xbf16, #tpu.memory_space<vmem>>, vector<256x256xbf16>
    %cst_88 = arith.constant dense<0.000000e+00> : vector<8x256xf32>
    %150 = tpu.matmul %148, %149, %cst_88 {dimension_numbers = #tpu.dot_dimension_numbers<[1], [0], [0], [1], [0, 0, 1, 1], [], []>} : vector<8x256xbf16>, vector<256x256xbf16>, vector<8x256xf32> -> vector<8x256xf32>
    %c0_89 = arith.constant 0 : index
    %c0_90 = arith.constant 0 : index
    %151 = vector.load %arg16[%c0_89, %c0_90] : memref<8x256xf32, #tpu.memory_space<vmem>>, vector<8x256xf32>
    tpu.vector_store %arg16[%c0_89, %c0_90], %150 {strides = array<i32>} : memref<8x256xf32, #tpu.memory_space<vmem>>, vector<8x256xf32>,
    %152 = arith.truncf %7 : vector<1024x256xf32> to vector<1024x256xbf16>
    %153 = arith.truncf %14 : vector<256x256xf32> to vector<256x256xbf16>
    %154 = arith.truncf %35 : vector<256x256xf32> to vector<256x256xbf16>
    %cst_91 = arith.constant dense<0.000000e+00> : vector<8x256xf32>
    %155 = tpu.matmul %0, %152, %cst_91 {dimension_numbers = #tpu.dot_dimension_numbers<[1], [0], [0], [1], [0, 0, 1, 1], [], []>} : vector<8x1024xbf16>, vector<1024x256xbf16>, vector<8x256xf32> -> vector<8x256xf32>
    %cst_92 = arith.constant 0.000000e+00 : f32
    %156 = vector.broadcast %cst_92 : f32 to vector<8x256xf32>
    %157 = arith.maximumf %155, %156 : vector<8x256xf32>
    %158 = arith.truncf %157 : vector<8x256xf32> to vector<8x256xbf16>
    %cst_93 = arith.constant dense<0.000000e+00> : vector<8x256xf32>
    %159 = tpu.matmul %158, %153, %cst_93 {dimension_numbers = #tpu.dot_dimension_numbers<[1], [0], [0], [1], [0, 0, 1, 1], [], []>} : vector<8x256xbf16>, vector<256x256xbf16>, vector<8x256xf32> -> vector<8x256xf32>
    %160 = tpu.iota {dimensions = array<i32: 0>} : vector<8x256xi32>
    %c2_i32_94 = arith.constant 2 : i32
    %161 = vector.broadcast %c2_i32_94 : i32 to vector<8x256xi32>
    %162 = arith.cmpi slt, %160, %161 : vector<8x256xi32>
    %cst_95 = arith.constant 0.000000e+00 : f32
    %163 = vector.broadcast %cst_95 : f32 to vector<8x256xf32>
    %164 = arith.select %162, %159, %163 : vector<8x256xi1>, vector<8x256xf32>
    %cst_96 = arith.constant dense<0.000000e+00> : vector<256xf32>
    %165 = vector.multi_reduction <add>, %164, %cst_96 [0] : vector<8x256xf32> to vector<256xf32>
    %166 = vector.shape_cast %165 : vector<256xf32> to vector<1x256xf32>
    %cst_97 = arith.constant 5.000000e-01 : f32
    %167 = vector.broadcast %cst_97 : f32 to vector<1x256xf32>
    %168 = arith.mulf %166, %167 : vector<1x256xf32>
    %169 = arith.mulf %164, %164 : vector<8x256xf32>
    %cst_98 = arith.constant dense<0.000000e+00> : vector<256xf32>
    %170 = vector.multi_reduction <add>, %169, %cst_98 [0] : vector<8x256xf32> to vector<256xf32>
    %171 = vector.shape_cast %170 : vector<256xf32> to vector<1x256xf32>
    %cst_99 = arith.constant 5.000000e-01 : f32
    %172 = vector.broadcast %cst_99 : f32 to vector<1x256xf32>
    %173 = arith.mulf %171, %172 : vector<1x256xf32>
    %174 = arith.mulf %168, %168 : vector<1x256xf32>
    %175 = arith.subf %173, %174 : vector<1x256xf32>
    %cst_100 = arith.constant 0.000000e+00 : f32
    %176 = vector.broadcast %cst_100 : f32 to vector<1x256xf32>
    %177 = arith.maximumf %175, %176 : vector<1x256xf32>
    %178 = vector.broadcast %168 : vector<1x256xf32> to vector<8x256xf32>
    %179 = arith.subf %159, %178 : vector<8x256xf32>
    %cst_101 = arith.constant 9.99999974E-6 : f32
    %180 = vector.broadcast %cst_101 : f32 to vector<1x256xf32>
    %181 = arith.addf %177, %180 : vector<1x256xf32>
    %182 = math.rsqrt %181 : vector<1x256xf32>
    %183 = vector.broadcast %182 : vector<1x256xf32> to vector<8x256xf32>
    %184 = arith.mulf %179, %183 : vector<8x256xf32>
    %185 = vector.broadcast %21 : vector<1x256xf32> to vector<8x256xf32>
    %186 = arith.mulf %184, %185 : vector<8x256xf32>
    %187 = vector.broadcast %28 : vector<1x256xf32> to vector<8x256xf32>
    %188 = arith.addf %186, %187 : vector<8x256xf32>
    %cst_102 = arith.constant 0.000000e+00 : f32
    %189 = vector.broadcast %cst_102 : f32 to vector<8x256xf32>
    %190 = arith.maximumf %188, %189 : vector<8x256xf32>
    %191 = arith.truncf %190 : vector<8x256xf32> to vector<8x256xbf16>
    %cst_103 = arith.constant dense<0.000000e+00> : vector<8x256xf32>
    %192 = tpu.matmul %191, %154, %cst_103 {dimension_numbers = #tpu.dot_dimension_numbers<[1], [0], [0], [1], [0, 0, 1, 1], [], []>} : vector<8x256xbf16>, vector<256x256xbf16>, vector<8x256xf32> -> vector<8x256xf32>
    %193 = tpu.iota {dimensions = array<i32: 0>} : vector<8x256xi32>
    %c2_i32_104 = arith.constant 2 : i32
    %194 = vector.broadcast %c2_i32_104 : i32 to vector<8x256xi32>
    %195 = arith.cmpi slt, %193, %194 : vector<8x256xi32>
    %cst_105 = arith.constant 0.000000e+00 : f32
    %196 = vector.broadcast %cst_105 : f32 to vector<8x256xf32>
    %197 = arith.select %195, %192, %196 : vector<8x256xi1>, vector<8x256xf32>
    %cst_106 = arith.constant dense<0.000000e+00> : vector<256xf32>
    %198 = vector.multi_reduction <add>, %197, %cst_106 [0] : vector<8x256xf32> to vector<256xf32>
    %199 = vector.shape_cast %198 : vector<256xf32> to vector<1x256xf32>
    %cst_107 = arith.constant 5.000000e-01 : f32
    %200 = vector.broadcast %cst_107 : f32 to vector<1x256xf32>
    %201 = arith.mulf %199, %200 : vector<1x256xf32>
    %202 = arith.mulf %197, %197 : vector<8x256xf32>
    %cst_108 = arith.constant dense<0.000000e+00> : vector<256xf32>
    %203 = vector.multi_reduction <add>, %202, %cst_108 [0] : vector<8x256xf32> to vector<256xf32>
    %204 = vector.shape_cast %203 : vector<256xf32> to vector<1x256xf32>
    %cst_109 = arith.constant 5.000000e-01 : f32
    %205 = vector.broadcast %cst_109 : f32 to vector<1x256xf32>
    %206 = arith.mulf %204, %205 : vector<1x256xf32>
    %207 = arith.mulf %201, %201 : vector<1x256xf32>
    %208 = arith.subf %206, %207 : vector<1x256xf32>
    %cst_110 = arith.constant 0.000000e+00 : f32
    %209 = vector.broadcast %cst_110 : f32 to vector<1x256xf32>
    %210 = arith.maximumf %208, %209 : vector<1x256xf32>
    %211 = vector.broadcast %201 : vector<1x256xf32> to vector<8x256xf32>
    %212 = arith.subf %192, %211 : vector<8x256xf32>
    %cst_111 = arith.constant 9.99999974E-6 : f32
    %213 = vector.broadcast %cst_111 : f32 to vector<1x256xf32>
    %214 = arith.addf %210, %213 : vector<1x256xf32>
    %215 = math.rsqrt %214 : vector<1x256xf32>
    %216 = vector.broadcast %215 : vector<1x256xf32> to vector<8x256xf32>
    %217 = arith.mulf %212, %216 : vector<8x256xf32>
    %c0_112 = arith.constant 0 : index
    %c0_113 = arith.constant 0 : index
    %218 = vector.load %arg17[%c0_112, %c0_113] : memref<8x256xf32, #tpu.memory_space<vmem>>, vector<8x256xf32>
    tpu.vector_store %arg17[%c0_112, %c0_113], %217 {strides = array<i32>} : memref<8x256xf32, #tpu.memory_space<vmem>>, vector<8x256xf32>,
    return
  }
  func.func @transform_0(%arg0: i32) -> (i32, i32) {
    %c0_i32 = arith.constant 0 : i32
    %c0_i32_0 = arith.constant 0 : i32
    return %arg0, %c0_i32 : i32, i32
  }
  func.func @transform_1(%arg0: i32) -> (i32, i32) {
    %c0_i32 = arith.constant 0 : i32
    %c0_i32_0 = arith.constant 0 : i32
    %c0_i32_1 = arith.constant 0 : i32
    return %c0_i32, %c0_i32_0 : i32, i32
  }
  func.func @transform_2(%arg0: i32) -> (i32, i32) {
    %c0_i32 = arith.constant 0 : i32
    %c0_i32_0 = arith.constant 0 : i32
    %c0_i32_1 = arith.constant 0 : i32
    return %c0_i32, %c0_i32_0 : i32, i32
  }
  func.func @transform_3(%arg0: i32) -> (i32, i32) {
    %c0_i32 = arith.constant 0 : i32
    %c0_i32_0 = arith.constant 0 : i32
    %c0_i32_1 = arith.constant 0 : i32
    return %c0_i32, %c0_i32_0 : i32, i32
  }
  func.func @transform_4(%arg0: i32) -> (i32, i32) {
    %c0_i32 = arith.constant 0 : i32
    %c0_i32_0 = arith.constant 0 : i32
    %c0_i32_1 = arith.constant 0 : i32
    return %c0_i32, %c0_i32_0 : i32, i32
  }
  func.func @transform_5(%arg0: i32) -> (i32, i32) {
    %c0_i32 = arith.constant 0 : i32
    %c0_i32_0 = arith.constant 0 : i32
    %c0_i32_1 = arith.constant 0 : i32
    return %c0_i32, %c0_i32_0 : i32, i32
  }
  func.func @transform_6(%arg0: i32) -> (i32, i32) {
    %c0_i32 = arith.constant 0 : i32
    %c0_i32_0 = arith.constant 0 : i32
    %c0_i32_1 = arith.constant 0 : i32
    return %c0_i32, %c0_i32_0 : i32, i32
  }
  func.func @transform_7(%arg0: i32) -> (i32, i32) {
    %c0_i32 = arith.constant 0 : i32
    %c0_i32_0 = arith.constant 0 : i32
    %c0_i32_1 = arith.constant 0 : i32
    return %c0_i32, %c0_i32_0 : i32, i32
  }
  func.func @transform_8(%arg0: i32) -> (i32, i32) {
    %c0_i32 = arith.constant 0 : i32
    %c0_i32_0 = arith.constant 0 : i32
    %c0_i32_1 = arith.constant 0 : i32
    return %c0_i32, %c0_i32_0 : i32, i32
  }
  func.func @transform_9(%arg0: i32) -> (i32, i32) {
    %c0_i32 = arith.constant 0 : i32
    %c0_i32_0 = arith.constant 0 : i32
    %c0_i32_1 = arith.constant 0 : i32
    return %c0_i32, %c0_i32_0 : i32, i32
  }
  func.func @transform_10(%arg0: i32) -> (i32, i32) {
    %c0_i32 = arith.constant 0 : i32
    %c0_i32_0 = arith.constant 0 : i32
    %c0_i32_1 = arith.constant 0 : i32
    return %c0_i32, %c0_i32_0 : i32, i32
  }
  func.func @transform_11(%arg0: i32) -> (i32, i32) {
    %c0_i32 = arith.constant 0 : i32
    %c0_i32_0 = arith.constant 0 : i32
    %c0_i32_1 = arith.constant 0 : i32
    return %c0_i32, %c0_i32_0 : i32, i32
  }
  func.func @transform_12(%arg0: i32) -> (i32, i32) {
    %c0_i32 = arith.constant 0 : i32
    %c0_i32_0 = arith.constant 0 : i32
    %c0_i32_1 = arith.constant 0 : i32
    return %c0_i32, %c0_i32_0 : i32, i32
  }
  func.func @transform_13(%arg0: i32) -> (i32, i32) {
    %c0_i32 = arith.constant 0 : i32
    %c0_i32_0 = arith.constant 0 : i32
    %c0_i32_1 = arith.constant 0 : i32
    return %c0_i32, %c0_i32_0 : i32, i32
  }
  func.func @transform_14(%arg0: i32) -> (i32, i32) {
    %c0_i32 = arith.constant 0 : i32
    %c0_i32_0 = arith.constant 0 : i32
    %c0_i32_1 = arith.constant 0 : i32
    return %c0_i32, %c0_i32_0 : i32, i32
  }
  func.func @transform_15(%arg0: i32) -> (i32, i32) {
    %c0_i32 = arith.constant 0 : i32
    %c0_i32_0 = arith.constant 0 : i32
    return %arg0, %c0_i32 : i32, i32
  }
  func.func @transform_16(%arg0: i32) -> (i32, i32) {
    %c0_i32 = arith.constant 0 : i32
    %c0_i32_0 = arith.constant 0 : i32
    return %arg0, %c0_i32 : i32, i32
  }
  func.func @transform_17(%arg0: i32) -> (i32, i32) {
    %c0_i32 = arith.constant 0 : i32
    %c0_i32_0 = arith.constant 0 : i32
    %c0_i32_1 = arith.constant 0 : i32
    return %c0_i32, %c0_i32_0 : i32, i32
  }
  func.func @transform_18(%arg0: i32) -> (i32, i32) {
    %c0_i32 = arith.constant 0 : i32
    %c0_i32_0 = arith.constant 0 : i32
    %c0_i32_1 = arith.constant 0 : i32
    return %c0_i32, %c0_i32_0 : i32, i32
  }
  func.func @transform_19(%arg0: i32) -> (i32, i32) {
    %c0_i32 = arith.constant 0 : i32
    %c0_i32_0 = arith.constant 0 : i32
    %c0_i32_1 = arith.constant 0 : i32
    return %c0_i32, %c0_i32_0 : i32, i32
  }
  func.func @transform_20(%arg0: i32) -> (i32, i32) {
    %c0_i32 = arith.constant 0 : i32
    %c0_i32_0 = arith.constant 0 : i32
    %c0_i32_1 = arith.constant 0 : i32
    return %c0_i32, %c0_i32_0 : i32, i32
  }
  func.func @transform_21(%arg0: i32) -> (i32, i32) {
    %c0_i32 = arith.constant 0 : i32
    %c0_i32_0 = arith.constant 0 : i32
    %c0_i32_1 = arith.constant 0 : i32
    return %c0_i32, %c0_i32_0 : i32, i32
  }
}

</mosaic_0001>

<bundles_post_ra>
// kernel: moco_forward.1
= control target key start
LH: loop header
LB: loop body
LE: loop exit
PB: predicated region body
PF: predicated region fallthrough
CT: control target
= control target key end

     0   :  { %s7959_s0 = inlined_call_operand.vmem [shape: bf16[16,1024], index: 0, kind: input, shape index: {}]   ;;  %s7960_s1 = inlined_call_operand.hbm [shape: f32[1024,256], index: 1, kind: input, shape index: {}]   ;;  %s7961_s2 = inlined_call_operand.vmem [shape: f32[256,256], index: 2, kind: input, shape index: {}]   ;;  %s7962_s3 = inlined_call_operand.vmem [shape: f32[1,256], index: 3, kind: input, shape index: {}]   ;;  %s7963_s4 = inlined_call_operand.hbm [shape: f32[1,256], index: 4, kind: input, shape index: {}]   ;;  %s7964_s5 = inlined_call_operand.hbm [shape: f32[256,256], index: 5, kind: input, shape index: {}]   ;;  %s7965_s6 = inlined_call_operand.hbm [shape: bf16[256,256], index: 6, kind: input, shape index: {}]   ;;  %s7966_s7 = inlined_call_operand.vmem [shape: f32[1,256], index: 7, kind: input, shape index: {}]   ;;  %s7967_s8 = inlined_call_operand.hbm [shape: f32[1,256], index: 8, kind: input, shape index: {}]   ;;  %s7968_s9 = inlined_call_operand.hbm [shape: bf16[256,256], index: 9, kind: input, shape index: {}]   ;;  %s7969_s10 = inlined_call_operand.hbm [shape: f32[1024,256], index: 10, kind: input, shape index: {}, may-alias: {10,17}]   ;;  %s7970_s11 = inlined_call_operand.hbm [shape: f32[256,256], index: 11, kind: input, shape index: {}, may-alias: {11,18}]   ;;  %s7971_s12 = inlined_call_operand.hbm [shape: f32[1,256], index: 12, kind: input, shape index: {}, may-alias: {12,19}]   ;;  %s7972_s13 = inlined_call_operand.hbm [shape: f32[1,256], index: 13, kind: input, shape index: {}, may-alias: {13,20}]   ;;  %s7973_s14 = inlined_call_operand.hbm [shape: f32[256,256], index: 14, kind: input, shape index: {}, may-alias: {14,21}]   ;;  %s7974_s15 = inlined_call_operand.vmem [shape: f32[16,256], index: 15, kind: output, shape index: {0}]   ;;  %s7975_s16 = inlined_call_operand.vmem [shape: f32[16,256], index: 16, kind: output, shape index: {1}]   ;;  %s7976_s17 = inlined_call_operand.hbm [shape: f32[1024,256], index: 17, kind: output, shape index: {2}, may-alias: {10,17}]   ;;  %s7977_s18 = inlined_call_operand.hbm [shape: f32[256,256], index: 18, kind: output, shape index: {3}, may-alias: {11,18}]   ;;  %s7978_s19 = inlined_call_operand.hbm [shape: f32[1,256], index: 19, kind: output, shape index: {4}, may-alias: {12,19}]   ;;  %s7979_s20 = inlined_call_operand.hbm [shape: f32[1,256], index: 20, kind: output, shape index: {5}, may-alias: {13,20}]   ;;  %s7980_s21 = inlined_call_operand.hbm [shape: f32[256,256], index: 21, kind: output, shape index: {6}, may-alias: {14,21}]  }
   0x1   :  { %8026 = sst [smem:[#allocation69_spill]] %s7959_s0 }
   0x2   :  { %8027 = sst [smem:[#allocation70_spill]] %s7960_s1 }
   0x3   :  { %8028 = sst [smem:[#allocation71_spill]] %s7961_s2 }
   0x4   :  { %8029 = sst [smem:[#allocation72_spill]] %s7962_s3 }
   0x5   :  { %8030 = sst [smem:[#allocation73_spill]] %s7963_s4 }
   0x6   :  { %8031 = sst [smem:[#allocation74_spill]] %s7964_s5 }
   0x7   :  { %8032 = sst [smem:[#allocation75_spill]] %s7965_s6 }
   0x8   :  { %8033 = sst [smem:[#allocation76_spill]] %s7968_s9 }
   0x9   :  { %8034 = sst [smem:[#allocation77_spill]] %s7970_s11 }
   0xa   :  { %8035 = sst [smem:[#allocation78_spill]] %s7975_s16 }
   0xb   :  { %8036 = sst [smem:[#allocation79_spill]] %s7980_s21 }
   0xc   :  { %27 = vsyncpa [#allocation3], 0 }
   0xd   :  { %28 = vsyncpa [#allocation6], 0 }
   0xe   :  { %29 = vsyncpa [#allocation9], 0 }
   0xf   :  { %30 = vsyncpa [#allocation12], 0 }
  0x10   :  { %31 = vsyncpa [#allocation15], 0 }
  0x11   :  { %32 = vsyncpa [#allocation18], 0 }
  0x12   :  { %33 = vsyncpa [#allocation4], 0 }
  0x13   :  { %34 = vsyncpa [#allocation22], 0 }
  0x14   :  { %35 = vsyncpa [#allocation25], 0  ;;  %s6612_s2 = smov 0  }
  0x15 LB: > { %8037 = sst [smem:[#allocation36_spill]] %s6478_s2  ;;  %s6480_s25 = smov [#allocation5]   ;;  %s6478_s2 = sphi %s6612_s2, %s41_s2  }
  0x16   : > { %s555_s26 = sshll.u32 %s6480_s25, 4  ;;  %s6618_s27 = sadd.s32 4294967295, %s6478_s2   ;;  %s556_s26 = int_to_ptr.vmem [resolvable:$true] %s555_s26 }
  0x17   : > { %p5542_p0 = scmp.ge.s32.totalorder %s6478_s2, 1  ;;  %p523_p1 = scmp.lt.s32.totalorder %s6478_s2, 3 }
  0x18   : > { %p7987_p2 = scmp.eq.s32.totalorder %s6618_s27, 0  ;;  %s6481_s28 = smov [#allocation8]  }
  0x19   : > { %p6623_p3 = pnand %p5542_p0, %p523_p1  ;;  %s578_s29 = sshll.u32 %s6481_s28, 4  ;;  %s6629_s29 = int_to_ptr.vmem [resolvable:$true] %s578_s29 }
  0x1a   : > { %s6482_s4 = smov [#allocation11]   ;;  %s8040_s23 = sld [smem:[#allocation73_spill]] }
  0x1b   : > { %s8038_s3 = scalar_select %p6623_p3, 1, 0 }
  0x1c   : > { %p5746_p4 = pneg %p6623_p3  ;;  %s605_s30 = sshll.u32 %s6482_s4, 4  ;;  %s6637_s30 = int_to_ptr.vmem [resolvable:$true] %s605_s30 }
  0x1e   : > { %p6633_p5 = pnand %p7987_p2, %p5746_p4 }
  0x20   : > { %s5998_s1 = scalar_lea.hbm %s8040_s23, 32  ;;  %p6647_p7 = pneg %p6633_p5 }
  0x21   : > { %p5999_p6 = scmp.ne.s32.totalorder %s8040_s23, %s5998_s1  ;;  %p6005_p10 = scmp.lt.u32.totalorder %s5998_s1, %s8040_s23 }
  0x23   : > { %p6001_p8 = pnand %p6647_p7, %p5999_p6 }
  0x25   : > { %p6002_p9 = pneg %p6001_p8 }
  0x27   : > { %p6007_p11 = pnand %p6005_p10, %p6002_p9 }
  0x29   : > { %6010 = shalt.err (!%p6007_p11)
}
  0x2a   : > { %s6011_s5 = scalar_lea.vmem %s556_s26, 32  ;;  %p6019_p1 = scmp.lt.s32.totalorder %s556_s26, %s556_s26 }
  0x2b   : > { %p6012_p12 = scmp.ne.s32.totalorder %s556_s26, %s6011_s5  ;;  %p6020_p4 = scmp.lt.s32.totalorder %s6011_s5, %s6011_s5 }
  0x2d   : > { %p6014_p13 = pnand %p6012_p12, %p6647_p7  ;;  %p6021_p2 = por %p6020_p4, %p6019_p1 }
  0x2f   : > { %p6015_p0 = pneg %p6014_p13 }
  0x31   : > { %p6022_p3 = pnand %p6021_p2, %p6015_p0 }
  0x33   : > { %6025 = shalt.err (!%p6022_p3)
}
  0x34   : > { %5752 = dma.hbm_to_vmem [thread:$0]  (!%p6633_p5), %s8040_s23, 32, %s556_s26, [#allocation6]  }
  0x35   : > { %s8042_s6 = sld [smem:[#allocation75_spill]] }
  0x3b   : > { %s6026_s25 = scalar_lea.hbm %s8042_s6, 4096 }
  0x3c   : > { %p6027_p6 = scmp.ne.s32.totalorder %s8042_s6, %s6026_s25  ;;  %p6033_p2 = scmp.lt.u32.totalorder %s6026_s25, %s8042_s6 }
  0x3e   : > { %p6029_p8 = pnand %p6027_p6, %p6647_p7 }
  0x40   : > { %p6030_p9 = pneg %p6029_p8 }
  0x42   : > { %p6035_p3 = pnand %p6033_p2, %p6030_p9 }
  0x44   : > { %6038 = shalt.err (!%p6035_p3)
}
  0x45   : > { %s6039_s26 = scalar_lea.vmem %s6629_s29, 4096  ;;  %p6047_p13 = scmp.lt.s32.totalorder %s6629_s29, %s6629_s29 }
  0x46   : > { %p6040_p10 = scmp.ne.s32.totalorder %s6629_s29, %s6039_s26  ;;  %p6048_p0 = scmp.lt.s32.totalorder %s6039_s26, %s6039_s26 }
  0x48   : > { %p6042_p11 = pnand %p6040_p10, %p6647_p7  ;;  %p6049_p1 = por %p6048_p0, %p6047_p13 }
  0x4a   : > { %p6043_p12 = pneg %p6042_p11 }
  0x4c   : > { %p6050_p4 = pnand %p6049_p1, %p6043_p12 }
  0x4e   : > { %6053 = shalt.err (!%p6050_p4)
}
  0x4f   : > { %s6483_s16 = smov 128   ;;  %s6484_s21 = smov 8  }
  0x50   : > { %5758 = dma.hbm_to_vmem [thread:$0]  (!%p6633_p5), %s8042_s6, 4096, %s6629_s29, [#allocation9], %s6483_s16, %s6483_s16, %s6484_s21  }
  0x51   : > { %s8043_s9 = sld [smem:[#allocation76_spill]] }
  0x57   : > { %s6054_s25 = scalar_lea.hbm %s8043_s9, 4096 }
  0x58   : > { %p6055_p6 = scmp.ne.s32.totalorder %s8043_s9, %s6054_s25  ;;  %p6061_p2 = scmp.lt.u32.totalorder %s6054_s25, %s8043_s9 }
  0x5a   : > { %p6057_p8 = pnand %p6055_p6, %p6647_p7 }
  0x5c   : > { %p6058_p9 = pneg %p6057_p8 }
  0x5e   : > { %p6063_p3 = pnand %p6061_p2, %p6058_p9 }
  0x60   : > { %6066 = shalt.err (!%p6063_p3)
}
  0x61   : > { %s6067_s29 = scalar_lea.vmem %s6637_s30, 4096  ;;  %p6075_p13 = scmp.lt.s32.totalorder %s6637_s30, %s6637_s30 }
  0x62   : > { %p6068_p10 = scmp.ne.s32.totalorder %s6637_s30, %s6067_s29  ;;  %p6076_p0 = scmp.lt.s32.totalorder %s6067_s29, %s6067_s29 }
  0x64   : > { %p6070_p11 = pnand %p6068_p10, %p6647_p7  ;;  %p6077_p1 = por %p6076_p0, %p6075_p13 }
  0x66   : > { %p6071_p12 = pneg %p6070_p11 }
  0x68   : > { %p6078_p4 = pnand %p6077_p1, %p6071_p12 }
  0x6a   : > { %6081 = shalt.err (!%p6078_p4)
}
  0x6b   : > { %5764 = dma.hbm_to_vmem [thread:$0]  (!%p6633_p5), %s8043_s9, 4096, %s6637_s30, [#allocation12], %s6483_s16, %s6483_s16, %s6484_s21  }
  0x6c   : > { %s6485_s24 = smov [#allocation14]   ;;  %s6486_s1 = smov [#allocation17]  }
  0x6d   : > { %s631_s2 = sshll.u32 %s6485_s24, 4  ;;  %s656_s25 = sshll.u32 %s6486_s1, 4  ;;  %s632_s2 = int_to_ptr.vmem [resolvable:$true] %s631_s2  ;;  %s6709_s25 = int_to_ptr.vmem [resolvable:$true] %s656_s25 }
  0x6e   : > { %s8044_s11 = sld [smem:[#allocation77_spill]] }
  0x74   : > { %s6082_s26 = scalar_lea.hbm %s8044_s11, 8192 }
  0x75   : > { %p6083_p6 = scmp.ne.s32.totalorder %s8044_s11, %s6082_s26  ;;  %p6089_p2 = scmp.lt.u32.totalorder %s6082_s26, %s8044_s11 }
  0x77   : > { %p6085_p8 = pnand %p6083_p6, %p6647_p7 }
  0x79   : > { %p6086_p9 = pneg %p6085_p8 }
  0x7b   : > { %p6091_p3 = pnand %p6089_p2, %p6086_p9 }
  0x7d   : > { %6094 = shalt.err (!%p6091_p3)
}
  0x7e   : > { %s6095_s16 = scalar_lea.vmem %s632_s2, 8192  ;;  %p6103_p13 = scmp.lt.s32.totalorder %s632_s2, %s632_s2 }
  0x7f   : > { %p6096_p10 = scmp.ne.s32.totalorder %s632_s2, %s6095_s16  ;;  %p6104_p0 = scmp.lt.s32.totalorder %s6095_s16, %s6095_s16 }
  0x81   : > { %p6098_p11 = pnand %p6096_p10, %p6647_p7  ;;  %p6105_p1 = por %p6104_p0, %p6103_p13 }
  0x83   : > { %p6099_p12 = pneg %p6098_p11 }
  0x85   : > { %p6106_p4 = pnand %p6105_p1, %p6099_p12 }
  0x87   : > { %6109 = shalt.err (!%p6106_p4)
}
  0x88   : > { %s7991_s6 = smov 256   ;;  %s6488_s21 = smov 16  }
  0x89   : > { %5770 = dma.hbm_to_vmem [thread:$0]  (!%p6633_p5), %s8044_s11, 8192, %s632_s2, [#allocation15], %s7991_s6, %s7991_s6, %s6488_s21  }
  0x8a   : > { %s6110_s5 = scalar_lea.hbm %s7972_s13, 32 }
  0x8b   : > { %p6111_p6 = scmp.ne.s32.totalorder %s7972_s13, %s6110_s5  ;;  %p6117_p2 = scmp.lt.u32.totalorder %s6110_s5, %s7972_s13 }
  0x8d   : > { %p6113_p8 = pnand %p6111_p6, %p6647_p7 }
  0x8f   : > { %p6114_p9 = pneg %p6113_p8 }
  0x91   : > { %p6119_p3 = pnand %p6117_p2, %p6114_p9 }
  0x93   : > { %6122 = shalt.err (!%p6119_p3)
}
  0x94   : > { %s6123_s2 = scalar_lea.vmem %s6709_s25, 32  ;;  %p6131_p13 = scmp.lt.s32.totalorder %s6709_s25, %s6709_s25 }
  0x95   : > { %p6124_p10 = scmp.ne.s32.totalorder %s6709_s25, %s6123_s2  ;;  %p6132_p0 = scmp.lt.s32.totalorder %s6123_s2, %s6123_s2 }
  0x97   : > { %p6126_p11 = pnand %p6124_p10, %p6647_p7  ;;  %p6133_p1 = por %p6132_p0, %p6131_p13 }
  0x99   : > { %p6127_p12 = pneg %p6126_p11 }
  0x9b   : > { %p6134_p4 = pnand %p6133_p1, %p6127_p12 }
  0x9d   : > { %6137 = shalt.err (!%p6134_p4)
}
  0x9e   : > { %5776 = dma.hbm_to_vmem [thread:$0]  (!%p6633_p5), %s7972_s13, 32, %s6709_s25, [#allocation18]  }
  0x9f   : > { %s6489_s24 = smov [#allocation2]   ;;  %s6490_s4 = smov [#allocation7]  }
  0xa0   : > { %s535_s1 = sshll.u32 %s6489_s24, 4  ;;  %s565_s5 = sshll.u32 %s6490_s4, 4  ;;  %s536_s1 = int_to_ptr.vmem [resolvable:$true] %s535_s1  ;;  %s6755_s5 = int_to_ptr.vmem [resolvable:$true] %s565_s5 }
  0xa1   : > { %s8045_s23 = sld [smem:[#allocation70_spill]] }
  0xa7   : > { %s6138_s30 = scalar_lea.hbm %s8045_s23, 32768 }
  0xa8   : > { %p6139_p6 = scmp.ne.s32.totalorder %s8045_s23, %s6138_s30  ;;  %p6145_p2 = scmp.lt.u32.totalorder %s6138_s30, %s8045_s23 }
  0xaa   : > { %p6141_p8 = pnand %p6139_p6, %p6647_p7 }
  0xac   : > { %p6142_p9 = pneg %p6141_p8 }
  0xae   : > { %p6147_p3 = pnand %p6145_p2, %p6142_p9 }
  0xb0   : > { %6150 = shalt.err (!%p6147_p3)
}
  0xb1   : > { %s6151_s22 = scalar_lea.vmem %s536_s1, 32768  ;;  %p6159_p13 = scmp.lt.s32.totalorder %s536_s1, %s536_s1 }
  0xb2   : > { %p6152_p10 = scmp.ne.s32.totalorder %s536_s1, %s6151_s22  ;;  %p6160_p0 = scmp.lt.s32.totalorder %s6151_s22, %s6151_s22 }
  0xb4   : > { %p6154_p11 = pnand %p6152_p10, %p6647_p7  ;;  %p6161_p1 = por %p6160_p0, %p6159_p13 }
  0xb6   : > { %p6155_p12 = pneg %p6154_p11 }
  0xb8   : > { %p6162_p4 = pnand %p6161_p1, %p6155_p12 }
  0xba   : > { %6165 = shalt.err (!%p6162_p4)
}
  0xbb   : > { %s8046_s6 = smov 256   ;;  %s8047_s30 = sld [smem:[#allocation74_spill]] }
  0xbc   : > { %5749 = dma.hbm_to_vmem [thread:$0]  (!%p6633_p5), %s8045_s23, 32768, %s536_s1, [#allocation3], %s8046_s6, %s8046_s6, %s6488_s21  }
  0xc1   : > { %s6166_s2 = scalar_lea.hbm %s8047_s30, 8192 }
  0xc2   : > { %p6167_p6 = scmp.ne.s32.totalorder %s8047_s30, %s6166_s2  ;;  %p6173_p2 = scmp.lt.u32.totalorder %s6166_s2, %s8047_s30 }
  0xc4   : > { %p6169_p8 = pnand %p6167_p6, %p6647_p7 }
  0xc6   : > { %p6170_p9 = pneg %p6169_p8 }
  0xc8   : > { %p6175_p3 = pnand %p6173_p2, %p6170_p9 }
  0xca   : > { %6178 = shalt.err (!%p6175_p3)
}
  0xcb   : > { %s6179_s1 = scalar_lea.vmem %s6755_s5, 8192  ;;  %p6187_p13 = scmp.lt.s32.totalorder %s6755_s5, %s6755_s5 }
  0xcc   : > { %p6180_p10 = scmp.ne.s32.totalorder %s6755_s5, %s6179_s1  ;;  %p6188_p0 = scmp.lt.s32.totalorder %s6179_s1, %s6179_s1 }
  0xce   : > { %p6182_p11 = pnand %p6180_p10, %p6647_p7  ;;  %p6189_p1 = por %p6188_p0, %p6187_p13 }
  0xd0   : > { %p6183_p12 = pneg %p6182_p11 }
  0xd2   : > { %p6190_p4 = pnand %p6189_p1, %p6183_p12 }
  0xd4   : > { %6193 = shalt.err (!%p6190_p4)
}
  0xd5   : > { %5755 = dma.hbm_to_vmem [thread:$0]  (!%p6633_p5), %s8047_s30, 8192, %s6755_s5, [#allocation6], %s8046_s6, %s8046_s6, %s6488_s21  }
  0xd6   : > { %s6491_s4 = smov [#allocation10]   ;;  %s6492_s29 = smov [#allocation13]  }
  0xd7   : > { %s595_s26 = sshll.u32 %s6491_s4, 4  ;;  %s618_s2 = sshll.u32 %s6492_s29, 4  ;;  %s596_s26 = int_to_ptr.vmem [resolvable:$true] %s595_s26  ;;  %s6804_s2 = int_to_ptr.vmem [resolvable:$true] %s618_s2 }
  0xd8   : > { %s6194_s22 = scalar_lea.hbm %s7967_s8, 32 }
  0xd9   : > { %p6195_p6 = scmp.ne.s32.totalorder %s7967_s8, %s6194_s22  ;;  %p6201_p2 = scmp.lt.u32.totalorder %s6194_s22, %s7967_s8 }
  0xdb   : > { %p6197_p8 = pnand %p6195_p6, %p6647_p7 }
  0xdd   : > { %p6198_p9 = pneg %p6197_p8 }
  0xdf   : > { %p6203_p3 = pnand %p6201_p2, %p6198_p9 }
  0xe1   : > { %6206 = shalt.err (!%p6203_p3)
}
  0xe2   : > { %s6207_s24 = scalar_lea.vmem %s596_s26, 32  ;;  %p6215_p13 = scmp.lt.s32.totalorder %s596_s26, %s596_s26 }
  0xe3   : > { %p6208_p10 = scmp.ne.s32.totalorder %s596_s26, %s6207_s24  ;;  %p6216_p0 = scmp.lt.s32.totalorder %s6207_s24, %s6207_s24 }
  0xe5   : > { %p6210_p11 = pnand %p6208_p10, %p6647_p7  ;;  %p6217_p1 = por %p6216_p0, %p6215_p13 }
  0xe7   : > { %p6211_p12 = pneg %p6210_p11 }
  0xe9   : > { %p6218_p4 = pnand %p6217_p1, %p6211_p12 }
  0xeb   : > { %6221 = shalt.err (!%p6218_p4)
}
  0xec   : > { %5761 = dma.hbm_to_vmem [thread:$0]  (!%p6633_p5), %s7967_s8, 32, %s596_s26, [#allocation9]  }
  0xed   : > { %s6222_s25 = scalar_lea.hbm %s7969_s10, 32768 }
  0xee   : > { %p6223_p6 = scmp.ne.s32.totalorder %s7969_s10, %s6222_s25  ;;  %p6229_p2 = scmp.lt.u32.totalorder %s6222_s25, %s7969_s10 }
  0xf0   : > { %p6225_p8 = pnand %p6223_p6, %p6647_p7 }
  0xf2   : > { %p6226_p9 = pneg %p6225_p8 }
  0xf4   : > { %p6231_p3 = pnand %p6229_p2, %p6226_p9 }
  0xf6   : > { %6234 = shalt.err (!%p6231_p3)
}
  0xf7   : > { %s6235_s26 = scalar_lea.vmem %s6804_s2, 32768  ;;  %p6243_p13 = scmp.lt.s32.totalorder %s6804_s2, %s6804_s2 }
  0xf8   : > { %p6236_p10 = scmp.ne.s32.totalorder %s6804_s2, %s6235_s26  ;;  %p6244_p0 = scmp.lt.s32.totalorder %s6235_s26, %s6235_s26 }
  0xfa   : > { %p6238_p11 = pnand %p6236_p10, %p6647_p7  ;;  %p6245_p1 = por %p6244_p0, %p6243_p13 }
  0xfc   : > { %p6239_p12 = pneg %p6238_p11 }
  0xfe   : > { %p6246_p4 = pnand %p6245_p1, %p6239_p12 }
 0x100   : > { %6249 = shalt.err (!%p6246_p4)
}
 0x101   : > { %5767 = dma.hbm_to_vmem [thread:$0]  (!%p6633_p5), %s7969_s10, 32768, %s6804_s2, [#allocation12], %s8046_s6, %s8046_s6, %s6488_s21  }
 0x102   : > { %s6493_s4 = smov [#allocation16]   ;;  %s6494_s16 = smov [#allocation19]  }
 0x103   : > { %s645_s29 = sshll.u32 %s6493_s4, 4  ;;  %s666_s25 = sshll.u32 %s6494_s16, 4  ;;  %s646_s29 = int_to_ptr.vmem [resolvable:$true] %s645_s29  ;;  %s6850_s25 = int_to_ptr.vmem [resolvable:$true] %s666_s25 }
 0x104   : > { %s6250_s9 = scalar_lea.hbm %s7971_s12, 32 }
 0x105   : > { %p6251_p6 = scmp.ne.s32.totalorder %s7971_s12, %s6250_s9  ;;  %p6257_p2 = scmp.lt.u32.totalorder %s6250_s9, %s7971_s12 }
 0x107   : > { %p6253_p8 = pnand %p6251_p6, %p6647_p7 }
 0x109   : > { %p6254_p9 = pneg %p6253_p8 }
 0x10b   : > { %p6259_p3 = pnand %p6257_p2, %p6254_p9 }
 0x10d   : > { %6262 = shalt.err (!%p6259_p3)
}
 0x10e   : > { %s6263_s11 = scalar_lea.vmem %s646_s29, 32  ;;  %p6271_p13 = scmp.lt.s32.totalorder %s646_s29, %s646_s29 }
 0x10f   : > { %p6264_p10 = scmp.ne.s32.totalorder %s646_s29, %s6263_s11  ;;  %p6272_p0 = scmp.lt.s32.totalorder %s6263_s11, %s6263_s11 }
 0x111   : > { %p6266_p11 = pnand %p6264_p10, %p6647_p7  ;;  %p6273_p1 = por %p6272_p0, %p6271_p13 }
 0x113   : > { %p6267_p12 = pneg %p6266_p11 }
 0x115   : > { %p6274_p4 = pnand %p6273_p1, %p6267_p12 }
 0x117   : > { %6277 = shalt.err (!%p6274_p4)
}
 0x118   : > { %5773 = dma.hbm_to_vmem [thread:$0]  (!%p6633_p5), %s7971_s12, 32, %s646_s29, [#allocation15]  }
 0x119   : > { %s6278_s9 = scalar_lea.hbm %s7973_s14, 8192 }
 0x11a   : > { %p6279_p6 = scmp.ne.s32.totalorder %s7973_s14, %s6278_s9  ;;  %p6285_p2 = scmp.lt.u32.totalorder %s6278_s9, %s7973_s14 }
 0x11c   : > { %p6281_p8 = pnand %p6279_p6, %p6647_p7 }
 0x11e   : > { %p6282_p9 = pneg %p6281_p8 }
 0x120   : > { %p6287_p3 = pnand %p6285_p2, %p6282_p9 }
 0x122   : > { %6290 = shalt.err (!%p6287_p3)
}
 0x123   : > { %s6291_s29 = scalar_lea.vmem %s6850_s25, 8192  ;;  %p6299_p13 = scmp.lt.s32.totalorder %s6850_s25, %s6850_s25 }
 0x124   : > { %p6292_p10 = scmp.ne.s32.totalorder %s6850_s25, %s6291_s29  ;;  %p6300_p0 = scmp.lt.s32.totalorder %s6291_s29, %s6291_s29 }
 0x126   : > { %p6294_p11 = pnand %p6292_p10, %p6647_p7  ;;  %p6301_p1 = por %p6300_p0, %p6299_p13 }
 0x128   : > { %p6295_p12 = pneg %p6294_p11 }
 0x12a   : > { %p6302_p4 = pnand %p6301_p1, %p6295_p12 }
 0x12c   : > { %6305 = shalt.err (!%p6302_p4)
}
 0x12d   : > { %5779 = dma.hbm_to_vmem [thread:$0]  (!%p6633_p5), %s7973_s14, 8192, %s6850_s25, [#allocation18], %s8046_s6, %s8046_s6, %s6488_s21  }
 0x12e   : > { %p8048_p6 = scmp.ne.s32.totalorder %s8038_s3, 0 }
 0x130   : > { %690 = sbr.rel (%p8048_p6) target bundleno = 2091 (0x82b), region = 80 }
 0x137   : > { %p8049_p7 = scmp.eq.s32.totalorder %s6618_s27, 0 }
 0x139   : > { %6441 = dma.done.wait (%p8049_p7), [#allocation3], 32768   ;;  %p8050_p8 = pmov %p8049_p7 }
 0x13a   : > { %p8051_p9 = pmov %p8049_p7 }
 0x13b   : > { %6443 = vsyncadd (%p8050_p8), [#allocation3], 4294934528 }
 0x13c   : > { %6445 = dma.done.wait (%p8051_p9), [#allocation6], 8224   ;;  %p8052_p2 = pmov %p8049_p7 }
 0x13e   : > { %6447 = vsyncadd (%p8052_p2), [#allocation6], 4294959072  ;;  %p8053_p3 = pmov %p8052_p2 }
 0x13f   : > { %p8054_p5 = pmov %p8052_p2 }
 0x140   : > { %6449 = dma.done.wait (%p8053_p3), [#allocation9], 4128  }
 0x141   : > { %6451 = vsyncadd (%p8054_p5), [#allocation9], 4294963168  ;;  %p8055_p10 = pmov %p8052_p2 }
 0x142   : > { %p8056_p11 = pmov %p8052_p2 }
 0x143   : > { %6453 = dma.done.wait (%p8055_p10), [#allocation12], 36864  }
 0x144   : > { %6455 = vsyncadd (%p8056_p11), [#allocation12], 4294930432  ;;  %p8057_p12 = pmov %p8052_p2 }
 0x145   : > { %p8058_p13 = pmov %p8052_p2 }
 0x146   : > { %6457 = dma.done.wait (%p8057_p12), [#allocation15], 8224  }
 0x147   : > { %6459 = vsyncadd (%p8058_p13), [#allocation15], 4294959072  ;;  %p8059_p0 = pmov %p8052_p2 }
 0x149   : > { %6461 = dma.done.wait (%p8059_p0), [#allocation18], 8224   ;;  %p8060_p1 = pmov %p8059_p0 }
 0x14a   : > { %v3199_v0 = vld [vmem:[#allocation2 + $0x208] sm:$0xff]  ;;  %v3201_v1 = vld [vmem:[#allocation2 + $0x218] sm:$0xff]  ;;  %v3198_v2 = vld [vmem:[#allocation2 + $0x200] sm:$0xff]  ;;  %p795_p4 = scmp.lt.s32.totalorder %s6618_s27, 1  ;;  %s8061_s6 = sld [smem:[#allocation69_spill]] }
 0x14b   : > { %6463 = vsyncadd (%p8060_p1), [#allocation18], 4294959072  ;;  %v3423_v3 = vpack.c.bf16 %v3201_v1, %v3199_v0  ;;  %v3200_v4 = vld [vmem:[#allocation2 + $0x210] sm:$0xff]  ;;  %v3203_v5 = vld [vmem:[#allocation2 + $0x228] sm:$0xff]  ;;  %s8062_s1 = sld [smem:[#allocation71_spill]]  ;;  %s8064_s21 = sld [smem:[#allocation72_spill]] }
 0x14c   : > { %v3205_v6 = vld [vmem:[#allocation2 + $0x238] sm:$0xff]  ;;  %v3422_v7 = vpack.c.bf16 %v3200_v4, %v3198_v2  ;;  %v3202_v9 = vld [vmem:[#allocation2 + $0x220] sm:$0xff]  ;;  %v3204_v10 = vld [vmem:[#allocation2 + $0x230] sm:$0xff]  ;;  %s6924_s3 = scalar_select %p795_p4, %s6618_s27, 1 }
 0x14d   : > { %v3425_v8 = vpack.c.bf16 %v3205_v6, %v3203_v5  ;;  %v3207_v11 = vld [vmem:[#allocation2 + $0x248] sm:$0xff]  ;;  %3781 = vmatprep.subr.bf16.mxu0 %v3423_v3  ;;  %v3209_v12 = vld [vmem:[#allocation2 + $0x258] sm:$0xff]  ;;  %v3424_v13 = vpack.c.bf16 %v3204_v10, %v3202_v9  ;;  %v3206_v15 = vld [vmem:[#allocation2 + $0x240] sm:$0xff]  ;;  %p5802_p6 = scmp.eq.s32.totalorder %s6618_s27, 1  ;;  %s6495_s4 = smov [#allocation21]  }
 0x14e   : > { %3782 = vmatpush1.bf16.msra.mxu0 %v3422_v7  ;;  %v3427_v14 = vpack.c.bf16 %v3209_v12, %v3207_v11  ;;  %v3208_v16 = vld [vmem:[#allocation2 + $0x250] sm:$0xff]  ;;  %v3211_v17 = vld [vmem:[#allocation2 + $0x268] sm:$0xff]  ;;  %v3213_v18 = vld [vmem:[#allocation2 + $0x278] sm:$0xff]  ;;  %s5657_s0 = sshll.u32 %s6924_s3, 5  ;;  %s5658_s5 = sshll.u32 %s6924_s3, 4 }
 0x14f   : > { %3783 = vmatprep.subr.bf16.mxu0 %v3425_v8  ;;  %v3426_v19 = vpack.c.bf16 %v3208_v16, %v3206_v15  ;;  %v3429_v20 = vpack.c.bf16 %v3213_v18, %v3211_v17  ;;  %v3210_v21 = vld [vmem:[#allocation2 + $0x260] sm:$0xff]  ;;  %v3212_v22 = vld [vmem:[#allocation2 + $0x270] sm:$0xff]  ;;  %v3215_v23 = vld [vmem:[#allocation2 + $0x288] sm:$0xff]  ;;  %s804_s2 = scalar_lea.vmem %s7974_s15, %s5658_s5 }
 0x150   : > { %v3217_v24 = vld [vmem:[#allocation2 + $0x298] sm:$0xff]  ;;  %v3428_v25 = vpack.c.bf16 %v3212_v22, %v3210_v21  ;;  %v3214_v27 = vld [vmem:[#allocation2 + $0x280] sm:$0xff]  ;;  %v3216_v28 = vld [vmem:[#allocation2 + $0x290] sm:$0xff]  ;;  %s6930_s25 = scalar_lea.vmem %s8061_s6, %s5657_s0  ;;  %s6496_s0 = smov [#allocation24]  }
 0x151   : > { %v3431_v26 = vpack.c.bf16 %v3217_v24, %v3215_v23  ;;  %v3219_v29 = vld [vmem:[#allocation2 + $0x2a8] sm:$0xff]  ;;  %v3221_v30 = vld [vmem:[#allocation2 + $0x2b8] sm:$0xff]  ;;  %v3430_v31 = vpack.c.bf16 %v3216_v28, %v3214_v27  ;;  %v3218_v33 = vld [vmem:[#allocation2 + $0x2a0] sm:$0xff]  ;;  %s5289_s28 = sshll.u32 %s6496_s0, 4  ;;  %s5290_s28 = int_to_ptr.vmem [resolvable:$true] %s5289_s28 }
 0x152   : > { %3784 = vmatpush1.bf16.msra.mxu0 %v3424_v13  ;;  %v3433_v32 = vpack.c.bf16 %v3221_v30, %v3219_v29  ;;  %v3220_v34 = vld [vmem:[#allocation2 + $0x2b0] sm:$0xff]  ;;  %v3223_v35 = vld [vmem:[#allocation2 + $0x2c8] sm:$0xff]  ;;  %v3225_v36 = vld [vmem:[#allocation2 + $0x2d8] sm:$0xff] }
 0x153   : > { %3785 = vmatprep.subr.bf16.mxu0 %v3427_v14  ;;  %v3432_v37 = vpack.c.bf16 %v3220_v34, %v3218_v33  ;;  %v3435_v38 = vpack.c.bf16 %v3225_v36, %v3223_v35  ;;  %v3222_v39 = vld [vmem:[#allocation2 + $0x2c0] sm:$0xff]  ;;  %v3224_v40 = vld [vmem:[#allocation2 + $0x2d0] sm:$0xff]  ;;  %v6933_v41 = vld [vmem:[%s6930_s25 + $0x8] sm:$0xff] }
 0x154   : > { %v3227_v42 = vld [vmem:[#allocation2 + $0x2e8] sm:$0xff]  ;;  %v3229_v43 = vld [vmem:[#allocation2 + $0x2f8] sm:$0xff]  ;;  %v6937_v44 = vcombine.high %v6933_v41, %v6933_v41  ;;  %v3434_v45 = vpack.c.bf16 %v3224_v40, %v3222_v39  ;;  %v3226_v47 = vld [vmem:[#allocation2 + $0x2e0] sm:$0xff] }
 0x155   : > { %v3437_v46 = vpack.c.bf16 %v3229_v43, %v3227_v42  ;;  %v3228_v48 = vld [vmem:[#allocation2 + $0x2f0] sm:$0xff]  ;;  %v3231_v49 = vld [vmem:[#allocation2 + $0x308] sm:$0xff]  ;;  %v3233_v50 = vld [vmem:[#allocation2 + $0x318] sm:$0xff] }
 0x156   : > { %3786 = vmatpush1.bf16.msra.mxu0 %v3426_v19  ;;  %3813 = vmatprep.mubr.bf16.mxu0 %v6937_v44  ;;  %v3436_v51 = vpack.c.bf16 %v3228_v48, %v3226_v47  ;;  %v3439_v52 = vpack.c.bf16 %v3233_v50, %v3231_v49  ;;  %v3230_v53 = vld [vmem:[#allocation2 + $0x300] sm:$0xff]  ;;  %v3232_v54 = vld [vmem:[#allocation2 + $0x310] sm:$0xff]  ;;  %v3235_v55 = vld [vmem:[#allocation2 + $0x328] sm:$0xff] }
 0x157   : > { %3787 = vmatprep.subr.bf16.mxu0 %v3429_v20  ;;  %v3237_v56 = vld [vmem:[#allocation2 + $0x338] sm:$0xff]  ;;  %v3438_v57 = vpack.c.bf16 %v3232_v54, %v3230_v53  ;;  %v3234_v59 = vld [vmem:[#allocation2 + $0x320] sm:$0xff]  ;;  %v3236_v60 = vld [vmem:[#allocation2 + $0x330] sm:$0xff] }
 0x158   : > { %v3441_v58 = vpack.c.bf16 %v3237_v56, %v3235_v55  ;;  %v3239_v61 = vld [vmem:[#allocation2 + $0x348] sm:$0xff]  ;;  %v3241_v62 = vld [vmem:[#allocation2 + $0x358] sm:$0xff]  ;;  %v3440_v63 = vpack.c.bf16 %v3236_v60, %v3234_v59  ;;  %v3238_v1 = vld [vmem:[#allocation2 + $0x340] sm:$0xff] }
 0x159   : > { %v3443_v0 = vpack.c.bf16 %v3241_v62, %v3239_v61  ;;  %v3240_v2 = vld [vmem:[#allocation2 + $0x350] sm:$0xff]  ;;  %v3243_v3 = vld [vmem:[#allocation2 + $0x368] sm:$0xff]  ;;  %v3245_v4 = vld [vmem:[#allocation2 + $0x378] sm:$0xff] }
 0x15a   : > { %3788 = vmatpush1.bf16.msra.mxu0 %v3428_v25  ;;  %v3442_v5 = vpack.c.bf16 %v3240_v2, %v3238_v1  ;;  %v3445_v6 = vpack.c.bf16 %v3245_v4, %v3243_v3  ;;  %v3242_v7 = vld [vmem:[#allocation2 + $0x360] sm:$0xff]  ;;  %v3244_v8 = vld [vmem:[#allocation2 + $0x370] sm:$0xff]  ;;  %v3247_v9 = vld [vmem:[#allocation2 + $0x388] sm:$0xff] }
 0x15b   : > { %3789 = vmatprep.subr.bf16.mxu0 %v3431_v26  ;;  %v3249_v10 = vld [vmem:[#allocation2 + $0x398] sm:$0xff]  ;;  %v3135_v11 = vld [vmem:[#allocation2 + $0x8] sm:$0xff]  ;;  %v3134_v14 = vld [vmem:[#allocation2] sm:$0xff]  ;;  %v3444_v15 = vpack.c.bf16 %v3244_v8, %v3242_v7 }
 0x15c   : > { %v3137_v12 = vld [vmem:[#allocation2 + $0x18] sm:$0xff]  ;;  %v3246_v16 = vld [vmem:[#allocation2 + $0x380] sm:$0xff]  ;;  %v3136_v17 = vld [vmem:[#allocation2 + $0x10] sm:$0xff]  ;;  %v3447_v18 = vpack.c.bf16 %v3249_v10, %v3247_v9 }
 0x15d   : > { %v3391_v13 = vpack.c.bf16 %v3137_v12, %v3135_v11  ;;  %v3248_v19 = vld [vmem:[#allocation2 + $0x390] sm:$0xff]  ;;  %v3390_v20 = vpack.c.bf16 %v3136_v17, %v3134_v14  ;;  %v3139_v21 = vld [vmem:[#allocation2 + $0x28] sm:$0xff]  ;;  %v3141_v22 = vld [vmem:[#allocation2 + $0x38] sm:$0xff]  ;;  %v6945_v17 = vcombine.low %v6933_v41, %v6933_v41 }
 0x15e   : > { %3790 = vmatpush1.bf16.msra.mxu0 %v3430_v31  ;;  %v3251_v23 = vld [vmem:[#allocation2 + $0x3a8] sm:$0xff]  ;;  %v3253_v24 = vld [vmem:[#allocation2 + $0x3b8] sm:$0xff]  ;;  %v3393_v25 = vpack.c.bf16 %v3141_v22, %v3139_v21  ;;  %v3138_v26 = vld [vmem:[#allocation2 + $0x20] sm:$0xff]  ;;  %v3446_v28 = vpack.c.bf16 %v3248_v19, %v3246_v16 }
 0x15f   : > { %3791 = vmatprep.subr.bf16.mxu0 %v3433_v32  ;;  %3740 = vmatprep.subr.bf16.mxu1 %v3391_v13  ;;  %v3140_v27 = vld [vmem:[#allocation2 + $0x30] sm:$0xff]  ;;  %v3250_v29 = vld [vmem:[#allocation2 + $0x3a0] sm:$0xff]  ;;  %v3143_v31 = vld [vmem:[#allocation2 + $0x48] sm:$0xff]  ;;  %v3449_v33 = vpack.c.bf16 %v3253_v24, %v3251_v23 }
 0x160   : > { %3741 = vmatpush1.bf16.msra.mxu1 %v3390_v20  ;;  %v3392_v30 = vpack.c.bf16 %v3140_v27, %v3138_v26  ;;  %v3145_v32 = vld [vmem:[#allocation2 + $0x58] sm:$0xff]  ;;  %v3252_v34 = vld [vmem:[#allocation2 + $0x3b0] sm:$0xff]  ;;  %v3142_v36 = vld [vmem:[#allocation2 + $0x40] sm:$0xff] }
 0x161   : > { %3742 = vmatprep.subr.bf16.mxu1 %v3393_v25  ;;  %v3395_v35 = vpack.c.bf16 %v3145_v32, %v3143_v31  ;;  %v3257_v39 = vld [vmem:[#allocation2 + $0x3d8] sm:$0xff]  ;;  %v3147_v40 = vld [vmem:[#allocation2 + $0x68] sm:$0xff]  ;;  %v3146_v48 = vld [vmem:[#allocation2 + $0x60] sm:$0xff] }
 0x162   : > { %3792 = vmatpush1.bf16.msra.mxu0 %v3432_v37  ;;  %v3144_v37 = vld [vmem:[#allocation2 + $0x50] sm:$0xff]  ;;  %v3149_v43 = vld [vmem:[#allocation2 + $0x78] sm:$0xff]  ;;  %v3259_v54 = vld [vmem:[#allocation2 + $0x3e8] sm:$0xff] }
 0x163   : > { %3793 = vmatprep.subr.bf16.mxu0 %v3435_v38  ;;  %v3255_v38 = vld [vmem:[#allocation2 + $0x3c8] sm:$0xff]  ;;  %v3394_v42 = vpack.c.bf16 %v3144_v37, %v3142_v36  ;;  %v3397_v47 = vpack.c.bf16 %v3149_v43, %v3147_v40  ;;  %v3148_v49 = vld [vmem:[#allocation2 + $0x70] sm:$0xff]  ;;  %v3153_v53 = vld [vmem:[#allocation2 + $0x98] sm:$0xff] }
 0x164   : > { %3743 = vmatpush1.bf16.msra.mxu1 %v3392_v30  ;;  %v3451_v50 = vpack.c.bf16 %v3257_v39, %v3255_v38  ;;  %v3261_v55 = vld [vmem:[#allocation2 + $0x3f8] sm:$0xff]  ;;  %v3396_v56 = vpack.c.bf16 %v3148_v49, %v3146_v48  ;;  %v3150_v60 = vld [vmem:[#allocation2 + $0x80] sm:$0xff]  ;;  %v3152_v61 = vld [vmem:[#allocation2 + $0x90] sm:$0xff] }
 0x165   : > { %3744 = vmatprep.subr.bf16.mxu1 %v3395_v35  ;;  %v3453_v62 = vpack.c.bf16 %v3261_v55, %v3259_v54  ;;  %v3157_v1 = vld [vmem:[#allocation2 + $0xb8] sm:$0xff]  ;;  %v3263_v2 = vld [vmem:[#allocation2 + $0x408] sm:$0xff]  ;;  %v3398_v4 = vpack.c.bf16 %v3152_v61, %v3150_v60  ;;  %v3154_v8 = vld [vmem:[#allocation2 + $0xa0] sm:$0xff] }
 0x166   : > { %3794 = vmatpush1.bf16.msra.mxu0 %v3434_v45  ;;  %v3448_v45 = vpack.c.bf16 %v3252_v34, %v3250_v29  ;;  %v3265_v3 = vld [vmem:[#allocation2 + $0x418] sm:$0xff]  ;;  %v3156_v9 = vld [vmem:[#allocation2 + $0xb0] sm:$0xff]  ;;  %v3267_v12 = vld [vmem:[#allocation2 + $0x428] sm:$0xff] }
 0x167   : > { %3795 = vmatprep.subr.bf16.mxu0 %v3437_v46  ;;  %v3254_v46 = vld [vmem:[#allocation2 + $0x3c0] sm:$0xff]  ;;  %v3455_v10 = vpack.c.bf16 %v3265_v3, %v3263_v2  ;;  %v3264_v11 = vld [vmem:[#allocation2 + $0x410] sm:$0xff]  ;;  %v3269_v14 = vld [vmem:[#allocation2 + $0x438] sm:$0xff] }
 0x168   : > { %3745 = vmatpush1.bf16.msra.mxu1 %v3394_v42  ;;  %v6941_v13 = vld [vmem:[%s6930_s25 + $0x10] sm:$0xff]  ;;  %v3161_v16 = vld [vmem:[#allocation2 + $0xd8] sm:$0xff]  ;;  %v3266_v20 = vld [vmem:[#allocation2 + $0x420] sm:$0xff]  ;;  %v3457_v24 = vpack.c.bf16 %v3269_v14, %v3267_v12 }
 0x169   : > { %3746 = vmatprep.subr.bf16.mxu1 %v3397_v47  ;;  %v6949_v21 = vcombine.high %v6941_v13, %v6941_v13  ;;  %v3158_v22 = vld [vmem:[#allocation2 + $0xc0] sm:$0xff]  ;;  %v3160_v23 = vld [vmem:[#allocation2 + $0xd0] sm:$0xff]  ;;  %v3163_v27 = vld [vmem:[#allocation2 + $0xe8] sm:$0xff] }
 0x16a   : > { %3796 = vmatpush1.bf16.msra.mxu0 %v3436_v51  ;;  %v3256_v51 = vld [vmem:[#allocation2 + $0x3d0] sm:$0xff]  ;;  %v3271_v41 = vld [vmem:[#allocation2 + $0x448] sm:$0xff]  ;;  %v3273_v29 = vld [vmem:[#allocation2 + $0x458] sm:$0xff]  ;;  %v3402_v30 = vpack.c.bf16 %v3160_v23, %v3158_v22 }
 0x16b   : > { %3797 = vmatprep.subr.bf16.mxu0 %v3439_v52  ;;  %v3151_v52 = vld [vmem:[#allocation2 + $0x88] sm:$0xff]  ;;  %v3268_v25 = vld [vmem:[#allocation2 + $0x430] sm:$0xff]  ;;  %v3270_v32 = vld [vmem:[#allocation2 + $0x440] sm:$0xff]  ;;  %v3459_v36 = vpack.c.bf16 %v3273_v29, %v3271_v41 }
 0x16c   : > { %v3399_v59 = vpack.c.bf16 %v3153_v53, %v3151_v52  ;;  %3747 = vmatpush1.bf16.msra.mxu1 %v3396_v56  ;;  %v3456_v31 = vpack.c.bf16 %v3268_v25, %v3266_v20  ;;  %v3162_v34 = vld [vmem:[#allocation2 + $0xe0] sm:$0xff]  ;;  %v3164_v35 = vld [vmem:[#allocation2 + $0xf0] sm:$0xff]  ;;  %v3167_v38 = vld [vmem:[#allocation2 + $0x108] sm:$0xff] }
 0x16d   : > { %v3272_v37 = vld [vmem:[#allocation2 + $0x450] sm:$0xff]  ;;  %v3169_v39 = vld [vmem:[#allocation2 + $0x118] sm:$0xff]  ;;  %v3275_v40 = vld [vmem:[#allocation2 + $0x468] sm:$0xff]  ;;  %v3404_v43 = vpack.c.bf16 %v3164_v35, %v3162_v34 }
 0x16e   : > { %3798 = vmatpush1.bf16.msra.mxu0 %v3438_v57  ;;  %v3450_v57 = vpack.c.bf16 %v3256_v51, %v3254_v46  ;;  %3748 = vmatprep.subr.bf16.mxu1 %v3399_v59  ;;  %v3277_v42 = vld [vmem:[#allocation2 + $0x478] sm:$0xff]  ;;  %v3274_v46 = vld [vmem:[#allocation2 + $0x460] sm:$0xff]  ;;  %v3407_v47 = vpack.c.bf16 %v3169_v39, %v3167_v38  ;;  %v3168_v49 = vld [vmem:[#allocation2 + $0x110] sm:$0xff] }
 0x16f   : > { %3799 = vmatprep.subr.bf16.mxu0 %v3441_v58  ;;  %v3258_v58 = vld [vmem:[#allocation2 + $0x3e0] sm:$0xff]  ;;  %v3276_v51 = vld [vmem:[#allocation2 + $0x470] sm:$0xff]  ;;  %v3171_v52 = vld [vmem:[#allocation2 + $0x128] sm:$0xff] }
 0x170   : > { %3749 = vmatpush1.bf16.msra.mxu1 %v3398_v4  ;;  %v3166_v48 = vld [vmem:[#allocation2 + $0x100] sm:$0xff]  ;;  %v3173_v53 = vld [vmem:[#allocation2 + $0x138] sm:$0xff]  ;;  %v3279_v54 = vld [vmem:[#allocation2 + $0x488] sm:$0xff] }
 0x171   : > { %v3281_v55 = vld [vmem:[#allocation2 + $0x498] sm:$0xff]  ;;  %v3406_v56 = vpack.c.bf16 %v3168_v49, %v3166_v48  ;;  %v3409_v59 = vpack.c.bf16 %v3173_v53, %v3171_v52  ;;  %v3170_v60 = vld [vmem:[#allocation2 + $0x120] sm:$0xff]  ;;  %v3172_v61 = vld [vmem:[#allocation2 + $0x130] sm:$0xff] }
 0x172   : > { %3800 = vmatpush1.bf16.msra.mxu0 %v3440_v63  ;;  %v3260_v63 = vld [vmem:[#allocation2 + $0x3f0] sm:$0xff]  ;;  %v3283_v2 = vld [vmem:[#allocation2 + $0x4a8] sm:$0xff]  ;;  %v3285_v3 = vld [vmem:[#allocation2 + $0x4b8] sm:$0xff]  ;;  %v3408_v4 = vpack.c.bf16 %v3172_v61, %v3170_v60 }
 0x173   : > { %3801 = vmatprep.subr.bf16.mxu0 %v3443_v0  ;;  %v3155_v0 = vld [vmem:[#allocation2 + $0xa8] sm:$0xff]  ;;  %v3181_v14 = vld [vmem:[#allocation2 + $0x178] sm:$0xff]  ;;  %v3178_v23 = vld [vmem:[#allocation2 + $0x160] sm:$0xff] }
 0x174   : > { %v3401_v7 = vpack.c.bf16 %v3157_v1, %v3155_v0  ;;  %v3175_v0 = vld [vmem:[#allocation2 + $0x148] sm:$0xff]  ;;  %v3177_v1 = vld [vmem:[#allocation2 + $0x158] sm:$0xff]  ;;  %v6954_v25 = vld [vmem:[%s6930_s25] sm:$0xff] }
 0x175   : > { %v3179_v12 = vld [vmem:[#allocation2 + $0x168] sm:$0xff]  ;;  %v3185_v41 = vld [vmem:[#allocation2 + $0x198] sm:$0xff]  ;;  %v6958_v29 = vcombine.high %v6954_v25, %v6954_v25  ;;  %v3290_v34 = vld [vmem:[#allocation2 + $0x4e0] sm:$0xff] }
 0x176   : > { %3802 = vmatpush1.bf16.msra.mxu0 %v3442_v5  ;;  %v3452_v5 = vpack.c.bf16 %v3260_v63, %v3258_v58  ;;  %3750 = vmatprep.subr.bf16.mxu1 %v3401_v7  ;;  %v3278_v58 = vld [vmem:[#allocation2 + $0x480] sm:$0xff]  ;;  %v3280_v63 = vld [vmem:[#allocation2 + $0x490] sm:$0xff]  ;;  %v3411_v7 = vpack.c.bf16 %v3177_v1, %v3175_v0  ;;  %v3413_v22 = vpack.c.bf16 %v3181_v14, %v3179_v12 }
 0x177   : > { %3803 = vmatprep.subr.bf16.mxu0 %v3445_v6  ;;  %v3262_v6 = vld [vmem:[#allocation2 + $0x400] sm:$0xff]  ;;  %3772 = vmatprep.mubr.bf16.mxu1 %v6958_v29  ;;  %v3292_v39 = vld [vmem:[#allocation2 + $0x4f0] sm:$0xff] }
 0x178   : > { %v3454_v19 = vpack.c.bf16 %v3264_v11, %v3262_v6  ;;  %v3282_v6 = vld [vmem:[#allocation2 + $0x4a0] sm:$0xff]  ;;  %v3284_v11 = vld [vmem:[#allocation2 + $0x4b0] sm:$0xff] }
 0x179   : > { %v3464_v20 = vpack.c.bf16 %v3284_v11, %v3282_v6  ;;  %v3294_v48 = vld [vmem:[#allocation2 + $0x500] sm:$0xff]  ;;  %v3296_v53 = vld [vmem:[#allocation2 + $0x510] sm:$0xff] }
 0x17a   : > { %3804 = vmatpush1.bf16.msra.mxu0 %v3444_v15  ;;  %v3159_v15 = vld [vmem:[#allocation2 + $0xc8] sm:$0xff]  ;;  %v3298_v60 = vld [vmem:[#allocation2 + $0x520] sm:$0xff]  ;;  %v3300_v1 = vld [vmem:[#allocation2 + $0x530] sm:$0xff] }
 0x17b   : > { %3805 = vmatprep.subr.bf16.mxu0 %v3447_v18  ;;  %v3400_v18 = vpack.c.bf16 %v3156_v9, %v3154_v8  ;;  %v3403_v26 = vpack.c.bf16 %v3161_v16, %v3159_v15  ;;  %v3174_v8 = vld [vmem:[#allocation2 + $0x140] sm:$0xff]  ;;  %v3176_v9 = vld [vmem:[#allocation2 + $0x150] sm:$0xff]  ;;  %v3287_v15 = vld [vmem:[#allocation2 + $0x4c8] sm:$0xff] }
 0x17c   : > { %v3289_v16 = vld [vmem:[#allocation2 + $0x4d8] sm:$0xff]  ;;  %v3196_v11 = vld [vmem:[#allocation2 + $0x1f0] sm:$0xff] }
 0x17d   : > { %3751 = vmatpush1.bf16.msra.mxu1 %v3400_v18  ;;  %v3286_v18 = vld [vmem:[#allocation2 + $0x4c0] sm:$0xff]  ;;  %v3304_v14 = vld [vmem:[#allocation2 + $0x550] sm:$0xff] }
 0x17e   : > { %3806 = vmatpush1.bf16.msra.mxu0 %v3446_v28  ;;  %v3165_v28 = vld [vmem:[#allocation2 + $0xf8] sm:$0xff]  ;;  %3752 = vmatprep.subr.bf16.mxu1 %v3403_v26  ;;  %v3467_v26 = vpack.c.bf16 %v3289_v16, %v3287_v15  ;;  %v3519_v15 = vld [vmem:[%s8062_s1 + $0x8] sm:$0xff] }
 0x17f   : > { %3807 = vmatprep.subr.bf16.mxu0 %v3449_v33  ;;  %v3405_v33 = vpack.c.bf16 %v3165_v28, %v3163_v27  ;;  %v3288_v27 = vld [vmem:[#allocation2 + $0x4d0] sm:$0xff]  ;;  %v3183_v28 = vld [vmem:[#allocation2 + $0x188] sm:$0xff]  ;;  %v3521_v16 = vld [vmem:[%s8062_s1 + $0x18] sm:$0xff] }
 0x180   : > { %v3415_v35 = vpack.c.bf16 %v3185_v41, %v3183_v28  ;;  %v3525_v28 = vld [vmem:[%s8062_s1 + $0x38] sm:$0xff] }
 0x181   : > { %3753 = vmatpush1.bf16.msra.mxu1 %v3402_v30  ;;  %v3291_v30 = vld [vmem:[#allocation2 + $0x4e8] sm:$0xff] }
 0x182   : > { %3808 = vmatpush1.bf16.msra.mxu0 %v3448_v45  ;;  %v3458_v45 = vpack.c.bf16 %v3272_v37, %v3270_v32  ;;  %3754 = vmatprep.subr.bf16.mxu1 %v3405_v33  ;;  %v3466_v33 = vpack.c.bf16 %v3288_v27, %v3286_v18  ;;  %v3184_v37 = vld [vmem:[#allocation2 + $0x190] sm:$0xff]  ;;  %v3307_v18 = vld [vmem:[#allocation2 + $0x568] sm:$0xff] }
 0x183   : > { %3809 = vmatprep.subr.bf16.mxu0 %v3451_v50  ;;  %v3461_v50 = vpack.c.bf16 %v3277_v42, %v3275_v40  ;;  %v3187_v40 = vld [vmem:[#allocation2 + $0x1a8] sm:$0xff]  ;;  %v3189_v42 = vld [vmem:[#allocation2 + $0x1b8] sm:$0xff] }
 0x184   : > { %v3417_v49 = vpack.c.bf16 %v3189_v42, %v3187_v40  ;;  %v3523_v27 = vld [vmem:[%s8062_s1 + $0x28] sm:$0xff] }
 0x185   : > { %3755 = vmatpush1.bf16.msra.mxu1 %v3404_v43  ;;  %v3295_v43 = vld [vmem:[#allocation2 + $0x508] sm:$0xff] }
 0x186   : > { %3810 = vmatpush1.bf16.msra.mxu0 %v3450_v57  ;;  %v3460_v57 = vpack.c.bf16 %v3276_v51, %v3274_v46  ;;  %3756 = vmatprep.subr.bf16.mxu1 %v3407_v47  ;;  %v3468_v47 = vpack.c.bf16 %v3292_v39, %v3290_v34  ;;  %v3188_v51 = vld [vmem:[#allocation2 + $0x1b0] sm:$0xff]  ;;  %v6981_v34 = vcombine.low %v6954_v25, %v6954_v25  ;;  %v3527_v40 = vld [vmem:[%s8062_s1 + $0x48] sm:$0xff]  ;;  %v3529_v25 = vld [vmem:[%s8062_s1 + $0x58] sm:$0xff] }
 0x187   : > { %3811 = vmatprep.subr.bf16.mxu0 %v3453_v62  ;;  %v3463_v62 = vpack.c.bf16 %v3281_v55, %v3279_v54  ;;  %v3191_v54 = vld [vmem:[#allocation2 + $0x1c8] sm:$0xff]  ;;  %v3193_v55 = vld [vmem:[#allocation2 + $0x1d8] sm:$0xff] }
 0x188   : > { %v3419_v61 = vpack.c.bf16 %v3193_v55, %v3191_v54  ;;  %v3533_v54 = vld [vmem:[%s8062_s1 + $0x78] sm:$0xff] }
 0x189   : > { %3757 = vmatpush1.bf16.msra.mxu1 %v3406_v56  ;;  %v3299_v56 = vld [vmem:[#allocation2 + $0x528] sm:$0xff] }
 0x18a   : > { %3812 = vmatpush1.bf16.msra.mxu0 %v3452_v5  ;;  %v3462_v5 = vpack.c.bf16 %v3280_v63, %v3278_v58  ;;  %3758 = vmatprep.subr.bf16.mxu1 %v3409_v59  ;;  %v3470_v59 = vpack.c.bf16 %v3296_v53, %v3294_v48  ;;  %v3192_v63 = vld [vmem:[#allocation2 + $0x1d0] sm:$0xff]  ;;  %v3526_v48 = vld [vmem:[%s8062_s1 + $0x40] sm:$0xff]  ;;  %v3531_v53 = vld [vmem:[%s8062_s1 + $0x68] sm:$0xff] }
 0x18b   : > { %3822 = vmatprep.subr.bf16.mxu0 %v3455_v10  ;;  %v3465_v10 = vpack.c.bf16 %v3285_v3, %v3283_v2  ;;  %v3195_v2 = vld [vmem:[#allocation2 + $0x1e8] sm:$0xff]  ;;  %v3197_v3 = vld [vmem:[#allocation2 + $0x1f8] sm:$0xff] }
 0x18d   : > { %3814 = vmatmul.mubr.bf16.vlgmr.msra.gmra.mrb[0].mxu0 %v6945_v17  ;;  %3759 = vmatpush1.bf16.msra.mxu1 %v3408_v4  ;;  %v3303_v4 = vld [vmem:[#allocation2 + $0x548] sm:$0xff] }
 0x18e   : > { %3823 = vmatpush1.bf16.msra.mxu0 %v3454_v19  ;;  %3854 = vmatprep.mubr.bf16.mxu0 %v6949_v21  ;;  %v3410_v19 = vpack.c.bf16 %v3176_v9, %v3174_v8  ;;  %v3302_v8 = vld [vmem:[#allocation2 + $0x540] sm:$0xff]  ;;  %v3421_v9 = vpack.c.bf16 %v3197_v3, %v3195_v2  ;;  %v3537_v2 = vld [vmem:[%s8062_s1 + $0x98] sm:$0xff] }
 0x18f   : > { %3824 = vmatprep.subr.bf16.mxu0 %v3457_v24  ;;  %3760 = vmatprep.subr.bf16.mxu1 %v3411_v7  ;;  %v3180_v24 = vld [vmem:[#allocation2 + $0x170] sm:$0xff]  ;;  %v3472_v7 = vpack.c.bf16 %v3300_v1, %v3298_v60  ;;  %v3474_v41 = vpack.c.bf16 %v3304_v14, %v3302_v8  ;;  %v3530_v60 = vld [vmem:[%s8062_s1 + $0x60] sm:$0xff]  ;;  %v3535_v1 = vld [vmem:[%s8062_s1 + $0x88] sm:$0xff] }
 0x190   : > { %v3412_v32 = vpack.c.bf16 %v3180_v24, %v3178_v23  ;;  %v3308_v23 = vld [vmem:[#allocation2 + $0x570] sm:$0xff]  ;;  %v3534_v8 = vld [vmem:[%s8062_s1 + $0x80] sm:$0xff]  ;;  %v3539_v14 = vld [vmem:[%s8062_s1 + $0xa8] sm:$0xff] }
 0x191   : > { %3761 = vmatpush1.bf16.msra.mxu1 %v3410_v19  ;;  %v3309_v19 = vld [vmem:[#allocation2 + $0x578] sm:$0xff] }
 0x192   : > { %3825 = vmatpush1.bf16.msra.mxu0 %v3456_v31  ;;  %v3293_v31 = vld [vmem:[#allocation2 + $0x4f8] sm:$0xff]  ;;  %3762 = vmatprep.subr.bf16.mxu1 %v3413_v22  ;;  %v3306_v22 = vld [vmem:[#allocation2 + $0x560] sm:$0xff] }
 0x193   : > { %3826 = vmatprep.subr.bf16.mxu0 %v3459_v36  ;;  %v3182_v36 = vld [vmem:[#allocation2 + $0x180] sm:$0xff]  ;;  %v3469_v38 = vpack.c.bf16 %v3293_v31, %v3291_v30  ;;  %v3311_v30 = vld [vmem:[#allocation2 + $0x588] sm:$0xff]  ;;  %v3313_v31 = vld [vmem:[#allocation2 + $0x598] sm:$0xff]  ;;  %v3476_v42 = vpack.c.bf16 %v3308_v23, %v3306_v22 }
 0x194   : > { %v3414_v46 = vpack.c.bf16 %v3184_v37, %v3182_v36  ;;  %v3524_v36 = vld [vmem:[%s8062_s1 + $0x30] sm:$0xff]  ;;  %v3310_v37 = vld [vmem:[#allocation2 + $0x580] sm:$0xff] }
 0x195   : > { %3763 = vmatpush1.bf16.msra.mxu1 %v3412_v32  ;;  %v3583_v32 = vpack.c.bf16 %v3521_v16, %v3519_v15  ;;  %v3541_v15 = vld [vmem:[%s8062_s1 + $0xb8] sm:$0xff]  ;;  %v3538_v23 = vld [vmem:[%s8062_s1 + $0xa0] sm:$0xff] }
 0x196   : > { %3827 = vmatpush1.bf16.msra.mxu0 %v3458_v45  ;;  %v3297_v45 = vld [vmem:[#allocation2 + $0x518] sm:$0xff]  ;;  %3764 = vmatprep.subr.bf16.mxu1 %v3415_v35  ;;  %v3522_v35 = vld [vmem:[%s8062_s1 + $0x20] sm:$0xff] }
 0x197   : > { %3828 = vmatprep.subr.bf16.mxu0 %v3461_v50  ;;  %v3186_v50 = vld [vmem:[#allocation2 + $0x1a0] sm:$0xff]  ;;  %v3471_v52 = vpack.c.bf16 %v3297_v45, %v3295_v43  ;;  %v3315_v43 = vld [vmem:[#allocation2 + $0x5a8] sm:$0xff]  ;;  %v3317_v45 = vld [vmem:[#allocation2 + $0x5b8] sm:$0xff] }
 0x198   : > { %v3416_v58 = vpack.c.bf16 %v3188_v51, %v3186_v50  ;;  %v3314_v50 = vld [vmem:[#allocation2 + $0x5a0] sm:$0xff]  ;;  %v3316_v51 = vld [vmem:[#allocation2 + $0x5b0] sm:$0xff] }
 0x199   : > { %3765 = vmatpush1.bf16.msra.mxu1 %v3414_v46  ;;  %v3585_v46 = vpack.c.bf16 %v3525_v28, %v3523_v27  ;;  %v3480_v3 = vpack.c.bf16 %v3316_v51, %v3314_v50  ;;  %v3328_v27 = vld [vmem:[#allocation2 + $0x610] sm:$0xff]  ;;  %v3335_v50 = vld [vmem:[#allocation2 + $0x648] sm:$0xff]  ;;  %v3337_v51 = vld [vmem:[#allocation2 + $0x658] sm:$0xff] }
 0x19a   : > { %3829 = vmatpush1.bf16.msra.mxu0 %v3460_v57  ;;  %v3301_v57 = vld [vmem:[#allocation2 + $0x538] sm:$0xff]  ;;  %3766 = vmatprep.subr.bf16.mxu1 %v3417_v49  ;;  %v3528_v49 = vld [vmem:[%s8062_s1 + $0x50] sm:$0xff] }
 0x19b   : > { %3830 = vmatprep.subr.bf16.mxu0 %v3463_v62  ;;  %v3190_v62 = vld [vmem:[#allocation2 + $0x1c0] sm:$0xff]  ;;  %v3473_v0 = vpack.c.bf16 %v3301_v57, %v3299_v56  ;;  %v3319_v56 = vld [vmem:[#allocation2 + $0x5c8] sm:$0xff]  ;;  %v3321_v57 = vld [vmem:[#allocation2 + $0x5d8] sm:$0xff] }
 0x19c   : > { %v3418_v6 = vpack.c.bf16 %v3192_v63, %v3190_v62  ;;  %v3318_v62 = vld [vmem:[#allocation2 + $0x5c0] sm:$0xff]  ;;  %v3320_v63 = vld [vmem:[#allocation2 + $0x5d0] sm:$0xff] }
 0x19d   : > { %3767 = vmatpush1.bf16.msra.mxu1 %v3416_v58  ;;  %v3587_v58 = vpack.c.bf16 %v3529_v25, %v3527_v40  ;;  %v3482_v16 = vpack.c.bf16 %v3320_v63, %v3318_v62  ;;  %v3330_v25 = vld [vmem:[#allocation2 + $0x620] sm:$0xff]  ;;  %v3339_v62 = vld [vmem:[#allocation2 + $0x668] sm:$0xff]  ;;  %v3341_v63 = vld [vmem:[#allocation2 + $0x678] sm:$0xff] }
 0x19e   : > { %3831 = vmatpush1.bf16.msra.mxu0 %v3462_v5  ;;  %v3305_v5 = vld [vmem:[#allocation2 + $0x558] sm:$0xff]  ;;  %3768 = vmatprep.subr.bf16.mxu1 %v3419_v61  ;;  %v3532_v61 = vld [vmem:[%s8062_s1 + $0x70] sm:$0xff] }
 0x19f   : > { %3832 = vmatprep.subr.bf16.mxu0 %v3465_v10  ;;  %v3194_v10 = vld [vmem:[#allocation2 + $0x1e0] sm:$0xff]  ;;  %v3475_v12 = vpack.c.bf16 %v3305_v5, %v3303_v4  ;;  %v3323_v4 = vld [vmem:[#allocation2 + $0x5e8] sm:$0xff]  ;;  %v3325_v5 = vld [vmem:[#allocation2 + $0x5f8] sm:$0xff] }
 0x1a0   : > { %v3420_v24 = vpack.c.bf16 %v3196_v11, %v3194_v10  ;;  %v3322_v10 = vld [vmem:[#allocation2 + $0x5e0] sm:$0xff]  ;;  %v3324_v11 = vld [vmem:[#allocation2 + $0x5f0] sm:$0xff]  ;;  %v3485_v22 = vpack.c.bf16 %v3325_v5, %v3323_v4 }
 0x1a1   : > { %3769 = vmatpush1.bf16.msra.mxu1 %v3418_v6  ;;  %v3589_v6 = vpack.c.bf16 %v3533_v54, %v3531_v53  ;;  %v3334_v54 = vld [vmem:[#allocation2 + $0x640] sm:$0xff]  ;;  %v3552_v5 = vld [vmem:[%s8062_s1 + $0x110] sm:$0xff] }
 0x1a2   : > { %3833 = vmatpush1.bf16.msra.mxu0 %v3464_v20  ;;  %v3518_v20 = vld [vmem:[%s8062_s1] sm:$0xff]  ;;  %3770 = vmatprep.subr.bf16.mxu1 %v3421_v9  ;;  %v3536_v9 = vld [vmem:[%s8062_s1 + $0x90] sm:$0xff] }
 0x1a3   : > { %3834 = vmatprep.subr.bf16.mxu0 %v3467_v26  ;;  %v3520_v26 = vld [vmem:[%s8062_s1 + $0x10] sm:$0xff]  ;;  %v3590_v28 = vpack.c.bf16 %v3536_v9, %v3534_v8  ;;  %v3550_v4 = vld [vmem:[%s8062_s1 + $0x100] sm:$0xff]  ;;  %v3555_v8 = vld [vmem:[%s8062_s1 + $0x128] sm:$0xff] }
 0x1a4   : > { %v3582_v39 = vpack.c.bf16 %v3520_v26, %v3518_v20  ;;  %v3591_v20 = vpack.c.bf16 %v3537_v2, %v3535_v1  ;;  %v3326_v26 = vld [vmem:[#allocation2 + $0x600] sm:$0xff]  ;;  %v3557_v9 = vld [vmem:[%s8062_s1 + $0x138] sm:$0xff] }
 0x1a5   : > { %3771 = vmatpush1.bf16.msra.mxu1 %v3420_v24  ;;  %v3540_v24 = vld [vmem:[%s8062_s1 + $0xb0] sm:$0xff]  ;;  %v3486_v40 = vpack.c.bf16 %v3328_v27, %v3326_v26  ;;  %v3338_v2 = vld [vmem:[#allocation2 + $0x660] sm:$0xff]  ;;  %v3347_v26 = vld [vmem:[#allocation2 + $0x6a8] sm:$0xff] }
 0x1a6   : > { %3835 = vmatpush1.bf16.msra.mxu0 %v3466_v33  ;;  %v3477_v33 = vpack.c.bf16 %v3309_v19, %v3307_v18  ;;  %3908 = vmatprep.subr.bf16.mxu1 %v3583_v32  ;;  %v3327_v18 = vld [vmem:[#allocation2 + $0x608] sm:$0xff]  ;;  %v3329_v19 = vld [vmem:[#allocation2 + $0x618] sm:$0xff] }
 0x1a7   : > { %3836 = vmatprep.subr.bf16.mxu0 %v3469_v38  ;;  %v3312_v38 = vld [vmem:[#allocation2 + $0x590] sm:$0xff]  ;;  %v3331_v32 = vld [vmem:[#allocation2 + $0x628] sm:$0xff]  ;;  %v3349_v27 = vld [vmem:[#allocation2 + $0x6b8] sm:$0xff] }
 0x1a8   : > { %3773 = vmatmul.mubr.bf16.vlgmr.msra.gmra.mrb[0].mxu1 %v6981_v34  ;;  %v3478_v55 = vpack.c.bf16 %v3312_v38, %v3310_v37  ;;  %v3545_v37 = vld [vmem:[%s8062_s1 + $0xd8] sm:$0xff]  ;;  %v7049_v38 = vcombine.low %v6941_v13, %v6941_v13 }
 0x1a9   : > { %3909 = vmatpush1.bf16.msra.mxu1 %v3582_v39  ;;  %v3592_v39 = vpack.c.bf16 %v3540_v24, %v3538_v23  ;;  %v3559_v23 = vld [vmem:[%s8062_s1 + $0x148] sm:$0xff]  ;;  %v3561_v24 = vld [vmem:[%s8062_s1 + $0x158] sm:$0xff] }
 0x1aa   : > { %3837 = vmatpush1.bf16.msra.mxu0 %v3468_v47  ;;  %v3479_v47 = vpack.c.bf16 %v3313_v31, %v3311_v30  ;;  %3910 = vmatprep.subr.bf16.mxu1 %v3585_v46  ;;  %v3593_v30 = vpack.c.bf16 %v3541_v15, %v3539_v14  ;;  %v3487_v31 = vpack.c.bf16 %v3329_v19, %v3327_v18  ;;  %v3332_v46 = vld [vmem:[#allocation2 + $0x630] sm:$0xff]  ;;  %v3342_v15 = vld [vmem:[#allocation2 + $0x680] sm:$0xff] }
 0x1ab   : > { %3838 = vmatprep.subr.bf16.mxu0 %v3471_v52  ;;  %v3584_v52 = vpack.c.bf16 %v3524_v36, %v3522_v35  ;;  %v3333_v35 = vld [vmem:[#allocation2 + $0x638] sm:$0xff]  ;;  %v3543_v36 = vld [vmem:[%s8062_s1 + $0xc8] sm:$0xff]  ;;  %v3488_v53 = vpack.c.bf16 %v3332_v46, %v3330_v25  ;;  %v3554_v18 = vld [vmem:[%s8062_s1 + $0x120] sm:$0xff] }
 0x1ac   : > { %v3489_v13 = vpack.c.bf16 %v3333_v35, %v3331_v32  ;;  %v3556_v19 = vld [vmem:[%s8062_s1 + $0x130] sm:$0xff]  ;;  %v3558_v32 = vld [vmem:[%s8062_s1 + $0x140] sm:$0xff]  ;;  %v3351_v25 = vld [vmem:[#allocation2 + $0x6c8] sm:$0xff] }
 0x1ad   : > { %3911 = vmatpush1.bf16.msra.mxu1 %v3584_v52  ;;  %v3560_v35 = vld [vmem:[%s8062_s1 + $0x150] sm:$0xff]  ;;  %v3350_v46 = vld [vmem:[#allocation2 + $0x6c0] sm:$0xff] }
 0x1ae   : > { %3839 = vmatpush1.bf16.msra.mxu0 %v3470_v59  ;;  %v3481_v59 = vpack.c.bf16 %v3317_v45, %v3315_v43  ;;  %3912 = vmatprep.subr.bf16.mxu1 %v3587_v58  ;;  %v3542_v43 = vld [vmem:[%s8062_s1 + $0xc0] sm:$0xff]  ;;  %v3544_v45 = vld [vmem:[%s8062_s1 + $0xd0] sm:$0xff]  ;;  %v3491_v58 = vpack.c.bf16 %v3337_v51, %v3335_v50 }
 0x1af   : > { %3840 = vmatprep.subr.bf16.mxu0 %v3473_v0  ;;  %v3586_v0 = vpack.c.bf16 %v3528_v49, %v3526_v48  ;;  %v3547_v48 = vld [vmem:[%s8062_s1 + $0xe8] sm:$0xff]  ;;  %v3549_v49 = vld [vmem:[%s8062_s1 + $0xf8] sm:$0xff]  ;;  %v3594_v52 = vpack.c.bf16 %v3544_v45, %v3542_v43  ;;  %v3602_v45 = vpack.c.bf16 %v3560_v35, %v3558_v32  ;;  %v3352_v51 = vld [vmem:[#allocation2 + $0x6d0] sm:$0xff] }
 0x1b0   : > { %v3353_v43 = vld [vmem:[#allocation2 + $0x6d8] sm:$0xff]  ;;  %v3374_v35 = vld [vmem:[#allocation2 + $0x780] sm:$0xff] }
 0x1b1   : > { %3913 = vmatpush1.bf16.msra.mxu1 %v3586_v0  ;;  %v3499_v50 = vpack.c.bf16 %v3353_v43, %v3351_v25  ;;  %v3378_v43 = vld [vmem:[#allocation2 + $0x7a0] sm:$0xff] }
 0x1b2   : > { %3841 = vmatpush1.bf16.msra.mxu0 %v3472_v7  ;;  %v3483_v7 = vpack.c.bf16 %v3321_v57, %v3319_v56  ;;  %3914 = vmatprep.subr.bf16.mxu1 %v3589_v6  ;;  %v3546_v56 = vld [vmem:[%s8062_s1 + $0xe0] sm:$0xff]  ;;  %v3548_v57 = vld [vmem:[%s8062_s1 + $0xf0] sm:$0xff]  ;;  %v3493_v6 = vpack.c.bf16 %v3341_v63, %v3339_v62 }
 0x1b3   : > { %3842 = vmatprep.subr.bf16.mxu0 %v3475_v12  ;;  %v3588_v12 = vpack.c.bf16 %v3532_v61, %v3530_v60  ;;  %v3551_v60 = vld [vmem:[%s8062_s1 + $0x108] sm:$0xff]  ;;  %v3553_v61 = vld [vmem:[%s8062_s1 + $0x118] sm:$0xff]  ;;  %v3596_v0 = vpack.c.bf16 %v3548_v57, %v3546_v56  ;;  %v3498_v57 = vpack.c.bf16 %v3352_v51, %v3350_v46  ;;  %v3354_v62 = vld [vmem:[#allocation2 + $0x6e0] sm:$0xff] }
 0x1b4   : > { %v3356_v63 = vld [vmem:[#allocation2 + $0x6f0] sm:$0xff]  ;;  %v3385_v46 = vld [vmem:[#allocation2 + $0x7d8] sm:$0xff]  ;;  %v3387_v51 = vld [vmem:[#allocation2 + $0x7e8] sm:$0xff] }
 0x1b5   : > { %3915 = vmatpush1.bf16.msra.mxu1 %v3588_v12  ;;  %v3598_v12 = vpack.c.bf16 %v3552_v5, %v3550_v4  ;;  %v3358_v5 = vld [vmem:[#allocation2 + $0x700] sm:$0xff] }
 0x1b6   : > { %3843 = vmatpush1.bf16.msra.mxu0 %v3474_v41  ;;  %v3484_v41 = vpack.c.bf16 %v3324_v11, %v3322_v10  ;;  %3916 = vmatprep.subr.bf16.mxu1 %v3591_v20  ;;  %v3343_v10 = vld [vmem:[#allocation2 + $0x688] sm:$0xff]  ;;  %v3345_v11 = vld [vmem:[#allocation2 + $0x698] sm:$0xff] }
 0x1b7   : > { %3844 = vmatprep.subr.bf16.mxu0 %v3477_v33  ;;  %v7039_v33 = vld [vmem:[%s6930_s25 + $0x18] sm:$0xff]  ;;  %v3495_v20 = vpack.c.bf16 %v3345_v11, %v3343_v10  ;;  %v3362_v11 = vld [vmem:[#allocation2 + $0x720] sm:$0xff]  ;;  %s5264_s25 = sshll.u32 %s6495_s4, 4  ;;  %s5265_s25 = int_to_ptr.vmem [resolvable:$true] %s5264_s25 }
 0x1b8   : > { %s6306_s6 = scalar_lea.vmem %s5265_s25, 8192  ;;  %p6313_p2 = scmp.lt.s32.totalorder %s5265_s25, %s5265_s25 }
 0x1b9   : > { %3917 = vmatpush1.bf16.msra.mxu1 %v3590_v28  ;;  %v3600_v28 = vpack.c.bf16 %v3556_v19, %v3554_v18  ;;  %v3366_v19 = vld [vmem:[#allocation2 + $0x740] sm:$0xff]  ;;  %p6307_p7 = scmp.ne.s32.totalorder %s5265_s25, %s6306_s6  ;;  %p6314_p3 = scmp.lt.s32.totalorder %s6306_s6, %s6306_s6 }
 0x1ba   : > { %3845 = vmatpush1.bf16.msra.mxu0 %v3476_v42  ;;  %v7053_v42 = vcombine.high %v7039_v33, %v7039_v33  ;;  %3918 = vmatprep.subr.bf16.mxu1 %v3593_v30  ;;  %v3346_v30 = vld [vmem:[#allocation2 + $0x6a0] sm:$0xff] }
 0x1bb   : > { %3846 = vmatprep.subr.bf16.mxu0 %v3479_v47  ;;  %v3595_v47 = vpack.c.bf16 %v3545_v37, %v3543_v36  ;;  %v3497_v36 = vpack.c.bf16 %v3349_v27, %v3347_v26  ;;  %v3348_v37 = vld [vmem:[#allocation2 + $0x6b0] sm:$0xff]  ;;  %v3370_v27 = vld [vmem:[#allocation2 + $0x760] sm:$0xff]  ;;  %p6308_p8 = pnand %p6307_p7, %p5802_p6  ;;  %p6315_p5 = por %p6314_p3, %p6313_p2 }
 0x1bd   : > { %3919 = vmatpush1.bf16.msra.mxu1 %v3592_v39  ;;  %v3563_v39 = vld [vmem:[%s8062_s1 + $0x168] sm:$0xff]  ;;  %p6309_p9 = pneg %p6308_p8 }
 0x1be   : > { %3847 = vmatpush1.bf16.msra.mxu0 %v3478_v55  ;;  %v3597_v55 = vpack.c.bf16 %v3549_v49, %v3547_v48  ;;  %3920 = vmatprep.subr.bf16.mxu1 %v3595_v47  ;;  %v3562_v48 = vld [vmem:[%s8062_s1 + $0x160] sm:$0xff]  ;;  %v3564_v49 = vld [vmem:[%s8062_s1 + $0x170] sm:$0xff] }
 0x1bf   : > { %3848 = vmatprep.subr.bf16.mxu0 %v3481_v59  ;;  %v3336_v59 = vld [vmem:[#allocation2 + $0x650] sm:$0xff]  ;;  %v3604_v56 = vpack.c.bf16 %v3564_v49, %v3562_v48  ;;  %v3382_v49 = vld [vmem:[#allocation2 + $0x7c0] sm:$0xff]  ;;  %p6316_p10 = pnand %p6315_p5, %p6309_p9 }
 0x1c0   : > { %v3490_v1 = vpack.c.bf16 %v3336_v59, %v3334_v54  ;;  %v3355_v54 = vld [vmem:[#allocation2 + $0x6e8] sm:$0xff]  ;;  %v3566_v59 = vld [vmem:[%s8062_s1 + $0x180] sm:$0xff] }
 0x1c1   : > { %3921 = vmatpush1.bf16.msra.mxu1 %v3594_v52  ;;  %v3567_v52 = vld [vmem:[%s8062_s1 + $0x188] sm:$0xff] }
 0x1c2   : > { %3849 = vmatpush1.bf16.msra.mxu0 %v3480_v3  ;;  %3922 = vmatprep.subr.bf16.mxu1 %v3597_v55  ;;  %v3599_v3 = vpack.c.bf16 %v3553_v61, %v3551_v60  ;;  %v3357_v55 = vld [vmem:[#allocation2 + $0x6f8] sm:$0xff]  ;;  %v3568_v60 = vld [vmem:[%s8062_s1 + $0x190] sm:$0xff] }
 0x1c3   : > { %3850 = vmatprep.subr.bf16.mxu0 %v3483_v7  ;;  %v3340_v7 = vld [vmem:[#allocation2 + $0x670] sm:$0xff]  ;;  %v3501_v61 = vpack.c.bf16 %v3357_v55, %v3355_v54  ;;  %v3386_v55 = vld [vmem:[#allocation2 + $0x7e0] sm:$0xff] }
 0x1c4   : > { %v3492_v14 = vpack.c.bf16 %v3340_v7, %v3338_v2  ;;  %v3606_v2 = vpack.c.bf16 %v3568_v60, %v3566_v59  ;;  %v3363_v7 = vld [vmem:[#allocation2 + $0x728] sm:$0xff]  ;;  %v3573_v60 = vld [vmem:[%s8062_s1 + $0x1b8] sm:$0xff] }
 0x1c5   : > { %3923 = vmatpush1.bf16.msra.mxu1 %v3596_v0  ;;  %v3359_v0 = vld [vmem:[#allocation2 + $0x708] sm:$0xff] }
 0x1c6   : > { %3851 = vmatpush1.bf16.msra.mxu0 %v3482_v16  ;;  %3924 = vmatprep.subr.bf16.mxu1 %v3599_v3  ;;  %v3601_v16 = vpack.c.bf16 %v3557_v9, %v3555_v8  ;;  %v3500_v3 = vpack.c.bf16 %v3356_v63, %v3354_v62  ;;  %v3365_v8 = vld [vmem:[#allocation2 + $0x738] sm:$0xff]  ;;  %v3571_v59 = vld [vmem:[%s8062_s1 + $0x1a8] sm:$0xff]  ;;  %v3570_v62 = vld [vmem:[%s8062_s1 + $0x1a0] sm:$0xff] }
 0x1c7   : > { %3852 = vmatprep.subr.bf16.mxu0 %v3485_v22  ;;  %v3344_v22 = vld [vmem:[#allocation2 + $0x690] sm:$0xff]  ;;  %v3505_v10 = vpack.c.bf16 %v3365_v8, %v3363_v7  ;;  %v3578_v8 = vld [vmem:[%s8062_s1 + $0x1e0] sm:$0xff] }
 0x1c8   : > { %v3572_v63 = vld [vmem:[%s8062_s1 + $0x1b0] sm:$0xff] }
 0x1c9   : > { %3925 = vmatpush1.bf16.msra.mxu1 %v3598_v12  ;;  %v3364_v12 = vld [vmem:[#allocation2 + $0x730] sm:$0xff] }
 0x1ca   : > { %3853 = vmatpush1.bf16.msra.mxu0 %v3484_v41  ;;  %v3494_v41 = vpack.c.bf16 %v3344_v22, %v3342_v15  ;;  %3926 = vmatprep.subr.bf16.mxu1 %v3601_v16  ;;  %v3369_v15 = vld [vmem:[#allocation2 + $0x758] sm:$0xff]  ;;  %v3504_v16 = vpack.c.bf16 %v3364_v12, %v3362_v11  ;;  %v3371_v22 = vld [vmem:[#allocation2 + $0x768] sm:$0xff] }
 0x1cb   : > { %3863 = vmatprep.subr.bf16.mxu0 %v3487_v31  ;;  %v3603_v31 = vpack.c.bf16 %v3561_v24, %v3559_v23  ;;  %v3373_v23 = vld [vmem:[#allocation2 + $0x778] sm:$0xff]  ;;  %v815_v11 = vld [vmem:[#allocation13 + $0x8] sm:$0xff] }
 0x1cc   : > { %v3509_v26 = vpack.c.bf16 %v3373_v23, %v3371_v22  ;;  %v817_v12 = vld [vmem:[#allocation13 + $0x18] sm:$0xff]  ;;  %v814_v22 = vld [vmem:[#allocation13] sm:$0xff]  ;;  %v816_v23 = vld [vmem:[#allocation13 + $0x10] sm:$0xff] }
 0x1cd   : > { %3855 = vmatmul.mubr.bf16.vlgmr.msra.gmra.mrb[0].mxu0 %v7049_v38  ;;  %3927 = vmatpush1.bf16.msra.mxu1 %v3600_v28  ;;  %v3372_v28 = vld [vmem:[#allocation2 + $0x770] sm:$0xff] }
 0x1ce   : > { %3864 = vmatpush1.bf16.msra.mxu0 %v3486_v40  ;;  %3895 = vmatprep.mubr.bf16.mxu0 %v7053_v42  ;;  %v3565_v40 = vld [vmem:[%s8062_s1 + $0x178] sm:$0xff] }
 0x1cf   : > { %3865 = vmatprep.subr.bf16.mxu0 %v3489_v13  ;;  %v3496_v13 = vpack.c.bf16 %v3348_v37, %v3346_v30  ;;  %3928 = vmatprep.subr.bf16.mxu1 %v3603_v31  ;;  %v3605_v47 = vpack.c.bf16 %v3565_v40, %v3563_v39  ;;  %v3377_v30 = vld [vmem:[#allocation2 + $0x798] sm:$0xff]  ;;  %v3508_v31 = vpack.c.bf16 %v3372_v28, %v3370_v27  ;;  %v3379_v37 = vld [vmem:[#allocation2 + $0x7a8] sm:$0xff]  ;;  %v5968_v27 = vld [vmem:[#allocation2] sm:$0xff] }
 0x1d0   : > { %v3381_v39 = vld [vmem:[#allocation2 + $0x7b8] sm:$0xff]  ;;  %v1582_v28 = vmul.f32 0.01, %v5968_v27 }
 0x1d1   : > { %3929 = vmatpush1.bf16.msra.mxu1 %v3602_v45  ;;  %v3513_v25 = vpack.c.bf16 %v3381_v39, %v3379_v37  ;;  %v3380_v45 = vld [vmem:[#allocation2 + $0x7b0] sm:$0xff]  ;;  %v5970_v37 = vld [vmem:[#allocation2 + $0x28] sm:$0xff] }
 0x1d2   : > { %3866 = vmatpush1.bf16.msra.mxu0 %v3488_v53  ;;  %v3569_v53 = vld [vmem:[%s8062_s1 + $0x198] sm:$0xff]  ;;  %3930 = vmatprep.subr.bf16.mxu1 %v3605_v47  ;;  %v3512_v47 = vpack.c.bf16 %v3380_v45, %v3378_v43  ;;  %v1587_v39 = vmul.f32 0.01, %v5970_v37 }
 0x1d3   : > { %3867 = vmatprep.subr.bf16.mxu0 %v3491_v58  ;;  %v3607_v58 = vpack.c.bf16 %v3569_v53, %v3567_v52  ;;  %v3389_v52 = vld [vmem:[#allocation2 + $0x7f8] sm:$0xff] }
 0x1d4   : > { %v3517_v54 = vpack.c.bf16 %v3389_v52, %v3387_v51  ;;  %v5971_v45 = vld [vmem:[#allocation2 + $0x38] sm:$0xff]  ;;  %v5973_v52 = vld [vmem:[#allocation2 + $0x30] sm:$0xff] }
 0x1d5   : > { %3931 = vmatpush1.bf16.msra.mxu1 %v3604_v56  ;;  %v3388_v56 = vld [vmem:[#allocation2 + $0x7f0] sm:$0xff] }
 0x1d6   : > { %3868 = vmatpush1.bf16.msra.mxu0 %v3490_v1  ;;  %v3361_v1 = vld [vmem:[#allocation2 + $0x718] sm:$0xff]  ;;  %3932 = vmatprep.subr.bf16.mxu1 %v3607_v58  ;;  %v7137_v58 = vcombine.low %v7039_v33, %v7039_v33  ;;  %v3608_v33 = vpack.c.bf16 %v3572_v63, %v3570_v62 }
 0x1d7   : > { %3869 = vmatprep.subr.bf16.mxu0 %v3493_v6  ;;  %v3503_v4 = vpack.c.bf16 %v3361_v1, %v3359_v0  ;;  %v3360_v6 = vld [vmem:[#allocation2 + $0x710] sm:$0xff]  ;;  %v3575_v0 = vld [vmem:[%s8062_s1 + $0x1c8] sm:$0xff]  ;;  %v3577_v1 = vld [vmem:[%s8062_s1 + $0x1d8] sm:$0xff] }
 0x1d8   : > { %v3502_v9 = vpack.c.bf16 %v3360_v6, %v3358_v5  ;;  %v3581_v6 = vld [vmem:[%s8062_s1 + $0x1f8] sm:$0xff] }
 0x1d9   : > { %3933 = vmatpush1.bf16.msra.mxu1 %v3606_v2  ;;  %v3611_v2 = vpack.c.bf16 %v3577_v1, %v3575_v0 }
 0x1da   : > { %3870 = vmatpush1.bf16.msra.mxu0 %v3492_v14  ;;  %v3367_v14 = vld [vmem:[#allocation2 + $0x748] sm:$0xff] }
 0x1db   : > { %3871 = vmatprep.subr.bf16.mxu0 %v3495_v20  ;;  %v3507_v18 = vpack.c.bf16 %v3369_v15, %v3367_v14  ;;  %v3368_v20 = vld [vmem:[#allocation2 + $0x750] sm:$0xff]  ;;  %v5966_v14 = vld [vmem:[#allocation2 + $0x8] sm:$0xff] }
 0x1dc   : > { %v3506_v24 = vpack.c.bf16 %v3368_v20, %v3366_v19  ;;  %v1583_v15 = vmul.f32 0.01, %v5966_v14  ;;  %v1071_v19 = vmul.f32 0.99, %v815_v11  ;;  %v1073_v20 = vmul.f32 0.99, %v817_v12 }
 0x1dd   : > { %v5976_v11 = vld [vmem:[#allocation2 + $0x40] sm:$0xff] }
 0x1de   : > { %3872 = vmatpush1.bf16.msra.mxu0 %v3494_v41  ;;  %v3375_v41 = vld [vmem:[#allocation2 + $0x788] sm:$0xff]  ;;  %v1590_v12 = vmul.f32 0.01, %v5976_v11 }
 0x1df   : > { %3873 = vmatprep.subr.bf16.mxu0 %v3497_v36  ;;  %v3511_v32 = vpack.c.bf16 %v3377_v30, %v3375_v41  ;;  %v3376_v36 = vld [vmem:[#allocation2 + $0x790] sm:$0xff]  ;;  %v1839_v41 = vadd.f32 %v1583_v15, %v1071_v19  ;;  %v829_v19 = vld [vmem:[#allocation13 + $0x78] sm:$0xff] }
 0x1e0   : > { %v3510_v40 = vpack.c.bf16 %v3376_v36, %v3374_v35  ;;  %v819_v35 = vld [vmem:[#allocation13 + $0x28] sm:$0xff]  ;;  %v821_v36 = vld [vmem:[#allocation13 + $0x38] sm:$0xff] }
 0x1e1   : > { %v1077_v43 = vmul.f32 0.99, %v821_v36  ;;  %2745 = vst [vmem:[#allocation20 + $0x8] sm:$0xff] %v1839_v41  ;;  %v5980_v36 = vld [vmem:[#allocation2 + $0x60] sm:$0xff] }
 0x1e2   : > { %3874 = vmatpush1.bf16.msra.mxu0 %v3496_v13  ;;  %v3383_v13 = vld [vmem:[#allocation2 + $0x7c8] sm:$0xff]  ;;  %v1594_v37 = vmul.f32 0.01, %v5980_v36 }
 0x1e3   : > { %3875 = vmatprep.subr.bf16.mxu0 %v3499_v50  ;;  %v3515_v48 = vpack.c.bf16 %v3385_v46, %v3383_v13  ;;  %v3384_v50 = vld [vmem:[#allocation2 + $0x7d0] sm:$0xff]  ;;  %v1589_v13 = vmul.f32 0.01, %v5971_v45 }
 0x1e4   : > { %v3514_v53 = vpack.c.bf16 %v3384_v50, %v3382_v49  ;;  %v820_v49 = vld [vmem:[#allocation13 + $0x30] sm:$0xff]  ;;  %v5972_v50 = vld [vmem:[#allocation2 + $0x20] sm:$0xff] }
 0x1e5   : > { %v1586_v51 = vmul.f32 0.01, %v5972_v50  ;;  %v5981_v45 = vld [vmem:[#allocation2 + $0x70] sm:$0xff] }
 0x1e6   : > { %3876 = vmatpush1.bf16.msra.mxu0 %v3498_v57  ;;  %v3516_v57 = vpack.c.bf16 %v3388_v56, %v3386_v55  ;;  %v1845_v55 = vadd.f32 %v1589_v13, %v1077_v43  ;;  %v1596_v13 = vmul.f32 0.01, %v5981_v45  ;;  %v5991_v45 = vld [vmem:[#allocation2 + $0xd8] sm:$0xff] }
 0x1e7   : > { %3877 = vmatprep.subr.bf16.mxu0 %v3501_v61  ;;  %v3609_v61 = vpack.c.bf16 %v3573_v60, %v3571_v59  ;;  %v823_v59 = vld [vmem:[#allocation13 + $0x48] sm:$0xff]  ;;  %v825_v60 = vld [vmem:[#allocation13 + $0x58] sm:$0xff] }
 0x1e8   : > { %v1079_v62 = vmul.f32 0.99, %v823_v59  ;;  %v1081_v63 = vmul.f32 0.99, %v825_v60  ;;  %2751 = vst [vmem:[#allocation20 + $0x38] sm:$0xff] %v1845_v55  ;;  %v5983_v59 = vld [vmem:[#allocation2 + $0x98] sm:$0xff] }
 0x1e9   : > { %3934 = vmatprep.subr.bf16.mxu1 %v3609_v61  ;;  %v1601_v60 = vmul.f32 0.01, %v5983_v59  ;;  %v844_v59 = vld [vmem:[#allocation13 + $0xf0] sm:$0xff] }
 0x1ea   : > { %3878 = vmatpush1.bf16.msra.mxu0 %v3500_v3  ;;  %3935 = vmatpush1.bf16.msra.mxu1 %v3608_v33  ;;  %v3574_v3 = vld [vmem:[%s8062_s1 + $0x1c0] sm:$0xff]  ;;  %v5974_v33 = vld [vmem:[#allocation2 + $0x48] sm:$0xff] }
 0x1eb   : > { %3879 = vmatprep.subr.bf16.mxu0 %v3503_v4  ;;  %v3576_v4 = vld [vmem:[%s8062_s1 + $0x1d0] sm:$0xff]  ;;  %3936 = vmatprep.subr.bf16.mxu1 %v3611_v2  ;;  %v1591_v0 = vmul.f32 0.01, %v5974_v33 }
 0x1ec   : > { %v3610_v5 = vpack.c.bf16 %v3576_v4, %v3574_v3  ;;  %v5975_v4 = vld [vmem:[#allocation2 + $0x58] sm:$0xff] }
 0x1ee   : > { %3880 = vmatpush1.bf16.msra.mxu0 %v3502_v9  ;;  %3937 = vmatpush1.bf16.msra.mxu1 %v3610_v5  ;;  %v3580_v9 = vld [vmem:[%s8062_s1 + $0x1f0] sm:$0xff]  ;;  %v1593_v5 = vmul.f32 0.01, %v5975_v4 }
 0x1ef   : > { %3881 = vmatprep.subr.bf16.mxu0 %v3505_v10  ;;  %v3612_v10 = vpack.c.bf16 %v3580_v9, %v3578_v8  ;;  %v1847_v8 = vadd.f32 %v1591_v0, %v1079_v62  ;;  %v834_v62 = vld [vmem:[#allocation13 + $0xa0] sm:$0xff] }
 0x1f0   : > { %v1849_v15 = vadd.f32 %v1593_v5, %v1081_v63  ;;  %v5984_v0 = vld [vmem:[#allocation2 + $0x80] sm:$0xff]  ;;  %v5985_v5 = vld [vmem:[#allocation2 + $0x90] sm:$0xff] }
 0x1f1   : > { %2753 = vst [vmem:[#allocation20 + $0x48] sm:$0xff] %v1847_v8 }
 0x1f2   : > { %3882 = vmatpush1.bf16.msra.mxu0 %v3504_v16  ;;  %v5967_v16 = vld [vmem:[#allocation2 + $0x18] sm:$0xff]  ;;  %2755 = vst [vmem:[#allocation20 + $0x58] sm:$0xff] %v1849_v15 }
 0x1f3   : > { %3883 = vmatprep.subr.bf16.mxu0 %v3507_v18  ;;  %v1585_v18 = vmul.f32 0.01, %v5967_v16  ;;  %v5977_v16 = vld [vmem:[#allocation2 + $0x50] sm:$0xff] }
 0x1f5   : > { %v1841_v30 = vadd.f32 %v1585_v18, %v1073_v20  ;;  %v1592_v18 = vmul.f32 0.01, %v5977_v16 }
 0x1f6   : > { %3884 = vmatpush1.bf16.msra.mxu0 %v3506_v24  ;;  %v1070_v24 = vmul.f32 0.99, %v814_v22  ;;  %v826_v22 = vld [vmem:[#allocation13 + $0x60] sm:$0xff] }
 0x1f7   : > { %3885 = vmatprep.subr.bf16.mxu0 %v3509_v26  ;;  %v1072_v26 = vmul.f32 0.99, %v816_v23  ;;  %2747 = vst [vmem:[#allocation20 + $0x18] sm:$0xff] %v1841_v30  ;;  %v4664_v46 = vpack.c.bf16 %v1841_v30, %v1839_v41  ;;  %v4668_v30 = vpack.c.bf16 %v1849_v15, %v1847_v8  ;;  %v841_v8 = vld [vmem:[#allocation13 + $0xd8] sm:$0xff] }
 0x1f8   : > { %v1097_v36 = vmul.f32 0.99, %v841_v8  ;;  %v1100_v8 = vmul.f32 0.99, %v844_v59 }
 0x1fa   : > { %3886 = vmatpush1.bf16.msra.mxu0 %v3508_v31  ;;  %v5969_v31 = vld [vmem:[#allocation2 + $0x10] sm:$0xff] }
 0x1fb   : > { %3887 = vmatprep.subr.bf16.mxu0 %v3511_v32  ;;  %v1584_v32 = vmul.f32 0.01, %v5969_v31 }
 0x1fe   : > { %3888 = vmatpush1.bf16.msra.mxu0 %v3510_v40  ;;  %v1838_v40 = vadd.f32 %v1582_v28, %v1070_v24  ;;  %v1085_v24 = vmul.f32 0.99, %v829_v19  ;;  %v5979_v28 = vld [vmem:[#allocation2 + $0x78] sm:$0xff] }
 0x1ff   : > { %3889 = vmatprep.subr.bf16.mxu0 %v3513_v25  ;;  %v1075_v25 = vmul.f32 0.99, %v819_v35  ;;  %v1597_v41 = vmul.f32 0.01, %v5979_v28  ;;  %v1082_v35 = vmul.f32 0.99, %v826_v22 }
 0x200   : > { %2744 = vst [vmem:[#allocation20] sm:$0xff] %v1838_v40  ;;  %v838_v22 = vld [vmem:[#allocation13 + $0xc0] sm:$0xff] }
 0x202   : > { %3890 = vmatpush1.bf16.msra.mxu0 %v3512_v47  ;;  %v1840_v47 = vadd.f32 %v1584_v32, %v1072_v26  ;;  %v5978_v26 = vld [vmem:[#allocation2 + $0x68] sm:$0xff]  ;;  %v828_v32 = vld [vmem:[#allocation13 + $0x70] sm:$0xff] }
 0x203   : > { %3891 = vmatprep.subr.bf16.mxu0 %v3515_v48  ;;  %v818_v48 = vld [vmem:[#allocation13 + $0x20] sm:$0xff]  ;;  %v1595_v27 = vmul.f32 0.01, %v5978_v26  ;;  %v1084_v43 = vmul.f32 0.99, %v828_v32 }
 0x204   : > { %v1074_v56 = vmul.f32 0.99, %v818_v48  ;;  %2746 = vst [vmem:[#allocation20 + $0x10] sm:$0xff] %v1840_v47  ;;  %v4663_v61 = vpack.c.bf16 %v1840_v47, %v1838_v40  ;;  %v830_v47 = vld [vmem:[#allocation13 + $0x80] sm:$0xff] }
 0x205   : > { %v1086_v63 = vmul.f32 0.99, %v830_v47  ;;  %v842_v47 = vld [vmem:[#allocation13 + $0xe0] sm:$0xff] }
 0x206   : > { %3892 = vmatpush1.bf16.msra.mxu0 %v3514_v53  ;;  %v1588_v53 = vmul.f32 0.01, %v5973_v52  ;;  %v1842_v2 = vadd.f32 %v1586_v51, %v1074_v56  ;;  %v832_v52 = vld [vmem:[#allocation13 + $0x90] sm:$0xff]  ;;  %v5982_v56 = vld [vmem:[#allocation2 + $0x88] sm:$0xff] }
 0x207   : > { %3893 = vmatprep.subr.bf16.mxu0 %v3517_v54  ;;  %v1843_v54 = vadd.f32 %v1587_v39, %v1075_v25  ;;  %v831_v39 = vld [vmem:[#allocation13 + $0x88] sm:$0xff]  ;;  %v1853_v25 = vadd.f32 %v1597_v41, %v1085_v24  ;;  %v1088_v33 = vmul.f32 0.99, %v832_v52 }
 0x208   : > { %2748 = vst [vmem:[#allocation20 + $0x20] sm:$0xff] %v1842_v2  ;;  %v1087_v50 = vmul.f32 0.99, %v831_v39  ;;  %v5989_v41 = vld [vmem:[#allocation2 + $0xb0] sm:$0xff] }
 0x209   : > { %2749 = vst [vmem:[#allocation20 + $0x28] sm:$0xff] %v1843_v54  ;;  %v4666_v1 = vpack.c.bf16 %v1845_v55, %v1843_v54  ;;  %2759 = vst [vmem:[#allocation20 + $0x78] sm:$0xff] %v1853_v25  ;;  %v1852_v55 = vadd.f32 %v1596_v13, %v1084_v43  ;;  %v1609_v13 = vmul.f32 0.01, %v5991_v45 }
 0x20a   : > { %3894 = vmatpush1.bf16.msra.mxu0 %v3516_v57  ;;  %v1076_v57 = vmul.f32 0.99, %v820_v49  ;;  %v1850_v49 = vadd.f32 %v1594_v37, %v1082_v35  ;;  %v843_v37 = vld [vmem:[#allocation13 + $0xe8] sm:$0xff] }
 0x20b   : > { %4855 = vmatprep.subr.bf16.mxu0 %v4664_v46  ;;  %v833_v46 = vld [vmem:[#allocation13 + $0x98] sm:$0xff]  ;;  %2758 = vst [vmem:[#allocation20 + $0x70] sm:$0xff] %v1852_v55 }
 0x20c   : > { %v1844_v3 = vadd.f32 %v1588_v53, %v1076_v57  ;;  %v1089_v51 = vmul.f32 0.99, %v833_v46  ;;  %v835_v53 = vld [vmem:[#allocation13 + $0xa8] sm:$0xff]  ;;  %v1599_v57 = vmul.f32 0.01, %v5982_v56  ;;  %2756 = vst [vmem:[#allocation20 + $0x60] sm:$0xff] %v1850_v49 }
 0x20d   : > { %3896 = vmatmul.mubr.bf16.vlgmr.msra.gmra.mrb[0].mxu0 %v7137_v58  ;;  %v845_v46 = vld [vmem:[#allocation13 + $0xf8] sm:$0xff]  ;;  %v5993_v56 = vld [vmem:[#allocation2 + $0xd0] sm:$0xff] }
 0x20e   : > { %4887 = vmatprep.mubr.bf16.mxu0 %v6958_v29  ;;  %v3579_v29 = vld [vmem:[%s8062_s1 + $0x1e8] sm:$0xff]  ;;  %4856 = vmatpush1.bf16.msra.mxu0 %v4663_v61  ;;  %2750 = vst [vmem:[#allocation20 + $0x30] sm:$0xff] %v1844_v3  ;;  %v4665_v14 = vpack.c.bf16 %v1844_v3, %v1842_v2  ;;  %v837_v61 = vld [vmem:[#allocation13 + $0xb8] sm:$0xff]  ;;  %v4669_v2 = vpack.c.bf16 %v1852_v55, %v1850_v49  ;;  %v1094_v49 = vmul.f32 0.99, %v838_v22 }
 0x20f   : > { %v3613_v7 = vpack.c.bf16 %v3581_v6, %v3579_v29  ;;  %v822_v29 = vld [vmem:[#allocation13 + $0x40] sm:$0xff]  ;;  %v824_v6 = vld [vmem:[#allocation13 + $0x50] sm:$0xff]  ;;  %4857 = vmatprep.subr.bf16.mxu0 %v4666_v1  ;;  %v1598_v1 = vmul.f32 0.01, %v5984_v0  ;;  %v1855_v3 = vadd.f32 %v1599_v57, %v1087_v50  ;;  %v1857_v4 = vadd.f32 %v1601_v60, %v1089_v51 }
 0x210   : > { %v1078_v9 = vmul.f32 0.99, %v822_v29  ;;  %v1600_v29 = vmul.f32 0.01, %v5985_v5  ;;  %v1093_v11 = vmul.f32 0.99, %v837_v61  ;;  %v1865_v55 = vadd.f32 %v1609_v13, %v1097_v36 }
 0x211   : > { %3938 = vmatprep.subr.bf16.mxu1 %v3613_v7  ;;  %v827_v7 = vld [vmem:[#allocation13 + $0x68] sm:$0xff]  ;;  %2761 = vst [vmem:[#allocation20 + $0x88] sm:$0xff] %v1855_v3  ;;  %2763 = vst [vmem:[#allocation20 + $0x98] sm:$0xff] %v1857_v4  ;;  %v4672_v15 = vpack.c.bf16 %v1857_v4, %v1855_v3  ;;  %v5992_v51 = vld [vmem:[#allocation2 + $0xc0] sm:$0xff]  ;;  %v1608_v57 = vmul.f32 0.01, %v5993_v56 }
 0x212   : > { %3939 = vmatpush1.bf16.msra.mxu1 %v3612_v10  ;;  %v1080_v10 = vmul.f32 0.99, %v824_v6  ;;  %v1083_v20 = vmul.f32 0.99, %v827_v7  ;;  %v1846_v23 = vadd.f32 %v1590_v12, %v1078_v9  ;;  %4858 = vmatpush1.bf16.msra.mxu0 %v4665_v14  ;;  %v836_v6 = vld [vmem:[#allocation13 + $0xb0] sm:$0xff]  ;;  %v839_v7 = vld [vmem:[#allocation13 + $0xc8] sm:$0xff]  ;;  %v1854_v9 = vadd.f32 %v1598_v1, %v1086_v63 }
 0x213   : > { %4859 = vmatprep.subr.bf16.mxu0 %v4668_v30  ;;  %v5986_v12 = vld [vmem:[#allocation2 + $0xa8] sm:$0xff]  ;;  %v1856_v16 = vadd.f32 %v1600_v29, %v1088_v33  ;;  %v1092_v26 = vmul.f32 0.99, %v836_v6  ;;  %v1604_v30 = vmul.f32 0.01, %v5989_v41  ;;  %v3619_v61 = vld [vmem:[#allocation7 + $0x18] sm:$0xff] }
 0x214   : > { %v1848_v31 = vadd.f32 %v1592_v18, %v1080_v10  ;;  %2752 = vst [vmem:[#allocation20 + $0x40] sm:$0xff] %v1846_v23  ;;  %v1851_v40 = vadd.f32 %v1595_v27, %v1083_v20  ;;  %v1091_v10 = vmul.f32 0.99, %v835_v53  ;;  %v1603_v14 = vmul.f32 0.01, %v5986_v12  ;;  %v5987_v18 = vld [vmem:[#allocation2 + $0xb8] sm:$0xff] }
 0x215   : > { %v1605_v19 = vmul.f32 0.01, %v5987_v18  ;;  %v1090_v20 = vmul.f32 0.99, %v834_v62  ;;  %2760 = vst [vmem:[#allocation20 + $0x80] sm:$0xff] %v1854_v9  ;;  %v5988_v27 = vld [vmem:[#allocation2 + $0xa0] sm:$0xff] }
 0x216   : > { %2754 = vst [vmem:[#allocation20 + $0x50] sm:$0xff] %v1848_v31  ;;  %v4667_v48 = vpack.c.bf16 %v1848_v31, %v1846_v23  ;;  %2757 = vst [vmem:[#allocation20 + $0x68] sm:$0xff] %v1851_v40  ;;  %v4670_v54 = vpack.c.bf16 %v1853_v25, %v1851_v40  ;;  %v840_v23 = vld [vmem:[#allocation13 + $0xd0] sm:$0xff]  ;;  %v1859_v24 = vadd.f32 %v1603_v14, %v1091_v10  ;;  %v1602_v28 = vmul.f32 0.01, %v5988_v27  ;;  %v5990_v25 = vld [vmem:[#allocation2 + $0xc8] sm:$0xff] }
 0x217   : > { %2762 = vst [vmem:[#allocation20 + $0x90] sm:$0xff] %v1856_v16  ;;  %v4671_v31 = vpack.c.bf16 %v1856_v16, %v1854_v9  ;;  %v1861_v32 = vadd.f32 %v1605_v19, %v1093_v11  ;;  %v1095_v35 = vmul.f32 0.99, %v839_v7  ;;  %v1860_v40 = vadd.f32 %v1604_v30, %v1092_v26  ;;  %v3617_v60 = vld [vmem:[#allocation7 + $0x8] sm:$0xff]  ;;  %2771 = vst [vmem:[#allocation20 + $0xd8] sm:$0xff] %v1865_v55  ;;  %v5995_v4 = vld [vmem:[#allocation2 + $0xf8] sm:$0xff] }
 0x218   : > { %4860 = vmatpush1.bf16.msra.mxu0 %v4667_v48  ;;  %2765 = vst [vmem:[#allocation20 + $0xa8] sm:$0xff] %v1859_v24  ;;  %v1858_v39 = vadd.f32 %v1602_v28, %v1090_v20  ;;  %v1607_v43 = vmul.f32 0.01, %v5990_v25  ;;  %v1096_v50 = vmul.f32 0.99, %v840_v23  ;;  %v5994_v0 = vld [vmem:[#allocation2 + $0xe8] sm:$0xff]  ;;  %v3681_v16 = vpack.c.bf16 %v3619_v61, %v3617_v60 }
 0x219   : > { %4861 = vmatprep.subr.bf16.mxu0 %v4670_v54  ;;  %2767 = vst [vmem:[#allocation20 + $0xb8] sm:$0xff] %v1861_v32  ;;  %v4674_v48 = vpack.c.bf16 %v1861_v32, %v1859_v24  ;;  %v1606_v52 = vmul.f32 0.01, %v5992_v51  ;;  %2766 = vst [vmem:[#allocation20 + $0xb0] sm:$0xff] %v1860_v40  ;;  %v1099_v63 = vmul.f32 0.99, %v843_v37 }
 0x21a   : > { %2764 = vst [vmem:[#allocation20 + $0xa0] sm:$0xff] %v1858_v39  ;;  %v4673_v53 = vpack.c.bf16 %v1860_v40, %v1858_v39  ;;  %v1863_v54 = vadd.f32 %v1607_v43, %v1095_v35  ;;  %v1101_v33 = vmul.f32 0.99, %v845_v46  ;;  %v1611_v1 = vmul.f32 0.01, %v5994_v0  ;;  %v847_v6 = vld [vmem:[#allocation13 + $0x108] sm:$0xff]  ;;  %4028 = vmatprep.subr.bf16.mxu1 %v3681_v16 }
 0x21b   : > { %v1862_v62 = vadd.f32 %v1606_v52, %v1094_v49  ;;  %v1864_v3 = vadd.f32 %v1608_v57, %v1096_v50  ;;  %v1613_v5 = vmul.f32 0.01, %v5995_v4  ;;  %v1098_v29 = vmul.f32 0.99, %v842_v47  ;;  %v5996_v9 = vld [vmem:[#allocation2 + $0xe0] sm:$0xff]  ;;  %v5997_v11 = vld [vmem:[#allocation2 + $0xf0] sm:$0xff] }
 0x21c   : > { %4862 = vmatpush1.bf16.msra.mxu0 %v4669_v2  ;;  %2769 = vst [vmem:[#allocation20 + $0xc8] sm:$0xff] %v1863_v54  ;;  %v4676_v2 = vpack.c.bf16 %v1865_v55, %v1863_v54  ;;  %v1867_v7 = vadd.f32 %v1611_v1, %v1099_v63  ;;  %v1610_v10 = vmul.f32 0.01, %v5996_v9  ;;  %v1612_v12 = vmul.f32 0.01, %v5997_v11  ;;  %v849_v18 = vld [vmem:[#allocation13 + $0x118] sm:$0xff] }
 0x21d   : > { %4863 = vmatprep.subr.bf16.mxu0 %v4672_v15  ;;  %2768 = vst [vmem:[#allocation20 + $0xc0] sm:$0xff] %v1862_v62  ;;  %2770 = vst [vmem:[#allocation20 + $0xd0] sm:$0xff] %v1864_v3  ;;  %v4675_v14 = vpack.c.bf16 %v1864_v3, %v1862_v62  ;;  %v1869_v15 = vadd.f32 %v1613_v5, %v1101_v33  ;;  %v1359_v19 = vld [vmem:[#allocation2 + $0x108] sm:$0xff]  ;;  %v1361_v20 = vld [vmem:[#allocation2 + $0x118] sm:$0xff]  ;;  %v1103_v24 = vmul.f32 0.99, %v847_v6 }
 0x21e   : > { %2773 = vst [vmem:[#allocation20 + $0xe8] sm:$0xff] %v1867_v7  ;;  %v1866_v22 = vadd.f32 %v1610_v10, %v1098_v29  ;;  %v1868_v23 = vadd.f32 %v1612_v12, %v1100_v8  ;;  %v1105_v26 = vmul.f32 0.99, %v849_v18  ;;  %v846_v27 = vld [vmem:[#allocation13 + $0x100] sm:$0xff]  ;;  %v848_v28 = vld [vmem:[#allocation13 + $0x110] sm:$0xff]  ;;  %v851_v13 = vld [vmem:[#allocation13 + $0x128] sm:$0xff] }
 0x21f   : > { %2775 = vst [vmem:[#allocation20 + $0xf8] sm:$0xff] %v1869_v15  ;;  %v4678_v41 = vpack.c.bf16 %v1869_v15, %v1867_v7  ;;  %v1615_v30 = vmul.f32 0.01, %v1359_v19  ;;  %v1102_v32 = vmul.f32 0.99, %v846_v27  ;;  %v1358_v36 = vld [vmem:[#allocation2 + $0x100] sm:$0xff] }
 0x220   : > { %4864 = vmatpush1.bf16.msra.mxu0 %v4671_v31  ;;  %v1617_v31 = vmul.f32 0.01, %v1361_v20  ;;  %2772 = vst [vmem:[#allocation20 + $0xe0] sm:$0xff] %v1866_v22  ;;  %2774 = vst [vmem:[#allocation20 + $0xf0] sm:$0xff] %v1868_v23  ;;  %v1104_v35 = vmul.f32 0.99, %v848_v28  ;;  %v4677_v45 = vpack.c.bf16 %v1868_v23, %v1866_v22 }
 0x221   : > { %4865 = vmatprep.subr.bf16.mxu0 %v4674_v48  ;;  %v1360_v37 = vld [vmem:[#allocation2 + $0x110] sm:$0xff]  ;;  %v1871_v39 = vadd.f32 %v1615_v30, %v1103_v24  ;;  %v1614_v25 = vmul.f32 0.01, %v1358_v36  ;;  %v853_v46 = vld [vmem:[#allocation13 + $0x138] sm:$0xff]  ;;  %v1363_v51 = vld [vmem:[#allocation2 + $0x128] sm:$0xff] }
 0x222   : > { %v1873_v40 = vadd.f32 %v1617_v31, %v1105_v26  ;;  %v1616_v43 = vmul.f32 0.01, %v1360_v37  ;;  %v1365_v52 = vld [vmem:[#allocation2 + $0x138] sm:$0xff]  ;;  %v1107_v55 = vmul.f32 0.99, %v851_v13  ;;  %v1362_v62 = vld [vmem:[#allocation2 + $0x120] sm:$0xff] }
 0x223   : > { %2777 = vst [vmem:[#allocation20 + $0x108] sm:$0xff] %v1871_v39  ;;  %v1870_v49 = vadd.f32 %v1614_v25, %v1102_v32  ;;  %v1109_v56 = vmul.f32 0.99, %v853_v46  ;;  %v852_v57 = vld [vmem:[#allocation13 + $0x130] sm:$0xff]  ;;  %v1619_v60 = vmul.f32 0.01, %v1363_v51 }
 0x224   : > { %4866 = vmatpush1.bf16.msra.mxu0 %v4673_v53  ;;  %2779 = vst [vmem:[#allocation20 + $0x118] sm:$0xff] %v1873_v40  ;;  %v4680_v48 = vpack.c.bf16 %v1873_v40, %v1871_v39  ;;  %v1872_v50 = vadd.f32 %v1616_v43, %v1104_v35  ;;  %v850_v53 = vld [vmem:[#allocation13 + $0x120] sm:$0xff]  ;;  %v1621_v61 = vmul.f32 0.01, %v1365_v52  ;;  %v1108_v1 = vmul.f32 0.99, %v852_v57 }
 0x225   : > { %4867 = vmatprep.subr.bf16.mxu0 %v4676_v2  ;;  %2776 = vst [vmem:[#allocation20 + $0x100] sm:$0xff] %v1870_v49  ;;  %v1106_v0 = vmul.f32 0.99, %v850_v53  ;;  %v1364_v2 = vld [vmem:[#allocation2 + $0x130] sm:$0xff]  ;;  %v1875_v3 = vadd.f32 %v1619_v60, %v1107_v55  ;;  %v1618_v5 = vmul.f32 0.01, %v1362_v62 }
 0x226   : > { %2778 = vst [vmem:[#allocation20 + $0x110] sm:$0xff] %v1872_v50  ;;  %v4679_v33 = vpack.c.bf16 %v1872_v50, %v1870_v49  ;;  %v1877_v4 = vadd.f32 %v1621_v61, %v1109_v56  ;;  %v1620_v29 = vmul.f32 0.01, %v1364_v2  ;;  %v855_v6 = vld [vmem:[#allocation13 + $0x148] sm:$0xff]  ;;  %v857_v10 = vld [vmem:[#allocation13 + $0x158] sm:$0xff]  ;;  %v854_v20 = vld [vmem:[#allocation13 + $0x140] sm:$0xff] }
 0x227   : > { %2781 = vst [vmem:[#allocation20 + $0x128] sm:$0xff] %v1875_v3  ;;  %v1874_v8 = vadd.f32 %v1618_v5, %v1106_v0  ;;  %v1367_v11 = vld [vmem:[#allocation2 + $0x148] sm:$0xff]  ;;  %v1369_v12 = vld [vmem:[#allocation2 + $0x158] sm:$0xff]  ;;  %v1113_v15 = vmul.f32 0.99, %v857_v10  ;;  %v1366_v23 = vld [vmem:[#allocation2 + $0x140] sm:$0xff] }
 0x228   : > { %4868 = vmatpush1.bf16.msra.mxu0 %v4675_v14  ;;  %2783 = vst [vmem:[#allocation20 + $0x138] sm:$0xff] %v1877_v4  ;;  %v4682_v7 = vpack.c.bf16 %v1877_v4, %v1875_v3  ;;  %v1876_v9 = vadd.f32 %v1620_v29, %v1108_v1  ;;  %v1111_v14 = vmul.f32 0.99, %v855_v6  ;;  %v1623_v16 = vmul.f32 0.01, %v1367_v11  ;;  %v856_v22 = vld [vmem:[#allocation13 + $0x150] sm:$0xff] }
 0x229   : > { %4869 = vmatprep.subr.bf16.mxu0 %v4678_v41  ;;  %2780 = vst [vmem:[#allocation20 + $0x120] sm:$0xff] %v1874_v8  ;;  %v1625_v19 = vmul.f32 0.01, %v1369_v12  ;;  %v1110_v26 = vmul.f32 0.99, %v854_v20  ;;  %v1368_v28 = vld [vmem:[#allocation2 + $0x150] sm:$0xff] }
 0x22a   : > { %2782 = vst [vmem:[#allocation20 + $0x130] sm:$0xff] %v1876_v9  ;;  %v4681_v18 = vpack.c.bf16 %v1876_v9, %v1874_v8  ;;  %v1879_v24 = vadd.f32 %v1623_v16, %v1111_v14  ;;  %v1112_v27 = vmul.f32 0.99, %v856_v22  ;;  %v1622_v30 = vmul.f32 0.01, %v1366_v23  ;;  %v859_v32 = vld [vmem:[#allocation13 + $0x168] sm:$0xff] }
 0x22b   : > { %v1881_v41 = vadd.f32 %v1625_v19, %v1113_v15  ;;  %v1624_v31 = vmul.f32 0.01, %v1368_v28  ;;  %v861_v35 = vld [vmem:[#allocation13 + $0x178] sm:$0xff]  ;;  %v1371_v40 = vld [vmem:[#allocation2 + $0x168] sm:$0xff]  ;;  %v860_v50 = vld [vmem:[#allocation13 + $0x170] sm:$0xff] }
 0x22c   : > { %4870 = vmatpush1.bf16.msra.mxu0 %v4677_v45  ;;  %2785 = vst [vmem:[#allocation20 + $0x148] sm:$0xff] %v1879_v24  ;;  %v1878_v37 = vadd.f32 %v1622_v30, %v1110_v26  ;;  %v1373_v25 = vld [vmem:[#allocation2 + $0x178] sm:$0xff]  ;;  %v858_v43 = vld [vmem:[#allocation13 + $0x160] sm:$0xff]  ;;  %v1115_v45 = vmul.f32 0.99, %v859_v32  ;;  %v1372_v56 = vld [vmem:[#allocation2 + $0x170] sm:$0xff] }
 0x22d   : > { %4871 = vmatprep.subr.bf16.mxu0 %v4680_v48  ;;  %2787 = vst [vmem:[#allocation20 + $0x158] sm:$0xff] %v1881_v41  ;;  %v4684_v36 = vpack.c.bf16 %v1881_v41, %v1879_v24  ;;  %v1880_v39 = vadd.f32 %v1624_v31, %v1112_v27  ;;  %v1117_v13 = vmul.f32 0.99, %v861_v35  ;;  %v1627_v46 = vmul.f32 0.01, %v1371_v40  ;;  %v1370_v52 = vld [vmem:[#allocation2 + $0x160] sm:$0xff] }
 0x22e   : > { %2784 = vst [vmem:[#allocation20 + $0x140] sm:$0xff] %v1878_v37  ;;  %v1629_v49 = vmul.f32 0.01, %v1373_v25  ;;  %v1114_v51 = vmul.f32 0.99, %v858_v43  ;;  %v3616_v6 = vld [vmem:[#allocation7] sm:$0xff] }
 0x22f   : > { %2786 = vst [vmem:[#allocation20 + $0x150] sm:$0xff] %v1880_v39  ;;  %v4683_v48 = vpack.c.bf16 %v1880_v39, %v1878_v37  ;;  %v1883_v53 = vadd.f32 %v1627_v46, %v1115_v45  ;;  %v1116_v55 = vmul.f32 0.99, %v860_v50  ;;  %v1626_v57 = vmul.f32 0.01, %v1370_v52  ;;  %v3621_v9 = vld [vmem:[#allocation7 + $0x28] sm:$0xff] }
 0x230   : > { %4872 = vmatpush1.bf16.msra.mxu0 %v4679_v33  ;;  %v1628_v60 = vmul.f32 0.01, %v1372_v56  ;;  %v3623_v10 = vld [vmem:[#allocation7 + $0x38] sm:$0xff]  ;;  %v3620_v16 = vld [vmem:[#allocation7 + $0x20] sm:$0xff]  ;;  %v3625_v19 = vld [vmem:[#allocation7 + $0x48] sm:$0xff] }
 0x231   : > { %4873 = vmatprep.subr.bf16.mxu0 %v4682_v7  ;;  %2789 = vst [vmem:[#allocation20 + $0x168] sm:$0xff] %v1883_v53  ;;  %v1882_v61 = vadd.f32 %v1626_v57, %v1114_v51  ;;  %v3618_v7 = vld [vmem:[#allocation7 + $0x10] sm:$0xff]  ;;  %v3683_v15 = vpack.c.bf16 %v3623_v10, %v3621_v9  ;;  %v3624_v22 = vld [vmem:[#allocation7 + $0x40] sm:$0xff]  ;;  %v3629_v24 = vld [vmem:[#allocation7 + $0x68] sm:$0xff] }
 0x232   : > { %v3680_v12 = vpack.c.bf16 %v3618_v7, %v3616_v6  ;;  %v3626_v23 = vld [vmem:[#allocation7 + $0x50] sm:$0xff]  ;;  %v3631_v26 = vld [vmem:[#allocation7 + $0x78] sm:$0xff]  ;;  %v3628_v41 = vld [vmem:[#allocation7 + $0x60] sm:$0xff] }
 0x233   : > { %2788 = vst [vmem:[#allocation20 + $0x160] sm:$0xff] %v1882_v61  ;;  %v3684_v27 = vpack.c.bf16 %v3626_v23, %v3624_v22  ;;  %v3687_v28 = vpack.c.bf16 %v3631_v26, %v3629_v24  ;;  %v3630_v30 = vld [vmem:[#allocation7 + $0x70] sm:$0xff]  ;;  %v3633_v31 = vld [vmem:[#allocation7 + $0x88] sm:$0xff]  ;;  %v3635_v32 = vld [vmem:[#allocation7 + $0x98] sm:$0xff] }
 0x234   : > { %4874 = vmatpush1.bf16.msra.mxu0 %v4681_v18  ;;  %v3622_v18 = vld [vmem:[#allocation7 + $0x30] sm:$0xff]  ;;  %v3686_v35 = vpack.c.bf16 %v3630_v30, %v3628_v41  ;;  %v865_v39 = vld [vmem:[#allocation13 + $0x198] sm:$0xff]  ;;  %v1375_v40 = vld [vmem:[#allocation2 + $0x188] sm:$0xff] }
 0x235   : > { %4875 = vmatprep.subr.bf16.mxu0 %v4684_v36  ;;  %v3689_v36 = vpack.c.bf16 %v3635_v32, %v3633_v31  ;;  %v863_v37 = vld [vmem:[#allocation13 + $0x188] sm:$0xff]  ;;  %v1121_v43 = vmul.f32 0.99, %v865_v39  ;;  %v1377_v45 = vld [vmem:[#allocation2 + $0x198] sm:$0xff]  ;;  %v1631_v46 = vmul.f32 0.01, %v1375_v40 }
 0x236   : > { %v1119_v25 = vmul.f32 0.99, %v863_v37  ;;  %v1374_v50 = vld [vmem:[#allocation2 + $0x180] sm:$0xff]  ;;  %v3634_v56 = vld [vmem:[#allocation7 + $0x90] sm:$0xff]  ;;  %v3637_v7 = vld [vmem:[#allocation7 + $0xa8] sm:$0xff] }
 0x237   : > { %v868_v6 = vld [vmem:[#allocation13 + $0x1b0] sm:$0xff]  ;;  %v1378_v10 = vld [vmem:[#allocation2 + $0x1a0] sm:$0xff]  ;;  %v871_v22 = vld [vmem:[#allocation13 + $0x1c8] sm:$0xff] }
 0x238   : > { %4876 = vmatpush1.bf16.msra.mxu0 %v4683_v48  ;;  %v1633_v48 = vmul.f32 0.01, %v1377_v45  ;;  %v1887_v57 = vadd.f32 %v1631_v46, %v1119_v25  ;;  %v1634_v26 = vmul.f32 0.01, %v1378_v10  ;;  %v1383_v41 = vld [vmem:[#allocation2 + $0x1c8] sm:$0xff]  ;;  %v3643_v31 = vld [vmem:[#allocation7 + $0xd8] sm:$0xff] }
 0x239   : > { %v3641_v30 = vld [vmem:[#allocation7 + $0xc8] sm:$0xff]  ;;  %v1127_v32 = vmul.f32 0.99, %v871_v22  ;;  %v3640_v25 = vld [vmem:[#allocation7 + $0xc0] sm:$0xff]  ;;  %v1385_v45 = vld [vmem:[#allocation2 + $0x1d8] sm:$0xff] }
 0x23a   : > { %2793 = vst [vmem:[#allocation20 + $0x188] sm:$0xff] %v1887_v57  ;;  %v3693_v40 = vpack.c.bf16 %v3643_v31, %v3641_v30  ;;  %v1639_v46 = vmul.f32 0.01, %v1383_v41  ;;  %v3649_v22 = vld [vmem:[#allocation7 + $0x108] sm:$0xff]  ;;  %v3650_v30 = vld [vmem:[#allocation7 + $0x110] sm:$0xff] }
 0x23b   : > { %v879_v31 = vld [vmem:[#allocation13 + $0x208] sm:$0xff] }
 0x27b   : > { %v7177_v47 = vpop.f32.mrb[0].mxu1 }
 0x27c   : > { %v7179_v54 = vpop.f32.mrb[1].mxu1 }
 0x27d   : > { %v3778_v59 = vpop.f32.mrb[2].mxu1 }
 0x27e   : > { %v3779_v63 = vpop.f32.mrb[3].mxu1  ;;  %v1885_v59 = vadd.f32 %v1629_v49, %v1117_v13  ;;  %v862_v13 = vld [vmem:[#allocation13 + $0x180] sm:$0xff]  ;;  %v864_v49 = vld [vmem:[#allocation13 + $0x190] sm:$0xff] }
 0x27f   : > { %v1884_v63 = vadd.f32 %v1628_v60, %v1116_v55  ;;  %v1118_v51 = vmul.f32 0.99, %v862_v13  ;;  %v1120_v52 = vmul.f32 0.99, %v864_v49  ;;  %v3632_v55 = vld [vmem:[#allocation7 + $0x80] sm:$0xff] }
 0x280   : > { %2791 = vst [vmem:[#allocation20 + $0x178] sm:$0xff] %v1885_v59  ;;  %v4686_v62 = vpack.c.bf16 %v1885_v59, %v1883_v53  ;;  %v1376_v53 = vld [vmem:[#allocation2 + $0x190] sm:$0xff]  ;;  %v1889_v59 = vadd.f32 %v1633_v48, %v1121_v43  ;;  %v1630_v60 = vmul.f32 0.01, %v1374_v50  ;;  %v1641_v48 = vmul.f32 0.01, %v1385_v45 }
 0x281   : > { %2790 = vst [vmem:[#allocation20 + $0x170] sm:$0xff] %v1884_v63  ;;  %v4685_v33 = vpack.c.bf16 %v1884_v63, %v1882_v61  ;;  %v1632_v61 = vmul.f32 0.01, %v1376_v53  ;;  %v867_v63 = vld [vmem:[#allocation13 + $0x1a8] sm:$0xff]  ;;  %v870_v49 = vld [vmem:[#allocation13 + $0x1c0] sm:$0xff]  ;;  %v872_v50 = vld [vmem:[#allocation13 + $0x1d0] sm:$0xff] }
 0x282   : > { %4877 = vmatprep.subr.bf16.mxu0 %v4686_v62  ;;  %v3688_v62 = vpack.c.bf16 %v3634_v56, %v3632_v55  ;;  %2795 = vst [vmem:[#allocation20 + $0x198] sm:$0xff] %v1889_v59  ;;  %v3642_v43 = vld [vmem:[#allocation7 + $0xd0] sm:$0xff]  ;;  %v1128_v53 = vmul.f32 0.99, %v872_v50  ;;  %v1382_v55 = vld [vmem:[#allocation2 + $0x1c0] sm:$0xff] }
 0x283   : > { %4878 = vmatpush1.bf16.msra.mxu0 %v4685_v33  ;;  %v869_v33 = vld [vmem:[#allocation13 + $0x1b8] sm:$0xff]  ;;  %v3692_v13 = vpack.c.bf16 %v3642_v43, %v3640_v25  ;;  %v1384_v56 = vld [vmem:[#allocation2 + $0x1d0] sm:$0xff]  ;;  %v878_v43 = vld [vmem:[#allocation13 + $0x200] sm:$0xff]  ;;  %v1135_v45 = vmul.f32 0.99, %v879_v31 }
 0x284   : > { %v1125_v9 = vmul.f32 0.99, %v869_v33  ;;  %v1393_v25 = vld [vmem:[#allocation2 + $0x218] sm:$0xff] }
 0x285   : > { %v880_v50 = vld [vmem:[#allocation13 + $0x210] sm:$0xff] }
 0x2e0   : > { %v3897_v0 = vpop.f32.mrb[0].mxu0 }
 0x2e1   : > { %v5660_v1 = vadd.f32 %v3897_v0, %v7177_v47  ;;  %v3899_v2 = vpop.f32.mrb[1].mxu0  ;;  %v3627_v47 = vld [vmem:[#allocation7 + $0x58] sm:$0xff]  ;;  %v1379_v0 = vld [vmem:[#allocation2 + $0x1a8] sm:$0xff] }
 0x2e2   : > { %v5661_v3 = vadd.f32 %v3899_v2, %v7179_v54  ;;  %v3901_v4 = vpop.f32.mrb[2].mxu0  ;;  %v3682_v54 = vpack.c.bf16 %v3622_v18, %v3620_v16  ;;  %v3685_v20 = vpack.c.bf16 %v3627_v47, %v3625_v19  ;;  %v1886_v2 = vadd.f32 %v1630_v60, %v1118_v51 }
 0x2e3   : > { %v3904_v5 = vmax.f32 %v5660_v1, 0.0  ;;  %v3902_v29 = vpop.f32.mrb[3].mxu0  ;;  %v4688_v1 = vpack.c.bf16 %v1889_v59, %v1887_v57  ;;  %v1123_v4 = vmul.f32 0.99, %v867_v63  ;;  %v1635_v16 = vmul.f32 0.01, %v1379_v0 }
 0x2e4   : > { %v3905_v8 = vmax.f32 %v5661_v3, 0.0  ;;  %v1888_v3 = vadd.f32 %v1632_v61, %v1120_v52  ;;  %v866_v29 = vld [vmem:[#allocation13 + $0x1a0] sm:$0xff]  ;;  %2792 = vst [vmem:[#allocation20 + $0x180] sm:$0xff] %v1886_v2  ;;  %v1126_v52 = vmul.f32 0.99, %v870_v49  ;;  %v1895_v57 = vadd.f32 %v1639_v46, %v1127_v32  ;;  %v3647_v63 = vld [vmem:[#allocation7 + $0xf8] sm:$0xff] }
 0x2e5   : > { %v3906_v14 = vpack.c.bf16 %v3904_v5, %v3904_v5  ;;  %v1381_v5 = vld [vmem:[#allocation2 + $0x1b8] sm:$0xff]  ;;  %4879 = vmatprep.subr.bf16.mxu0 %v4688_v1  ;;  %v1122_v47 = vmul.f32 0.99, %v866_v29  ;;  %v1891_v23 = vadd.f32 %v1635_v16, %v1123_v4  ;;  %v1638_v60 = vmul.f32 0.01, %v1382_v55  ;;  %v3644_v0 = vld [vmem:[#allocation7 + $0xe0] sm:$0xff] }
 0x2e6   : > { %v3907_v11 = vpack.c.bf16 %v3905_v8, %v3905_v8  ;;  %v3639_v8 = vld [vmem:[#allocation7 + $0xb8] sm:$0xff]  ;;  %2794 = vst [vmem:[#allocation20 + $0x190] sm:$0xff] %v1888_v3  ;;  %v1637_v18 = vmul.f32 0.01, %v1381_v5  ;;  %v1640_v61 = vmul.f32 0.01, %v1384_v56 }
 0x2e7   : > { %2797 = vst [vmem:[#allocation20 + $0x1a8] sm:$0xff] %v1891_v23  ;;  %v1890_v37 = vadd.f32 %v1634_v26, %v1122_v47  ;;  %v3646_v1 = vld [vmem:[#allocation7 + $0xf0] sm:$0xff]  ;;  %2801 = vst [vmem:[#allocation20 + $0x1c8] sm:$0xff] %v1895_v57  ;;  %v1894_v4 = vadd.f32 %v1638_v60, %v1126_v52  ;;  %v881_v32 = vld [vmem:[#allocation13 + $0x218] sm:$0xff]  ;;  %v1649_v49 = vmul.f32 0.01, %v1393_v25 }
 0x2e8   : > { %3940 = vmatprep.mubr.bf16.mxu1 %v3907_v11  ;;  %v4687_v11 = vpack.c.bf16 %v1888_v3, %v1886_v2  ;;  %v1893_v24 = vadd.f32 %v1637_v18, %v1125_v9  ;;  %v875_v2 = vld [vmem:[#allocation13 + $0x1e8] sm:$0xff]  ;;  %v1896_v5 = vadd.f32 %v1640_v61, %v1128_v53  ;;  %v3694_v29 = vpack.c.bf16 %v3646_v1, %v3644_v0  ;;  %v876_v16 = vld [vmem:[#allocation13 + $0x1f0] sm:$0xff]  ;;  %v1386_v18 = vld [vmem:[#allocation2 + $0x1e0] sm:$0xff] }
 0x2e9   : > { %3941 = vmatmul.mubr.bf16.vlgmr.msra.gmra.mrb[4].mxu1 %v3906_v14  ;;  %v3636_v14 = vld [vmem:[#allocation7 + $0xa0] sm:$0xff]  ;;  %2796 = vst [vmem:[#allocation20 + $0x1a0] sm:$0xff] %v1890_v37  ;;  %v1131_v9 = vmul.f32 0.99, %v875_v2  ;;  %2800 = vst [vmem:[#allocation20 + $0x1c0] sm:$0xff] %v1894_v4  ;;  %v1392_v56 = vld [vmem:[#allocation2 + $0x210] sm:$0xff] }
 0x2ea   : > { %4029 = vmatpush1.bf16.msra.mxu1 %v3680_v12  ;;  %v3691_v12 = vpack.c.bf16 %v3639_v8, %v3637_v7  ;;  %4880 = vmatpush1.bf16.msra.mxu0 %v4687_v11  ;;  %2799 = vst [vmem:[#allocation20 + $0x1b8] sm:$0xff] %v1893_v24  ;;  %v1387_v7 = vld [vmem:[#allocation2 + $0x1e8] sm:$0xff]  ;;  %v1389_v8 = vld [vmem:[#allocation2 + $0x1f8] sm:$0xff]  ;;  %2802 = vst [vmem:[#allocation20 + $0x1d0] sm:$0xff] %v1896_v5  ;;  %v1136_v55 = vmul.f32 0.99, %v880_v50 }
 0x2eb   : > { %4030 = vmatprep.subr.bf16.mxu1 %v3683_v15  ;;  %v3638_v15 = vld [vmem:[#allocation7 + $0xb0] sm:$0xff]  ;;  %v1643_v11 = vmul.f32 0.01, %v1387_v7  ;;  %v1390_v52 = vld [vmem:[#allocation2 + $0x200] sm:$0xff]  ;;  %v1648_v61 = vmul.f32 0.01, %v1392_v56 }
 0x2ec   : > { %v3690_v19 = vpack.c.bf16 %v3638_v15, %v3636_v14  ;;  %v1645_v14 = vmul.f32 0.01, %v1389_v8  ;;  %v874_v15 = vld [vmem:[#allocation13 + $0x1e0] sm:$0xff] }
 0x2ed   : > { %v1130_v47 = vmul.f32 0.99, %v874_v15  ;;  %v1394_v15 = vld [vmem:[#allocation2 + $0x220] sm:$0xff] }
 0x2ee   : > { %4031 = vmatpush1.bf16.msra.mxu1 %v3682_v54  ;;  %v1124_v54 = vmul.f32 0.99, %v868_v6  ;;  %v877_v6 = vld [vmem:[#allocation13 + $0x1f8] sm:$0xff] }
 0x2ef   : > { %4032 = vmatprep.subr.bf16.mxu1 %v3685_v20  ;;  %v1380_v20 = vld [vmem:[#allocation2 + $0x1b0] sm:$0xff]  ;;  %v1133_v10 = vmul.f32 0.99, %v877_v6  ;;  %v1904_v6 = vadd.f32 %v1648_v61, %v1136_v55 }
 0x2f0   : > { %v3661_v55 = vld [vmem:[#allocation7 + $0x168] sm:$0xff]  ;;  %v3662_v61 = vld [vmem:[#allocation7 + $0x170] sm:$0xff] }
 0x2f1   : > { %2810 = vst [vmem:[#allocation20 + $0x210] sm:$0xff] %v1904_v6 }
 0x2f2   : > { %4033 = vmatpush1.bf16.msra.mxu1 %v3684_v27  ;;  %v1636_v27 = vmul.f32 0.01, %v1380_v20  ;;  %v1388_v20 = vld [vmem:[#allocation2 + $0x1f0] sm:$0xff] }
 0x2f3   : > { %4034 = vmatprep.subr.bf16.mxu1 %v3687_v28  ;;  %v873_v28 = vld [vmem:[#allocation13 + $0x1d8] sm:$0xff]  ;;  %v1644_v26 = vmul.f32 0.01, %v1388_v20 }
 0x2f4   : > { %v1892_v39 = vadd.f32 %v1636_v27, %v1124_v54  ;;  %v1132_v54 = vmul.f32 0.99, %v876_v16  ;;  %v3651_v27 = vld [vmem:[#allocation7 + $0x118] sm:$0xff] }
 0x2f5   : > { %v3697_v41 = vpack.c.bf16 %v3651_v27, %v3649_v22 }
 0x2f6   : > { %4035 = vmatpush1.bf16.msra.mxu1 %v3686_v35  ;;  %v1129_v35 = vmul.f32 0.99, %v873_v28  ;;  %2798 = vst [vmem:[#allocation20 + $0x1b0] sm:$0xff] %v1892_v39  ;;  %v4689_v51 = vpack.c.bf16 %v1892_v39, %v1890_v37  ;;  %v3648_v28 = vld [vmem:[#allocation7 + $0x100] sm:$0xff]  ;;  %v1900_v37 = vadd.f32 %v1644_v26, %v1132_v54  ;;  %v3657_v54 = vld [vmem:[#allocation7 + $0x148] sm:$0xff]  ;;  %v3659_v26 = vld [vmem:[#allocation7 + $0x158] sm:$0xff] }
 0x2f7   : > { %4036 = vmatprep.subr.bf16.mxu1 %v3689_v36  ;;  %v4690_v36 = vpack.c.bf16 %v1893_v24, %v1891_v23  ;;  %v1901_v23 = vadd.f32 %v1645_v14, %v1133_v10  ;;  %v1642_v24 = vmul.f32 0.01, %v1386_v18  ;;  %v3696_v39 = vpack.c.bf16 %v3650_v30, %v3648_v28  ;;  %v882_v10 = vld [vmem:[#allocation13 + $0x220] sm:$0xff]  ;;  %v884_v14 = vld [vmem:[#allocation13 + $0x230] sm:$0xff]  ;;  %v889_v30 = vld [vmem:[#allocation13 + $0x258] sm:$0xff] }
 0x2f8   : > { %v1897_v59 = vadd.f32 %v1641_v48, %v1129_v35  ;;  %2806 = vst [vmem:[#allocation20 + $0x1f0] sm:$0xff] %v1900_v37  ;;  %v1138_v18 = vmul.f32 0.99, %v882_v10  ;;  %v3701_v27 = vpack.c.bf16 %v3659_v26, %v3657_v54  ;;  %v3658_v28 = vld [vmem:[#allocation7 + $0x150] sm:$0xff]  ;;  %v1402_v10 = vld [vmem:[#allocation2 + $0x260] sm:$0xff] }
 0x2f9   : > { %4881 = vmatprep.subr.bf16.mxu0 %v4690_v36  ;;  %2807 = vst [vmem:[#allocation20 + $0x1f8] sm:$0xff] %v1901_v23  ;;  %v1898_v36 = vadd.f32 %v1642_v24, %v1130_v47  ;;  %v1396_v47 = vld [vmem:[#allocation2 + $0x230] sm:$0xff]  ;;  %v3667_v54 = vld [vmem:[#allocation7 + $0x198] sm:$0xff] }
 0x2fa   : > { %4037 = vmatpush1.bf16.msra.mxu1 %v3688_v62  ;;  %v3645_v62 = vld [vmem:[#allocation7 + $0xe8] sm:$0xff]  ;;  %4882 = vmatpush1.bf16.msra.mxu0 %v4689_v51  ;;  %2803 = vst [vmem:[#allocation20 + $0x1d8] sm:$0xff] %v1897_v59  ;;  %v4692_v3 = vpack.c.bf16 %v1897_v59, %v1895_v57  ;;  %v1134_v51 = vmul.f32 0.99, %v878_v43  ;;  %v1646_v57 = vmul.f32 0.01, %v1390_v52 }
 0x2fb   : > { %4038 = vmatprep.subr.bf16.mxu1 %v3691_v12  ;;  %v3695_v33 = vpack.c.bf16 %v3647_v63, %v3645_v62  ;;  %v4691_v12 = vpack.c.bf16 %v1896_v5, %v1894_v4  ;;  %2804 = vst [vmem:[#allocation20 + $0x1e0] sm:$0xff] %v1898_v36  ;;  %v4693_v48 = vpack.c.bf16 %v1900_v37, %v1898_v36  ;;  %v3653_v59 = vld [vmem:[#allocation7 + $0x128] sm:$0xff]  ;;  %v3655_v62 = vld [vmem:[#allocation7 + $0x138] sm:$0xff]  ;;  %v3652_v63 = vld [vmem:[#allocation7 + $0x120] sm:$0xff]  ;;  %v1652_v24 = vmul.f32 0.01, %v1396_v47 }
 0x2fc   : > { %4883 = vmatprep.subr.bf16.mxu0 %v4692_v3  ;;  %v1902_v0 = vadd.f32 %v1646_v57, %v1134_v51  ;;  %v3699_v1 = vpack.c.bf16 %v3655_v62, %v3653_v59  ;;  %v883_v3 = vld [vmem:[#allocation13 + $0x228] sm:$0xff]  ;;  %v885_v4 = vld [vmem:[#allocation13 + $0x238] sm:$0xff]  ;;  %v1145_v43 = vmul.f32 0.99, %v889_v30  ;;  %v1658_v47 = vmul.f32 0.01, %v1402_v10 }
 0x2fd   : > { %v1395_v5 = vld [vmem:[#allocation2 + $0x228] sm:$0xff]  ;;  %v1139_v7 = vmul.f32 0.99, %v883_v3  ;;  %v1141_v8 = vmul.f32 0.99, %v885_v4  ;;  %v1400_v52 = vld [vmem:[#allocation2 + $0x250] sm:$0xff] }
 0x2fe   : > { %4039 = vmatpush1.bf16.msra.mxu1 %v3690_v19  ;;  %v1899_v19 = vadd.f32 %v1643_v11, %v1131_v9  ;;  %4884 = vmatpush1.bf16.msra.mxu0 %v4691_v12  ;;  %v1397_v9 = vld [vmem:[#allocation2 + $0x238] sm:$0xff]  ;;  %2808 = vst [vmem:[#allocation20 + $0x200] sm:$0xff] %v1902_v0  ;;  %v1651_v11 = vmul.f32 0.01, %v1395_v5  ;;  %v4695_v16 = vpack.c.bf16 %v1904_v6, %v1902_v0  ;;  %v1399_v37 = vld [vmem:[#allocation2 + $0x248] sm:$0xff]  ;;  %v1412_v10 = vld [vmem:[#allocation2 + $0x2b0] sm:$0xff] }
 0x2ff   : > { %4040 = vmatprep.subr.bf16.mxu1 %v3693_v40  ;;  %v1391_v40 = vld [vmem:[#allocation2 + $0x208] sm:$0xff]  ;;  %v1653_v12 = vmul.f32 0.01, %v1397_v9  ;;  %v1656_v57 = vmul.f32 0.01, %v1400_v52  ;;  %v3663_v59 = vld [vmem:[#allocation7 + $0x178] sm:$0xff] }
 0x300   : > { %2805 = vst [vmem:[#allocation20 + $0x1e8] sm:$0xff] %v1899_v19  ;;  %v4694_v35 = vpack.c.bf16 %v1901_v23, %v1899_v19  ;;  %v1647_v46 = vmul.f32 0.01, %v1391_v40  ;;  %v1140_v19 = vmul.f32 0.99, %v884_v14  ;;  %v1907_v20 = vadd.f32 %v1651_v11, %v1139_v7  ;;  %v886_v40 = vld [vmem:[#allocation13 + $0x240] sm:$0xff] }
 0x301   : > { %v1909_v22 = vadd.f32 %v1653_v12, %v1141_v8  ;;  %v1650_v23 = vmul.f32 0.01, %v1394_v15  ;;  %v891_v0 = vld [vmem:[#allocation13 + $0x268] sm:$0xff]  ;;  %v890_v6 = vld [vmem:[#allocation13 + $0x260] sm:$0xff]  ;;  %v892_v7 = vld [vmem:[#allocation13 + $0x270] sm:$0xff] }
 0x302   : > { %4041 = vmatpush1.bf16.msra.mxu1 %v3692_v13  ;;  %v1137_v13 = vmul.f32 0.99, %v881_v32  ;;  %4885 = vmatprep.subr.bf16.mxu0 %v4694_v35  ;;  %v1903_v53 = vadd.f32 %v1647_v46, %v1135_v45  ;;  %2813 = vst [vmem:[#allocation20 + $0x228] sm:$0xff] %v1907_v20  ;;  %v1908_v35 = vadd.f32 %v1652_v24, %v1140_v19  ;;  %v1655_v45 = vmul.f32 0.01, %v1399_v37  ;;  %v888_v46 = vld [vmem:[#allocation13 + $0x250] sm:$0xff] }
 0x303   : > { %4042 = vmatprep.subr.bf16.mxu1 %v3695_v33  ;;  %4886 = vmatpush1.bf16.msra.mxu0 %v4693_v48  ;;  %v3654_v33 = vld [vmem:[#allocation7 + $0x130] sm:$0xff]  ;;  %2815 = vst [vmem:[#allocation20 + $0x238] sm:$0xff] %v1909_v22  ;;  %v4698_v31 = vpack.c.bf16 %v1909_v22, %v1907_v20  ;;  %v1906_v32 = vadd.f32 %v1650_v23, %v1138_v18  ;;  %v1142_v48 = vmul.f32 0.99, %v886_v40  ;;  %v1144_v51 = vmul.f32 0.99, %v888_v46 }
 0x304   : > { %v1905_v60 = vadd.f32 %v1649_v49, %v1137_v13  ;;  %2809 = vst [vmem:[#allocation20 + $0x208] sm:$0xff] %v1903_v53  ;;  %v3698_v2 = vpack.c.bf16 %v3654_v33, %v3652_v63  ;;  %2814 = vst [vmem:[#allocation20 + $0x230] sm:$0xff] %v1908_v35  ;;  %v1398_v49 = vld [vmem:[#allocation2 + $0x240] sm:$0xff]  ;;  %v3703_v63 = vpack.c.bf16 %v3663_v59, %v3661_v55  ;;  %v1147_v5 = vmul.f32 0.99, %v891_v0  ;;  %v1404_v15 = vld [vmem:[#allocation2 + $0x270] sm:$0xff] }
 0x305   : > { %2812 = vst [vmem:[#allocation20 + $0x220] sm:$0xff] %v1906_v32  ;;  %v1912_v4 = vadd.f32 %v1656_v57, %v1144_v51  ;;  %v1146_v14 = vmul.f32 0.99, %v890_v6  ;;  %v1148_v19 = vmul.f32 0.99, %v892_v7  ;;  %v3664_v20 = vld [vmem:[#allocation7 + $0x180] sm:$0xff] }
 0x306   : > { %4043 = vmatpush1.bf16.msra.mxu1 %v3694_v29  ;;  %2811 = vst [vmem:[#allocation20 + $0x218] sm:$0xff] %v1905_v60  ;;  %v4696_v29 = vpack.c.bf16 %v1905_v60, %v1903_v53  ;;  %4888 = vmatmul.mubr.bf16.vlgmr.msra.gmra.mrb[4].mxu0 %v6981_v34  ;;  %v3656_v34 = vld [vmem:[#allocation7 + $0x140] sm:$0xff]  ;;  %v1654_v53 = vmul.f32 0.01, %v1398_v49  ;;  %v1660_v23 = vmul.f32 0.01, %v1404_v15 }
 0x307   : > { %4044 = vmatprep.subr.bf16.mxu1 %v3697_v41  ;;  %4928 = vmatprep.mubr.bf16.mxu0 %v6937_v44  ;;  %v887_v41 = vld [vmem:[#allocation13 + $0x248] sm:$0xff]  ;;  %v3700_v36 = vpack.c.bf16 %v3658_v28, %v3656_v34  ;;  %v4697_v44 = vpack.c.bf16 %v1908_v35, %v1906_v32  ;;  %v3660_v60 = vld [vmem:[#allocation7 + $0x160] sm:$0xff]  ;;  %2818 = vst [vmem:[#allocation20 + $0x250] sm:$0xff] %v1912_v4  ;;  %v1409_v35 = vld [vmem:[#allocation2 + $0x298] sm:$0xff] }
 0x308   : > { %4896 = vmatprep.subr.bf16.mxu0 %v4696_v29  ;;  %v1143_v25 = vmul.f32 0.99, %v887_v41  ;;  %v1910_v62 = vadd.f32 %v1654_v53, %v1142_v48  ;;  %v3702_v33 = vpack.c.bf16 %v3662_v61, %v3660_v60  ;;  %v1405_v29 = vld [vmem:[#allocation2 + $0x278] sm:$0xff]  ;;  %v895_v34 = vld [vmem:[#allocation13 + $0x288] sm:$0xff]  ;;  %v1914_v28 = vadd.f32 %v1658_v47, %v1146_v14  ;;  %v3668_v55 = vld [vmem:[#allocation7 + $0x1a0] sm:$0xff] }
 0x309   : > { %4897 = vmatpush1.bf16.msra.mxu0 %v4695_v16  ;;  %v1661_v12 = vmul.f32 0.01, %v1405_v29  ;;  %v3665_v16 = vld [vmem:[#allocation7 + $0x188] sm:$0xff]  ;;  %v3666_v26 = vld [vmem:[#allocation7 + $0x190] sm:$0xff]  ;;  %v1151_v30 = vmul.f32 0.99, %v895_v34  ;;  %v1916_v37 = vadd.f32 %v1660_v23, %v1148_v19  ;;  %v7993_v47 = vlaneseq }
 0x30a   : > { %4045 = vmatpush1.bf16.msra.mxu1 %v3696_v39  ;;  %v1401_v39 = vld [vmem:[#allocation2 + $0x258] sm:$0xff]  ;;  %4898 = vmatprep.subr.bf16.mxu0 %v4698_v31  ;;  %v1911_v50 = vadd.f32 %v1655_v45, %v1143_v25  ;;  %2816 = vst [vmem:[#allocation20 + $0x240] sm:$0xff] %v1910_v62  ;;  %v4699_v11 = vpack.c.bf16 %v1912_v4, %v1910_v62  ;;  %v1407_v32 = vld [vmem:[#allocation2 + $0x288] sm:$0xff]  ;;  %v1665_v40 = vmul.f32 0.01, %v1409_v35  ;;  %2820 = vst [vmem:[#allocation20 + $0x260] sm:$0xff] %v1914_v28 }
 0x30b   : > { %4046 = vmatprep.subr.bf16.mxu1 %v3699_v1  ;;  %v1657_v13 = vmul.f32 0.01, %v1401_v39  ;;  %v893_v1 = vld [vmem:[#allocation13 + $0x278] sm:$0xff]  ;;  %v3705_v24 = vpack.c.bf16 %v3667_v54, %v3665_v16  ;;  %v3704_v41 = vpack.c.bf16 %v3666_v26, %v3664_v20  ;;  %v1663_v39 = vmul.f32 0.01, %v1407_v32  ;;  %v894_v25 = vld [vmem:[#allocation13 + $0x280] sm:$0xff] }
 0x30c   : > { %2817 = vst [vmem:[#allocation20 + $0x248] sm:$0xff] %v1911_v50  ;;  %v1149_v8 = vmul.f32 0.99, %v893_v1  ;;  %v1150_v45 = vmul.f32 0.99, %v894_v25  ;;  %v1408_v46 = vld [vmem:[#allocation2 + $0x290] sm:$0xff]  ;;  %v4701_v48 = vpack.c.bf16 %v1916_v37, %v1914_v28 }
 0x30d   : > { %4899 = vmatpush1.bf16.msra.mxu0 %v4697_v44  ;;  %v1913_v56 = vadd.f32 %v1657_v13, %v1145_v43  ;;  %v896_v43 = vld [vmem:[#allocation13 + $0x290] sm:$0xff]  ;;  %v1406_v13 = vld [vmem:[#allocation2 + $0x280] sm:$0xff]  ;;  %2822 = vst [vmem:[#allocation20 + $0x270] sm:$0xff] %v1916_v37  ;;  %v1919_v49 = vadd.f32 %v1663_v39, %v1151_v30  ;;  %v3669_v52 = vld [vmem:[#allocation7 + $0x1a8] sm:$0xff]  ;;  %v1668_v20 = vmul.f32 0.01, %v1412_v10 }
 0x30e   : > { %4047 = vmatpush1.bf16.msra.mxu1 %v3698_v2  ;;  %v1403_v2 = vld [vmem:[#allocation2 + $0x268] sm:$0xff]  ;;  %v1917_v22 = vadd.f32 %v1661_v12, %v1149_v8  ;;  %v1152_v44 = vmul.f32 0.99, %v896_v43  ;;  %v1662_v51 = vmul.f32 0.01, %v1406_v13  ;;  %v3671_v53 = vld [vmem:[#allocation7 + $0x1b8] sm:$0xff] }
 0x30f   : > { %4048 = vmatprep.subr.bf16.mxu1 %v3701_v27  ;;  %2819 = vst [vmem:[#allocation20 + $0x258] sm:$0xff] %v1913_v56  ;;  %v4700_v3 = vpack.c.bf16 %v1913_v56, %v1911_v50  ;;  %v1659_v9 = vmul.f32 0.01, %v1403_v2  ;;  %v897_v27 = vld [vmem:[#allocation13 + $0x298] sm:$0xff]  ;;  %v1664_v56 = vmul.f32 0.01, %v1408_v46  ;;  %v3707_v57 = vpack.c.bf16 %v3671_v53, %v3669_v52 }
 0x310   : > { %v1153_v31 = vmul.f32 0.99, %v897_v27  ;;  %2823 = vst [vmem:[#allocation20 + $0x278] sm:$0xff] %v1917_v22  ;;  %v3670_v59 = vld [vmem:[#allocation7 + $0x1b0] sm:$0xff]  ;;  %v901_v61 = vld [vmem:[#allocation13 + $0x2b8] sm:$0xff]  ;;  %2825 = vst [vmem:[#allocation20 + $0x288] sm:$0xff] %v1919_v49 }
 0x311   : > { %4900 = vmatprep.subr.bf16.mxu0 %v4700_v3  ;;  %v1915_v18 = vadd.f32 %v1659_v9, %v1147_v5  ;;  %v899_v60 = vld [vmem:[#allocation13 + $0x2a8] sm:$0xff]  ;;  %v1413_v2 = vld [vmem:[#allocation2 + $0x2b8] sm:$0xff]  ;;  %v898_v3 = vld [vmem:[#allocation13 + $0x2a0] sm:$0xff]  ;;  %v1920_v4 = vadd.f32 %v1664_v56, %v1152_v44  ;;  %v1157_v5 = vmul.f32 0.99, %v901_v61 }
 0x312   : > { %4049 = vmatpush1.bf16.msra.mxu1 %v3700_v36  ;;  %4901 = vmatpush1.bf16.msra.mxu0 %v4699_v11  ;;  %v1921_v50 = vadd.f32 %v1665_v40, %v1153_v31  ;;  %v1155_v0 = vmul.f32 0.99, %v899_v60  ;;  %v1411_v1 = vld [vmem:[#allocation2 + $0x2a8] sm:$0xff]  ;;  %v1669_v6 = vmul.f32 0.01, %v1413_v2  ;;  %v900_v7 = vld [vmem:[#allocation13 + $0x2b0] sm:$0xff] }
 0x313   : > { %4050 = vmatprep.subr.bf16.mxu1 %v3703_v63  ;;  %2821 = vst [vmem:[#allocation20 + $0x268] sm:$0xff] %v1915_v18  ;;  %v4702_v36 = vpack.c.bf16 %v1917_v22, %v1915_v18  ;;  %v1918_v63 = vadd.f32 %v1662_v51, %v1150_v45  ;;  %v1667_v29 = vmul.f32 0.01, %v1411_v1  ;;  %v1154_v8 = vmul.f32 0.99, %v898_v3  ;;  %v1410_v9 = vld [vmem:[#allocation2 + $0x2a0] sm:$0xff] }
 0x314   : > { %2827 = vst [vmem:[#allocation20 + $0x298] sm:$0xff] %v1921_v50  ;;  %v4704_v62 = vpack.c.bf16 %v1921_v50, %v1919_v49  ;;  %2826 = vst [vmem:[#allocation20 + $0x290] sm:$0xff] %v1920_v4  ;;  %v1925_v14 = vadd.f32 %v1669_v6, %v1157_v5  ;;  %v1156_v15 = vmul.f32 0.99, %v900_v7  ;;  %v3673_v16 = vld [vmem:[#allocation7 + $0x1c8] sm:$0xff]  ;;  %v3675_v18 = vld [vmem:[#allocation7 + $0x1d8] sm:$0xff] }
 0x315   : > { %4902 = vmatprep.subr.bf16.mxu0 %v4702_v36  ;;  %2824 = vst [vmem:[#allocation20 + $0x280] sm:$0xff] %v1918_v63  ;;  %v4703_v11 = vpack.c.bf16 %v1920_v4, %v1918_v63  ;;  %v1923_v12 = vadd.f32 %v1667_v29, %v1155_v0  ;;  %v3672_v19 = vld [vmem:[#allocation7 + $0x1c0] sm:$0xff]  ;;  %v1666_v54 = vmul.f32 0.01, %v1410_v9  ;;  %v3709_v22 = vpack.c.bf16 %v3675_v18, %v3673_v16  ;;  %v3674_v23 = vld [vmem:[#allocation7 + $0x1d0] sm:$0xff]  ;;  %v3677_v49 = vld [vmem:[#allocation7 + $0x1e8] sm:$0xff] }
 0x316   : > { %4051 = vmatpush1.bf16.msra.mxu1 %v3702_v33  ;;  %4903 = vmatpush1.bf16.msra.mxu0 %v4701_v48  ;;  %v3706_v33 = vpack.c.bf16 %v3670_v59, %v3668_v55  ;;  %2831 = vst [vmem:[#allocation20 + $0x2b8] sm:$0xff] %v1925_v14  ;;  %v3708_v34 = vpack.c.bf16 %v3674_v23, %v3672_v19  ;;  %v905_v27 = vld [vmem:[#allocation13 + $0x2d8] sm:$0xff]  ;;  %v902_v37 = vld [vmem:[#allocation13 + $0x2c0] sm:$0xff]  ;;  %v904_v39 = vld [vmem:[#allocation13 + $0x2d0] sm:$0xff]  ;;  %v7186_v45 = vshrl.u32 %v7993_v47, 7 }
 0x317   : > { %4052 = vmatprep.subr.bf16.mxu1 %v3705_v24  ;;  %4904 = vmatprep.subr.bf16.mxu0 %v4704_v62  ;;  %v903_v24 = vld [vmem:[#allocation13 + $0x2c8] sm:$0xff]  ;;  %2829 = vst [vmem:[#allocation20 + $0x2a8] sm:$0xff] %v1923_v12  ;;  %v4706_v26 = vpack.c.bf16 %v1925_v14, %v1923_v12  ;;  %v1417_v30 = vld [vmem:[#allocation2 + $0x2d8] sm:$0xff]  ;;  %v1922_v31 = vadd.f32 %v1666_v54, %v1154_v8  ;;  %v1161_v35 = vmul.f32 0.99, %v905_v27  ;;  %v1414_v46 = vld [vmem:[#allocation2 + $0x2c0] sm:$0xff] }
 0x318   : > { %v1159_v28 = vmul.f32 0.99, %v903_v24  ;;  %v1924_v32 = vadd.f32 %v1668_v20, %v1156_v15  ;;  %v1673_v40 = vmul.f32 0.01, %v1417_v30  ;;  %v1158_v25 = vmul.f32 0.99, %v902_v37 }
 0x319   : > { %v1160_v43 = vmul.f32 0.99, %v904_v39  ;;  %8063 = vst [vmem:[#allocation37_spill] sm:$0xff] %v7186_v45  ;;  %2828 = vst [vmem:[#allocation20 + $0x2a0] sm:$0xff] %v1922_v31  ;;  %v1416_v48 = vld [vmem:[#allocation2 + $0x2d0] sm:$0xff]  ;;  %v3679_v53 = vld [vmem:[#allocation7 + $0x1f8] sm:$0xff] }
 0x31a   : > { %4053 = vmatpush1.bf16.msra.mxu1 %v3704_v41  ;;  %4905 = vmatpush1.bf16.msra.mxu0 %v4703_v11  ;;  %v1415_v41 = vld [vmem:[#allocation2 + $0x2c8] sm:$0xff]  ;;  %2830 = vst [vmem:[#allocation20 + $0x2b0] sm:$0xff] %v1924_v32  ;;  %v4705_v44 = vpack.c.bf16 %v1924_v32, %v1922_v31  ;;  %v1929_v50 = vadd.f32 %v1673_v40, %v1161_v35  ;;  %v1670_v51 = vmul.f32 0.01, %v1414_v46  ;;  %v1672_v52 = vmul.f32 0.01, %v1416_v48 }
 0x31b   : > { %4054 = vmatprep.subr.bf16.mxu1 %v3707_v57  ;;  %v1671_v36 = vmul.f32 0.01, %v1415_v41  ;;  %4906 = vmatprep.subr.bf16.mxu0 %v4706_v26  ;;  %v3676_v55 = vld [vmem:[#allocation7 + $0x1e0] sm:$0xff]  ;;  %v7189_v56 = vsub.s32 0, %v7186_v45  ;;  %v7192_v57 = vsub.s32 1, %v7186_v45  ;;  %v3711_v59 = vpack.c.bf16 %v3679_v53, %v3677_v49  ;;  %v3678_v60 = vld [vmem:[#allocation7 + $0x1f0] sm:$0xff] }
 0x31c   : > { %v907_v61 = vld [vmem:[#allocation13 + $0x2e8] sm:$0xff]  ;;  %v909_v62 = vld [vmem:[#allocation13 + $0x2f8] sm:$0xff]  ;;  %2835 = vst [vmem:[#allocation20 + $0x2d8] sm:$0xff] %v1929_v50  ;;  %v1928_v0 = vadd.f32 %v1672_v52, %v1160_v43  ;;  %v3710_v1 = vpack.c.bf16 %v3678_v60, %v3676_v55  ;;  %v906_v4 = vld [vmem:[#allocation13 + $0x2e0] sm:$0xff]  ;;  %vm3951_vm0 = vcmp.lt.s32.totalorder %v7186_v45, 2 }
 0x31d   : > { %v1927_v13 = vadd.f32 %v1671_v36, %v1159_v28  ;;  %v1419_v2 = vld [vmem:[#allocation2 + $0x2e8] sm:$0xff]  ;;  %v1421_v3 = vld [vmem:[#allocation2 + $0x2f8] sm:$0xff]  ;;  %v1163_v5 = vmul.f32 0.99, %v907_v61  ;;  %v1165_v29 = vmul.f32 0.99, %v909_v62 }
 0x31e   : > { %4055 = vmatpush1.bf16.msra.mxu1 %v3706_v33  ;;  %4907 = vmatpush1.bf16.msra.mxu0 %v4705_v44  ;;  %v1926_v33 = vadd.f32 %v1670_v51, %v1158_v25  ;;  %v1675_v6 = vmul.f32 0.01, %v1419_v2  ;;  %2834 = vst [vmem:[#allocation20 + $0x2d0] sm:$0xff] %v1928_v0  ;;  %v1677_v8 = vmul.f32 0.01, %v1421_v3  ;;  %v908_v9 = vld [vmem:[#allocation13 + $0x2f0] sm:$0xff] }
 0x31f   : > { %4056 = vmatprep.subr.bf16.mxu1 %v3709_v22  ;;  %2833 = vst [vmem:[#allocation20 + $0x2c8] sm:$0xff] %v1927_v13  ;;  %v4708_v63 = vpack.c.bf16 %v1929_v50, %v1927_v13  ;;  %v1162_v10 = vmul.f32 0.99, %v906_v4  ;;  %v1418_v11 = vld [vmem:[#allocation2 + $0x2e0] sm:$0xff]  ;;  %v1164_v14 = vmul.f32 0.99, %v908_v9 }
 0x320   : > { %2832 = vst [vmem:[#allocation20 + $0x2c0] sm:$0xff] %v1926_v33  ;;  %v4707_v7 = vpack.c.bf16 %v1928_v0, %v1926_v33  ;;  %v1931_v12 = vadd.f32 %v1675_v6, %v1163_v5  ;;  %v1420_v15 = vld [vmem:[#allocation2 + $0x2f0] sm:$0xff]  ;;  %v1674_v16 = vmul.f32 0.01, %v1418_v11  ;;  %v1933_v19 = vadd.f32 %v1677_v8, %v1165_v29  ;;  %v913_v20 = vld [vmem:[#allocation13 + $0x318] sm:$0xff]  ;;  %v1423_v23 = vld [vmem:[#allocation2 + $0x308] sm:$0xff] }
 0x321   : > { %4908 = vmatprep.subr.bf16.mxu0 %v4708_v63  ;;  %v911_v18 = vld [vmem:[#allocation13 + $0x308] sm:$0xff]  ;;  %v1676_v54 = vmul.f32 0.01, %v1420_v15  ;;  %v1169_v26 = vmul.f32 0.99, %v913_v20  ;;  %v910_v28 = vld [vmem:[#allocation13 + $0x300] sm:$0xff] }
 0x322   : > { %4057 = vmatpush1.bf16.msra.mxu1 %v3708_v34  ;;  %4909 = vmatpush1.bf16.msra.mxu0 %v4707_v7  ;;  %v1167_v22 = vmul.f32 0.99, %v911_v18  ;;  %2837 = vst [vmem:[#allocation20 + $0x2e8] sm:$0xff] %v1931_v12  ;;  %v1930_v24 = vadd.f32 %v1674_v16, %v1162_v10  ;;  %v1425_v34 = vld [vmem:[#allocation2 + $0x318] sm:$0xff]  ;;  %v1679_v27 = vmul.f32 0.01, %v1423_v23  ;;  %v4710_v41 = vpack.c.bf16 %v1933_v19, %v1931_v12 }
 0x323   : > { %4058 = vmatprep.subr.bf16.mxu1 %v3711_v59  ;;  %2839 = vst [vmem:[#allocation20 + $0x2f8] sm:$0xff] %v1933_v19  ;;  %v1932_v30 = vadd.f32 %v1676_v54, %v1164_v14  ;;  %v1681_v31 = vmul.f32 0.01, %v1425_v34  ;;  %v912_v32 = vld [vmem:[#allocation13 + $0x310] sm:$0xff]  ;;  %v1166_v35 = vmul.f32 0.99, %v910_v28 }
 0x324   : > { %v1422_v36 = vld [vmem:[#allocation2 + $0x300] sm:$0xff]  ;;  %2836 = vst [vmem:[#allocation20 + $0x2e0] sm:$0xff] %v1930_v24  ;;  %v1935_v37 = vadd.f32 %v1679_v27, %v1167_v22  ;;  %v1168_v39 = vmul.f32 0.99, %v912_v32  ;;  %v1424_v40 = vld [vmem:[#allocation2 + $0x310] sm:$0xff]  ;;  %4910 = vmatprep.subr.bf16.mxu0 %v4710_v41  ;;  %v1427_v50 = vld [vmem:[#allocation2 + $0x328] sm:$0xff] }
 0x325   : > { %v1678_v25 = vmul.f32 0.01, %v1422_v36  ;;  %v915_v43 = vld [vmem:[#allocation13 + $0x328] sm:$0xff]  ;;  %2838 = vst [vmem:[#allocation20 + $0x2f0] sm:$0xff] %v1932_v30  ;;  %v4709_v44 = vpack.c.bf16 %v1932_v30, %v1930_v24  ;;  %v1937_v13 = vadd.f32 %v1681_v31, %v1169_v26  ;;  %v1680_v46 = vmul.f32 0.01, %v1424_v40 }
 0x326   : > { %4059 = vmatpush1.bf16.msra.mxu1 %v3710_v1  ;;  %v917_v48 = vld [vmem:[#allocation13 + $0x338] sm:$0xff]  ;;  %v1171_v49 = vmul.f32 0.99, %v915_v43  ;;  %2841 = vst [vmem:[#allocation20 + $0x308] sm:$0xff] %v1935_v37  ;;  %v1683_v55 = vmul.f32 0.01, %v1427_v50 }
 0x327   : > { %v1934_v51 = vadd.f32 %v1678_v25, %v1166_v35  ;;  %v1173_v52 = vmul.f32 0.99, %v917_v48  ;;  %v1429_v53 = vld [vmem:[#allocation2 + $0x338] sm:$0xff]  ;;  %v914_v59 = vld [vmem:[#allocation13 + $0x320] sm:$0xff]  ;;  %4911 = vmatpush1.bf16.msra.mxu0 %v4709_v44  ;;  %2843 = vst [vmem:[#allocation20 + $0x318] sm:$0xff] %v1937_v13  ;;  %v4712_v60 = vpack.c.bf16 %v1937_v13, %v1935_v37  ;;  %v1936_v61 = vadd.f32 %v1680_v46, %v1168_v39  ;;  %v1428_v3 = vld [vmem:[#allocation2 + $0x330] sm:$0xff] }
 0x328   : > { %v1685_v62 = vmul.f32 0.01, %v1429_v53  ;;  %v916_v63 = vld [vmem:[#allocation13 + $0x330] sm:$0xff]  ;;  %v1170_v33 = vmul.f32 0.99, %v914_v59  ;;  %v1426_v0 = vld [vmem:[#allocation2 + $0x320] sm:$0xff]  ;;  %v1939_v1 = vadd.f32 %v1683_v55, %v1171_v49 }
 0x329   : > { %2840 = vst [vmem:[#allocation20 + $0x300] sm:$0xff] %v1934_v51  ;;  %v1172_v2 = vmul.f32 0.99, %v916_v63  ;;  %v1682_v4 = vmul.f32 0.01, %v1426_v0  ;;  %v919_v5 = vld [vmem:[#allocation13 + $0x348] sm:$0xff]  ;;  %4912 = vmatprep.subr.bf16.mxu0 %v4712_v60  ;;  %v4711_v29 = vpack.c.bf16 %v1936_v61, %v1934_v51 }
 0x32a   : > { %2842 = vst [vmem:[#allocation20 + $0x310] sm:$0xff] %v1936_v61  ;;  %v1941_v6 = vadd.f32 %v1685_v62, %v1173_v52  ;;  %v1684_v7 = vmul.f32 0.01, %v1428_v3  ;;  %v921_v8 = vld [vmem:[#allocation13 + $0x358] sm:$0xff]  ;;  %v1175_v9 = vmul.f32 0.99, %v919_v5 }
 0x32b   : > { %v1431_v10 = vld [vmem:[#allocation2 + $0x348] sm:$0xff]  ;;  %2845 = vst [vmem:[#allocation20 + $0x328] sm:$0xff] %v1939_v1  ;;  %v1938_v11 = vadd.f32 %v1682_v4, %v1170_v33  ;;  %v1177_v12 = vmul.f32 0.99, %v921_v8  ;;  %v1433_v14 = vld [vmem:[#allocation2 + $0x358] sm:$0xff]  ;;  %4913 = vmatpush1.bf16.msra.mxu0 %v4711_v29  ;;  %v1430_v23 = vld [vmem:[#allocation2 + $0x340] sm:$0xff] }
 0x32c   : > { %v1687_v15 = vmul.f32 0.01, %v1431_v10  ;;  %v918_v16 = vld [vmem:[#allocation13 + $0x340] sm:$0xff]  ;;  %2847 = vst [vmem:[#allocation20 + $0x338] sm:$0xff] %v1941_v6  ;;  %v4714_v18 = vpack.c.bf16 %v1941_v6, %v1939_v1  ;;  %v1940_v19 = vadd.f32 %v1684_v7, %v1172_v2  ;;  %v1689_v54 = vmul.f32 0.01, %v1433_v14 }
 0x32d   : > { %v920_v20 = vld [vmem:[#allocation13 + $0x350] sm:$0xff]  ;;  %v1174_v22 = vmul.f32 0.99, %v918_v16  ;;  %2844 = vst [vmem:[#allocation20 + $0x320] sm:$0xff] %v1938_v11  ;;  %v1686_v27 = vmul.f32 0.01, %v1430_v23 }
 0x32e   : > { %v1943_v24 = vadd.f32 %v1687_v15, %v1175_v9  ;;  %v1176_v26 = vmul.f32 0.99, %v920_v20  ;;  %v1432_v34 = vld [vmem:[#allocation2 + $0x350] sm:$0xff]  ;;  %4914 = vmatprep.subr.bf16.mxu0 %v4714_v18  ;;  %2846 = vst [vmem:[#allocation20 + $0x330] sm:$0xff] %v1940_v19  ;;  %v4713_v41 = vpack.c.bf16 %v1940_v19, %v1938_v11  ;;  %v1945_v30 = vadd.f32 %v1689_v54, %v1177_v12  ;;  %v925_v32 = vld [vmem:[#allocation13 + $0x378] sm:$0xff]  ;;  %v1435_v36 = vld [vmem:[#allocation2 + $0x368] sm:$0xff] }
 0x32f   : > { %v923_v28 = vld [vmem:[#allocation13 + $0x368] sm:$0xff]  ;;  %v1688_v31 = vmul.f32 0.01, %v1432_v34  ;;  %v1942_v37 = vadd.f32 %v1686_v27, %v1174_v22  ;;  %v1181_v39 = vmul.f32 0.99, %v925_v32  ;;  %v1437_v40 = vld [vmem:[#allocation2 + $0x378] sm:$0xff] }
 0x330   : > { %v1179_v35 = vmul.f32 0.99, %v923_v28  ;;  %2849 = vst [vmem:[#allocation20 + $0x348] sm:$0xff] %v1943_v24  ;;  %v1691_v25 = vmul.f32 0.01, %v1435_v36  ;;  %v922_v43 = vld [vmem:[#allocation13 + $0x360] sm:$0xff]  ;;  %4915 = vmatpush1.bf16.msra.mxu0 %v4713_v41  ;;  %v4716_v44 = vpack.c.bf16 %v1945_v30, %v1943_v24 }
 0x331   : > { %2851 = vst [vmem:[#allocation20 + $0x358] sm:$0xff] %v1945_v30  ;;  %v1944_v13 = vadd.f32 %v1688_v31, %v1176_v26  ;;  %v1693_v46 = vmul.f32 0.01, %v1437_v40  ;;  %v924_v48 = vld [vmem:[#allocation13 + $0x370] sm:$0xff]  ;;  %v1178_v49 = vmul.f32 0.99, %v922_v43 }
 0x332   : > { %v1434_v50 = vld [vmem:[#allocation2 + $0x360] sm:$0xff]  ;;  %2848 = vst [vmem:[#allocation20 + $0x340] sm:$0xff] %v1942_v37  ;;  %v1947_v51 = vadd.f32 %v1691_v25, %v1179_v35  ;;  %v1180_v52 = vmul.f32 0.99, %v924_v48  ;;  %v1436_v53 = vld [vmem:[#allocation2 + $0x370] sm:$0xff]  ;;  %4916 = vmatprep.subr.bf16.mxu0 %v4716_v44  ;;  %v1439_v0 = vld [vmem:[#allocation2 + $0x388] sm:$0xff] }
 0x333   : > { %v1690_v55 = vmul.f32 0.01, %v1434_v50  ;;  %v927_v59 = vld [vmem:[#allocation13 + $0x388] sm:$0xff]  ;;  %2850 = vst [vmem:[#allocation20 + $0x350] sm:$0xff] %v1944_v13  ;;  %v4715_v60 = vpack.c.bf16 %v1944_v13, %v1942_v37  ;;  %v1949_v61 = vadd.f32 %v1693_v46, %v1181_v39  ;;  %v1692_v62 = vmul.f32 0.01, %v1436_v53 }
 0x334   : > { %v929_v63 = vld [vmem:[#allocation13 + $0x398] sm:$0xff]  ;;  %v1183_v33 = vmul.f32 0.99, %v927_v59  ;;  %2853 = vst [vmem:[#allocation20 + $0x368] sm:$0xff] %v1947_v51  ;;  %v1695_v4 = vmul.f32 0.01, %v1439_v0 }
 0x335   : > { %v1946_v1 = vadd.f32 %v1690_v55, %v1178_v49  ;;  %v1185_v2 = vmul.f32 0.99, %v929_v63  ;;  %v1441_v3 = vld [vmem:[#allocation2 + $0x398] sm:$0xff]  ;;  %v926_v5 = vld [vmem:[#allocation13 + $0x380] sm:$0xff]  ;;  %4917 = vmatpush1.bf16.msra.mxu0 %v4715_v60  ;;  %2855 = vst [vmem:[#allocation20 + $0x378] sm:$0xff] %v1949_v61  ;;  %v4718_v29 = vpack.c.bf16 %v1949_v61, %v1947_v51  ;;  %v1948_v6 = vadd.f32 %v1692_v62, %v1180_v52  ;;  %v1440_v14 = vld [vmem:[#allocation2 + $0x390] sm:$0xff] }
 0x336   : > { %v1697_v7 = vmul.f32 0.01, %v1441_v3  ;;  %v928_v8 = vld [vmem:[#allocation13 + $0x390] sm:$0xff]  ;;  %v1182_v9 = vmul.f32 0.99, %v926_v5  ;;  %v1438_v10 = vld [vmem:[#allocation2 + $0x380] sm:$0xff]  ;;  %v1951_v11 = vadd.f32 %v1695_v4, %v1183_v33 }
 0x337   : > { %2852 = vst [vmem:[#allocation20 + $0x360] sm:$0xff] %v1946_v1  ;;  %v1184_v12 = vmul.f32 0.99, %v928_v8  ;;  %v1694_v15 = vmul.f32 0.01, %v1438_v10  ;;  %v931_v16 = vld [vmem:[#allocation13 + $0x3a8] sm:$0xff]  ;;  %4918 = vmatprep.subr.bf16.mxu0 %v4718_v29  ;;  %v4717_v18 = vpack.c.bf16 %v1948_v6, %v1946_v1 }
 0x338   : > { %2854 = vst [vmem:[#allocation20 + $0x370] sm:$0xff] %v1948_v6  ;;  %v1953_v19 = vadd.f32 %v1697_v7, %v1185_v2  ;;  %v1696_v54 = vmul.f32 0.01, %v1440_v14  ;;  %v933_v20 = vld [vmem:[#allocation13 + $0x3b8] sm:$0xff]  ;;  %v1187_v22 = vmul.f32 0.99, %v931_v16 }
 0x339   : > { %v1443_v23 = vld [vmem:[#allocation2 + $0x3a8] sm:$0xff]  ;;  %2857 = vst [vmem:[#allocation20 + $0x388] sm:$0xff] %v1951_v11  ;;  %v1950_v24 = vadd.f32 %v1694_v15, %v1182_v9  ;;  %v1189_v26 = vmul.f32 0.99, %v933_v20  ;;  %v1445_v34 = vld [vmem:[#allocation2 + $0x3b8] sm:$0xff]  ;;  %4919 = vmatpush1.bf16.msra.mxu0 %v4717_v18  ;;  %v1442_v36 = vld [vmem:[#allocation2 + $0x3a0] sm:$0xff] }
 0x33a   : > { %v1699_v27 = vmul.f32 0.01, %v1443_v23  ;;  %v930_v28 = vld [vmem:[#allocation13 + $0x3a0] sm:$0xff]  ;;  %2859 = vst [vmem:[#allocation20 + $0x398] sm:$0xff] %v1953_v19  ;;  %v4720_v41 = vpack.c.bf16 %v1953_v19, %v1951_v11  ;;  %v1952_v30 = vadd.f32 %v1696_v54, %v1184_v12  ;;  %v1701_v31 = vmul.f32 0.01, %v1445_v34 }
 0x33b   : > { %v932_v32 = vld [vmem:[#allocation13 + $0x3b0] sm:$0xff]  ;;  %v1186_v35 = vmul.f32 0.99, %v930_v28  ;;  %2856 = vst [vmem:[#allocation20 + $0x380] sm:$0xff] %v1950_v24  ;;  %v1698_v25 = vmul.f32 0.01, %v1442_v36 }
 0x33c   : > { %v1955_v37 = vadd.f32 %v1699_v27, %v1187_v22  ;;  %v1188_v39 = vmul.f32 0.99, %v932_v32  ;;  %v1444_v40 = vld [vmem:[#allocation2 + $0x3b0] sm:$0xff]  ;;  %4920 = vmatprep.subr.bf16.mxu0 %v4720_v41  ;;  %2858 = vst [vmem:[#allocation20 + $0x390] sm:$0xff] %v1952_v30  ;;  %v4719_v44 = vpack.c.bf16 %v1952_v30, %v1950_v24  ;;  %v1957_v13 = vadd.f32 %v1701_v31, %v1189_v26  ;;  %v937_v48 = vld [vmem:[#allocation13 + $0x3d8] sm:$0xff]  ;;  %v1447_v50 = vld [vmem:[#allocation2 + $0x3c8] sm:$0xff] }
 0x33d   : > { %v935_v43 = vld [vmem:[#allocation13 + $0x3c8] sm:$0xff]  ;;  %v1700_v46 = vmul.f32 0.01, %v1444_v40  ;;  %v1954_v51 = vadd.f32 %v1698_v25, %v1186_v35  ;;  %v1193_v52 = vmul.f32 0.99, %v937_v48  ;;  %v1449_v53 = vld [vmem:[#allocation2 + $0x3d8] sm:$0xff] }
 0x33e   : > { %v1191_v49 = vmul.f32 0.99, %v935_v43  ;;  %2861 = vst [vmem:[#allocation20 + $0x3a8] sm:$0xff] %v1955_v37  ;;  %v1703_v55 = vmul.f32 0.01, %v1447_v50  ;;  %v934_v59 = vld [vmem:[#allocation13 + $0x3c0] sm:$0xff]  ;;  %4921 = vmatpush1.bf16.msra.mxu0 %v4719_v44  ;;  %v4722_v60 = vpack.c.bf16 %v1957_v13, %v1955_v37 }
 0x33f   : > { %2863 = vst [vmem:[#allocation20 + $0x3b8] sm:$0xff] %v1957_v13  ;;  %v1956_v61 = vadd.f32 %v1700_v46, %v1188_v39  ;;  %v1705_v62 = vmul.f32 0.01, %v1449_v53  ;;  %v936_v63 = vld [vmem:[#allocation13 + $0x3d0] sm:$0xff]  ;;  %v1190_v33 = vmul.f32 0.99, %v934_v59 }
 0x340   : > { %v1446_v0 = vld [vmem:[#allocation2 + $0x3c0] sm:$0xff]  ;;  %2860 = vst [vmem:[#allocation20 + $0x3a0] sm:$0xff] %v1954_v51  ;;  %v1959_v1 = vadd.f32 %v1703_v55, %v1191_v49  ;;  %v1192_v2 = vmul.f32 0.99, %v936_v63  ;;  %v1448_v3 = vld [vmem:[#allocation2 + $0x3d0] sm:$0xff]  ;;  %4922 = vmatprep.subr.bf16.mxu0 %v4722_v60  ;;  %v1451_v10 = vld [vmem:[#allocation2 + $0x3e8] sm:$0xff] }
 0x341   : > { %v1702_v4 = vmul.f32 0.01, %v1446_v0  ;;  %v939_v5 = vld [vmem:[#allocation13 + $0x3e8] sm:$0xff]  ;;  %2862 = vst [vmem:[#allocation20 + $0x3b0] sm:$0xff] %v1956_v61  ;;  %v4721_v29 = vpack.c.bf16 %v1956_v61, %v1954_v51  ;;  %v1961_v6 = vadd.f32 %v1705_v62, %v1193_v52  ;;  %v1704_v7 = vmul.f32 0.01, %v1448_v3 }
 0x342   : > { %v941_v8 = vld [vmem:[#allocation13 + $0x3f8] sm:$0xff]  ;;  %v1195_v9 = vmul.f32 0.99, %v939_v5  ;;  %2865 = vst [vmem:[#allocation20 + $0x3c8] sm:$0xff] %v1959_v1  ;;  %v1707_v15 = vmul.f32 0.01, %v1451_v10 }
 0x343   : > { %v1958_v11 = vadd.f32 %v1702_v4, %v1190_v33  ;;  %v1197_v12 = vmul.f32 0.99, %v941_v8  ;;  %v1453_v14 = vld [vmem:[#allocation2 + $0x3f8] sm:$0xff]  ;;  %v938_v16 = vld [vmem:[#allocation13 + $0x3e0] sm:$0xff]  ;;  %4923 = vmatpush1.bf16.msra.mxu0 %v4721_v29  ;;  %2867 = vst [vmem:[#allocation20 + $0x3d8] sm:$0xff] %v1961_v6  ;;  %v4724_v18 = vpack.c.bf16 %v1961_v6, %v1959_v1  ;;  %v1960_v19 = vadd.f32 %v1704_v7, %v1192_v2  ;;  %v1452_v34 = vld [vmem:[#allocation2 + $0x3f0] sm:$0xff] }
 0x344   : > { %v1709_v54 = vmul.f32 0.01, %v1453_v14  ;;  %v940_v20 = vld [vmem:[#allocation13 + $0x3f0] sm:$0xff]  ;;  %v1194_v22 = vmul.f32 0.99, %v938_v16  ;;  %v1450_v23 = vld [vmem:[#allocation2 + $0x3e0] sm:$0xff]  ;;  %v1963_v24 = vadd.f32 %v1707_v15, %v1195_v9 }
 0x345   : > { %2864 = vst [vmem:[#allocation20 + $0x3c0] sm:$0xff] %v1958_v11  ;;  %v1196_v26 = vmul.f32 0.99, %v940_v20  ;;  %v1706_v27 = vmul.f32 0.01, %v1450_v23  ;;  %v943_v28 = vld [vmem:[#allocation13 + $0x408] sm:$0xff]  ;;  %4924 = vmatprep.subr.bf16.mxu0 %v4724_v18  ;;  %v4723_v41 = vpack.c.bf16 %v1960_v19, %v1958_v11 }
 0x346   : > { %2866 = vst [vmem:[#allocation20 + $0x3d0] sm:$0xff] %v1960_v19  ;;  %v1965_v30 = vadd.f32 %v1709_v54, %v1197_v12  ;;  %v1708_v31 = vmul.f32 0.01, %v1452_v34  ;;  %v945_v32 = vld [vmem:[#allocation13 + $0x418] sm:$0xff]  ;;  %v1199_v35 = vmul.f32 0.99, %v943_v28 }
 0x347   : > { %v1455_v36 = vld [vmem:[#allocation2 + $0x408] sm:$0xff]  ;;  %2869 = vst [vmem:[#allocation20 + $0x3e8] sm:$0xff] %v1963_v24  ;;  %v1962_v37 = vadd.f32 %v1706_v27, %v1194_v22  ;;  %v1201_v39 = vmul.f32 0.99, %v945_v32  ;;  %v1457_v40 = vld [vmem:[#allocation2 + $0x418] sm:$0xff]  ;;  %4925 = vmatpush1.bf16.msra.mxu0 %v4723_v41  ;;  %v1454_v50 = vld [vmem:[#allocation2 + $0x400] sm:$0xff] }
 0x348   : > { %v1711_v25 = vmul.f32 0.01, %v1455_v36  ;;  %v942_v43 = vld [vmem:[#allocation13 + $0x400] sm:$0xff]  ;;  %2871 = vst [vmem:[#allocation20 + $0x3f8] sm:$0xff] %v1965_v30  ;;  %v4726_v44 = vpack.c.bf16 %v1965_v30, %v1963_v24  ;;  %v1964_v13 = vadd.f32 %v1708_v31, %v1196_v26  ;;  %v1713_v46 = vmul.f32 0.01, %v1457_v40 }
 0x349   : > { %v944_v48 = vld [vmem:[#allocation13 + $0x410] sm:$0xff]  ;;  %v1198_v49 = vmul.f32 0.99, %v942_v43  ;;  %2868 = vst [vmem:[#allocation20 + $0x3e0] sm:$0xff] %v1962_v37  ;;  %v1710_v55 = vmul.f32 0.01, %v1454_v50 }
 0x34a   : > { %v1967_v51 = vadd.f32 %v1711_v25, %v1199_v35  ;;  %v1200_v52 = vmul.f32 0.99, %v944_v48  ;;  %v1456_v53 = vld [vmem:[#allocation2 + $0x410] sm:$0xff]  ;;  %4926 = vmatprep.subr.bf16.mxu0 %v4726_v44  ;;  %2870 = vst [vmem:[#allocation20 + $0x3f0] sm:$0xff] %v1964_v13  ;;  %v4725_v60 = vpack.c.bf16 %v1964_v13, %v1962_v37  ;;  %v1969_v61 = vadd.f32 %v1713_v46, %v1201_v39  ;;  %v949_v63 = vld [vmem:[#allocation13 + $0x438] sm:$0xff]  ;;  %v1459_v0 = vld [vmem:[#allocation2 + $0x428] sm:$0xff] }
 0x34b   : > { %v947_v59 = vld [vmem:[#allocation13 + $0x428] sm:$0xff]  ;;  %v1712_v62 = vmul.f32 0.01, %v1456_v53  ;;  %v1966_v1 = vadd.f32 %v1710_v55, %v1198_v49  ;;  %v1205_v2 = vmul.f32 0.99, %v949_v63  ;;  %v1461_v3 = vld [vmem:[#allocation2 + $0x438] sm:$0xff] }
 0x34c   : > { %v1203_v33 = vmul.f32 0.99, %v947_v59  ;;  %2873 = vst [vmem:[#allocation20 + $0x408] sm:$0xff] %v1967_v51  ;;  %v1715_v4 = vmul.f32 0.01, %v1459_v0  ;;  %v946_v5 = vld [vmem:[#allocation13 + $0x420] sm:$0xff]  ;;  %4927 = vmatpush1.bf16.msra.mxu0 %v4725_v60  ;;  %v4728_v29 = vpack.c.bf16 %v1969_v61, %v1967_v51 }
 0x34d   : > { %2875 = vst [vmem:[#allocation20 + $0x418] sm:$0xff] %v1969_v61  ;;  %v1968_v6 = vadd.f32 %v1712_v62, %v1200_v52  ;;  %v1717_v7 = vmul.f32 0.01, %v1461_v3  ;;  %v948_v8 = vld [vmem:[#allocation13 + $0x430] sm:$0xff]  ;;  %v1202_v9 = vmul.f32 0.99, %v946_v5 }
 0x34e   : > { %v1458_v10 = vld [vmem:[#allocation2 + $0x420] sm:$0xff]  ;;  %2872 = vst [vmem:[#allocation20 + $0x400] sm:$0xff] %v1966_v1  ;;  %v1971_v11 = vadd.f32 %v1715_v4, %v1203_v33  ;;  %v1204_v12 = vmul.f32 0.99, %v948_v8  ;;  %v1460_v14 = vld [vmem:[#allocation2 + $0x430] sm:$0xff]  ;;  %4937 = vmatprep.subr.bf16.mxu0 %v4728_v29  ;;  %v1463_v23 = vld [vmem:[#allocation2 + $0x448] sm:$0xff] }
 0x34f   : > { %v1714_v15 = vmul.f32 0.01, %v1458_v10  ;;  %v951_v16 = vld [vmem:[#allocation13 + $0x448] sm:$0xff]  ;;  %2874 = vst [vmem:[#allocation20 + $0x410] sm:$0xff] %v1968_v6  ;;  %v4727_v18 = vpack.c.bf16 %v1968_v6, %v1966_v1  ;;  %v1973_v19 = vadd.f32 %v1717_v7, %v1205_v2  ;;  %v1716_v54 = vmul.f32 0.01, %v1460_v14  ;;  %4929 = vmatmul.mubr.bf16.vlgmr.msra.gmra.mrb[4].mxu0 %v6945_v17 }
 0x350   : > { %v953_v20 = vld [vmem:[#allocation13 + $0x458] sm:$0xff]  ;;  %v1207_v22 = vmul.f32 0.99, %v951_v16  ;;  %2877 = vst [vmem:[#allocation20 + $0x428] sm:$0xff] %v1971_v11  ;;  %v1719_v27 = vmul.f32 0.01, %v1463_v23  ;;  %4969 = vmatprep.mubr.bf16.mxu0 %v6949_v21 }
 0x351   : > { %v1970_v24 = vadd.f32 %v1714_v15, %v1202_v9  ;;  %v1209_v26 = vmul.f32 0.99, %v953_v20  ;;  %v1465_v34 = vld [vmem:[#allocation2 + $0x458] sm:$0xff]  ;;  %v950_v28 = vld [vmem:[#allocation13 + $0x440] sm:$0xff]  ;;  %4938 = vmatpush1.bf16.msra.mxu0 %v4727_v18  ;;  %2879 = vst [vmem:[#allocation20 + $0x438] sm:$0xff] %v1973_v19  ;;  %v4730_v41 = vpack.c.bf16 %v1973_v19, %v1971_v11  ;;  %v1972_v30 = vadd.f32 %v1716_v54, %v1204_v12  ;;  %v1464_v17 = vld [vmem:[#allocation2 + $0x450] sm:$0xff] }
 0x352   : > { %v1721_v31 = vmul.f32 0.01, %v1465_v34  ;;  %v952_v32 = vld [vmem:[#allocation13 + $0x450] sm:$0xff]  ;;  %v1206_v35 = vmul.f32 0.99, %v950_v28  ;;  %v1462_v36 = vld [vmem:[#allocation2 + $0x440] sm:$0xff]  ;;  %v1975_v37 = vadd.f32 %v1719_v27, %v1207_v22 }
 0x353   : > { %2876 = vst [vmem:[#allocation20 + $0x420] sm:$0xff] %v1970_v24  ;;  %v1208_v39 = vmul.f32 0.99, %v952_v32  ;;  %v1718_v40 = vmul.f32 0.01, %v1462_v36  ;;  %v955_v25 = vld [vmem:[#allocation13 + $0x468] sm:$0xff]  ;;  %4939 = vmatprep.subr.bf16.mxu0 %v4730_v41  ;;  %v4729_v43 = vpack.c.bf16 %v1972_v30, %v1970_v24 }
 0x354   : > { %2878 = vst [vmem:[#allocation20 + $0x430] sm:$0xff] %v1972_v30  ;;  %v1977_v44 = vadd.f32 %v1721_v31, %v1209_v26  ;;  %v1720_v13 = vmul.f32 0.01, %v1464_v17  ;;  %v957_v46 = vld [vmem:[#allocation13 + $0x478] sm:$0xff]  ;;  %v1211_v48 = vmul.f32 0.99, %v955_v25 }
 0x355   : > { %v1467_v49 = vld [vmem:[#allocation2 + $0x468] sm:$0xff]  ;;  %2881 = vst [vmem:[#allocation20 + $0x448] sm:$0xff] %v1975_v37  ;;  %v1974_v50 = vadd.f32 %v1718_v40, %v1206_v35  ;;  %v1213_v51 = vmul.f32 0.99, %v957_v46  ;;  %v1469_v52 = vld [vmem:[#allocation2 + $0x478] sm:$0xff]  ;;  %4940 = vmatpush1.bf16.msra.mxu0 %v4729_v43  ;;  %v1466_v63 = vld [vmem:[#allocation2 + $0x460] sm:$0xff] }
 0x356   : > { %v1723_v53 = vmul.f32 0.01, %v1467_v49  ;;  %v954_v21 = vld [vmem:[#allocation13 + $0x460] sm:$0xff]  ;;  %2883 = vst [vmem:[#allocation20 + $0x458] sm:$0xff] %v1977_v44  ;;  %v4732_v55 = vpack.c.bf16 %v1977_v44, %v1975_v37  ;;  %v1976_v59 = vadd.f32 %v1720_v13, %v1208_v39  ;;  %v1725_v60 = vmul.f32 0.01, %v1469_v52 }
 0x357   : > { %v956_v61 = vld [vmem:[#allocation13 + $0x470] sm:$0xff]  ;;  %v1210_v62 = vmul.f32 0.99, %v954_v21  ;;  %2880 = vst [vmem:[#allocation20 + $0x440] sm:$0xff] %v1974_v50  ;;  %v1722_v2 = vmul.f32 0.01, %v1466_v63 }
 0x358   : > { %v1979_v33 = vadd.f32 %v1723_v53, %v1211_v48  ;;  %v1212_v0 = vmul.f32 0.99, %v956_v61  ;;  %v1468_v1 = vld [vmem:[#allocation2 + $0x470] sm:$0xff]  ;;  %4941 = vmatprep.subr.bf16.mxu0 %v4732_v55  ;;  %2882 = vst [vmem:[#allocation20 + $0x450] sm:$0xff] %v1976_v59  ;;  %v4731_v4 = vpack.c.bf16 %v1976_v59, %v1974_v50  ;;  %v1981_v5 = vadd.f32 %v1725_v60, %v1213_v51  ;;  %v961_v6 = vld [vmem:[#allocation13 + $0x498] sm:$0xff]  ;;  %v1471_v8 = vld [vmem:[#allocation2 + $0x488] sm:$0xff] }
 0x359   : > { %v959_v3 = vld [vmem:[#allocation13 + $0x488] sm:$0xff]  ;;  %v1724_v29 = vmul.f32 0.01, %v1468_v1  ;;  %v1978_v9 = vadd.f32 %v1722_v2, %v1210_v62  ;;  %v1217_v10 = vmul.f32 0.99, %v961_v6  ;;  %v1473_v11 = vld [vmem:[#allocation2 + $0x498] sm:$0xff] }
 0x35a   : > { %v1215_v7 = vmul.f32 0.99, %v959_v3  ;;  %2885 = vst [vmem:[#allocation20 + $0x468] sm:$0xff] %v1979_v33  ;;  %v1727_v12 = vmul.f32 0.01, %v1471_v8  ;;  %v958_v14 = vld [vmem:[#allocation13 + $0x480] sm:$0xff]  ;;  %4942 = vmatpush1.bf16.msra.mxu0 %v4731_v4  ;;  %v4734_v15 = vpack.c.bf16 %v1981_v5, %v1979_v33 }
 0x35b   : > { %2887 = vst [vmem:[#allocation20 + $0x478] sm:$0xff] %v1981_v5  ;;  %v1980_v16 = vadd.f32 %v1724_v29, %v1212_v0  ;;  %v1729_v18 = vmul.f32 0.01, %v1473_v11  ;;  %v960_v19 = vld [vmem:[#allocation13 + $0x490] sm:$0xff]  ;;  %v1214_v54 = vmul.f32 0.99, %v958_v14 }
 0x35c   : > { %v1470_v20 = vld [vmem:[#allocation2 + $0x480] sm:$0xff]  ;;  %2884 = vst [vmem:[#allocation20 + $0x460] sm:$0xff] %v1978_v9  ;;  %v1983_v22 = vadd.f32 %v1727_v12, %v1215_v7  ;;  %v1216_v23 = vmul.f32 0.99, %v960_v19  ;;  %v1472_v24 = vld [vmem:[#allocation2 + $0x490] sm:$0xff]  ;;  %4943 = vmatprep.subr.bf16.mxu0 %v4734_v15  ;;  %v1475_v32 = vld [vmem:[#allocation2 + $0x4a8] sm:$0xff] }
 0x35d   : > { %v1726_v26 = vmul.f32 0.01, %v1470_v20  ;;  %v963_v34 = vld [vmem:[#allocation13 + $0x4a8] sm:$0xff]  ;;  %2886 = vst [vmem:[#allocation20 + $0x470] sm:$0xff] %v1980_v16  ;;  %v4733_v27 = vpack.c.bf16 %v1980_v16, %v1978_v9  ;;  %v1985_v28 = vadd.f32 %v1729_v18, %v1217_v10  ;;  %v1728_v41 = vmul.f32 0.01, %v1472_v24 }
 0x35e   : > { %v965_v30 = vld [vmem:[#allocation13 + $0x4b8] sm:$0xff]  ;;  %v1219_v31 = vmul.f32 0.99, %v963_v34  ;;  %2889 = vst [vmem:[#allocation20 + $0x488] sm:$0xff] %v1983_v22  ;;  %v1731_v39 = vmul.f32 0.01, %v1475_v32 }
 0x35f   : > { %v1982_v35 = vadd.f32 %v1726_v26, %v1214_v54  ;;  %v1221_v36 = vmul.f32 0.99, %v965_v30  ;;  %v1477_v37 = vld [vmem:[#allocation2 + $0x4b8] sm:$0xff]  ;;  %v962_v17 = vld [vmem:[#allocation13 + $0x4a0] sm:$0xff]  ;;  %4944 = vmatpush1.bf16.msra.mxu0 %v4733_v27  ;;  %2891 = vst [vmem:[#allocation20 + $0x498] sm:$0xff] %v1985_v28  ;;  %v4736_v40 = vpack.c.bf16 %v1985_v28, %v1983_v22  ;;  %v1984_v25 = vadd.f32 %v1728_v41, %v1216_v23  ;;  %v1476_v50 = vld [vmem:[#allocation2 + $0x4b0] sm:$0xff] }
 0x360   : > { %v1733_v43 = vmul.f32 0.01, %v1477_v37  ;;  %v964_v44 = vld [vmem:[#allocation13 + $0x4b0] sm:$0xff]  ;;  %v1218_v13 = vmul.f32 0.99, %v962_v17  ;;  %v1474_v46 = vld [vmem:[#allocation2 + $0x4a0] sm:$0xff]  ;;  %v1987_v48 = vadd.f32 %v1731_v39, %v1219_v31 }
 0x361   : > { %2888 = vst [vmem:[#allocation20 + $0x480] sm:$0xff] %v1982_v35  ;;  %v1220_v49 = vmul.f32 0.99, %v964_v44  ;;  %v1730_v51 = vmul.f32 0.01, %v1474_v46  ;;  %v967_v52 = vld [vmem:[#allocation13 + $0x4c8] sm:$0xff]  ;;  %4945 = vmatprep.subr.bf16.mxu0 %v4736_v40  ;;  %v4735_v53 = vpack.c.bf16 %v1984_v25, %v1982_v35 }
 0x362   : > { %2890 = vst [vmem:[#allocation20 + $0x490] sm:$0xff] %v1984_v25  ;;  %v1989_v21 = vadd.f32 %v1733_v43, %v1221_v36  ;;  %v1732_v55 = vmul.f32 0.01, %v1476_v50  ;;  %v969_v59 = vld [vmem:[#allocation13 + $0x4d8] sm:$0xff]  ;;  %v1223_v60 = vmul.f32 0.99, %v967_v52 }
 0x363   : > { %v1479_v61 = vld [vmem:[#allocation2 + $0x4c8] sm:$0xff]  ;;  %2893 = vst [vmem:[#allocation20 + $0x4a8] sm:$0xff] %v1987_v48  ;;  %v1986_v62 = vadd.f32 %v1730_v51, %v1218_v13  ;;  %v1225_v63 = vmul.f32 0.99, %v969_v59  ;;  %v1481_v33 = vld [vmem:[#allocation2 + $0x4d8] sm:$0xff]  ;;  %4946 = vmatpush1.bf16.msra.mxu0 %v4735_v53  ;;  %v1478_v6 = vld [vmem:[#allocation2 + $0x4c0] sm:$0xff] }
 0x364   : > { %v1735_v0 = vmul.f32 0.01, %v1479_v61  ;;  %v966_v1 = vld [vmem:[#allocation13 + $0x4c0] sm:$0xff]  ;;  %2895 = vst [vmem:[#allocation20 + $0x4b8] sm:$0xff] %v1989_v21  ;;  %v4738_v2 = vpack.c.bf16 %v1989_v21, %v1987_v48  ;;  %v1988_v3 = vadd.f32 %v1732_v55, %v1220_v49  ;;  %v1737_v4 = vmul.f32 0.01, %v1481_v33 }
 0x365   : > { %v968_v5 = vld [vmem:[#allocation13 + $0x4d0] sm:$0xff]  ;;  %v1222_v29 = vmul.f32 0.99, %v966_v1  ;;  %2892 = vst [vmem:[#allocation20 + $0x4a0] sm:$0xff] %v1986_v62  ;;  %v1734_v10 = vmul.f32 0.01, %v1478_v6 }
 0x366   : > { %v1991_v7 = vadd.f32 %v1735_v0, %v1223_v60  ;;  %v1224_v8 = vmul.f32 0.99, %v968_v5  ;;  %v1480_v9 = vld [vmem:[#allocation2 + $0x4d0] sm:$0xff]  ;;  %4947 = vmatprep.subr.bf16.mxu0 %v4738_v2  ;;  %2894 = vst [vmem:[#allocation20 + $0x4b0] sm:$0xff] %v1988_v3  ;;  %v4737_v12 = vpack.c.bf16 %v1988_v3, %v1986_v62  ;;  %v1993_v14 = vadd.f32 %v1737_v4, %v1225_v63  ;;  %v973_v16 = vld [vmem:[#allocation13 + $0x4f8] sm:$0xff]  ;;  %v1483_v19 = vld [vmem:[#allocation2 + $0x4e8] sm:$0xff] }
 0x367   : > { %v971_v11 = vld [vmem:[#allocation13 + $0x4e8] sm:$0xff]  ;;  %v1736_v15 = vmul.f32 0.01, %v1480_v9  ;;  %v1990_v54 = vadd.f32 %v1734_v10, %v1222_v29  ;;  %v1229_v20 = vmul.f32 0.99, %v973_v16  ;;  %v1485_v22 = vld [vmem:[#allocation2 + $0x4f8] sm:$0xff] }
 0x368   : > { %v1227_v18 = vmul.f32 0.99, %v971_v11  ;;  %2897 = vst [vmem:[#allocation20 + $0x4c8] sm:$0xff] %v1991_v7  ;;  %v1739_v23 = vmul.f32 0.01, %v1483_v19  ;;  %v970_v24 = vld [vmem:[#allocation13 + $0x4e0] sm:$0xff]  ;;  %4948 = vmatpush1.bf16.msra.mxu0 %v4737_v12  ;;  %v4740_v34 = vpack.c.bf16 %v1993_v14, %v1991_v7 }
 0x369   : > { %v7200_v26 = vld [vmem:[%s8064_s21] sm:$0x3]  ;;  %2899 = vst [vmem:[#allocation20 + $0x4d8] sm:$0xff] %v1993_v14  ;;  %v1992_v27 = vadd.f32 %v1736_v15, %v1224_v8  ;;  %v1741_v28 = vmul.f32 0.01, %v1485_v22  ;;  %v972_v41 = vld [vmem:[#allocation13 + $0x4f0] sm:$0xff] }
 0x36a   : > { %v1226_v30 = vmul.f32 0.99, %v970_v24  ;;  %v1482_v31 = vld [vmem:[#allocation2 + $0x4e0] sm:$0xff]  ;;  %2896 = vst [vmem:[#allocation20 + $0x4c0] sm:$0xff] %v1990_v54  ;;  %v1995_v32 = vadd.f32 %v1739_v23, %v1227_v18  ;;  %v1228_v35 = vmul.f32 0.99, %v972_v41  ;;  %4949 = vmatprep.subr.bf16.mxu0 %v4740_v34  ;;  %v4002_v62 = vrot.slane %v7200_v26, %v7189_v56 }
 0x36b   : > { %v1484_v36 = vld [vmem:[#allocation2 + $0x4f0] sm:$0xff]  ;;  %v1738_v37 = vmul.f32 0.01, %v1482_v31  ;;  %2898 = vst [vmem:[#allocation20 + $0x4d0] sm:$0xff] %v1992_v27  ;;  %v4739_v17 = vpack.c.bf16 %v1992_v27, %v1990_v54  ;;  %v1997_v40 = vadd.f32 %v1741_v28, %v1229_v20  ;;  %v977_v43 = vld [vmem:[#allocation13 + $0x518] sm:$0xff]  ;;  %v1487_v13 = vld [vmem:[#allocation2 + $0x508] sm:$0xff]  ;;  %v4006_v8 = vrot.slane %v7200_v26, %v7192_v57 }
 0x36c   : > { %v975_v39 = vld [vmem:[#allocation13 + $0x508] sm:$0xff]  ;;  %v1740_v25 = vmul.f32 0.01, %v1484_v36  ;;  %2901 = vst [vmem:[#allocation20 + $0x4e8] sm:$0xff] %v1995_v32  ;;  %v1233_v48 = vmul.f32 0.99, %v977_v43 }
 0x36d   : > { %v1231_v44 = vmul.f32 0.99, %v975_v39  ;;  %v1994_v46 = vadd.f32 %v1738_v37, %v1226_v30  ;;  %v1489_v49 = vld [vmem:[#allocation2 + $0x518] sm:$0xff]  ;;  %v1743_v50 = vmul.f32 0.01, %v1487_v13  ;;  %v974_v51 = vld [vmem:[#allocation13 + $0x500] sm:$0xff]  ;;  %4950 = vmatpush1.bf16.msra.mxu0 %v4739_v17  ;;  %v4742_v53 = vpack.c.bf16 %v1997_v40, %v1995_v32 }
 0x36e   : > { %v7202_v52 = vld [vmem:[#allocation5] sm:$0x3]  ;;  %2903 = vst [vmem:[#allocation20 + $0x4f8] sm:$0xff] %v1997_v40  ;;  %v1996_v21 = vadd.f32 %v1740_v25, %v1228_v35  ;;  %v1745_v55 = vmul.f32 0.01, %v1489_v49  ;;  %v976_v59 = vld [vmem:[#allocation13 + $0x510] sm:$0xff] }
 0x36f   : > { %v1230_v60 = vmul.f32 0.99, %v974_v51  ;;  %v1486_v61 = vld [vmem:[#allocation2 + $0x500] sm:$0xff]  ;;  %2900 = vst [vmem:[#allocation20 + $0x4e0] sm:$0xff] %v1994_v46  ;;  %v1999_v63 = vadd.f32 %v1743_v50, %v1231_v44  ;;  %v1232_v33 = vmul.f32 0.99, %v976_v59  ;;  %4951 = vmatprep.subr.bf16.mxu0 %v4742_v53  ;;  %v4015_v23 = vrot.slane %v7202_v52, %v7189_v56 }
 0x370   : > { %v1488_v0 = vld [vmem:[#allocation2 + $0x510] sm:$0xff]  ;;  %v1742_v1 = vmul.f32 0.01, %v1486_v61  ;;  %2902 = vst [vmem:[#allocation20 + $0x4f0] sm:$0xff] %v1996_v21  ;;  %v4741_v3 = vpack.c.bf16 %v1996_v21, %v1994_v46  ;;  %v2001_v4 = vadd.f32 %v1745_v55, %v1233_v48  ;;  %v981_v29 = vld [vmem:[#allocation13 + $0x538] sm:$0xff]  ;;  %v1491_v7 = vld [vmem:[#allocation2 + $0x528] sm:$0xff] }
 0x371   : > { %v979_v2 = vld [vmem:[#allocation13 + $0x528] sm:$0xff]  ;;  %v1744_v5 = vmul.f32 0.01, %v1488_v0  ;;  %2905 = vst [vmem:[#allocation20 + $0x508] sm:$0xff] %v1999_v63  ;;  %v1237_v10 = vmul.f32 0.99, %v981_v29 }
 0x372   : > { %v1235_v6 = vmul.f32 0.99, %v979_v2  ;;  %v1998_v9 = vadd.f32 %v1742_v1, %v1230_v60  ;;  %v1493_v11 = vld [vmem:[#allocation2 + $0x538] sm:$0xff]  ;;  %v1747_v12 = vmul.f32 0.01, %v1491_v7  ;;  %v978_v14 = vld [vmem:[#allocation13 + $0x520] sm:$0xff]  ;;  %4952 = vmatpush1.bf16.msra.mxu0 %v4741_v3  ;;  %v4744_v16 = vpack.c.bf16 %v2001_v4, %v1999_v63 }
 0x373   : > { %2907 = vst [vmem:[#allocation20 + $0x518] sm:$0xff] %v2001_v4  ;;  %v2000_v18 = vadd.f32 %v1744_v5, %v1232_v33  ;;  %v1749_v19 = vmul.f32 0.01, %v1493_v11  ;;  %v980_v54 = vld [vmem:[#allocation13 + $0x530] sm:$0xff]  ;;  %v1234_v20 = vmul.f32 0.99, %v978_v14 }
 0x374   : > { %2904 = vst [vmem:[#allocation20 + $0x500] sm:$0xff] %v1998_v9  ;;  %v2003_v34 = vadd.f32 %v1747_v12, %v1235_v6  ;;  %v1236_v27 = vmul.f32 0.99, %v980_v54  ;;  %v1490_v28 = vld [vmem:[#allocation2 + $0x520] sm:$0xff]  ;;  %v1492_v41 = vld [vmem:[#allocation2 + $0x530] sm:$0xff]  ;;  %4953 = vmatprep.subr.bf16.mxu0 %v4744_v16  ;;  %v1495_v13 = vld [vmem:[#allocation2 + $0x548] sm:$0xff] }
 0x375   : > { %2906 = vst [vmem:[#allocation20 + $0x510] sm:$0xff] %v2000_v18  ;;  %v4743_v36 = vpack.c.bf16 %v2000_v18, %v1998_v9  ;;  %v983_v37 = vld [vmem:[#allocation13 + $0x548] sm:$0xff]  ;;  %v2005_v25 = vadd.f32 %v1749_v19, %v1237_v10  ;;  %v1746_v43 = vmul.f32 0.01, %v1490_v28  ;;  %v985_v44 = vld [vmem:[#allocation13 + $0x558] sm:$0xff]  ;;  %v982_v60 = vld [vmem:[#allocation13 + $0x540] sm:$0xff] }
 0x376   : > { %2909 = vst [vmem:[#allocation20 + $0x528] sm:$0xff] %v2003_v34  ;;  %v1748_v49 = vmul.f32 0.01, %v1492_v41  ;;  %v1239_v50 = vmul.f32 0.99, %v983_v37  ;;  %v1497_v51 = vld [vmem:[#allocation2 + $0x558] sm:$0xff] }
 0x377   : > { %4954 = vmatpush1.bf16.msra.mxu0 %v4743_v36  ;;  %2911 = vst [vmem:[#allocation20 + $0x538] sm:$0xff] %v2005_v25  ;;  %v4746_v55 = vpack.c.bf16 %v2005_v25, %v2003_v34  ;;  %v2002_v59 = vadd.f32 %v1746_v43, %v1234_v20  ;;  %v1241_v0 = vmul.f32 0.99, %v985_v44  ;;  %v984_v1 = vld [vmem:[#allocation13 + $0x550] sm:$0xff]  ;;  %v1751_v4 = vmul.f32 0.01, %v1495_v13 }
 0x378   : > { %v2004_v33 = vadd.f32 %v1748_v49, %v1236_v27  ;;  %v1753_v5 = vmul.f32 0.01, %v1497_v51  ;;  %v1494_v29 = vld [vmem:[#allocation2 + $0x540] sm:$0xff]  ;;  %v1238_v10 = vmul.f32 0.99, %v982_v60  ;;  %v1496_v11 = vld [vmem:[#allocation2 + $0x550] sm:$0xff] }
 0x379   : > { %4955 = vmatprep.subr.bf16.mxu0 %v4746_v55  ;;  %2908 = vst [vmem:[#allocation20 + $0x520] sm:$0xff] %v2002_v59  ;;  %v2007_v16 = vadd.f32 %v1751_v4, %v1239_v50  ;;  %v987_v19 = vld [vmem:[#allocation13 + $0x568] sm:$0xff]  ;;  %v1750_v34 = vmul.f32 0.01, %v1494_v29  ;;  %v989_v27 = vld [vmem:[#allocation13 + $0x578] sm:$0xff]  ;;  %v986_v13 = vld [vmem:[#allocation13 + $0x560] sm:$0xff] }
 0x37a   : > { %2910 = vst [vmem:[#allocation20 + $0x530] sm:$0xff] %v2004_v33  ;;  %v4745_v9 = vpack.c.bf16 %v2004_v33, %v2002_v59  ;;  %v2009_v18 = vadd.f32 %v1753_v5, %v1241_v0  ;;  %v1245_v44 = vmul.f32 0.99, %v989_v27  ;;  %v988_v59 = vld [vmem:[#allocation13 + $0x570] sm:$0xff]  ;;  %v1498_v60 = vld [vmem:[#allocation2 + $0x560] sm:$0xff]  ;;  %v1503_v4 = vld [vmem:[#allocation2 + $0x588] sm:$0xff] }
 0x37b   : > { %2913 = vst [vmem:[#allocation20 + $0x548] sm:$0xff] %v2007_v16  ;;  %v1504_v27 = vld [vmem:[#allocation2 + $0x590] sm:$0xff] }
 0x37c   : > { %4956 = vmatpush1.bf16.msra.mxu0 %v4745_v9  ;;  %2915 = vst [vmem:[#allocation20 + $0x558] sm:$0xff] %v2009_v18  ;;  %v1505_v9 = vld [vmem:[#allocation2 + $0x598] sm:$0xff] }
 0x3bc   : > { %v7208_v15 = vpop.f32.mrb[4].mxu1 }
 0x3bd   : > { %v3952_v22 = vsel %vm3951_vm0, %v7208_v15, 0.0  ;;  %v7215_v24 = vpop.f32.mrb[5].mxu1 }
 0x3be   : > { %v3954_v30 = vrot.slane %v3952_v22, 4  ;;  %v3968_v31 = vmul.f32 %v3952_v22, %v3952_v22  ;;  %v3953_v32 = vsel %vm3951_vm0, %v7215_v24, 0.0  ;;  %v3946_v35 = vpop.f32.mrb[6].mxu1 }
 0x3bf   : > { %v3960_v39 = vrot.slane %v3953_v32, 4  ;;  %v3969_v17 = vmul.f32 %v3953_v32, %v3953_v32  ;;  %v3947_v40 = vpop.f32.mrb[7].mxu1  ;;  %v1501_v35 = vld [vmem:[#allocation2 + $0x578] sm:$0xff] }
 0x3c0   : > { %v3955_v46 = vadd.f32 %v3954_v30, %v3952_v22  ;;  %v3970_v48 = vrot.slane %v3968_v31, 4  ;;  %v1240_v22 = vmul.f32 0.99, %v984_v1  ;;  %v4748_v30 = vpack.c.bf16 %v2009_v18, %v2007_v16 }
 0x3c1   : > { %v3961_v53 = vadd.f32 %v3960_v39, %v3953_v32  ;;  %v3976_v21 = vrot.slane %v3969_v17, 4  ;;  %v1499_v32 = vld [vmem:[#allocation2 + $0x568] sm:$0xff]  ;;  %v2006_v39 = vadd.f32 %v1750_v34, %v1238_v10  ;;  %v1757_v50 = vmul.f32 0.01, %v1501_v35  ;;  %v1502_v34 = vld [vmem:[#allocation2 + $0x580] sm:$0xff] }
 0x3c2   : > { %v3956_v61 = vrot.slane %v3955_v46, 2  ;;  %v3971_v63 = vadd.f32 %v3970_v48, %v3968_v31  ;;  %v1752_v31 = vmul.f32 0.01, %v1496_v11  ;;  %4957 = vmatprep.subr.bf16.mxu0 %v4748_v30  ;;  %v1755_v49 = vmul.f32 0.01, %v1499_v32  ;;  %v990_v10 = vld [vmem:[#allocation13 + $0x580] sm:$0xff] }
 0x3c3   : > { %v3962_v2 = vrot.slane %v3961_v53, 2  ;;  %v3977_v3 = vadd.f32 %v3976_v21, %v3969_v17  ;;  %v1243_v17 = vmul.f32 0.99, %v987_v19  ;;  %2912 = vst [vmem:[#allocation20 + $0x540] sm:$0xff] %v2006_v39  ;;  %v4019_v21 = vrot.slane %v7202_v52, %v7192_v57  ;;  %v992_v11 = vld [vmem:[#allocation13 + $0x590] sm:$0xff]  ;;  %v995_v32 = vld [vmem:[#allocation13 + $0x5a8] sm:$0xff] }
 0x3c4   : > { %v3957_v6 = vadd.f32 %v3956_v61, %v3955_v46  ;;  %v3972_v7 = vrot.slane %v3971_v63, 2  ;;  %v2008_v43 = vadd.f32 %v1752_v31, %v1240_v22  ;;  %v1500_v61 = vld [vmem:[#allocation2 + $0x570] sm:$0xff]  ;;  %v1242_v1 = vmul.f32 0.99, %v986_v13  ;;  %v997_v35 = vld [vmem:[#allocation13 + $0x5b8] sm:$0xff] }
 0x3c5   : > { %v3963_v12 = vadd.f32 %v3962_v2, %v3961_v53  ;;  %v3978_v14 = vrot.slane %v3977_v3, 2  ;;  %v2011_v0 = vadd.f32 %v1755_v49, %v1243_v17  ;;  %v991_v2 = vld [vmem:[#allocation13 + $0x588] sm:$0xff]  ;;  %v1754_v16 = vmul.f32 0.01, %v1498_v60 }
 0x3c6   : > { %v3958_v54 = vrot.slane %v3957_v6, 1  ;;  %v3973_v20 = vadd.f32 %v3972_v7, %v3971_v63  ;;  %2914 = vst [vmem:[#allocation20 + $0x550] sm:$0xff] %v2008_v43  ;;  %v4747_v55 = vpack.c.bf16 %v2008_v43, %v2006_v39  ;;  %v2013_v7 = vadd.f32 %v1757_v50, %v1245_v44  ;;  %v994_v43 = vld [vmem:[#allocation13 + $0x5a0] sm:$0xff]  ;;  %v996_v44 = vld [vmem:[#allocation13 + $0x5b0] sm:$0xff] }
 0x3c7   : > { %v3964_v28 = vrot.slane %v3963_v12, 1  ;;  %v3979_v41 = vadd.f32 %v3978_v14, %v3977_v3  ;;  %v993_v3 = vld [vmem:[#allocation13 + $0x598] sm:$0xff]  ;;  %2917 = vst [vmem:[#allocation20 + $0x568] sm:$0xff] %v2011_v0  ;;  %v1244_v14 = vmul.f32 0.99, %v988_v59  ;;  %v999_v59 = vld [vmem:[#allocation13 + $0x5c8] sm:$0xff] }
 0x3c8   : > { %v3959_v36 = vadd.f32 %v3958_v54, %v3957_v6  ;;  %v3974_v37 = vrot.slane %v3973_v20, 1  ;;  %4958 = vmatpush1.bf16.msra.mxu0 %v4747_v55  ;;  %v1756_v18 = vmul.f32 0.01, %v1500_v61  ;;  %2919 = vst [vmem:[#allocation20 + $0x578] sm:$0xff] %v2013_v7  ;;  %v4750_v54 = vpack.c.bf16 %v2013_v7, %v2011_v0  ;;  %v1508_v55 = vld [vmem:[#allocation2 + $0x5b0] sm:$0xff]  ;;  %v1001_v0 = vld [vmem:[#allocation13 + $0x5d8] sm:$0xff] }
 0x3c9   : > { %v3965_v40 = vadd.f32 %v3964_v28, %v3963_v12  ;;  %v3980_v25 = vrot.slane %v3979_v41, 1  ;;  %v1249_v22 = vmul.f32 0.99, %v993_v3  ;;  %v1759_v31 = vmul.f32 0.01, %v1503_v4 }
 0x3ca   : > { %v7220_v46 = vmul.f32 0.5, %v3959_v36  ;;  %v3975_v48 = vadd.f32 %v3974_v37, %v3973_v20  ;;  %v1247_v20 = vmul.f32 0.99, %v991_v2  ;;  %v2012_v30 = vadd.f32 %v1756_v18, %v1244_v14  ;;  %v1507_v36 = vld [vmem:[#allocation2 + $0x5a8] sm:$0xff]  ;;  %4959 = vmatprep.subr.bf16.mxu0 %v4750_v54  ;;  %v1513_v2 = vld [vmem:[#allocation2 + $0x5d8] sm:$0xff]  ;;  %v1512_v54 = vld [vmem:[#allocation2 + $0x5d0] sm:$0xff] }
 0x3cb   : > { %v7222_v51 = vmul.f32 0.5, %v3965_v40  ;;  %v3981_v53 = vadd.f32 %v3980_v25, %v3979_v41  ;;  %v2010_v41 = vadd.f32 %v1754_v16, %v1242_v1  ;;  %v1761_v17 = vmul.f32 0.01, %v1505_v9  ;;  %v1509_v25 = vld [vmem:[#allocation2 + $0x5b8] sm:$0xff]  ;;  %v1511_v1 = vld [vmem:[#allocation2 + $0x5c8] sm:$0xff] }
 0x3cc   : > { %v3982_v63 = vmul.f32 0.5, %v3975_v48  ;;  %v3984_v33 = vmul.f32 %v7220_v46, %v7220_v46  ;;  %v3990_v5 = vsub.f32 %v7208_v15, %v7220_v46  ;;  %v1246_v40 = vmul.f32 0.99, %v990_v10  ;;  %2918 = vst [vmem:[#allocation20 + $0x570] sm:$0xff] %v2012_v30  ;;  %v998_v10 = vld [vmem:[#allocation13 + $0x5c0] sm:$0xff]  ;;  %v1525_v15 = vld [vmem:[#allocation2 + $0x638] sm:$0xff] }
 0x3cd   : > { %v3983_v29 = vmul.f32 0.5, %v3981_v53  ;;  %v3985_v6 = vmul.f32 %v7222_v51, %v7222_v51  ;;  %v3991_v39 = vsub.f32 %v7215_v24, %v7222_v51  ;;  %2916 = vst [vmem:[#allocation20 + $0x560] sm:$0xff] %v2010_v41  ;;  %v4749_v48 = vpack.c.bf16 %v2012_v30, %v2010_v41  ;;  %v1506_v53 = vld [vmem:[#allocation2 + $0x5a0] sm:$0xff]  ;;  %v1515_v30 = vld [vmem:[#allocation2 + $0x5e8] sm:$0xff] }
 0x3ce   : > { %v3986_v12 = vsub.f32 %v3982_v63, %v3984_v33  ;;  %v2015_v49 = vadd.f32 %v1759_v31, %v1247_v20  ;;  %v1248_v50 = vmul.f32 0.99, %v992_v11  ;;  %v2017_v61 = vadd.f32 %v1761_v17, %v1249_v22  ;;  %v1000_v11 = vld [vmem:[#allocation13 + $0x5d0] sm:$0xff]  ;;  %v1003_v20 = vld [vmem:[#allocation13 + $0x5e8] sm:$0xff]  ;;  %v1005_v22 = vld [vmem:[#allocation13 + $0x5f8] sm:$0xff] }
 0x3cf   : > { %v3987_v19 = vsub.f32 %v3983_v29, %v3985_v6  ;;  %v1758_v63 = vmul.f32 0.01, %v1502_v34  ;;  %v1760_v33 = vmul.f32 0.01, %v1504_v27  ;;  %4960 = vmatpush1.bf16.msra.mxu0 %v4749_v48  ;;  %v1251_v3 = vmul.f32 0.99, %v995_v32 }
 0x3d0   : > { %v3988_v28 = vmax.f32 %v3986_v12, 0.0  ;;  %2921 = vst [vmem:[#allocation20 + $0x588] sm:$0xff] %v2015_v49  ;;  %v1253_v4 = vmul.f32 0.99, %v997_v35  ;;  %v1763_v29 = vmul.f32 0.01, %v1507_v36  ;;  %v4752_v6 = vpack.c.bf16 %v2017_v61, %v2015_v49 }
 0x3d1   : > { %v3989_v37 = vmax.f32 %v3987_v19, 0.0  ;;  %2923 = vst [vmem:[#allocation20 + $0x598] sm:$0xff] %v2017_v61  ;;  %v2014_v7 = vadd.f32 %v1758_v63, %v1246_v40  ;;  %v2016_v9 = vadd.f32 %v1760_v33, %v1248_v50  ;;  %v1510_v12 = vld [vmem:[#allocation2 + $0x5c0] sm:$0xff]  ;;  %v1765_v14 = vmul.f32 0.01, %v1509_v25  ;;  %v1517_v31 = vld [vmem:[#allocation2 + $0x5f8] sm:$0xff] }
 0x3d2   : > { %v3992_v13 = vadd.f32 1e-05, %v3988_v28  ;;  %v2019_v16 = vadd.f32 %v1763_v29, %v1251_v3  ;;  %v1250_v18 = vmul.f32 0.99, %v994_v43  ;;  %v1252_v19 = vmul.f32 0.99, %v996_v44  ;;  %4961 = vmatprep.subr.bf16.mxu0 %v4752_v6 }
 0x3d3   : > { %v3993_v60 = vadd.f32 1e-05, %v3989_v37  ;;  %2920 = vst [vmem:[#allocation20 + $0x580] sm:$0xff] %v2014_v7  ;;  %2922 = vst [vmem:[#allocation20 + $0x590] sm:$0xff] %v2016_v9  ;;  %v4751_v34 = vpack.c.bf16 %v2016_v9, %v2014_v7  ;;  %v1762_v27 = vmul.f32 0.01, %v1506_v53  ;;  %v2021_v32 = vadd.f32 %v1765_v14, %v1253_v4 }
 0x3d4   : > { %5946 = vrsqrt.f32 %v3992_v13  ;;  %v1764_v28 = vmul.f32 0.01, %v1508_v55  ;;  %v1255_v41 = vmul.f32 0.99, %v999_v59  ;;  %2925 = vst [vmem:[#allocation20 + $0x5a8] sm:$0xff] %v2019_v16  ;;  %v1002_v17 = vld [vmem:[#allocation13 + $0x5e0] sm:$0xff] }
 0x3d5   : > { %5948 = vrsqrt.f32 %v3993_v60  ;;  %v1257_v35 = vmul.f32 0.99, %v1001_v0  ;;  %v1767_v36 = vmul.f32 0.01, %v1511_v1  ;;  %v1769_v37 = vmul.f32 0.01, %v1513_v2  ;;  %4962 = vmatpush1.bf16.msra.mxu0 %v4751_v34 }
 0x3d6   : > { %v2018_v40 = vadd.f32 %v1762_v27, %v1250_v18  ;;  %v2020_v25 = vadd.f32 %v1764_v28, %v1252_v19  ;;  %v1254_v43 = vmul.f32 0.99, %v998_v10  ;;  %v1256_v44 = vmul.f32 0.99, %v1000_v11  ;;  %v1004_v13 = vld [vmem:[#allocation13 + $0x5f0] sm:$0xff]  ;;  %v1514_v48 = vld [vmem:[#allocation2 + $0x5e0] sm:$0xff] }
 0x3d7   : > { %2927 = vst [vmem:[#allocation20 + $0x5b8] sm:$0xff] %v2021_v32  ;;  %v4754_v49 = vpack.c.bf16 %v2021_v32, %v2019_v16  ;;  %v2023_v50 = vadd.f32 %v1767_v36, %v1255_v41  ;;  %v2025_v53 = vadd.f32 %v1769_v37, %v1257_v35  ;;  %v1766_v55 = vmul.f32 0.01, %v1510_v12  ;;  %v1516_v59 = vld [vmem:[#allocation2 + $0x5f0] sm:$0xff]  ;;  %v1009_v61 = vld [vmem:[#allocation13 + $0x618] sm:$0xff]  ;;  %v1519_v6 = vld [vmem:[#allocation2 + $0x608] sm:$0xff] }
 0x3d8   : > { %v1007_v60 = vld [vmem:[#allocation13 + $0x608] sm:$0xff]  ;;  %2924 = vst [vmem:[#allocation20 + $0x5a0] sm:$0xff] %v2018_v40  ;;  %2926 = vst [vmem:[#allocation20 + $0x5b0] sm:$0xff] %v2020_v25  ;;  %v4753_v63 = vpack.c.bf16 %v2020_v25, %v2018_v40  ;;  %v1768_v33 = vmul.f32 0.01, %v1512_v54  ;;  %v1521_v7 = vld [vmem:[#allocation2 + $0x618] sm:$0xff] }
 0x3d9   : > { %v1259_v0 = vmul.f32 0.99, %v1003_v20  ;;  %v1261_v1 = vmul.f32 0.99, %v1005_v22  ;;  %4963 = vmatprep.subr.bf16.mxu0 %v4754_v49  ;;  %2929 = vst [vmem:[#allocation20 + $0x5c8] sm:$0xff] %v2023_v50  ;;  %2931 = vst [vmem:[#allocation20 + $0x5d8] sm:$0xff] %v2025_v53  ;;  %v4756_v2 = vpack.c.bf16 %v2025_v53, %v2023_v50  ;;  %v2022_v3 = vadd.f32 %v1766_v55, %v1254_v43 }
 0x3da   : > { %v1771_v4 = vmul.f32 0.01, %v1515_v30  ;;  %v1773_v29 = vmul.f32 0.01, %v1517_v31  ;;  %4964 = vmatpush1.bf16.msra.mxu0 %v4753_v63  ;;  %v2024_v9 = vadd.f32 %v1768_v33, %v1256_v44  ;;  %v1258_v10 = vmul.f32 0.99, %v1002_v17 }
 0x3db   : > { %v1260_v11 = vmul.f32 0.99, %v1004_v13  ;;  %v1770_v12 = vmul.f32 0.01, %v1514_v48  ;;  %4965 = vmatprep.subr.bf16.mxu0 %v4756_v2  ;;  %2928 = vst [vmem:[#allocation20 + $0x5c0] sm:$0xff] %v2022_v3  ;;  %v1006_v20 = vld [vmem:[#allocation13 + $0x600] sm:$0xff] }
 0x3dc   : > { %v2027_v16 = vadd.f32 %v1771_v4, %v1259_v0  ;;  %v2029_v18 = vadd.f32 %v1773_v29, %v1261_v1  ;;  %v1772_v19 = vmul.f32 0.01, %v1516_v59  ;;  %v1263_v54 = vmul.f32 0.99, %v1007_v60  ;;  %v1008_v22 = vld [vmem:[#allocation13 + $0x610] sm:$0xff]  ;;  %2930 = vst [vmem:[#allocation20 + $0x5d0] sm:$0xff] %v2024_v9 }
 0x3dd   : > { %v4755_v28 = vpack.c.bf16 %v2024_v9, %v2022_v3  ;;  %v2026_v41 = vadd.f32 %v1770_v12, %v1258_v10  ;;  %v1265_v30 = vmul.f32 0.99, %v1009_v61  ;;  %v1518_v31 = vld [vmem:[#allocation2 + $0x600] sm:$0xff]  ;;  %v1520_v32 = vld [vmem:[#allocation2 + $0x610] sm:$0xff]  ;;  %v1775_v40 = vmul.f32 0.01, %v1519_v6 }
 0x3de   : > { %v5947_v14 = vpop.eup %5946  ;;  %v1011_v35 = vld [vmem:[#allocation13 + $0x628] sm:$0xff]  ;;  %2933 = vst [vmem:[#allocation20 + $0x5e8] sm:$0xff] %v2027_v16  ;;  %2935 = vst [vmem:[#allocation20 + $0x5f8] sm:$0xff] %v2029_v18  ;;  %v4758_v37 = vpack.c.bf16 %v2029_v18, %v2027_v16  ;;  %v2028_v17 = vadd.f32 %v1772_v19, %v1260_v11  ;;  %v1013_v25 = vld [vmem:[#allocation13 + $0x638] sm:$0xff]  ;;  %v1262_v44 = vmul.f32 0.99, %v1006_v20 }
 0x3df   : > { %v5949_v34 = vpop.eup %5948  ;;  %v3996_v27 = vmul.f32 %v5947_v14, %v3990_v5  ;;  %v1523_v43 = vld [vmem:[#allocation2 + $0x628] sm:$0xff]  ;;  %4966 = vmatpush1.bf16.msra.mxu0 %v4755_v28  ;;  %2932 = vst [vmem:[#allocation20 + $0x5e0] sm:$0xff] %v2026_v41  ;;  %v1777_v5 = vmul.f32 0.01, %v1521_v7  ;;  %v1264_v13 = vmul.f32 0.99, %v1008_v22 }
 0x3e0   : > { %v3997_v36 = vmul.f32 %v5949_v34, %v3991_v39  ;;  %4967 = vmatprep.subr.bf16.mxu0 %v4758_v37  ;;  %2934 = vst [vmem:[#allocation20 + $0x5f0] sm:$0xff] %v2028_v17  ;;  %v4757_v51 = vpack.c.bf16 %v2028_v17, %v2026_v41  ;;  %v2031_v39 = vadd.f32 %v1775_v40, %v1263_v54  ;;  %v1774_v48 = vmul.f32 0.01, %v1518_v31  ;;  %v1010_v49 = vld [vmem:[#allocation13 + $0x620] sm:$0xff]  ;;  %v1012_v50 = vld [vmem:[#allocation13 + $0x630] sm:$0xff]  ;;  %v1015_v63 = vld [vmem:[#allocation13 + $0x648] sm:$0xff] }
 0x3e1   : > { %v4009_v46 = vmul.f32 %v4002_v62, %v3996_v27  ;;  %v1522_v53 = vld [vmem:[#allocation2 + $0x620] sm:$0xff]  ;;  %v2033_v55 = vadd.f32 %v1777_v5, %v1265_v30  ;;  %v1776_v59 = vmul.f32 0.01, %v1520_v32  ;;  %v1267_v60 = vmul.f32 0.99, %v1011_v35  ;;  %v1524_v61 = vld [vmem:[#allocation2 + $0x630] sm:$0xff] }
 0x3e2   : > { %v4010_v24 = vmul.f32 %v4006_v8, %v3997_v36  ;;  %v1017_v33 = vld [vmem:[#allocation13 + $0x658] sm:$0xff]  ;;  %2937 = vst [vmem:[#allocation20 + $0x608] sm:$0xff] %v2031_v39  ;;  %v2030_v8 = vadd.f32 %v1774_v48, %v1262_v44  ;;  %v1269_v0 = vmul.f32 0.99, %v1013_v25  ;;  %v1779_v1 = vmul.f32 0.01, %v1523_v43 }
 0x3e3   : > { %v4022_v62 = vadd.f32 %v4015_v23, %v4009_v46  ;;  %v1527_v2 = vld [vmem:[#allocation2 + $0x648] sm:$0xff]  ;;  %v1529_v3 = vld [vmem:[#allocation2 + $0x658] sm:$0xff]  ;;  %4968 = vmatpush1.bf16.msra.mxu0 %v4757_v51  ;;  %2939 = vst [vmem:[#allocation20 + $0x618] sm:$0xff] %v2033_v55  ;;  %v4760_v23 = vpack.c.bf16 %v2033_v55, %v2031_v39  ;;  %v2032_v29 = vadd.f32 %v1776_v59, %v1264_v13  ;;  %v1781_v6 = vmul.f32 0.01, %v1525_v15  ;;  %v1526_v10 = vld [vmem:[#allocation2 + $0x640] sm:$0xff] }
 0x3e4   : > { %v4023_v26 = vadd.f32 %v4019_v21, %v4010_v24  ;;  %v1014_v7 = vld [vmem:[#allocation13 + $0x640] sm:$0xff]  ;;  %v1016_v9 = vld [vmem:[#allocation13 + $0x650] sm:$0xff]  ;;  %2936 = vst [vmem:[#allocation20 + $0x600] sm:$0xff] %v2030_v8  ;;  %v2035_v12 = vadd.f32 %v1779_v1, %v1267_v60  ;;  %v1266_v52 = vmul.f32 0.99, %v1010_v49  ;;  %v1019_v20 = vld [vmem:[#allocation13 + $0x668] sm:$0xff] }
 0x3e5   : > { %v4024_v4 = vmax.f32 %v4022_v62, 0.0  ;;  %v1268_v21 = vmul.f32 0.99, %v1012_v50  ;;  %v1528_v14 = vld [vmem:[#allocation2 + $0x650] sm:$0xff]  ;;  %4978 = vmatprep.subr.bf16.mxu0 %v4760_v23  ;;  %2938 = vst [vmem:[#allocation20 + $0x610] sm:$0xff] %v2032_v29  ;;  %v4759_v18 = vpack.c.bf16 %v2032_v29, %v2030_v8  ;;  %v2037_v19 = vadd.f32 %v1781_v6, %v1269_v0  ;;  %v1021_v22 = vld [vmem:[#allocation13 + $0x678] sm:$0xff] }
 0x3e6   : > { %v4025_v11 = vmax.f32 %v4023_v26, 0.0  ;;  %v1778_v54 = vmul.f32 0.01, %v1522_v53  ;;  %v1531_v34 = vld [vmem:[#allocation2 + $0x668] sm:$0xff]  ;;  %4970 = vmatmul.mubr.bf16.vlgmr.msra.gmra.mrb[4].mxu0 %v7049_v38  ;;  %2941 = vst [vmem:[#allocation20 + $0x628] sm:$0xff] %v2035_v12  ;;  %v1533_v31 = vld [vmem:[#allocation2 + $0x678] sm:$0xff] }
 0x3e7   : > { %v4026_v16 = vpack.c.bf16 %v4024_v4, %v4024_v4  ;;  %v1780_v28 = vmul.f32 0.01, %v1524_v61  ;;  %v1271_v41 = vmul.f32 0.99, %v1015_v63  ;;  %v1273_v30 = vmul.f32 0.99, %v1017_v33  ;;  %4979 = vmatpush1.bf16.msra.mxu0 %v4759_v18  ;;  %5010 = vmatprep.mubr.bf16.mxu0 %v7053_v42 }
 0x3e8   : > { %v4027_v27 = vpack.c.bf16 %v4025_v11, %v4025_v11  ;;  %v1018_v32 = vld [vmem:[#allocation13 + $0x660] sm:$0xff]  ;;  %2943 = vst [vmem:[#allocation20 + $0x638] sm:$0xff] %v2037_v19  ;;  %v4762_v35 = vpack.c.bf16 %v2037_v19, %v2035_v12  ;;  %v2034_v36 = vadd.f32 %v1778_v54, %v1266_v52  ;;  %v1783_v37 = vmul.f32 0.01, %v1527_v2  ;;  %v1020_v40 = vld [vmem:[#allocation13 + $0x670] sm:$0xff]  ;;  %v1023_v44 = vld [vmem:[#allocation13 + $0x688] sm:$0xff] }
 0x3e9   : > { %v1785_v17 = vmul.f32 0.01, %v1529_v3  ;;  %v1530_v25 = vld [vmem:[#allocation2 + $0x660] sm:$0xff]  ;;  %v1532_v43 = vld [vmem:[#allocation2 + $0x670] sm:$0xff]  ;;  %v2036_v15 = vadd.f32 %v1780_v28, %v1268_v21  ;;  %v1270_v38 = vmul.f32 0.99, %v1014_v7 }
 0x3ea   : > { %4060 = vmatprep.mubr.bf16.mxu1 %v4027_v27  ;;  %v1272_v46 = vmul.f32 0.99, %v1016_v9  ;;  %v1782_v5 = vmul.f32 0.01, %v1526_v10  ;;  %4980 = vmatprep.subr.bf16.mxu0 %v4762_v35  ;;  %2940 = vst [vmem:[#allocation20 + $0x620] sm:$0xff] %v2034_v36  ;;  %v2039_v13 = vadd.f32 %v1783_v37, %v1271_v41  ;;  %v1025_v48 = vld [vmem:[#allocation13 + $0x698] sm:$0xff] }
 0x3eb   : > { %4061 = vmatmul.mubr.bf16.vlgmr.msra.gmra.mrb[8].mxu1 %v4026_v16  ;;  %v2041_v24 = vadd.f32 %v1785_v17, %v1273_v30  ;;  %v1784_v51 = vmul.f32 0.01, %v1528_v14  ;;  %v1275_v39 = vmul.f32 0.99, %v1019_v20  ;;  %v1535_v49 = vld [vmem:[#allocation2 + $0x688] sm:$0xff]  ;;  %2942 = vst [vmem:[#allocation20 + $0x630] sm:$0xff] %v2036_v15  ;;  %v4761_v50 = vpack.c.bf16 %v2036_v15, %v2034_v36 }
 0x3ec   : > { %v2038_v53 = vadd.f32 %v1782_v5, %v1270_v38  ;;  %v1277_v62 = vmul.f32 0.99, %v1021_v22  ;;  %v1787_v42 = vmul.f32 0.01, %v1531_v34  ;;  %v1537_v55 = vld [vmem:[#allocation2 + $0x698] sm:$0xff]  ;;  %v1022_v59 = vld [vmem:[#allocation13 + $0x680] sm:$0xff] }
 0x3ed   : > { %2945 = vst [vmem:[#allocation20 + $0x648] sm:$0xff] %v2039_v13  ;;  %2947 = vst [vmem:[#allocation20 + $0x658] sm:$0xff] %v2041_v24  ;;  %v4764_v60 = vpack.c.bf16 %v2041_v24, %v2039_v13  ;;  %v2040_v61 = vadd.f32 %v1784_v51, %v1272_v46  ;;  %v1789_v63 = vmul.f32 0.01, %v1533_v31  ;;  %v1274_v33 = vmul.f32 0.99, %v1018_v32  ;;  %4981 = vmatpush1.bf16.msra.mxu0 %v4761_v50 }
 0x3ee   : > { %v1024_v26 = vld [vmem:[#allocation13 + $0x690] sm:$0xff]  ;;  %v1534_v8 = vld [vmem:[#allocation2 + $0x680] sm:$0xff]  ;;  %2944 = vst [vmem:[#allocation20 + $0x640] sm:$0xff] %v2038_v53  ;;  %v2043_v0 = vadd.f32 %v1787_v42, %v1275_v39  ;;  %v1276_v1 = vmul.f32 0.99, %v1020_v40  ;;  %v1027_v9 = vld [vmem:[#allocation13 + $0x6a8] sm:$0xff] }
 0x3ef   : > { %v1786_v2 = vmul.f32 0.01, %v1530_v25  ;;  %v1788_v3 = vmul.f32 0.01, %v1532_v43  ;;  %4982 = vmatprep.subr.bf16.mxu0 %v4764_v60  ;;  %2946 = vst [vmem:[#allocation20 + $0x650] sm:$0xff] %v2040_v61  ;;  %v4763_v4 = vpack.c.bf16 %v2040_v61, %v2038_v53  ;;  %v2045_v23 = vadd.f32 %v1789_v63, %v1277_v62  ;;  %v1536_v7 = vld [vmem:[#allocation2 + $0x690] sm:$0xff] }
 0x3f0   : > { %v1279_v29 = vmul.f32 0.99, %v1023_v44  ;;  %v1281_v6 = vmul.f32 0.99, %v1025_v48  ;;  %2949 = vst [vmem:[#allocation20 + $0x668] sm:$0xff] %v2043_v0  ;;  %v1029_v21 = vld [vmem:[#allocation13 + $0x6b8] sm:$0xff] }
 0x3f1   : > { %v2042_v10 = vadd.f32 %v1786_v2, %v1274_v33  ;;  %v2044_v11 = vadd.f32 %v1788_v3, %v1276_v1  ;;  %v1791_v12 = vmul.f32 0.01, %v1535_v49  ;;  %v1793_v52 = vmul.f32 0.01, %v1537_v55  ;;  %v1539_v14 = vld [vmem:[#allocation2 + $0x6a8] sm:$0xff]  ;;  %2951 = vst [vmem:[#allocation20 + $0x678] sm:$0xff] %v2045_v23  ;;  %4983 = vmatpush1.bf16.msra.mxu0 %v4763_v4 }
 0x3f2   : > { %v4766_v16 = vpack.c.bf16 %v2045_v23, %v2043_v0  ;;  %v1278_v18 = vmul.f32 0.99, %v1022_v59  ;;  %v1280_v19 = vmul.f32 0.99, %v1024_v26  ;;  %v1790_v54 = vmul.f32 0.01, %v1534_v8 }
 0x3f3   : > { %2948 = vst [vmem:[#allocation20 + $0x660] sm:$0xff] %v2042_v10  ;;  %2950 = vst [vmem:[#allocation20 + $0x670] sm:$0xff] %v2044_v11  ;;  %v4765_v20 = vpack.c.bf16 %v2044_v11, %v2042_v10  ;;  %v2047_v22 = vadd.f32 %v1791_v12, %v1279_v29  ;;  %v2049_v34 = vadd.f32 %v1793_v52, %v1281_v6  ;;  %v1792_v27 = vmul.f32 0.01, %v1536_v7  ;;  %v1541_v28 = vld [vmem:[#allocation2 + $0x6b8] sm:$0xff]  ;;  %v1026_v41 = vld [vmem:[#allocation13 + $0x6a0] sm:$0xff] }
 0x3f4   : > { %v1028_v30 = vld [vmem:[#allocation13 + $0x6b0] sm:$0xff]  ;;  %4984 = vmatprep.subr.bf16.mxu0 %v4766_v16  ;;  %v2046_v31 = vadd.f32 %v1790_v54, %v1278_v18  ;;  %v1283_v32 = vmul.f32 0.99, %v1027_v9  ;;  %v1285_v35 = vmul.f32 0.99, %v1029_v21  ;;  %v1538_v43 = vld [vmem:[#allocation2 + $0x6a0] sm:$0xff] }
 0x3f5   : > { %v1795_v36 = vmul.f32 0.01, %v1539_v14  ;;  %2953 = vst [vmem:[#allocation20 + $0x688] sm:$0xff] %v2047_v22  ;;  %2955 = vst [vmem:[#allocation20 + $0x698] sm:$0xff] %v2049_v34  ;;  %v4768_v37 = vpack.c.bf16 %v2049_v34, %v2047_v22  ;;  %v2048_v17 = vadd.f32 %v1792_v27, %v1280_v19  ;;  %v1797_v40 = vmul.f32 0.01, %v1541_v28  ;;  %4985 = vmatpush1.bf16.msra.mxu0 %v4765_v20 }
 0x3f6   : > { %v1282_v25 = vmul.f32 0.99, %v1026_v41  ;;  %v1540_v15 = vld [vmem:[#allocation2 + $0x6b0] sm:$0xff]  ;;  %2952 = vst [vmem:[#allocation20 + $0x680] sm:$0xff] %v2046_v31  ;;  %v1284_v46 = vmul.f32 0.99, %v1028_v30 }
 0x3f7   : > { %v2051_v38 = vadd.f32 %v1795_v36, %v1283_v32  ;;  %v1794_v5 = vmul.f32 0.01, %v1538_v43  ;;  %v1796_v44 = vmul.f32 0.01, %v1540_v15  ;;  %2954 = vst [vmem:[#allocation20 + $0x690] sm:$0xff] %v2048_v17  ;;  %v4767_v13 = vpack.c.bf16 %v2048_v17, %v2046_v31  ;;  %v1031_v51 = vld [vmem:[#allocation13 + $0x6c8] sm:$0xff]  ;;  %4986 = vmatprep.subr.bf16.mxu0 %v4768_v37 }
 0x3f8   : > { %v2053_v24 = vadd.f32 %v1797_v40, %v1285_v35  ;;  %v1033_v39 = vld [vmem:[#allocation13 + $0x6d8] sm:$0xff]  ;;  %v1543_v48 = vld [vmem:[#allocation2 + $0x6c8] sm:$0xff]  ;;  %v1287_v53 = vmul.f32 0.99, %v1031_v51  ;;  %v1032_v63 = vld [vmem:[#allocation13 + $0x6d0] sm:$0xff] }
 0x3f9   : > { %2957 = vst [vmem:[#allocation20 + $0x6a8] sm:$0xff] %v2051_v38  ;;  %v2050_v49 = vadd.f32 %v1794_v5, %v1282_v25  ;;  %v2052_v50 = vadd.f32 %v1796_v44, %v1284_v46  ;;  %v1289_v62 = vmul.f32 0.99, %v1033_v39  ;;  %v1545_v42 = vld [vmem:[#allocation2 + $0x6d8] sm:$0xff]  ;;  %v1030_v55 = vld [vmem:[#allocation13 + $0x6c0] sm:$0xff]  ;;  %v1544_v1 = vld [vmem:[#allocation2 + $0x6d0] sm:$0xff]  ;;  %4987 = vmatpush1.bf16.msra.mxu0 %v4767_v13 }
 0x3fa   : > { %2959 = vst [vmem:[#allocation20 + $0x6b8] sm:$0xff] %v2053_v24  ;;  %v4770_v59 = vpack.c.bf16 %v2053_v24, %v2051_v38  ;;  %v1799_v60 = vmul.f32 0.01, %v1543_v48  ;;  %v1801_v61 = vmul.f32 0.01, %v1545_v42  ;;  %v1542_v33 = vld [vmem:[#allocation2 + $0x6c0] sm:$0xff] }
 0x3fb   : > { %2956 = vst [vmem:[#allocation20 + $0x6a0] sm:$0xff] %v2050_v49  ;;  %2958 = vst [vmem:[#allocation20 + $0x6b0] sm:$0xff] %v2052_v50  ;;  %v4769_v26 = vpack.c.bf16 %v2052_v50, %v2050_v49  ;;  %v1286_v8 = vmul.f32 0.99, %v1030_v55  ;;  %v1288_v0 = vmul.f32 0.99, %v1032_v63 }
 0x3fc   : > { %v1035_v2 = vld [vmem:[#allocation13 + $0x6e8] sm:$0xff]  ;;  %v2055_v3 = vadd.f32 %v1799_v60, %v1287_v53  ;;  %v2057_v4 = vadd.f32 %v1801_v61, %v1289_v62  ;;  %v1798_v23 = vmul.f32 0.01, %v1542_v33  ;;  %v1800_v29 = vmul.f32 0.01, %v1544_v1  ;;  %v1037_v6 = vld [vmem:[#allocation13 + $0x6f8] sm:$0xff]  ;;  %4988 = vmatprep.subr.bf16.mxu0 %v4770_v59 }
 0x3fd   : > { %v1547_v7 = vld [vmem:[#allocation2 + $0x6e8] sm:$0xff]  ;;  %v1291_v9 = vmul.f32 0.99, %v1035_v2  ;;  %v1293_v10 = vmul.f32 0.99, %v1037_v6  ;;  %v1549_v11 = vld [vmem:[#allocation2 + $0x6f8] sm:$0xff]  ;;  %4989 = vmatpush1.bf16.msra.mxu0 %v4769_v26 }
 0x3fe   : > { %v1034_v12 = vld [vmem:[#allocation13 + $0x6e0] sm:$0xff]  ;;  %2961 = vst [vmem:[#allocation20 + $0x6c8] sm:$0xff] %v2055_v3  ;;  %2963 = vst [vmem:[#allocation20 + $0x6d8] sm:$0xff] %v2057_v4  ;;  %v4772_v52 = vpack.c.bf16 %v2057_v4, %v2055_v3  ;;  %v2054_v21 = vadd.f32 %v1798_v23, %v1286_v8  ;;  %v2056_v14 = vadd.f32 %v1800_v29, %v1288_v0  ;;  %v1803_v16 = vmul.f32 0.01, %v1547_v7  ;;  %v1036_v18 = vld [vmem:[#allocation13 + $0x6f0] sm:$0xff] }
 0x3ff   : > { %v1546_v19 = vld [vmem:[#allocation2 + $0x6e0] sm:$0xff]  ;;  %v1548_v54 = vld [vmem:[#allocation2 + $0x6f0] sm:$0xff]  ;;  %v1805_v20 = vmul.f32 0.01, %v1549_v11  ;;  %v1290_v22 = vmul.f32 0.99, %v1034_v12 }
 0x400   : > { %v1292_v34 = vmul.f32 0.99, %v1036_v18  ;;  %2960 = vst [vmem:[#allocation20 + $0x6c0] sm:$0xff] %v2054_v21  ;;  %2962 = vst [vmem:[#allocation20 + $0x6d0] sm:$0xff] %v2056_v14  ;;  %v4771_v27 = vpack.c.bf16 %v2056_v14, %v2054_v21  ;;  %v2059_v28 = vadd.f32 %v1803_v16, %v1291_v9  ;;  %v1802_v41 = vmul.f32 0.01, %v1546_v19  ;;  %4990 = vmatprep.subr.bf16.mxu0 %v4772_v52 }
 0x401   : > { %v1804_v30 = vmul.f32 0.01, %v1548_v54  ;;  %v1039_v31 = vld [vmem:[#allocation13 + $0x708] sm:$0xff]  ;;  %v1041_v32 = vld [vmem:[#allocation13 + $0x718] sm:$0xff]  ;;  %v2061_v35 = vadd.f32 %v1805_v20, %v1293_v10  ;;  %v1038_v46 = vld [vmem:[#allocation13 + $0x700] sm:$0xff] }
 0x402   : > { %v1295_v36 = vmul.f32 0.99, %v1039_v31  ;;  %v1297_v37 = vmul.f32 0.99, %v1041_v32  ;;  %v1551_v17 = vld [vmem:[#allocation2 + $0x708] sm:$0xff]  ;;  %v1553_v40 = vld [vmem:[#allocation2 + $0x718] sm:$0xff]  ;;  %v2058_v25 = vadd.f32 %v1802_v41, %v1290_v22  ;;  %4991 = vmatpush1.bf16.msra.mxu0 %v4771_v27 }
 0x403   : > { %2965 = vst [vmem:[#allocation20 + $0x6e8] sm:$0xff] %v2059_v28  ;;  %v2060_v43 = vadd.f32 %v1804_v30, %v1292_v34  ;;  %v1807_v15 = vmul.f32 0.01, %v1551_v17  ;;  %v1809_v38 = vmul.f32 0.01, %v1553_v40  ;;  %v1040_v5 = vld [vmem:[#allocation13 + $0x710] sm:$0xff]  ;;  %v4774_v44 = vpack.c.bf16 %v2061_v35, %v2059_v28 }
 0x404   : > { %2967 = vst [vmem:[#allocation20 + $0x6f8] sm:$0xff] %v2061_v35  ;;  %v1294_v13 = vmul.f32 0.99, %v1038_v46  ;;  %v1296_v24 = vmul.f32 0.99, %v1040_v5  ;;  %v1550_v51 = vld [vmem:[#allocation2 + $0x700] sm:$0xff] }
 0x405   : > { %v1552_v39 = vld [vmem:[#allocation2 + $0x710] sm:$0xff]  ;;  %2964 = vst [vmem:[#allocation20 + $0x6e0] sm:$0xff] %v2058_v25  ;;  %2966 = vst [vmem:[#allocation20 + $0x6f0] sm:$0xff] %v2060_v43  ;;  %v4773_v48 = vpack.c.bf16 %v2060_v43, %v2058_v25  ;;  %v2063_v49 = vadd.f32 %v1807_v15, %v1295_v36  ;;  %v2065_v50 = vadd.f32 %v1809_v38, %v1297_v37  ;;  %v1806_v53 = vmul.f32 0.01, %v1550_v51  ;;  %v1045_v42 = vld [vmem:[#allocation13 + $0x738] sm:$0xff] }
 0x406   : > { %v1043_v62 = vld [vmem:[#allocation13 + $0x728] sm:$0xff]  ;;  %4992 = vmatprep.subr.bf16.mxu0 %v4774_v44  ;;  %v1808_v59 = vmul.f32 0.01, %v1552_v39  ;;  %v1301_v61 = vmul.f32 0.99, %v1045_v42  ;;  %v1557_v26 = vld [vmem:[#allocation2 + $0x738] sm:$0xff] }
 0x407   : > { %v1555_v55 = vld [vmem:[#allocation2 + $0x728] sm:$0xff]  ;;  %v1299_v60 = vmul.f32 0.99, %v1043_v62  ;;  %2969 = vst [vmem:[#allocation20 + $0x708] sm:$0xff] %v2063_v49  ;;  %2971 = vst [vmem:[#allocation20 + $0x718] sm:$0xff] %v2065_v50  ;;  %v4776_v63 = vpack.c.bf16 %v2065_v50, %v2063_v49  ;;  %v2062_v33 = vadd.f32 %v1806_v53, %v1294_v13  ;;  %v1044_v1 = vld [vmem:[#allocation13 + $0x730] sm:$0xff]  ;;  %4993 = vmatpush1.bf16.msra.mxu0 %v4773_v48 }
 0x408   : > { %v1811_v8 = vmul.f32 0.01, %v1555_v55  ;;  %v1042_v0 = vld [vmem:[#allocation13 + $0x720] sm:$0xff]  ;;  %v2064_v2 = vadd.f32 %v1808_v59, %v1296_v24  ;;  %v1813_v3 = vmul.f32 0.01, %v1557_v26  ;;  %v1556_v7 = vld [vmem:[#allocation2 + $0x730] sm:$0xff] }
 0x409   : > { %v1298_v4 = vmul.f32 0.99, %v1042_v0  ;;  %v1300_v23 = vmul.f32 0.99, %v1044_v1  ;;  %2968 = vst [vmem:[#allocation20 + $0x700] sm:$0xff] %v2062_v33  ;;  %v1554_v6 = vld [vmem:[#allocation2 + $0x720] sm:$0xff]  ;;  %4994 = vmatprep.subr.bf16.mxu0 %v4776_v63 }
 0x40a   : > { %v2067_v29 = vadd.f32 %v1811_v8, %v1299_v60  ;;  %v1047_v9 = vld [vmem:[#allocation13 + $0x748] sm:$0xff]  ;;  %2970 = vst [vmem:[#allocation20 + $0x710] sm:$0xff] %v2064_v2  ;;  %v4775_v10 = vpack.c.bf16 %v2064_v2, %v2062_v33  ;;  %v2069_v11 = vadd.f32 %v1813_v3, %v1301_v61  ;;  %v1810_v12 = vmul.f32 0.01, %v1554_v6  ;;  %v1049_v21 = vld [vmem:[#allocation13 + $0x758] sm:$0xff]  ;;  %v1046_v54 = vld [vmem:[#allocation13 + $0x740] sm:$0xff] }
 0x40b   : > { %v1812_v52 = vmul.f32 0.01, %v1556_v7  ;;  %v1559_v14 = vld [vmem:[#allocation2 + $0x748] sm:$0xff]  ;;  %v1303_v16 = vmul.f32 0.99, %v1047_v9  ;;  %v1561_v19 = vld [vmem:[#allocation2 + $0x758] sm:$0xff] }
 0x40c   : > { %2973 = vst [vmem:[#allocation20 + $0x728] sm:$0xff] %v2067_v29  ;;  %v1305_v18 = vmul.f32 0.99, %v1049_v21  ;;  %2975 = vst [vmem:[#allocation20 + $0x738] sm:$0xff] %v2069_v11  ;;  %v4778_v20 = vpack.c.bf16 %v2069_v11, %v2067_v29  ;;  %v2066_v22 = vadd.f32 %v1810_v12, %v1298_v4  ;;  %v1815_v27 = vmul.f32 0.01, %v1559_v14  ;;  %4995 = vmatpush1.bf16.msra.mxu0 %v4775_v10 }
 0x40d   : > { %v2068_v34 = vadd.f32 %v1812_v52, %v1300_v23  ;;  %v1048_v28 = vld [vmem:[#allocation13 + $0x750] sm:$0xff]  ;;  %v1558_v41 = vld [vmem:[#allocation2 + $0x740] sm:$0xff]  ;;  %v1817_v31 = vmul.f32 0.01, %v1561_v19  ;;  %v1302_v32 = vmul.f32 0.99, %v1046_v54 }
 0x40e   : > { %v1560_v30 = vld [vmem:[#allocation2 + $0x750] sm:$0xff]  ;;  %v1304_v35 = vmul.f32 0.99, %v1048_v28  ;;  %4996 = vmatprep.subr.bf16.mxu0 %v4778_v20  ;;  %2972 = vst [vmem:[#allocation20 + $0x720] sm:$0xff] %v2066_v22  ;;  %v2071_v37 = vadd.f32 %v1815_v27, %v1303_v16  ;;  %v1814_v17 = vmul.f32 0.01, %v1558_v41 }
 0x40f   : > { %2974 = vst [vmem:[#allocation20 + $0x730] sm:$0xff] %v2068_v34  ;;  %v4777_v36 = vpack.c.bf16 %v2068_v34, %v2066_v22  ;;  %v1816_v40 = vmul.f32 0.01, %v1560_v30  ;;  %v1051_v25 = vld [vmem:[#allocation13 + $0x768] sm:$0xff]  ;;  %v1053_v43 = vld [vmem:[#allocation13 + $0x778] sm:$0xff]  ;;  %v2073_v15 = vadd.f32 %v1817_v31, %v1305_v18  ;;  %v1050_v48 = vld [vmem:[#allocation13 + $0x760] sm:$0xff] }
 0x410   : > { %v1307_v38 = vmul.f32 0.99, %v1051_v25  ;;  %v1309_v46 = vmul.f32 0.99, %v1053_v43  ;;  %v1563_v5 = vld [vmem:[#allocation2 + $0x768] sm:$0xff]  ;;  %v1565_v44 = vld [vmem:[#allocation2 + $0x778] sm:$0xff]  ;;  %v2070_v13 = vadd.f32 %v1814_v17, %v1302_v32 }
 0x411   : > { %2977 = vst [vmem:[#allocation20 + $0x748] sm:$0xff] %v2071_v37  ;;  %v2072_v24 = vadd.f32 %v1816_v40, %v1304_v35  ;;  %v1819_v51 = vmul.f32 0.01, %v1563_v5  ;;  %v1821_v39 = vmul.f32 0.01, %v1565_v44  ;;  %v1052_v49 = vld [vmem:[#allocation13 + $0x770] sm:$0xff]  ;;  %4997 = vmatpush1.bf16.msra.mxu0 %v4777_v36  ;;  %v4780_v50 = vpack.c.bf16 %v2073_v15, %v2071_v37 }
 0x412   : > { %2979 = vst [vmem:[#allocation20 + $0x758] sm:$0xff] %v2073_v15  ;;  %v1306_v53 = vmul.f32 0.99, %v1050_v48  ;;  %v1308_v62 = vmul.f32 0.99, %v1052_v49  ;;  %v1562_v42 = vld [vmem:[#allocation2 + $0x760] sm:$0xff] }
 0x413   : > { %v1564_v55 = vld [vmem:[#allocation2 + $0x770] sm:$0xff]  ;;  %2976 = vst [vmem:[#allocation20 + $0x740] sm:$0xff] %v2070_v13  ;;  %2978 = vst [vmem:[#allocation20 + $0x750] sm:$0xff] %v2072_v24  ;;  %v4779_v59 = vpack.c.bf16 %v2072_v24, %v2070_v13  ;;  %v2075_v60 = vadd.f32 %v1819_v51, %v1307_v38  ;;  %v2077_v61 = vadd.f32 %v1821_v39, %v1309_v46  ;;  %v1818_v63 = vmul.f32 0.01, %v1562_v42  ;;  %v1057_v26 = vld [vmem:[#allocation13 + $0x798] sm:$0xff] }
 0x414   : > { %v1055_v33 = vld [vmem:[#allocation13 + $0x788] sm:$0xff]  ;;  %4998 = vmatprep.subr.bf16.mxu0 %v4780_v50  ;;  %v1820_v0 = vmul.f32 0.01, %v1564_v55  ;;  %v1313_v2 = vmul.f32 0.99, %v1057_v26  ;;  %v1569_v23 = vld [vmem:[#allocation2 + $0x798] sm:$0xff] }
 0x415   : > { %v1567_v8 = vld [vmem:[#allocation2 + $0x788] sm:$0xff]  ;;  %v1311_v1 = vmul.f32 0.99, %v1055_v33  ;;  %2981 = vst [vmem:[#allocation20 + $0x768] sm:$0xff] %v2075_v60  ;;  %2983 = vst [vmem:[#allocation20 + $0x778] sm:$0xff] %v2077_v61  ;;  %v4782_v3 = vpack.c.bf16 %v2077_v61, %v2075_v60  ;;  %v2074_v4 = vadd.f32 %v1818_v63, %v1306_v53  ;;  %v1056_v7 = vld [vmem:[#allocation13 + $0x790] sm:$0xff]  ;;  %4999 = vmatpush1.bf16.msra.mxu0 %v4779_v59 }
 0x416   : > { %v1823_v29 = vmul.f32 0.01, %v1567_v8  ;;  %v1054_v6 = vld [vmem:[#allocation13 + $0x780] sm:$0xff]  ;;  %v2076_v9 = vadd.f32 %v1820_v0, %v1308_v62  ;;  %v1825_v10 = vmul.f32 0.01, %v1569_v23  ;;  %v1568_v14 = vld [vmem:[#allocation2 + $0x790] sm:$0xff] }
 0x417   : > { %v1310_v11 = vmul.f32 0.99, %v1054_v6  ;;  %v1312_v12 = vmul.f32 0.99, %v1056_v7  ;;  %5000 = vmatprep.subr.bf16.mxu0 %v4782_v3  ;;  %2980 = vst [vmem:[#allocation20 + $0x760] sm:$0xff] %v2074_v4  ;;  %v1566_v21 = vld [vmem:[#allocation2 + $0x780] sm:$0xff] }
 0x418   : > { %v2079_v52 = vadd.f32 %v1823_v29, %v1311_v1  ;;  %v1059_v16 = vld [vmem:[#allocation13 + $0x7a8] sm:$0xff]  ;;  %2982 = vst [vmem:[#allocation20 + $0x770] sm:$0xff] %v2076_v9  ;;  %v4781_v18 = vpack.c.bf16 %v2076_v9, %v2074_v4  ;;  %v2081_v19 = vadd.f32 %v1825_v10, %v1313_v2  ;;  %v1822_v54 = vmul.f32 0.01, %v1566_v21  ;;  %v1061_v22 = vld [vmem:[#allocation13 + $0x7b8] sm:$0xff]  ;;  %v1058_v30 = vld [vmem:[#allocation13 + $0x7a0] sm:$0xff] }
 0x419   : > { %v1824_v20 = vmul.f32 0.01, %v1568_v14  ;;  %v1571_v34 = vld [vmem:[#allocation2 + $0x7a8] sm:$0xff]  ;;  %v1315_v27 = vmul.f32 0.99, %v1059_v16  ;;  %v1573_v41 = vld [vmem:[#allocation2 + $0x7b8] sm:$0xff] }
 0x41a   : > { %2985 = vst [vmem:[#allocation20 + $0x788] sm:$0xff] %v2079_v52  ;;  %v1317_v28 = vmul.f32 0.99, %v1061_v22  ;;  %5001 = vmatpush1.bf16.msra.mxu0 %v4781_v18  ;;  %2987 = vst [vmem:[#allocation20 + $0x798] sm:$0xff] %v2081_v19  ;;  %v4784_v31 = vpack.c.bf16 %v2081_v19, %v2079_v52  ;;  %v2078_v32 = vadd.f32 %v1822_v54, %v1310_v11  ;;  %v1827_v36 = vmul.f32 0.01, %v1571_v34 }
 0x41b   : > { %v2080_v35 = vadd.f32 %v1824_v20, %v1312_v12  ;;  %v1060_v37 = vld [vmem:[#allocation13 + $0x7b0] sm:$0xff]  ;;  %v1570_v17 = vld [vmem:[#allocation2 + $0x7a0] sm:$0xff]  ;;  %v1829_v25 = vmul.f32 0.01, %v1573_v41  ;;  %v1314_v43 = vmul.f32 0.99, %v1058_v30 }
 0x41c   : > { %v1572_v40 = vld [vmem:[#allocation2 + $0x7b0] sm:$0xff]  ;;  %v1316_v15 = vmul.f32 0.99, %v1060_v37  ;;  %5002 = vmatprep.subr.bf16.mxu0 %v4784_v31  ;;  %2984 = vst [vmem:[#allocation20 + $0x780] sm:$0xff] %v2078_v32  ;;  %v2083_v46 = vadd.f32 %v1827_v36, %v1315_v27  ;;  %v1826_v5 = vmul.f32 0.01, %v1570_v17 }
 0x41d   : > { %2986 = vst [vmem:[#allocation20 + $0x790] sm:$0xff] %v2080_v35  ;;  %v4783_v38 = vpack.c.bf16 %v2080_v35, %v2078_v32  ;;  %v1828_v44 = vmul.f32 0.01, %v1572_v40  ;;  %v1063_v13 = vld [vmem:[#allocation13 + $0x7c8] sm:$0xff]  ;;  %v1065_v24 = vld [vmem:[#allocation13 + $0x7d8] sm:$0xff]  ;;  %v2085_v51 = vadd.f32 %v1829_v25, %v1317_v28  ;;  %v1062_v59 = vld [vmem:[#allocation13 + $0x7c0] sm:$0xff] }
 0x41e   : > { %v1319_v39 = vmul.f32 0.99, %v1063_v13  ;;  %v1321_v48 = vmul.f32 0.99, %v1065_v24  ;;  %v1575_v49 = vld [vmem:[#allocation2 + $0x7c8] sm:$0xff]  ;;  %v1577_v50 = vld [vmem:[#allocation2 + $0x7d8] sm:$0xff]  ;;  %v2082_v53 = vadd.f32 %v1826_v5, %v1314_v43 }
 0x41f   : > { %5003 = vmatpush1.bf16.msra.mxu0 %v4783_v38  ;;  %2989 = vst [vmem:[#allocation20 + $0x7a8] sm:$0xff] %v2083_v46  ;;  %v2084_v62 = vadd.f32 %v1828_v44, %v1316_v15  ;;  %v1831_v42 = vmul.f32 0.01, %v1575_v49  ;;  %v1833_v55 = vmul.f32 0.01, %v1577_v50  ;;  %v1064_v60 = vld [vmem:[#allocation13 + $0x7d0] sm:$0xff]  ;;  %v4786_v61 = vpack.c.bf16 %v2085_v51, %v2083_v46 }
 0x420   : > { %2991 = vst [vmem:[#allocation20 + $0x7b8] sm:$0xff] %v2085_v51  ;;  %v1318_v63 = vmul.f32 0.99, %v1062_v59  ;;  %v1320_v33 = vmul.f32 0.99, %v1064_v60  ;;  %v1574_v26 = vld [vmem:[#allocation2 + $0x7c0] sm:$0xff] }
 0x421   : > { %v1576_v8 = vld [vmem:[#allocation2 + $0x7d0] sm:$0xff]  ;;  %2988 = vst [vmem:[#allocation20 + $0x7a0] sm:$0xff] %v2082_v53  ;;  %2990 = vst [vmem:[#allocation20 + $0x7b0] sm:$0xff] %v2084_v62  ;;  %v4785_v0 = vpack.c.bf16 %v2084_v62, %v2082_v53  ;;  %v2087_v1 = vadd.f32 %v1831_v42, %v1319_v39  ;;  %v2089_v2 = vadd.f32 %v1833_v55, %v1321_v48  ;;  %v1830_v3 = vmul.f32 0.01, %v1574_v26  ;;  %v1069_v23 = vld [vmem:[#allocation13 + $0x7f8] sm:$0xff] }
 0x422   : > { %v1067_v4 = vld [vmem:[#allocation13 + $0x7e8] sm:$0xff]  ;;  %5004 = vmatprep.subr.bf16.mxu0 %v4786_v61  ;;  %v1832_v6 = vmul.f32 0.01, %v1576_v8  ;;  %v1325_v9 = vmul.f32 0.99, %v1069_v23  ;;  %v1581_v12 = vld [vmem:[#allocation2 + $0x7f8] sm:$0xff] }
 0x423   : > { %v1579_v29 = vld [vmem:[#allocation2 + $0x7e8] sm:$0xff]  ;;  %v1323_v7 = vmul.f32 0.99, %v1067_v4  ;;  %5005 = vmatpush1.bf16.msra.mxu0 %v4785_v0  ;;  %2993 = vst [vmem:[#allocation20 + $0x7c8] sm:$0xff] %v2087_v1  ;;  %2995 = vst [vmem:[#allocation20 + $0x7d8] sm:$0xff] %v2089_v2  ;;  %v4788_v10 = vpack.c.bf16 %v2089_v2, %v2087_v1  ;;  %v2086_v11 = vadd.f32 %v1830_v3, %v1318_v63  ;;  %v1068_v14 = vld [vmem:[#allocation13 + $0x7f0] sm:$0xff] }
 0x424   : > { %v1835_v52 = vmul.f32 0.01, %v1579_v29  ;;  %v1066_v21 = vld [vmem:[#allocation13 + $0x7e0] sm:$0xff]  ;;  %v2088_v16 = vadd.f32 %v1832_v6, %v1320_v33  ;;  %v1837_v18 = vmul.f32 0.01, %v1581_v12  ;;  %v1580_v34 = vld [vmem:[#allocation2 + $0x7f0] sm:$0xff] }
 0x425   : > { %v1322_v19 = vmul.f32 0.99, %v1066_v21  ;;  %v1324_v54 = vmul.f32 0.99, %v1068_v14  ;;  %5006 = vmatprep.subr.bf16.mxu0 %v4788_v10  ;;  %2992 = vst [vmem:[#allocation20 + $0x7c0] sm:$0xff] %v2086_v11  ;;  %v1578_v22 = vld [vmem:[#allocation2 + $0x7e0] sm:$0xff] }
 0x426   : > { %v2091_v20 = vadd.f32 %v1835_v52, %v1323_v7  ;;  %v5850_v27 = vld [vmem:[#allocation8] ss:$8 sps:$4 sm:$0xff]   ;;  %2994 = vst [vmem:[#allocation20 + $0x7d0] sm:$0xff] %v2088_v16  ;;  %v4787_v28 = vpack.c.bf16 %v2088_v16, %v2086_v11  ;;  %v2093_v41 = vadd.f32 %v1837_v18, %v1325_v9  ;;  %v1834_v30 = vmul.f32 0.01, %v1578_v22 }
 0x427   : > { %v1836_v31 = vmul.f32 0.01, %v1580_v34  ;;  %v5852_v32 = vld [vmem:[#allocation8 + $0x4] ss:$8 sps:$4 sm:$0xff]   ;;  %v5855_v35 = vld [vmem:[#allocation8 + $0x14] ss:$8 sps:$4 sm:$0xff]  }
 0x428   : > { %2997 = vst [vmem:[#allocation20 + $0x7e8] sm:$0xff] %v2091_v20  ;;  %5007 = vmatpush1.bf16.msra.mxu0 %v4787_v28  ;;  %2999 = vst [vmem:[#allocation20 + $0x7f8] sm:$0xff] %v2093_v41  ;;  %v4790_v36 = vpack.c.bf16 %v2093_v41, %v2091_v20  ;;  %v2090_v37 = vadd.f32 %v1834_v30, %v1322_v19  ;;  %4309 = vmatprep.subr.bf16.mxu1 %v5852_v32  ;;  %v5853_v40 = vld [vmem:[#allocation8 + $0x10] ss:$8 sps:$4 sm:$0xff]   ;;  %v5858_v43 = vld [vmem:[#allocation8 + $0x24] ss:$8 sps:$4 sm:$0xff]  }
 0x429   : > { %v2092_v17 = vadd.f32 %v1836_v31, %v1324_v54  ;;  %4310 = vmatpush1.bf16.msra.mxu1 %v5850_v27  ;;  %v5856_v15 = vld [vmem:[#allocation8 + $0x20] ss:$8 sps:$4 sm:$0xff]   ;;  %v5861_v38 = vld [vmem:[#allocation8 + $0x34] ss:$8 sps:$4 sm:$0xff]   ;;  %v5859_v46 = vld [vmem:[#allocation8 + $0x30] ss:$8 sps:$4 sm:$0xff]  }
 0x42a   : > { %5008 = vmatprep.subr.bf16.mxu0 %v4790_v36  ;;  %2996 = vst [vmem:[#allocation20 + $0x7e0] sm:$0xff] %v2090_v37  ;;  %4311 = vmatprep.subr.bf16.mxu1 %v5855_v35  ;;  %v5864_v5 = vld [vmem:[#allocation8 + $0x44] ss:$8 sps:$4 sm:$0xff]   ;;  %v5862_v44 = vld [vmem:[#allocation8 + $0x40] ss:$8 sps:$4 sm:$0xff]  }
 0x42b   : > { %2998 = vst [vmem:[#allocation20 + $0x7f0] sm:$0xff] %v2092_v17  ;;  %v4789_v25 = vpack.c.bf16 %v2092_v17, %v2090_v37  ;;  %v5867_v13 = vld [vmem:[#allocation8 + $0x54] ss:$8 sps:$4 sm:$0xff]   ;;  %v5865_v24 = vld [vmem:[#allocation8 + $0x50] ss:$8 sps:$4 sm:$0xff]  }
 0x42c   : > { %v5870_v51 = vld [vmem:[#allocation8 + $0x64] ss:$8 sps:$4 sm:$0xff]   ;;  %v5868_v39 = vld [vmem:[#allocation8 + $0x60] ss:$8 sps:$4 sm:$0xff]   ;;  %v5873_v48 = vld [vmem:[#allocation8 + $0x74] ss:$8 sps:$4 sm:$0xff]  }
 0x42d   : > { %5009 = vmatpush1.bf16.msra.mxu0 %v4789_v25  ;;  %4312 = vmatpush1.bf16.msra.mxu1 %v5853_v40  ;;  %v5871_v49 = vld [vmem:[#allocation8 + $0x70] ss:$8 sps:$4 sm:$0xff]   ;;  %v5874_v50 = vld [vmem:[#allocation8 + $0x80] ss:$8 sps:$4 sm:$0xff]   ;;  %v5879_v53 = vld [vmem:[#allocation8 + $0x94] ss:$8 sps:$4 sm:$0xff]  }
 0x42e   : > { %4313 = vmatprep.subr.bf16.mxu1 %v5858_v43  ;;  %v5877_v62 = vld [vmem:[#allocation8 + $0x90] ss:$8 sps:$4 sm:$0xff]   ;;  %v5882_v42 = vld [vmem:[#allocation8 + $0xa4] ss:$8 sps:$4 sm:$0xff]   ;;  %v5880_v55 = vld [vmem:[#allocation8 + $0xa0] ss:$8 sps:$4 sm:$0xff]  }
 0x42f   : > { %v5885_v59 = vld [vmem:[#allocation8 + $0xb4] ss:$8 sps:$4 sm:$0xff]   ;;  %v5883_v60 = vld [vmem:[#allocation8 + $0xb0] ss:$8 sps:$4 sm:$0xff]   ;;  %v5888_v61 = vld [vmem:[#allocation8 + $0xc4] ss:$8 sps:$4 sm:$0xff]  }
 0x430   : > { %5011 = vmatmul.mubr.bf16.vlgmr.msra.gmra.mrb[4].mxu0 %v7137_v58  ;;  %v5876_v58 = vld [vmem:[#allocation8 + $0x84] ss:$8 sps:$4 sm:$0xff]   ;;  %v5886_v63 = vld [vmem:[#allocation8 + $0xc0] ss:$8 sps:$4 sm:$0xff]   ;;  %v5891_v33 = vld [vmem:[#allocation8 + $0xd4] ss:$8 sps:$4 sm:$0xff]  }
 0x431   : > { %4314 = vmatpush1.bf16.msra.mxu1 %v5856_v15  ;;  %v5889_v26 = vld [vmem:[#allocation8 + $0xd0] ss:$8 sps:$4 sm:$0xff]   ;;  %v5894_v8 = vld [vmem:[#allocation8 + $0xe4] ss:$8 sps:$4 sm:$0xff]   ;;  %v5892_v0 = vld [vmem:[#allocation8 + $0xe0] ss:$8 sps:$4 sm:$0xff]  }
 0x432   : > { %4315 = vmatprep.subr.bf16.mxu1 %v5861_v38  ;;  %v5897_v1 = vld [vmem:[#allocation8 + $0xf4] ss:$8 sps:$4 sm:$0xff]   ;;  %v5895_v2 = vld [vmem:[#allocation8 + $0xf0] ss:$8 sps:$4 sm:$0xff]  }
 0x433   : > { %v5900_v3 = vld [vmem:[#allocation11 + $0x4] ss:$8 sps:$4 sm:$0xff]  }
 0x435   : > { %4316 = vmatpush1.bf16.msra.mxu1 %v5859_v46 }
 0x436   : > { %4317 = vmatprep.subr.bf16.mxu1 %v5864_v5 }
 0x439   : > { %4318 = vmatpush1.bf16.msra.mxu1 %v5862_v44 }
 0x43a   : > { %4319 = vmatprep.subr.bf16.mxu1 %v5867_v13 }
 0x43d   : > { %4320 = vmatpush1.bf16.msra.mxu1 %v5865_v24 }
 0x43e   : > { %4321 = vmatprep.subr.bf16.mxu1 %v5870_v51 }
 0x441   : > { %4322 = vmatpush1.bf16.msra.mxu1 %v5868_v39 }
 0x442   : > { %4323 = vmatprep.subr.bf16.mxu1 %v5873_v48 }
 0x445   : > { %4324 = vmatpush1.bf16.msra.mxu1 %v5871_v49 }
 0x446   : > { %4325 = vmatprep.subr.bf16.mxu1 %v5876_v58 }
 0x449   : > { %4326 = vmatpush1.bf16.msra.mxu1 %v5874_v50 }
 0x44a   : > { %4327 = vmatprep.subr.bf16.mxu1 %v5879_v53 }
 0x44d   : > { %4328 = vmatpush1.bf16.msra.mxu1 %v5877_v62 }
 0x44e   : > { %4329 = vmatprep.subr.bf16.mxu1 %v5882_v42 }
 0x451   : > { %4330 = vmatpush1.bf16.msra.mxu1 %v5880_v55 }
 0x452   : > { %4331 = vmatprep.subr.bf16.mxu1 %v5885_v59 }
 0x455   : > { %4332 = vmatpush1.bf16.msra.mxu1 %v5883_v60 }
 0x456   : > { %4333 = vmatprep.subr.bf16.mxu1 %v5888_v61  ;;  %v5898_v61 = vld [vmem:[#allocation11] ss:$8 sps:$4 sm:$0xff]  }
 0x459   : > { %4334 = vmatpush1.bf16.msra.mxu1 %v5886_v63 }
 0x45a   : > { %4335 = vmatprep.subr.bf16.mxu1 %v5891_v33  ;;  %v5903_v33 = vld [vmem:[#allocation11 + $0x14] ss:$8 sps:$4 sm:$0xff]  }
 0x45d   : > { %4336 = vmatpush1.bf16.msra.mxu1 %v5889_v26  ;;  %v5901_v26 = vld [vmem:[#allocation11 + $0x10] ss:$8 sps:$4 sm:$0xff]  }
 0x45e   : > { %4337 = vmatprep.subr.bf16.mxu1 %v5894_v8  ;;  %v5906_v8 = vld [vmem:[#allocation11 + $0x24] ss:$8 sps:$4 sm:$0xff]  }
 0x461   : > { %4338 = vmatpush1.bf16.msra.mxu1 %v5892_v0  ;;  %v5904_v0 = vld [vmem:[#allocation11 + $0x20] ss:$8 sps:$4 sm:$0xff]  }
 0x462   : > { %4339 = vmatprep.subr.bf16.mxu1 %v5897_v1  ;;  %v5909_v1 = vld [vmem:[#allocation11 + $0x34] ss:$8 sps:$4 sm:$0xff]  }
 0x465   : > { %4340 = vmatpush1.bf16.msra.mxu1 %v5895_v2  ;;  %v5907_v2 = vld [vmem:[#allocation11 + $0x30] ss:$8 sps:$4 sm:$0xff]  }
 0x466   : > { %4620 = vmatprep.subr.bf16.mxu1 %v5900_v3  ;;  %v5912_v3 = vld [vmem:[#allocation11 + $0x44] ss:$8 sps:$4 sm:$0xff]  }
 0x4be   : > { %v4062_v4 = vpop.f32.mrb[8].mxu1 }
 0x4bf   : > { %v4069_v23 = vsel %vm3951_vm0, %v4062_v4, 0.0  ;;  %v4064_v29 = vpop.f32.mrb[9].mxu1 }
 0x4c0   : > { %v4071_v6 = vrot.slane %v4069_v23, 4  ;;  %v4085_v7 = vmul.f32 %v4069_v23, %v4069_v23  ;;  %v4070_v9 = vsel %vm3951_vm0, %v4064_v29, 0.0  ;;  %v4066_v10 = vpop.f32.mrb[10].mxu1 }
 0x4c1   : > { %v4077_v11 = vrot.slane %v4070_v9, 4  ;;  %v4086_v12 = vmul.f32 %v4070_v9, %v4070_v9  ;;  %v4067_v52 = vpop.f32.mrb[11].mxu1  ;;  %v5913_v10 = vld [vmem:[#allocation11 + $0x50] ss:$8 sps:$4 sm:$0xff]  }
 0x4c2   : > { %v4072_v21 = vadd.f32 %v4071_v6, %v4069_v23  ;;  %v4087_v14 = vrot.slane %v4085_v7, 4  ;;  %v5921_v52 = vld [vmem:[#allocation11 + $0x74] ss:$8 sps:$4 sm:$0xff]  }
 0x4c3   : > { %v4078_v16 = vadd.f32 %v4077_v11, %v4070_v9  ;;  %v4093_v18 = vrot.slane %v4086_v12, 4  ;;  %v5915_v9 = vld [vmem:[#allocation11 + $0x54] ss:$8 sps:$4 sm:$0xff]   ;;  %v5918_v11 = vld [vmem:[#allocation11 + $0x64] ss:$8 sps:$4 sm:$0xff]  }
 0x4c4   : > { %v4073_v19 = vrot.slane %v4072_v21, 2  ;;  %v4088_v54 = vadd.f32 %v4087_v14, %v4085_v7  ;;  %v5924_v14 = vld [vmem:[#allocation11 + $0x84] ss:$8 sps:$4 sm:$0xff]  }
 0x4c5   : > { %v4079_v20 = vrot.slane %v4078_v16, 2  ;;  %v4094_v22 = vadd.f32 %v4093_v18, %v4086_v12  ;;  %v5916_v12 = vld [vmem:[#allocation11 + $0x60] ss:$8 sps:$4 sm:$0xff]   ;;  %v5927_v18 = vld [vmem:[#allocation11 + $0x94] ss:$8 sps:$4 sm:$0xff]  }
 0x4c6   : > { %v4074_v34 = vadd.f32 %v4073_v19, %v4072_v21  ;;  %v4089_v27 = vrot.slane %v4088_v54, 2  ;;  %v5919_v21 = vld [vmem:[#allocation11 + $0x70] ss:$8 sps:$4 sm:$0xff]  }
 0x4c7   : > { %v4080_v28 = vadd.f32 %v4079_v20, %v4078_v16  ;;  %v4095_v41 = vrot.slane %v4094_v22, 2  ;;  %v5922_v16 = vld [vmem:[#allocation11 + $0x80] ss:$8 sps:$4 sm:$0xff]   ;;  %v5925_v19 = vld [vmem:[#allocation11 + $0x90] ss:$8 sps:$4 sm:$0xff]  }
 0x4c8   : > { %v4075_v30 = vrot.slane %v4074_v34, 1  ;;  %v4090_v31 = vadd.f32 %v4089_v27, %v4088_v54  ;;  %v5930_v54 = vld [vmem:[#allocation11 + $0xa4] ss:$8 sps:$4 sm:$0xff]   ;;  %v5928_v20 = vld [vmem:[#allocation11 + $0xa0] ss:$8 sps:$4 sm:$0xff]  }
 0x4c9   : > { %v4081_v32 = vrot.slane %v4080_v28, 1  ;;  %v4096_v35 = vadd.f32 %v4095_v41, %v4094_v22  ;;  %v5933_v22 = vld [vmem:[#allocation11 + $0xb4] ss:$8 sps:$4 sm:$0xff]   ;;  %v5936_v27 = vld [vmem:[#allocation11 + $0xc4] ss:$8 sps:$4 sm:$0xff]  }
 0x4ca   : > { %v4076_v36 = vadd.f32 %v4075_v30, %v4074_v34  ;;  %v4091_v37 = vrot.slane %v4090_v31, 1  ;;  %v5931_v34 = vld [vmem:[#allocation11 + $0xb0] ss:$8 sps:$4 sm:$0xff]   ;;  %v5939_v41 = vld [vmem:[#allocation11 + $0xd4] ss:$8 sps:$4 sm:$0xff]  }
 0x4cb   : > { %v4082_v17 = vadd.f32 %v4081_v32, %v4080_v28  ;;  %v4097_v40 = vrot.slane %v4096_v35, 1  ;;  %v5934_v28 = vld [vmem:[#allocation11 + $0xc0] ss:$8 sps:$4 sm:$0xff]   ;;  %v5937_v30 = vld [vmem:[#allocation11 + $0xd0] ss:$8 sps:$4 sm:$0xff]  }
 0x4cc   : > { %v4083_v25 = vmul.f32 0.5, %v4076_v36  ;;  %v4092_v43 = vadd.f32 %v4091_v37, %v4090_v31  ;;  %v5942_v31 = vld [vmem:[#allocation11 + $0xe4] ss:$8 sps:$4 sm:$0xff]   ;;  %v5940_v32 = vld [vmem:[#allocation11 + $0xe0] ss:$8 sps:$4 sm:$0xff]  }
 0x4cd   : > { %v4084_v15 = vmul.f32 0.5, %v4082_v17  ;;  %v4098_v38 = vadd.f32 %v4097_v40, %v4096_v35  ;;  %v5943_v35 = vld [vmem:[#allocation11 + $0xf0] ss:$8 sps:$4 sm:$0xff]   ;;  %v5945_v36 = vld [vmem:[#allocation11 + $0xf4] ss:$8 sps:$4 sm:$0xff]   ;;  %v2095_v37 = vld [vmem:[#allocation14 + $0x8] sm:$0xff] }
 0x4ce   : > { %v4099_v46 = vmul.f32 0.5, %v4092_v43  ;;  %v4101_v5 = vmul.f32 %v4083_v25, %v4083_v25  ;;  %v4107_v50 = vsub.f32 %v4062_v4, %v4083_v25  ;;  %v5910_v4 = vld [vmem:[#allocation11 + $0x40] ss:$8 sps:$4 sm:$0xff]   ;;  %v2097_v17 = vld [vmem:[#allocation14 + $0x18] sm:$0xff]  ;;  %v2159_v40 = vmul.f32 0.99, %v2095_v37 }
 0x4cf   : > { %v4100_v44 = vmul.f32 0.5, %v4098_v38  ;;  %v4102_v13 = vmul.f32 %v4084_v15, %v4084_v15  ;;  %v4108_v62 = vsub.f32 %v4064_v29, %v4084_v15  ;;  %v2223_v25 = vld [vmem:[%s8062_s1 + $0x8] sm:$0xff]  ;;  %v2225_v43 = vld [vmem:[%s8062_s1 + $0x18] sm:$0xff]  ;;  %v2161_v15 = vmul.f32 0.99, %v2097_v17 }
 0x4d0   : > { %v4103_v24 = vsub.f32 %v4099_v46, %v4101_v5  ;;  %v2287_v38 = vmul.f32 0.01, %v2223_v25  ;;  %v2289_v46 = vmul.f32 0.01, %v2225_v43  ;;  %v2094_v5 = vld [vmem:[#allocation14] sm:$0xff]  ;;  %v2107_v37 = vld [vmem:[#allocation14 + $0x68] sm:$0xff] }
 0x4d1   : > { %v4104_v51 = vsub.f32 %v4100_v44, %v4102_v13  ;;  %v2096_v44 = vld [vmem:[#allocation14 + $0x10] sm:$0xff]  ;;  %v2222_v13 = vld [vmem:[%s8062_s1] sm:$0xff] }
 0x4d2   : > { %v4105_v39 = vmax.f32 %v4103_v24, 0.0  ;;  %v2351_v24 = vadd.f32 %v2287_v38, %v2159_v40  ;;  %v2235_v38 = vld [vmem:[%s8062_s1 + $0x68] sm:$0xff] }
 0x4d3   : > { %v4106_v48 = vmax.f32 %v4104_v51, 0.0  ;;  %v2353_v51 = vadd.f32 %v2289_v46, %v2161_v15  ;;  %v2109_v15 = vld [vmem:[#allocation14 + $0x78] sm:$0xff]  ;;  %v2171_v46 = vmul.f32 0.99, %v2107_v37  ;;  %v2243_v37 = vld [vmem:[%s8062_s1 + $0xa8] sm:$0xff] }
 0x4d4   : > { %v4109_v49 = vadd.f32 1e-05, %v4105_v39  ;;  %v2158_v39 = vmul.f32 0.99, %v2094_v5  ;;  %3001 = vst [vmem:[#allocation21 + $0x8] sm:$0xff] %v2351_v24 }
 0x4d5   : > { %v4110_v58 = vadd.f32 1e-05, %v4106_v48  ;;  %v2160_v48 = vmul.f32 0.99, %v2096_v44  ;;  %3003 = vst [vmem:[#allocation21 + $0x18] sm:$0xff] %v2353_v51  ;;  %v2237_v44 = vld [vmem:[%s8062_s1 + $0x78] sm:$0xff] }
 0x4d6   : > { %5950 = vrsqrt.f32 %v4109_v49  ;;  %v2224_v49 = vld [vmem:[%s8062_s1 + $0x10] sm:$0xff]  ;;  %v2173_v5 = vmul.f32 0.99, %v2109_v15 }
 0x4d7   : > { %5952 = vrsqrt.f32 %v4110_v58  ;;  %v2286_v58 = vmul.f32 0.01, %v2222_v13  ;;  %v2106_v13 = vld [vmem:[#allocation14 + $0x60] sm:$0xff] }
 0x4e0   : > { %v5951_v53 = vpop.eup %5950 }
 0x4e1   : > { %v5953_v42 = vpop.eup %5952  ;;  %v4113_v55 = vmul.f32 %v5951_v53, %v4107_v50  ;;  %v2288_v50 = vmul.f32 0.01, %v2224_v49  ;;  %v2099_v53 = vld [vmem:[#allocation14 + $0x28] sm:$0xff]  ;;  %v2108_v49 = vld [vmem:[#allocation14 + $0x70] sm:$0xff] }
 0x4e2   : > { %v4114_v59 = vmul.f32 %v5953_v42, %v4108_v62  ;;  %v2101_v62 = vld [vmem:[#allocation14 + $0x38] sm:$0xff]  ;;  %v4792_v42 = vpack.c.bf16 %v2353_v51, %v2351_v24 }
 0x4e3   : > { %v4115_v63 = vpack.c.bf16 %v4113_v55, %v4113_v55  ;;  %v2163_v55 = vmul.f32 0.99, %v2099_v53  ;;  %v2301_v53 = vmul.f32 0.01, %v2237_v44  ;;  %v2307_v44 = vmul.f32 0.01, %v2243_v37 }
 0x4e4   : > { %v4116_v60 = vpack.c.bf16 %v4114_v59, %v4114_v59  ;;  %v2165_v59 = vmul.f32 0.99, %v2101_v62  ;;  %v2170_v62 = vmul.f32 0.99, %v2106_v13  ;;  %v2114_v13 = vld [vmem:[#allocation14 + $0xa0] sm:$0xff] }
 0x4e6   : > { %4341 = vmatprep.mubr.bf16.mxu1 %v4116_v60  ;;  %v2227_v60 = vld [vmem:[%s8062_s1 + $0x28] sm:$0xff] }
 0x4e7   : > { %4342 = vmatmul.mubr.bf16.vlgmr.msra.gmra.mrb[12].mxu1 %v4115_v63  ;;  %v7281_v63 = vadd.f32 %v2286_v58, %v2158_v39  ;;  %v2234_v58 = vld [vmem:[%s8062_s1 + $0x60] sm:$0xff] }
 0x4e8   : > { %4621 = vmatpush1.bf16.msra.mxu1 %v5898_v61  ;;  %v2229_v61 = vld [vmem:[%s8062_s1 + $0x38] sm:$0xff] }
 0x4e9   : > { %4622 = vmatprep.subr.bf16.mxu1 %v5903_v33  ;;  %v7283_v33 = vadd.f32 %v2288_v50, %v2160_v48  ;;  %3000 = vst [vmem:[#allocation21] sm:$0xff] %v7281_v63  ;;  %v2299_v48 = vmul.f32 0.01, %v2235_v38  ;;  %v2236_v50 = vld [vmem:[%s8062_s1 + $0x70] sm:$0xff] }
 0x4eb   : > { %3002 = vst [vmem:[#allocation21 + $0x10] sm:$0xff] %v7283_v33 }
 0x4ec   : > { %4623 = vmatpush1.bf16.msra.mxu1 %v5901_v26  ;;  %v2291_v26 = vmul.f32 0.01, %v2227_v60  ;;  %v2298_v60 = vmul.f32 0.01, %v2234_v58 }
 0x4ed   : > { %4624 = vmatprep.subr.bf16.mxu1 %v5906_v8  ;;  %v2293_v8 = vmul.f32 0.01, %v2229_v61  ;;  %v2300_v61 = vmul.f32 0.01, %v2236_v50  ;;  %v2178_v50 = vmul.f32 0.99, %v2114_v13 }
 0x4f0   : > { %4625 = vmatpush1.bf16.msra.mxu1 %v5904_v0  ;;  %v2098_v0 = vld [vmem:[#allocation14 + $0x20] sm:$0xff] }
 0x4f1   : > { %4626 = vmatprep.subr.bf16.mxu1 %v5909_v1  ;;  %v2100_v1 = vld [vmem:[#allocation14 + $0x30] sm:$0xff] }
 0x4f4   : > { %4627 = vmatpush1.bf16.msra.mxu1 %v5907_v2  ;;  %v2162_v2 = vmul.f32 0.99, %v2098_v0  ;;  %v7353_v0 = vadd.f32 %v2301_v53, %v2173_v5  ;;  %v2245_v5 = vld [vmem:[%s8062_s1 + $0xb8] sm:$0xff] }
 0x4f5   : > { %4628 = vmatprep.subr.bf16.mxu1 %v5912_v3  ;;  %v2164_v3 = vmul.f32 0.99, %v2100_v1  ;;  %v2309_v58 = vmul.f32 0.01, %v2245_v5 }
 0x4f6   : > { %3015 = vst [vmem:[#allocation21 + $0x78] sm:$0xff] %v7353_v0 }
 0x4f8   : > { %4629 = vmatpush1.bf16.msra.mxu1 %v5910_v4  ;;  %v2226_v4 = vld [vmem:[%s8062_s1 + $0x20] sm:$0xff] }
 0x4f9   : > { %4630 = vmatprep.subr.bf16.mxu1 %v5915_v9  ;;  %v7295_v9 = vadd.f32 %v2291_v26, %v2163_v55  ;;  %v2111_v26 = vld [vmem:[#allocation14 + $0x88] sm:$0xff] }
 0x4fa   : > { %v2175_v1 = vmul.f32 0.99, %v2111_v26 }
 0x4fb   : > { %3005 = vst [vmem:[#allocation21 + $0x28] sm:$0xff] %v7295_v9 }
 0x4fc   : > { %4631 = vmatpush1.bf16.msra.mxu1 %v5913_v10  ;;  %v7297_v10 = vadd.f32 %v2293_v8, %v2165_v59  ;;  %v7351_v59 = vadd.f32 %v2299_v48, %v2171_v46  ;;  %v2113_v8 = vld [vmem:[#allocation14 + $0x98] sm:$0xff]  ;;  %v2116_v48 = vld [vmem:[#allocation14 + $0xb0] sm:$0xff] }
 0x4fd   : > { %4632 = vmatprep.subr.bf16.mxu1 %v5918_v11  ;;  %v2290_v11 = vmul.f32 0.01, %v2226_v4  ;;  %v2241_v4 = vld [vmem:[%s8062_s1 + $0x98] sm:$0xff]  ;;  %v2180_v53 = vmul.f32 0.99, %v2116_v48  ;;  %v2123_v48 = vld [vmem:[#allocation14 + $0xe8] sm:$0xff] }
 0x4fe   : > { %3007 = vst [vmem:[#allocation21 + $0x38] sm:$0xff] %v7297_v10  ;;  %3013 = vst [vmem:[#allocation21 + $0x68] sm:$0xff] %v7351_v59 }
 0x500   : > { %4633 = vmatpush1.bf16.msra.mxu1 %v5916_v12  ;;  %v2103_v12 = vld [vmem:[#allocation14 + $0x48] sm:$0xff] }
 0x501   : > { %4634 = vmatprep.subr.bf16.mxu1 %v5921_v52  ;;  %v2105_v52 = vld [vmem:[#allocation14 + $0x58] sm:$0xff] }
 0x503   : > { %v7259_v23 = vpop.f32.mrb[4].mxu0 }
 0x504   : > { %8065 = vst [vmem:[#allocation38_spill] sm:$0xff] %v7259_v23  ;;  %v7261_v29 = vpop.f32.mrb[5].mxu0  ;;  %4635 = vmatpush1.bf16.msra.mxu1 %v5919_v21  ;;  %v2231_v21 = vld [vmem:[%s8062_s1 + $0x48] sm:$0xff] }
 0x505   : > { %v5016_v6 = vpop.f32.mrb[6].mxu0  ;;  %4636 = vmatprep.subr.bf16.mxu1 %v5924_v14  ;;  %v2142_v23 = vld [vmem:[#allocation14 + $0x180] sm:$0xff] }
 0x506   : > { %v5017_v7 = vpop.f32.mrb[7].mxu0  ;;  %v2228_v6 = vld [vmem:[%s8062_s1 + $0x30] sm:$0xff] }
 0x507   : > { %v2292_v14 = vmul.f32 0.01, %v2228_v6  ;;  %v7362_v6 = vadd.f32 %v2298_v60, %v2170_v62  ;;  %v2244_v60 = vld [vmem:[%s8062_s1 + $0xb0] sm:$0xff]  ;;  %v2273_v7 = vld [vmem:[%s8062_s1 + $0x198] sm:$0xff] }
 0x508   : > { %4637 = vmatpush1.bf16.msra.mxu1 %v5922_v16  ;;  %v2167_v16 = vmul.f32 0.99, %v2103_v12 }
 0x509   : > { %4638 = vmatprep.subr.bf16.mxu1 %v5927_v18  ;;  %v2169_v18 = vmul.f32 0.99, %v2105_v52  ;;  %v2305_v52 = vmul.f32 0.01, %v2241_v4  ;;  %3012 = vst [vmem:[#allocation21 + $0x60] sm:$0xff] %v7362_v6  ;;  %v2247_v4 = vld [vmem:[%s8062_s1 + $0xc8] sm:$0xff] }
 0x50c   : > { %4639 = vmatpush1.bf16.msra.mxu1 %v5925_v19 }
 0x50d   : > { %4640 = vmatprep.subr.bf16.mxu1 %v5930_v54  ;;  %v7306_v54 = vadd.f32 %v2290_v11, %v2162_v2  ;;  %v2177_v2 = vmul.f32 0.99, %v2113_v8 }
 0x50f   : > { %3004 = vst [vmem:[#allocation21 + $0x20] sm:$0xff] %v7306_v54 }
 0x510   : > { %4641 = vmatpush1.bf16.msra.mxu1 %v5928_v20  ;;  %v2233_v20 = vld [vmem:[%s8062_s1 + $0x58] sm:$0xff] }
 0x511   : > { %4642 = vmatprep.subr.bf16.mxu1 %v5933_v22  ;;  %v2295_v22 = vmul.f32 0.01, %v2231_v21  ;;  %v2110_v21 = vld [vmem:[#allocation14 + $0x80] sm:$0xff] }
 0x514   : > { %4643 = vmatpush1.bf16.msra.mxu1 %v5931_v34  ;;  %v2102_v34 = vld [vmem:[#allocation14 + $0x40] sm:$0xff] }
 0x515   : > { %4644 = vmatprep.subr.bf16.mxu1 %v5936_v27  ;;  %v2104_v27 = vld [vmem:[#allocation14 + $0x50] sm:$0xff] }
 0x518   : > { %4645 = vmatpush1.bf16.msra.mxu1 %v5934_v28  ;;  %v7311_v28 = vadd.f32 %v2292_v14, %v2164_v3  ;;  %v2239_v3 = vld [vmem:[%s8062_s1 + $0x88] sm:$0xff]  ;;  %v2112_v14 = vld [vmem:[#allocation14 + $0x90] sm:$0xff] }
 0x519   : > { %4646 = vmatprep.subr.bf16.mxu1 %v5939_v41  ;;  %v2297_v41 = vmul.f32 0.01, %v2233_v20  ;;  %v2303_v12 = vmul.f32 0.01, %v2239_v3  ;;  %v2176_v20 = vmul.f32 0.99, %v2112_v14 }
 0x51a   : > { %3006 = vst [vmem:[#allocation21 + $0x30] sm:$0xff] %v7311_v28  ;;  %v2121_v3 = vld [vmem:[#allocation14 + $0xd8] sm:$0xff]  ;;  %v2118_v14 = vld [vmem:[#allocation14 + $0xc0] sm:$0xff] }
 0x51b   : > { %v7325_v40 = vadd.f32 %v2297_v41, %v2169_v18  ;;  %v2174_v18 = vmul.f32 0.99, %v2110_v21  ;;  %v7379_v41 = vadd.f32 %v2303_v12, %v2175_v1  ;;  %v2249_v21 = vld [vmem:[%s8062_s1 + $0xd8] sm:$0xff] }
 0x51c   : > { %4647 = vmatpush1.bf16.msra.mxu1 %v5937_v30  ;;  %v2166_v30 = vmul.f32 0.99, %v2102_v34  ;;  %v2240_v34 = vld [vmem:[%s8062_s1 + $0x90] sm:$0xff]  ;;  %v2313_v37 = vmul.f32 0.01, %v2249_v21  ;;  %v2130_v21 = vld [vmem:[#allocation14 + $0x120] sm:$0xff] }
 0x51d   : > { %4648 = vmatprep.subr.bf16.mxu1 %v5942_v31  ;;  %v2168_v31 = vmul.f32 0.99, %v2104_v27  ;;  %3011 = vst [vmem:[#allocation21 + $0x58] sm:$0xff] %v7325_v40  ;;  %3017 = vst [vmem:[#allocation21 + $0x88] sm:$0xff] %v7379_v41 }
 0x520   : > { %4649 = vmatpush1.bf16.msra.mxu1 %v5940_v32  ;;  %v7314_v32 = vadd.f32 %v2295_v22, %v2167_v16  ;;  %v2238_v22 = vld [vmem:[%s8062_s1 + $0x80] sm:$0xff] }
 0x521   : > { %4650 = vmatprep.subr.bf16.mxu1 %v5945_v36  ;;  %v2232_v36 = vld [vmem:[%s8062_s1 + $0x50] sm:$0xff] }
 0x522   : > { %v2296_v43 = vmul.f32 0.01, %v2232_v36  ;;  %3009 = vst [vmem:[#allocation21 + $0x48] sm:$0xff] %v7314_v32  ;;  %v2117_v36 = vld [vmem:[#allocation14 + $0xb8] sm:$0xff] }
 0x523   : > { %v2181_v15 = vmul.f32 0.99, %v2117_v36  ;;  %v2248_v36 = vld [vmem:[%s8062_s1 + $0xd0] sm:$0xff] }
 0x524   : > { %4651 = vmatpush1.bf16.msra.mxu1 %v5943_v35  ;;  %v2230_v35 = vld [vmem:[%s8062_s1 + $0x40] sm:$0xff]  ;;  %v7339_v39 = vadd.f32 %v2296_v43, %v2168_v31  ;;  %v2302_v31 = vmul.f32 0.01, %v2238_v22  ;;  %v2312_v13 = vmul.f32 0.01, %v2248_v36  ;;  %v2261_v36 = vld [vmem:[%s8062_s1 + $0x138] sm:$0xff] }
 0x525   : > { %5023 = vmatprep.subr.bf16.mxu1 %v4792_v42  ;;  %v2294_v25 = vmul.f32 0.01, %v2230_v35  ;;  %v2172_v42 = vmul.f32 0.99, %v2108_v49  ;;  %v2115_v35 = vld [vmem:[#allocation14 + $0xa8] sm:$0xff]  ;;  %v7409_v8 = vadd.f32 %v2309_v58, %v2181_v15  ;;  %v2125_v58 = vld [vmem:[#allocation14 + $0xf8] sm:$0xff] }
 0x526   : > { %3010 = vst [vmem:[#allocation21 + $0x50] sm:$0xff] %v7339_v39  ;;  %v2179_v43 = vmul.f32 0.99, %v2115_v35  ;;  %v7390_v46 = vadd.f32 %v2302_v31, %v2174_v18  ;;  %v2120_v31 = vld [vmem:[#allocation14 + $0xd0] sm:$0xff]  ;;  %v2246_v35 = vld [vmem:[%s8062_s1 + $0xc0] sm:$0xff] }
 0x527   : > { %v7337_v51 = vadd.f32 %v2294_v25, %v2166_v30  ;;  %v7364_v11 = vadd.f32 %v2300_v61, %v2172_v42  ;;  %v7381_v30 = vadd.f32 %v2305_v52, %v2177_v2  ;;  %v2304_v25 = vmul.f32 0.01, %v2240_v34  ;;  %v2242_v42 = vld [vmem:[%s8062_s1 + $0xa0] sm:$0xff]  ;;  %v2119_v61 = vld [vmem:[#allocation14 + $0xc8] sm:$0xff]  ;;  %3023 = vst [vmem:[#allocation21 + $0xb8] sm:$0xff] %v7409_v8 }
 0x528   : > { %3016 = vst [vmem:[#allocation21 + $0x80] sm:$0xff] %v7390_v46  ;;  %v7398_v62 = vadd.f32 %v2307_v44, %v2179_v43  ;;  %v2306_v1 = vmul.f32 0.01, %v2242_v42  ;;  %v2308_v2 = vmul.f32 0.01, %v2244_v60  ;;  %v2251_v60 = vld [vmem:[%s8062_s1 + $0xe8] sm:$0xff] }
 0x529   : > { %3008 = vst [vmem:[#allocation21 + $0x40] sm:$0xff] %v7337_v51  ;;  %3014 = vst [vmem:[#allocation21 + $0x70] sm:$0xff] %v7364_v11  ;;  %v7395_v49 = vadd.f32 %v2304_v25, %v2176_v20  ;;  %v2183_v12 = vmul.f32 0.99, %v2119_v61  ;;  %v2185_v52 = vmul.f32 0.99, %v2121_v3 }
 0x52a   : > { %3019 = vst [vmem:[#allocation21 + $0x98] sm:$0xff] %v7381_v30  ;;  %3021 = vst [vmem:[#allocation21 + $0xa8] sm:$0xff] %v7398_v62  ;;  %v7421_v20 = vadd.f32 %v2306_v1, %v2178_v50  ;;  %v7423_v22 = vadd.f32 %v2308_v2, %v2180_v53  ;;  %v2311_v34 = vmul.f32 0.01, %v2247_v4  ;;  %v2182_v25 = vmul.f32 0.99, %v2118_v14 }
 0x52b   : > { %3018 = vst [vmem:[#allocation21 + $0x90] sm:$0xff] %v7395_v49  ;;  %v2184_v43 = vmul.f32 0.99, %v2120_v31  ;;  %v2310_v44 = vmul.f32 0.01, %v2246_v35  ;;  %v7437_v50 = vadd.f32 %v2313_v37, %v2185_v52  ;;  %v2253_v61 = vld [vmem:[%s8062_s1 + $0xf8] sm:$0xff] }
 0x52c   : > { %3020 = vst [vmem:[#allocation21 + $0xa0] sm:$0xff] %v7421_v20  ;;  %3022 = vst [vmem:[#allocation21 + $0xb0] sm:$0xff] %v7423_v22  ;;  %v7435_v5 = vadd.f32 %v2311_v34, %v2183_v12  ;;  %v2187_v53 = vmul.f32 0.99, %v2123_v48  ;;  %v2189_v42 = vmul.f32 0.99, %v2125_v58 }
 0x52d   : > { %v7446_v1 = vadd.f32 %v2310_v44, %v2182_v25  ;;  %v7448_v2 = vadd.f32 %v2312_v13, %v2184_v43  ;;  %v2315_v3 = vmul.f32 0.01, %v2251_v60  ;;  %v2317_v4 = vmul.f32 0.01, %v2253_v61  ;;  %v2122_v12 = vld [vmem:[#allocation14 + $0xe0] sm:$0xff]  ;;  %v2124_v52 = vld [vmem:[#allocation14 + $0xf0] sm:$0xff] }
 0x52e   : > { %3025 = vst [vmem:[#allocation21 + $0xc8] sm:$0xff] %v7435_v5  ;;  %3027 = vst [vmem:[#allocation21 + $0xd8] sm:$0xff] %v7437_v50  ;;  %v2186_v14 = vmul.f32 0.99, %v2122_v12  ;;  %v2188_v34 = vmul.f32 0.99, %v2124_v52 }
 0x52f   : > { %v2250_v31 = vld [vmem:[%s8062_s1 + $0xe0] sm:$0xff]  ;;  %v2252_v35 = vld [vmem:[%s8062_s1 + $0xf0] sm:$0xff]  ;;  %3024 = vst [vmem:[#allocation21 + $0xc0] sm:$0xff] %v7446_v1  ;;  %3026 = vst [vmem:[#allocation21 + $0xd0] sm:$0xff] %v7448_v2  ;;  %v7463_v37 = vadd.f32 %v2315_v3, %v2187_v53  ;;  %v7465_v25 = vadd.f32 %v2317_v4, %v2189_v42  ;;  %v2325_v15 = vmul.f32 0.01, %v2261_v36 }
 0x530   : > { %v2314_v43 = vmul.f32 0.01, %v2250_v31  ;;  %v2127_v44 = vld [vmem:[#allocation14 + $0x108] sm:$0xff]  ;;  %v2129_v13 = vld [vmem:[#allocation14 + $0x118] sm:$0xff]  ;;  %v2316_v58 = vmul.f32 0.01, %v2252_v35 }
 0x531   : > { %v2255_v48 = vld [vmem:[%s8062_s1 + $0x108] sm:$0xff]  ;;  %v2191_v60 = vmul.f32 0.99, %v2127_v44  ;;  %v2193_v61 = vmul.f32 0.99, %v2129_v13  ;;  %3029 = vst [vmem:[#allocation21 + $0xe8] sm:$0xff] %v7463_v37 }
 0x532   : > { %3031 = vst [vmem:[#allocation21 + $0xf8] sm:$0xff] %v7465_v25  ;;  %v7474_v3 = vadd.f32 %v2314_v43, %v2186_v14  ;;  %v2257_v42 = vld [vmem:[%s8062_s1 + $0x118] sm:$0xff]  ;;  %v2319_v4 = vmul.f32 0.01, %v2255_v48  ;;  %v2126_v12 = vld [vmem:[#allocation14 + $0x100] sm:$0xff]  ;;  %v7479_v31 = vadd.f32 %v2316_v58, %v2188_v34  ;;  %v2256_v43 = vld [vmem:[%s8062_s1 + $0x110] sm:$0xff] }
 0x533   : > { %v2128_v52 = vld [vmem:[#allocation14 + $0x110] sm:$0xff]  ;;  %v2321_v35 = vmul.f32 0.01, %v2257_v42  ;;  %v2190_v44 = vmul.f32 0.99, %v2126_v12  ;;  %v2254_v14 = vld [vmem:[%s8062_s1 + $0x100] sm:$0xff] }
 0x534   : > { %v2192_v13 = vmul.f32 0.99, %v2128_v52  ;;  %3028 = vst [vmem:[#allocation21 + $0xe0] sm:$0xff] %v7474_v3  ;;  %v7482_v47 = vadd.f32 %v2319_v4, %v2191_v60  ;;  %v2131_v48 = vld [vmem:[#allocation14 + $0x128] sm:$0xff]  ;;  %3030 = vst [vmem:[#allocation21 + $0xf0] sm:$0xff] %v7479_v31  ;;  %v2133_v60 = vld [vmem:[#allocation14 + $0x138] sm:$0xff] }
 0x535   : > { %v7493_v58 = vadd.f32 %v2321_v35, %v2193_v61  ;;  %v2318_v42 = vmul.f32 0.01, %v2254_v14  ;;  %v2320_v12 = vmul.f32 0.01, %v2256_v43  ;;  %v2259_v4 = vld [vmem:[%s8062_s1 + $0x128] sm:$0xff]  ;;  %v2132_v34 = vld [vmem:[#allocation14 + $0x130] sm:$0xff] }
 0x536   : > { %3033 = vst [vmem:[#allocation21 + $0x108] sm:$0xff] %v7482_v47  ;;  %v2195_v52 = vmul.f32 0.99, %v2131_v48  ;;  %v2197_v53 = vmul.f32 0.99, %v2133_v60  ;;  %v2258_v48 = vld [vmem:[%s8062_s1 + $0x120] sm:$0xff] }
 0x537   : > { %3035 = vst [vmem:[#allocation21 + $0x118] sm:$0xff] %v7493_v58  ;;  %v7505_v35 = vadd.f32 %v2318_v42, %v2190_v44  ;;  %v7507_v14 = vadd.f32 %v2320_v12, %v2192_v13  ;;  %v2323_v43 = vmul.f32 0.01, %v2259_v4  ;;  %v2260_v60 = vld [vmem:[%s8062_s1 + $0x130] sm:$0xff]  ;;  %v2194_v18 = vmul.f32 0.99, %v2130_v21 }
 0x538   : > { %v2196_v26 = vmul.f32 0.99, %v2132_v34  ;;  %v2322_v42 = vmul.f32 0.01, %v2258_v48  ;;  %v2324_v12 = vmul.f32 0.01, %v2260_v60  ;;  %v7521_v38 = vadd.f32 %v2325_v15, %v2197_v53 }
 0x539   : > { %8066 = vst [vmem:[#allocation39_spill] sm:$0xff] %v7505_v35  ;;  %8067 = vst [vmem:[#allocation40_spill] sm:$0xff] %v7507_v14  ;;  %v7519_v13 = vadd.f32 %v2323_v43, %v2195_v52  ;;  %v2135_v4 = vld [vmem:[#allocation14 + $0x148] sm:$0xff]  ;;  %v2137_v61 = vld [vmem:[#allocation14 + $0x158] sm:$0xff] }
 0x53a   : > { %3032 = vst [vmem:[#allocation21 + $0x100] sm:$0xff] %v7505_v35  ;;  %3034 = vst [vmem:[#allocation21 + $0x110] sm:$0xff] %v7507_v14  ;;  %v2199_v27 = vmul.f32 0.99, %v2135_v4  ;;  %v2201_v16 = vmul.f32 0.99, %v2137_v61  ;;  %v7530_v34 = vadd.f32 %v2322_v42, %v2194_v18  ;;  %v7532_v52 = vadd.f32 %v2324_v12, %v2196_v26 }
 0x53b   : > { %8068 = vst [vmem:[#allocation41_spill] sm:$0xff] %v7519_v13  ;;  %8069 = vst [vmem:[#allocation42_spill] sm:$0xff] %v7521_v38  ;;  %v2263_v21 = vld [vmem:[%s8062_s1 + $0x148] sm:$0xff]  ;;  %v2265_v36 = vld [vmem:[%s8062_s1 + $0x158] sm:$0xff] }
 0x53c   : > { %3037 = vst [vmem:[#allocation21 + $0x128] sm:$0xff] %v7519_v13  ;;  %8070 = vst [vmem:[#allocation43_spill] sm:$0xff] %v7530_v34  ;;  %v2327_v43 = vmul.f32 0.01, %v2263_v21  ;;  %v2329_v48 = vmul.f32 0.01, %v2265_v36 }
 0x53d   : > { %8071 = vst [vmem:[#allocation44_spill] sm:$0xff] %v7532_v52  ;;  %v2134_v15 = vld [vmem:[#allocation14 + $0x140] sm:$0xff]  ;;  %v2136_v53 = vld [vmem:[#allocation14 + $0x150] sm:$0xff]  ;;  %3039 = vst [vmem:[#allocation21 + $0x138] sm:$0xff] %v7521_v38 }
 0x53e   : > { %v2198_v60 = vmul.f32 0.99, %v2134_v15  ;;  %v2200_v4 = vmul.f32 0.99, %v2136_v53  ;;  %v2262_v44 = vld [vmem:[%s8062_s1 + $0x140] sm:$0xff]  ;;  %v2264_v26 = vld [vmem:[%s8062_s1 + $0x150] sm:$0xff]  ;;  %v7547_v42 = vadd.f32 %v2327_v43, %v2199_v27  ;;  %v7549_v12 = vadd.f32 %v2329_v48, %v2201_v16 }
 0x53f   : > { %3036 = vst [vmem:[#allocation21 + $0x120] sm:$0xff] %v7530_v34  ;;  %3038 = vst [vmem:[#allocation21 + $0x130] sm:$0xff] %v7532_v52  ;;  %v2326_v21 = vmul.f32 0.01, %v2262_v44  ;;  %v2139_v36 = vld [vmem:[#allocation14 + $0x168] sm:$0xff]  ;;  %v2141_v15 = vld [vmem:[#allocation14 + $0x178] sm:$0xff] }
 0x540   : > { %8072 = vst [vmem:[#allocation45_spill] sm:$0xff] %v7547_v42  ;;  %8073 = vst [vmem:[#allocation46_spill] sm:$0xff] %v7549_v12  ;;  %v2267_v53 = vld [vmem:[%s8062_s1 + $0x168] sm:$0xff]  ;;  %v2328_v61 = vmul.f32 0.01, %v2264_v26  ;;  %v2269_v16 = vld [vmem:[%s8062_s1 + $0x178] sm:$0xff] }
 0x541   : > { %v2203_v55 = vmul.f32 0.99, %v2139_v36  ;;  %v2205_v24 = vmul.f32 0.99, %v2141_v15  ;;  %3041 = vst [vmem:[#allocation21 + $0x148] sm:$0xff] %v7547_v42  ;;  %3043 = vst [vmem:[#allocation21 + $0x158] sm:$0xff] %v7549_v12  ;;  %v7558_v43 = vadd.f32 %v2326_v21, %v2198_v60 }
 0x542   : > { %v2331_v44 = vmul.f32 0.01, %v2267_v53  ;;  %v2138_v48 = vld [vmem:[#allocation14 + $0x160] sm:$0xff]  ;;  %v2140_v18 = vld [vmem:[#allocation14 + $0x170] sm:$0xff]  ;;  %v7563_v17 = vadd.f32 %v2328_v61, %v2200_v4  ;;  %v2333_v26 = vmul.f32 0.01, %v2269_v16 }
 0x543   : > { %8074 = vst [vmem:[#allocation47_spill] sm:$0xff] %v7558_v43  ;;  %v2202_v36 = vmul.f32 0.99, %v2138_v48  ;;  %v2204_v15 = vmul.f32 0.99, %v2140_v18  ;;  %3040 = vst [vmem:[#allocation21 + $0x140] sm:$0xff] %v7558_v43 }
 0x544   : > { %8075 = vst [vmem:[#allocation48_spill] sm:$0xff] %v7563_v17  ;;  %v7566_v19 = vadd.f32 %v2331_v44, %v2203_v55  ;;  %v2266_v60 = vld [vmem:[%s8062_s1 + $0x160] sm:$0xff]  ;;  %v2268_v21 = vld [vmem:[%s8062_s1 + $0x170] sm:$0xff]  ;;  %3042 = vst [vmem:[#allocation21 + $0x150] sm:$0xff] %v7563_v17  ;;  %v7577_v4 = vadd.f32 %v2333_v26, %v2205_v24  ;;  %v2337_v43 = vmul.f32 0.01, %v2273_v7 }
 0x545   : > { %v2143_v53 = vld [vmem:[#allocation14 + $0x188] sm:$0xff]  ;;  %v2330_v18 = vmul.f32 0.01, %v2266_v60  ;;  %v2332_v16 = vmul.f32 0.01, %v2268_v21  ;;  %v2145_v55 = vld [vmem:[#allocation14 + $0x198] sm:$0xff] }
 0x546   : > { %8076 = vst [vmem:[#allocation49_spill] sm:$0xff] %v7566_v19  ;;  %8077 = vst [vmem:[#allocation50_spill] sm:$0xff] %v7577_v4  ;;  %v2271_v44 = vld [vmem:[%s8062_s1 + $0x188] sm:$0xff]  ;;  %v2207_v48 = vmul.f32 0.99, %v2143_v53  ;;  %v2144_v61 = vld [vmem:[#allocation14 + $0x190] sm:$0xff] }
 0x547   : > { %3045 = vst [vmem:[#allocation21 + $0x168] sm:$0xff] %v7566_v19  ;;  %v2209_v27 = vmul.f32 0.99, %v2145_v55  ;;  %3047 = vst [vmem:[#allocation21 + $0x178] sm:$0xff] %v7577_v4  ;;  %v7589_v26 = vadd.f32 %v2330_v18, %v2202_v36  ;;  %v7591_v60 = vadd.f32 %v2332_v16, %v2204_v15  ;;  %v2335_v21 = vmul.f32 0.01, %v2271_v44 }
 0x548   : > { %v2270_v53 = vld [vmem:[%s8062_s1 + $0x180] sm:$0xff]  ;;  %v2272_v55 = vld [vmem:[%s8062_s1 + $0x190] sm:$0xff]  ;;  %v2206_v17 = vmul.f32 0.99, %v2142_v23  ;;  %v2208_v42 = vmul.f32 0.99, %v2144_v61 }
 0x549   : > { %8078 = vst [vmem:[#allocation51_spill] sm:$0xff] %v7589_v26  ;;  %8079 = vst [vmem:[#allocation52_spill] sm:$0xff] %v7591_v60  ;;  %v7603_v15 = vadd.f32 %v2335_v21, %v2207_v48  ;;  %v2334_v18 = vmul.f32 0.01, %v2270_v53  ;;  %v2336_v16 = vmul.f32 0.01, %v2272_v55  ;;  %v7605_v19 = vadd.f32 %v2337_v43, %v2209_v27 }
 0x54a   : > { %3044 = vst [vmem:[#allocation21 + $0x160] sm:$0xff] %v7589_v26  ;;  %3046 = vst [vmem:[#allocation21 + $0x170] sm:$0xff] %v7591_v60  ;;  %v2147_v44 = vld [vmem:[#allocation14 + $0x1a8] sm:$0xff]  ;;  %v2149_v24 = vld [vmem:[#allocation14 + $0x1b8] sm:$0xff] }
 0x54b   : > { %8080 = vst [vmem:[#allocation53_spill] sm:$0xff] %v7603_v15  ;;  %8081 = vst [vmem:[#allocation54_spill] sm:$0xff] %v7605_v19  ;;  %v2211_v4 = vmul.f32 0.99, %v2147_v44  ;;  %v2213_v12 = vmul.f32 0.99, %v2149_v24  ;;  %v7614_v61 = vadd.f32 %v2334_v18, %v2206_v17  ;;  %v7616_v48 = vadd.f32 %v2336_v16, %v2208_v42 }
 0x54c   : > { %v2275_v23 = vld [vmem:[%s8062_s1 + $0x1a8] sm:$0xff]  ;;  %v2277_v7 = vld [vmem:[%s8062_s1 + $0x1b8] sm:$0xff]  ;;  %3049 = vst [vmem:[#allocation21 + $0x188] sm:$0xff] %v7603_v15  ;;  %3051 = vst [vmem:[#allocation21 + $0x198] sm:$0xff] %v7605_v19 }
 0x54d   : > { %8082 = vst [vmem:[#allocation55_spill] sm:$0xff] %v7614_v61  ;;  %8083 = vst [vmem:[#allocation56_spill] sm:$0xff] %v7616_v48  ;;  %v2339_v21 = vmul.f32 0.01, %v2275_v23  ;;  %v2341_v53 = vmul.f32 0.01, %v2277_v7 }
 0x54e   : > { %v2146_v27 = vld [vmem:[#allocation14 + $0x1a0] sm:$0xff]  ;;  %v2148_v43 = vld [vmem:[#allocation14 + $0x1b0] sm:$0xff]  ;;  %3048 = vst [vmem:[#allocation21 + $0x180] sm:$0xff] %v7614_v61  ;;  %3050 = vst [vmem:[#allocation21 + $0x190] sm:$0xff] %v7616_v48 }
 0x54f   : > { %v2210_v55 = vmul.f32 0.99, %v2146_v27  ;;  %v2212_v44 = vmul.f32 0.99, %v2148_v43  ;;  %v2274_v36 = vld [vmem:[%s8062_s1 + $0x1a0] sm:$0xff]  ;;  %v2276_v17 = vld [vmem:[%s8062_s1 + $0x1b0] sm:$0xff]  ;;  %v7631_v18 = vadd.f32 %v2339_v21, %v2211_v4  ;;  %v7633_v16 = vadd.f32 %v2341_v53, %v2213_v12 }
 0x550   : > { %v2338_v23 = vmul.f32 0.01, %v2274_v36  ;;  %v2151_v7 = vld [vmem:[#allocation14 + $0x1c8] sm:$0xff]  ;;  %v2153_v27 = vld [vmem:[#allocation14 + $0x1d8] sm:$0xff]  ;;  %v2340_v24 = vmul.f32 0.01, %v2276_v17 }
 0x551   : > { %8084 = vst [vmem:[#allocation57_spill] sm:$0xff] %v7631_v18  ;;  %8085 = vst [vmem:[#allocation58_spill] sm:$0xff] %v7633_v16  ;;  %v2279_v43 = vld [vmem:[%s8062_s1 + $0x1c8] sm:$0xff]  ;;  %v2215_v15 = vmul.f32 0.99, %v2151_v7  ;;  %v2281_v12 = vld [vmem:[%s8062_s1 + $0x1d8] sm:$0xff] }
 0x552   : > { %v2217_v19 = vmul.f32 0.99, %v2153_v27  ;;  %3053 = vst [vmem:[#allocation21 + $0x1a8] sm:$0xff] %v7631_v18  ;;  %3055 = vst [vmem:[#allocation21 + $0x1b8] sm:$0xff] %v7633_v16  ;;  %v7642_v21 = vadd.f32 %v2338_v23, %v2210_v55  ;;  %v2343_v36 = vmul.f32 0.01, %v2279_v43  ;;  %v7647_v61 = vadd.f32 %v2340_v24, %v2212_v44 }
 0x553   : > { %v2150_v53 = vld [vmem:[#allocation14 + $0x1c0] sm:$0xff]  ;;  %v2152_v42 = vld [vmem:[#allocation14 + $0x1d0] sm:$0xff]  ;;  %v2345_v17 = vmul.f32 0.01, %v2281_v12  ;;  %v2155_v43 = vld [vmem:[#allocation14 + $0x1e8] sm:$0xff] }
 0x554   : > { %8086 = vst [vmem:[#allocation59_spill] sm:$0xff] %v7642_v21  ;;  %8087 = vst [vmem:[#allocation60_spill] sm:$0xff] %v7647_v61  ;;  %v2214_v7 = vmul.f32 0.99, %v2150_v53  ;;  %v2216_v27 = vmul.f32 0.99, %v2152_v42  ;;  %v7650_v48 = vadd.f32 %v2343_v36, %v2215_v15 }
 0x555   : > { %3052 = vst [vmem:[#allocation21 + $0x1a0] sm:$0xff] %v7642_v21  ;;  %v2278_v55 = vld [vmem:[%s8062_s1 + $0x1c0] sm:$0xff]  ;;  %v2280_v23 = vld [vmem:[%s8062_s1 + $0x1d0] sm:$0xff]  ;;  %3054 = vst [vmem:[#allocation21 + $0x1b0] sm:$0xff] %v7647_v61  ;;  %v7661_v44 = vadd.f32 %v2345_v17, %v2217_v19  ;;  %v2219_v53 = vmul.f32 0.99, %v2155_v43 }
 0x556   : > { %8088 = vst [vmem:[#allocation61_spill] sm:$0xff] %v7650_v48  ;;  %v2342_v42 = vmul.f32 0.01, %v2278_v55  ;;  %v2344_v12 = vmul.f32 0.01, %v2280_v23  ;;  %v2157_v15 = vld [vmem:[#allocation14 + $0x1f8] sm:$0xff] }
 0x557   : > { %8089 = vst [vmem:[#allocation62_spill] sm:$0xff] %v7661_v44  ;;  %v2283_v36 = vld [vmem:[%s8062_s1 + $0x1e8] sm:$0xff]  ;;  %3057 = vst [vmem:[#allocation21 + $0x1c8] sm:$0xff] %v7650_v48  ;;  %v2221_v4 = vmul.f32 0.99, %v2157_v15  ;;  %v2285_v18 = vld [vmem:[%s8062_s1 + $0x1f8] sm:$0xff] }
 0x558   : > { %v2154_v16 = vld [vmem:[#allocation14 + $0x1e0] sm:$0xff]  ;;  %3059 = vst [vmem:[#allocation21 + $0x1d8] sm:$0xff] %v7661_v44  ;;  %v7673_v17 = vadd.f32 %v2342_v42, %v2214_v7  ;;  %v7675_v55 = vadd.f32 %v2344_v12, %v2216_v27  ;;  %v2347_v23 = vmul.f32 0.01, %v2283_v36  ;;  %v2156_v24 = vld [vmem:[#allocation14 + $0x1f0] sm:$0xff] }
 0x559   : > { %v2282_v43 = vld [vmem:[%s8062_s1 + $0x1e0] sm:$0xff]  ;;  %v2284_v15 = vld [vmem:[%s8062_s1 + $0x1f0] sm:$0xff]  ;;  %v2349_v21 = vmul.f32 0.01, %v2285_v18  ;;  %v2218_v61 = vmul.f32 0.99, %v2154_v16 }
 0x55a   : > { %8090 = vst [vmem:[#allocation63_spill] sm:$0xff] %v7673_v17  ;;  %8091 = vst [vmem:[#allocation64_spill] sm:$0xff] %v7675_v55  ;;  %v2220_v26 = vmul.f32 0.99, %v2156_v24  ;;  %v7687_v27 = vadd.f32 %v2347_v23, %v2219_v53  ;;  %v2346_v42 = vmul.f32 0.01, %v2282_v43 }
 0x55b   : > { %3056 = vst [vmem:[#allocation21 + $0x1c0] sm:$0xff] %v7673_v17  ;;  %3058 = vst [vmem:[#allocation21 + $0x1d0] sm:$0xff] %v7675_v55  ;;  %v2348_v12 = vmul.f32 0.01, %v2284_v15  ;;  %v7689_v36 = vadd.f32 %v2349_v21, %v2221_v4 }
 0x55c   : > { %8092 = vst [vmem:[#allocation65_spill] sm:$0xff] %v7687_v27  ;;  %3061 = vst [vmem:[#allocation21 + $0x1e8] sm:$0xff] %v7687_v27  ;;  %v7692_v19 = vadd.f32 %v2346_v42, %v2218_v61 }
 0x55d   : > { %8093 = vst [vmem:[#allocation66_spill] sm:$0xff] %v7689_v36  ;;  %v7694_v18 = vadd.f32 %v2348_v12, %v2220_v26  ;;  %3063 = vst [vmem:[#allocation21 + $0x1f8] sm:$0xff] %v7689_v36 }
 0x55e   : > { %8094 = vst [vmem:[#allocation67_spill] sm:$0xff] %v7692_v19  ;;  %3060 = vst [vmem:[#allocation21 + $0x1e0] sm:$0xff] %v7692_v19 }
 0x55f   : > { %8095 = vst [vmem:[#allocation68_spill] sm:$0xff] %v7694_v18  ;;  %3062 = vst [vmem:[#allocation21 + $0x1f0] sm:$0xff] %v7694_v18 }
 0x5ba   : > { %v4343_v4 = vpop.f32.mrb[12].mxu1 }
 0x5bb   : > { %v4352_v21 = vsel %vm3951_vm0, %v4343_v4, 0.0  ;;  %v4345_v61 = vpop.f32.mrb[13].mxu1 }
 0x5bc   : > { %v4354_v53 = vrot.slane %v4352_v21, 4  ;;  %v4368_v26 = vmul.f32 %v4352_v21, %v4352_v21  ;;  %v4353_v23 = vsel %vm3951_vm0, %v4345_v61, 0.0  ;;  %v4347_v43 = vpop.f32.mrb[14].mxu1 }
 0x5bd   : > { %v4360_v15 = vrot.slane %v4353_v23, 4  ;;  %v4369_v42 = vmul.f32 %v4353_v23, %v4353_v23  ;;  %v4348_v12 = vpop.f32.mrb[15].mxu1 }
 0x5be   : > { %v4355_v16 = vadd.f32 %v4354_v53, %v4352_v21  ;;  %v4370_v7 = vrot.slane %v4368_v26, 4 }
 0x5bf   : > { %v4361_v27 = vadd.f32 %v4360_v15, %v4353_v23  ;;  %v4376_v36 = vrot.slane %v4369_v42, 4 }
 0x5c0   : > { %v4356_v17 = vrot.slane %v4355_v16, 2  ;;  %v4371_v24 = vadd.f32 %v4370_v7, %v4368_v26 }
 0x5c1   : > { %v4362_v19 = vrot.slane %v4361_v27, 2  ;;  %v4377_v18 = vadd.f32 %v4376_v36, %v4369_v42 }
 0x5c2   : > { %v4357_v55 = vadd.f32 %v4356_v17, %v4355_v16  ;;  %v4372_v48 = vrot.slane %v4371_v24, 2 }
 0x5c3   : > { %v4363_v44 = vadd.f32 %v4362_v19, %v4361_v27  ;;  %v4378_v60 = vrot.slane %v4377_v18, 2 }
 0x5c4   : > { %v4358_v34 = vrot.slane %v4357_v55, 1  ;;  %v4373_v52 = vadd.f32 %v4372_v48, %v4371_v24 }
 0x5c5   : > { %v4364_v45 = vrot.slane %v4363_v44, 1  ;;  %v4379_v13 = vadd.f32 %v4378_v60, %v4377_v18 }
 0x5c6   : > { %v4359_v43 = vadd.f32 %v4358_v34, %v4357_v55  ;;  %v4374_v38 = vrot.slane %v4373_v52, 1  ;;  %v4351_v34 = vld [vmem:[#allocation10] sm:$0x3] }
 0x5c7   : > { %v4365_v35 = vadd.f32 %v4364_v45, %v4363_v44  ;;  %v4380_v12 = vrot.slane %v4379_v13, 1  ;;  %v4350_v45 = vld [vmem:[%s7966_s7] sm:$0x3]  ;;  %v4415_v55 = vrot.slane %v4351_v34, %v7189_v56  ;;  %v4419_v24 = vrot.slane %v4351_v34, %v7192_v57 }
 0x5c8   : > { %v4366_v21 = vmul.f32 0.5, %v4359_v43  ;;  %v4375_v53 = vadd.f32 %v4374_v38, %v4373_v52  ;;  %v4406_v60 = vrot.slane %v4350_v45, %v7192_v57  ;;  %v8137_v34 = vld [vmem:[#allocation55_spill] sm:$0xff] }
 0x5c9   : > { %v4367_v23 = vmul.f32 0.5, %v4365_v35  ;;  %v4381_v15 = vadd.f32 %v4380_v12, %v4379_v13  ;;  %v4402_v35 = vrot.slane %v4350_v45, %v7189_v56  ;;  %v8136_v45 = vld [vmem:[#allocation56_spill] sm:$0xff] }
 0x5ca   : > { %v4382_v14 = vmul.f32 0.5, %v4375_v53  ;;  %v4384_v7 = vmul.f32 %v4366_v21, %v4366_v21  ;;  %v4390_v38 = vsub.f32 %v4343_v4, %v4366_v21  ;;  %v5020_v4 = vmax.f32 %v7261_v29, 0.0 }
 0x5cb   : > { %v4383_v26 = vmul.f32 0.5, %v4381_v15  ;;  %v4385_v36 = vmul.f32 %v4367_v23, %v4367_v23  ;;  %v4391_v52 = vsub.f32 %v4345_v61, %v4367_v23  ;;  %v8096_v23 = vpack.c.bf16 %v7283_v33, %v7281_v63 }
 0x5cc   : > { %v4386_v17 = vsub.f32 %v4382_v14, %v4384_v7  ;;  %v5022_v61 = vpack.c.bf16 %v5020_v4, %v5020_v4  ;;  %v8099_v29 = vpack.c.bf16 %v7325_v40, %v7314_v32  ;;  %v8101_v63 = vpack.c.bf16 %v7353_v0, %v7351_v59  ;;  %v8112_v0 = vld [vmem:[#allocation40_spill] sm:$0xff]  ;;  %v8152_v4 = vld [vmem:[#allocation66_spill] sm:$0xff] }
 0x5cd   : > { %v4387_v16 = vsub.f32 %v4383_v26, %v4385_v36  ;;  %v8102_v33 = vpack.c.bf16 %v7364_v11, %v7362_v6  ;;  %v8107_v32 = vpack.c.bf16 %v7437_v50, %v7435_v5  ;;  %v8108_v40 = vpack.c.bf16 %v7448_v2, %v7446_v1  ;;  %v8113_v6 = vld [vmem:[#allocation39_spill] sm:$0xff]  ;;  %v8124_v50 = vld [vmem:[#allocation48_spill] sm:$0xff]  ;;  %v8127_v2 = vld [vmem:[#allocation50_spill] sm:$0xff] }
 0x5ce   : > { %v4388_v19 = vmax.f32 %v4386_v17, 0.0  ;;  %v8097_v17 = vpack.c.bf16 %v7297_v10, %v7295_v9  ;;  %v8103_v9 = vpack.c.bf16 %v7381_v30, %v7379_v41  ;;  %v8104_v10 = vpack.c.bf16 %v7395_v49, %v7390_v46  ;;  %v8115_v41 = vld [vmem:[#allocation42_spill] sm:$0xff]  ;;  %v8116_v30 = vld [vmem:[#allocation41_spill] sm:$0xff]  ;;  %v8118_v49 = vld [vmem:[#allocation44_spill] sm:$0xff] }
 0x5cf   : > { %v4389_v27 = vmax.f32 %v4387_v16, 0.0  ;;  %v8098_v16 = vpack.c.bf16 %v7311_v28, %v7306_v54  ;;  %v8105_v54 = vpack.c.bf16 %v7409_v8, %v7398_v62  ;;  %v8106_v28 = vpack.c.bf16 %v7423_v22, %v7421_v20  ;;  %v8119_v62 = vld [vmem:[#allocation43_spill] sm:$0xff]  ;;  %v8121_v20 = vld [vmem:[#allocation46_spill] sm:$0xff]  ;;  %v8122_v22 = vld [vmem:[#allocation45_spill] sm:$0xff] }
 0x5d0   : > { %v4392_v42 = vadd.f32 1e-05, %v4388_v19  ;;  %v8100_v19 = vpack.c.bf16 %v7339_v39, %v7337_v51  ;;  %v8109_v51 = vpack.c.bf16 %v7465_v25, %v7463_v37  ;;  %v8110_v39 = vpack.c.bf16 %v7479_v31, %v7474_v3  ;;  %v8125_v1 = vld [vmem:[#allocation47_spill] sm:$0xff]  ;;  %v8128_v37 = vld [vmem:[#allocation49_spill] sm:$0xff]  ;;  %v8130_v3 = vld [vmem:[#allocation52_spill] sm:$0xff] }
 0x5d1   : > { %v4393_v48 = vadd.f32 1e-05, %v4389_v27  ;;  %v8111_v59 = vpack.c.bf16 %v7493_v58, %v7482_v47  ;;  %v8114_v11 = vpack.c.bf16 %v8112_v0, %v8113_v6  ;;  %v8117_v46 = vpack.c.bf16 %v8115_v41, %v8116_v30  ;;  %v8131_v31 = vld [vmem:[#allocation51_spill] sm:$0xff]  ;;  %v8133_v27 = vld [vmem:[#allocation54_spill] sm:$0xff] }
 0x5d2   : > { %5954 = vrsqrt.f32 %v4392_v42  ;;  %v8120_v8 = vpack.c.bf16 %v8118_v49, %v8119_v62  ;;  %v8123_v5 = vpack.c.bf16 %v8121_v20, %v8122_v22  ;;  %v8126_v47 = vpack.c.bf16 %v8124_v50, %v8125_v1  ;;  %v8134_v42 = vld [vmem:[#allocation53_spill] sm:$0xff]  ;;  %v2559_v20 = vld [vmem:[#allocation7 + $0x38] sm:$0xff] }
 0x5d3   : > { %5956 = vrsqrt.f32 %v4393_v48  ;;  %v8129_v25 = vpack.c.bf16 %v8127_v2, %v8128_v37  ;;  %v8132_v58 = vpack.c.bf16 %v8130_v3, %v8131_v31  ;;  %v8135_v48 = vpack.c.bf16 %v8133_v27, %v8134_v42  ;;  %v2429_v0 = vld [vmem:[#allocation19 + $0x28] sm:$0xff]  ;;  %v2428_v22 = vld [vmem:[#allocation19 + $0x20] sm:$0xff]  ;;  %v2430_v2 = vld [vmem:[#allocation19 + $0x30] sm:$0xff] }
 0x5d4   : > { %v2557_v49 = vld [vmem:[#allocation7 + $0x28] sm:$0xff]  ;;  %v2493_v62 = vmul.f32 0.99, %v2429_v0  ;;  %v2556_v37 = vld [vmem:[#allocation7 + $0x20] sm:$0xff]  ;;  %v2623_v3 = vmul.f32 0.01, %v2559_v20 }
 0x5d5   : > { %v2492_v31 = vmul.f32 0.99, %v2428_v22  ;;  %v2443_v20 = vld [vmem:[#allocation19 + $0x98] sm:$0xff]  ;;  %v2569_v22 = vld [vmem:[#allocation7 + $0x88] sm:$0xff] }
 0x5dc   : > { %v5955_v13 = vpop.eup %5954 }
 0x5dd   : > { %v5957_v14 = vpop.eup %5956  ;;  %v4396_v44 = vmul.f32 %v5955_v13, %v4390_v38  ;;  %v8138_v38 = vpack.c.bf16 %v8136_v45, %v8137_v34  ;;  %v8140_v13 = vld [vmem:[#allocation57_spill] sm:$0xff] }
 0x5de   : > { %v4397_v18 = vmul.f32 %v5957_v14, %v4391_v52  ;;  %v8143_v14 = vld [vmem:[#allocation59_spill] sm:$0xff]  ;;  %v2433_v34 = vld [vmem:[#allocation19 + $0x48] sm:$0xff] }
 0x5df   : > { %v4409_v43 = vmul.f32 %v4402_v35, %v4396_v44  ;;  %v8139_v35 = vld [vmem:[#allocation58_spill] sm:$0xff] }
 0x5e0   : > { %v4410_v12 = vmul.f32 %v4406_v60, %v4397_v18  ;;  %v8141_v52 = vpack.c.bf16 %v8139_v35, %v8140_v13  ;;  %v8142_v60 = vld [vmem:[#allocation60_spill] sm:$0xff]  ;;  %v8146_v18 = vld [vmem:[#allocation61_spill] sm:$0xff]  ;;  %v2497_v13 = vmul.f32 0.99, %v2433_v34 }
 0x5e1   : > { %v4422_v53 = vadd.f32 %v4415_v55, %v4409_v43  ;;  %v8144_v44 = vpack.c.bf16 %v8142_v60, %v8143_v14  ;;  %v8145_v55 = vld [vmem:[#allocation62_spill] sm:$0xff]  ;;  %v8148_v43 = vld [vmem:[#allocation64_spill] sm:$0xff] }
 0x5e2   : > { %v4423_v15 = vadd.f32 %v4419_v24, %v4410_v12  ;;  %v8147_v24 = vpack.c.bf16 %v8145_v55, %v8146_v18  ;;  %v8149_v12 = vld [vmem:[#allocation63_spill] sm:$0xff]  ;;  %v2561_v60 = vld [vmem:[#allocation7 + $0x48] sm:$0xff] }
 0x5e3   : > { %v4424_v7 = vmax.f32 %v4422_v53, 0.0  ;;  %v8150_v53 = vpack.c.bf16 %v8148_v43, %v8149_v12  ;;  %v2563_v14 = vld [vmem:[#allocation7 + $0x58] sm:$0xff]  ;;  %v2625_v18 = vmul.f32 0.01, %v2561_v60  ;;  %v2432_v43 = vld [vmem:[#allocation19 + $0x40] sm:$0xff] }
 0x5e4   : > { %v4425_v21 = vmax.f32 %v4423_v15, 0.0  ;;  %v8151_v15 = vld [vmem:[#allocation38_spill] sm:$0xff]  ;;  %v2568_v34 = vld [vmem:[#allocation7 + $0x80] sm:$0xff] }
 0x5e5   : > { %v4426_v36 = vpack.c.bf16 %v4424_v7, %v4424_v7  ;;  %v5019_v7 = vmax.f32 %v8151_v15, 0.0  ;;  %v2434_v12 = vld [vmem:[#allocation19 + $0x50] sm:$0xff]  ;;  %v2496_v15 = vmul.f32 0.99, %v2432_v43 }
 0x5e6   : > { %v4427_v26 = vpack.c.bf16 %v4425_v21, %v4425_v21  ;;  %v8153_v21 = vld [vmem:[#allocation65_spill] sm:$0xff] }
 0x5e8   : > { %4652 = vmatprep.mubr.bf16.mxu1 %v4427_v26  ;;  %v8154_v26 = vpack.c.bf16 %v8152_v4, %v8153_v21  ;;  %v2560_v4 = vld [vmem:[#allocation7 + $0x40] sm:$0xff]  ;;  %v2562_v21 = vld [vmem:[#allocation7 + $0x50] sm:$0xff] }
 0x5e9   : > { %4653 = vmatmul.mubr.bf16.vlgmr.msra.gmra.mrb[16].mxu1 %v4426_v36  ;;  %v8155_v36 = vld [vmem:[#allocation68_spill] sm:$0xff] }
 0x5ea   : > { %5024 = vmatpush1.bf16.msra.mxu1 %v8096_v23  ;;  %5055 = vmatprep.mubr.bf16.mxu1 %v5022_v61  ;;  %v8156_v61 = vld [vmem:[#allocation67_spill] sm:$0xff] }
 0x5eb   : > { %5025 = vmatprep.subr.bf16.mxu1 %v8097_v17  ;;  %v8157_v23 = vpack.c.bf16 %v8155_v36, %v8156_v61  ;;  %v5021_v17 = vpack.c.bf16 %v5019_v7, %v5019_v7  ;;  %v2498_v7 = vmul.f32 0.99, %v2434_v12  ;;  %v2689_v36 = vadd.f32 %v2625_v18, %v2497_v13  ;;  %v2570_v13 = vld [vmem:[#allocation7 + $0x90] sm:$0xff] }
 0x5ec   : > { %v2634_v60 = vmul.f32 0.01, %v2570_v13  ;;  %v2582_v13 = vld [vmem:[#allocation7 + $0xf0] sm:$0xff] }
 0x5ed   : > { %3079 = vst [vmem:[#allocation26 + $0x48] sm:$0xff] %v2689_v36 }
 0x5ee   : > { %5026 = vmatpush1.bf16.msra.mxu1 %v8098_v16  ;;  %v2425_v16 = vld [vmem:[#allocation19 + $0x8] sm:$0xff] }
 0x5ef   : > { %5027 = vmatprep.subr.bf16.mxu1 %v8099_v29  ;;  %v2427_v29 = vld [vmem:[#allocation19 + $0x18] sm:$0xff] }
 0x5f2   : > { %5028 = vmatpush1.bf16.msra.mxu1 %v8100_v19  ;;  %v2553_v19 = vld [vmem:[#allocation7 + $0x8] sm:$0xff] }
 0x5f3   : > { %5029 = vmatprep.subr.bf16.mxu1 %v8101_v63  ;;  %v2489_v63 = vmul.f32 0.99, %v2425_v16  ;;  %v2439_v16 = vld [vmem:[#allocation19 + $0x78] sm:$0xff] }
 0x5f6   : > { %5030 = vmatpush1.bf16.msra.mxu1 %v8102_v33  ;;  %v2491_v33 = vmul.f32 0.99, %v2427_v29  ;;  %v2565_v29 = vld [vmem:[#allocation7 + $0x68] sm:$0xff] }
 0x5f7   : > { %5031 = vmatprep.subr.bf16.mxu1 %v8103_v9  ;;  %v2555_v9 = vld [vmem:[#allocation7 + $0x18] sm:$0xff] }
 0x5fa   : > { %5032 = vmatpush1.bf16.msra.mxu1 %v8104_v10  ;;  %v2424_v10 = vld [vmem:[#allocation19] sm:$0xff] }
 0x5fb   : > { %5033 = vmatprep.subr.bf16.mxu1 %v8105_v54  ;;  %v2617_v54 = vmul.f32 0.01, %v2553_v19  ;;  %v2626_v19 = vmul.f32 0.01, %v2562_v21  ;;  %v2446_v21 = vld [vmem:[#allocation19 + $0xb0] sm:$0xff] }
 0x5fd   : > { %v2681_v6 = vadd.f32 %v2617_v54, %v2489_v63  ;;  %v2567_v54 = vld [vmem:[#allocation7 + $0x78] sm:$0xff] }
 0x5fe   : > { %5034 = vmatpush1.bf16.msra.mxu1 %v8106_v28  ;;  %v2619_v28 = vmul.f32 0.01, %v2555_v9 }
 0x5ff   : > { %5035 = vmatprep.subr.bf16.mxu1 %v8107_v32  ;;  %v2426_v32 = vld [vmem:[#allocation19 + $0x10] sm:$0xff]  ;;  %3071 = vst [vmem:[#allocation26 + $0x8] sm:$0xff] %v2681_v6 }
 0x602   : > { %5036 = vmatpush1.bf16.msra.mxu1 %v8108_v40  ;;  %v2552_v40 = vld [vmem:[#allocation7] sm:$0xff] }
 0x603   : > { %5037 = vmatprep.subr.bf16.mxu1 %v8109_v51  ;;  %v2488_v51 = vmul.f32 0.99, %v2424_v10  ;;  %v2616_v41 = vmul.f32 0.01, %v2552_v40  ;;  %v2438_v40 = vld [vmem:[#allocation19 + $0x70] sm:$0xff] }
 0x604   : > { %v2502_v0 = vmul.f32 0.99, %v2438_v40 }
 0x605   : > { %v2680_v50 = vadd.f32 %v2616_v41, %v2488_v51  ;;  %v2690_v51 = vadd.f32 %v2626_v19, %v2498_v7  ;;  %v2566_v41 = vld [vmem:[#allocation7 + $0x70] sm:$0xff] }
 0x606   : > { %5038 = vmatpush1.bf16.msra.mxu1 %v8110_v39  ;;  %v2490_v39 = vmul.f32 0.99, %v2426_v32  ;;  %v2436_v32 = vld [vmem:[#allocation19 + $0x60] sm:$0xff] }
 0x607   : > { %5039 = vmatprep.subr.bf16.mxu1 %v8111_v59  ;;  %v2554_v59 = vld [vmem:[#allocation7 + $0x10] sm:$0xff]  ;;  %3070 = vst [vmem:[#allocation26] sm:$0xff] %v2680_v50  ;;  %3080 = vst [vmem:[#allocation26 + $0x50] sm:$0xff] %v2690_v51 }
 0x608   : > { %v2618_v30 = vmul.f32 0.01, %v2554_v59  ;;  %v2500_v59 = vmul.f32 0.99, %v2436_v32  ;;  %v2579_v32 = vld [vmem:[#allocation7 + $0xd8] sm:$0xff] }
 0x60a   : > { %5040 = vmatpush1.bf16.msra.mxu1 %v8114_v11  ;;  %v2683_v11 = vadd.f32 %v2619_v28, %v2491_v33  ;;  %v2682_v1 = vadd.f32 %v2618_v30, %v2490_v39  ;;  %v2503_v33 = vmul.f32 0.99, %v2439_v16  ;;  %v2629_v28 = vmul.f32 0.01, %v2565_v29  ;;  %v2441_v30 = vld [vmem:[#allocation19 + $0x88] sm:$0xff] }
 0x60b   : > { %5041 = vmatprep.subr.bf16.mxu1 %v8117_v46  ;;  %v2431_v46 = vld [vmem:[#allocation19 + $0x38] sm:$0xff]  ;;  %v2631_v39 = vmul.f32 0.01, %v2567_v54 }
 0x60c   : > { %3073 = vst [vmem:[#allocation26 + $0x18] sm:$0xff] %v2683_v11  ;;  %3072 = vst [vmem:[#allocation26 + $0x10] sm:$0xff] %v2682_v1  ;;  %v4823_v27 = vpack.c.bf16 %v2682_v1, %v2680_v50  ;;  %v2507_v50 = vmul.f32 0.99, %v2443_v20  ;;  %v2571_v1 = vld [vmem:[#allocation7 + $0x98] sm:$0xff] }
 0x60e   : > { %5042 = vmatpush1.bf16.msra.mxu1 %v8120_v8  ;;  %v2495_v8 = vmul.f32 0.99, %v2431_v46 }
 0x60f   : > { %5043 = vmatprep.subr.bf16.mxu1 %v8123_v5  ;;  %v4824_v5 = vpack.c.bf16 %v2683_v11, %v2681_v6  ;;  %v2564_v11 = vld [vmem:[#allocation7 + $0x60] sm:$0xff] }
 0x610   : > { %v2687_v35 = vadd.f32 %v2623_v3, %v2495_v8  ;;  %v2630_v8 = vmul.f32 0.01, %v2566_v41  ;;  %v2635_v3 = vmul.f32 0.01, %v2571_v1  ;;  %v2643_v41 = vmul.f32 0.01, %v2579_v32 }
 0x612   : > { %5044 = vmatpush1.bf16.msra.mxu1 %v8126_v47  ;;  %v2621_v47 = vmul.f32 0.01, %v2557_v49  ;;  %3077 = vst [vmem:[#allocation26 + $0x38] sm:$0xff] %v2687_v35  ;;  %v2695_v49 = vadd.f32 %v2631_v39, %v2503_v33  ;;  %v2449_v33 = vld [vmem:[#allocation19 + $0xc8] sm:$0xff] }
 0x613   : > { %5045 = vmatprep.subr.bf16.mxu1 %v8129_v25  ;;  %v2558_v25 = vld [vmem:[#allocation7 + $0x30] sm:$0xff] }
 0x614   : > { %v2685_v42 = vadd.f32 %v2621_v47, %v2493_v62  ;;  %v2622_v45 = vmul.f32 0.01, %v2558_v25  ;;  %v2628_v62 = vmul.f32 0.01, %v2564_v11  ;;  %3085 = vst [vmem:[#allocation26 + $0x78] sm:$0xff] %v2695_v49  ;;  %v2576_v11 = vld [vmem:[#allocation7 + $0xc0] sm:$0xff] }
 0x615   : > { %v2633_v25 = vmul.f32 0.01, %v2569_v22  ;;  %v2640_v20 = vmul.f32 0.01, %v2576_v11  ;;  %v2453_v22 = vld [vmem:[#allocation19 + $0xe8] sm:$0xff] }
 0x616   : > { %5046 = vmatpush1.bf16.msra.mxu1 %v8132_v58  ;;  %v2494_v58 = vmul.f32 0.99, %v2430_v2  ;;  %3075 = vst [vmem:[#allocation26 + $0x28] sm:$0xff] %v2685_v42  ;;  %v2692_v2 = vadd.f32 %v2628_v62, %v2500_v59 }
 0x617   : > { %5047 = vmatprep.subr.bf16.mxu1 %v8135_v48  ;;  %v2620_v48 = vmul.f32 0.01, %v2556_v37  ;;  %v2694_v37 = vadd.f32 %v2630_v8, %v2502_v0  ;;  %v2448_v0 = vld [vmem:[#allocation19 + $0xc0] sm:$0xff]  ;;  %v2578_v8 = vld [vmem:[#allocation7 + $0xd0] sm:$0xff] }
 0x618   : > { %v2686_v55 = vadd.f32 %v2622_v45, %v2494_v58  ;;  %3082 = vst [vmem:[#allocation26 + $0x60] sm:$0xff] %v2692_v2  ;;  %v2442_v45 = vld [vmem:[#allocation19 + $0x90] sm:$0xff]  ;;  %v2642_v1 = vmul.f32 0.01, %v2578_v8 }
 0x619   : > { %3084 = vst [vmem:[#allocation26 + $0x70] sm:$0xff] %v2694_v37 }
 0x61a   : > { %5048 = vmatpush1.bf16.msra.mxu1 %v8138_v38  ;;  %v2435_v38 = vld [vmem:[#allocation19 + $0x58] sm:$0xff]  ;;  %3076 = vst [vmem:[#allocation26 + $0x30] sm:$0xff] %v2686_v55 }
 0x61b   : > { %5049 = vmatprep.subr.bf16.mxu1 %v8141_v52  ;;  %v2499_v52 = vmul.f32 0.99, %v2435_v38 }
 0x61e   : > { %5050 = vmatpush1.bf16.msra.mxu1 %v8144_v44  ;;  %v2684_v44 = vadd.f32 %v2620_v48, %v2492_v31  ;;  %v4829_v31 = vpack.c.bf16 %v2694_v37, %v2692_v2  ;;  %v2440_v48 = vld [vmem:[#allocation19 + $0x80] sm:$0xff] }
 0x61f   : > { %5051 = vmatprep.subr.bf16.mxu1 %v8147_v24  ;;  %v2627_v24 = vmul.f32 0.01, %v2563_v14  ;;  %v2504_v38 = vmul.f32 0.99, %v2440_v48  ;;  %v2445_v14 = vld [vmem:[#allocation19 + $0xa8] sm:$0xff] }
 0x620   : > { %3074 = vst [vmem:[#allocation26 + $0x20] sm:$0xff] %v2684_v44  ;;  %v2509_v43 = vmul.f32 0.99, %v2445_v14 }
 0x621   : > { %v2691_v61 = vadd.f32 %v2627_v24, %v2499_v52  ;;  %v2632_v52 = vmul.f32 0.01, %v2568_v34  ;;  %v2580_v34 = vld [vmem:[#allocation7 + $0xe0] sm:$0xff] }
 0x622   : > { %5052 = vmatpush1.bf16.msra.mxu1 %v8150_v53  ;;  %v4826_v53 = vpack.c.bf16 %v2687_v35, %v2685_v42  ;;  %v2506_v35 = vmul.f32 0.99, %v2442_v45  ;;  %v2454_v45 = vld [vmem:[#allocation19 + $0xf0] sm:$0xff] }
 0x623   : > { %5053 = vmatprep.subr.bf16.mxu1 %v8154_v26  ;;  %v4825_v26 = vpack.c.bf16 %v2686_v55, %v2684_v44  ;;  %3081 = vst [vmem:[#allocation26 + $0x58] sm:$0xff] %v2691_v61  ;;  %v4828_v9 = vpack.c.bf16 %v2691_v61, %v2689_v36  ;;  %v2447_v44 = vld [vmem:[#allocation19 + $0xb8] sm:$0xff]  ;;  %v2573_v55 = vld [vmem:[#allocation7 + $0xa8] sm:$0xff]  ;;  %v2696_v18 = vadd.f32 %v2632_v52, %v2504_v38 }
 0x624   : > { %v2698_v24 = vadd.f32 %v2634_v60, %v2506_v35  ;;  %v2511_v12 = vmul.f32 0.99, %v2447_v44  ;;  %v2637_v7 = vmul.f32 0.01, %v2573_v55  ;;  %v2518_v35 = vmul.f32 0.99, %v2454_v45 }
 0x625   : > { %3086 = vst [vmem:[#allocation26 + $0x80] sm:$0xff] %v2696_v18  ;;  %v2457_v52 = vld [vmem:[#allocation19 + $0x108] sm:$0xff]  ;;  %v2644_v55 = vmul.f32 0.01, %v2580_v34 }
 0x626   : > { %5054 = vmatpush1.bf16.msra.mxu1 %v8157_v23  ;;  %v2624_v23 = vmul.f32 0.01, %v2560_v4  ;;  %3088 = vst [vmem:[#allocation26 + $0x90] sm:$0xff] %v2698_v24  ;;  %v4831_v36 = vpack.c.bf16 %v2698_v24, %v2696_v18  ;;  %v2701_v16 = vadd.f32 %v2637_v7, %v2509_v43  ;;  %v2459_v18 = vld [vmem:[#allocation19 + $0x118] sm:$0xff]  ;;  %v2585_v24 = vld [vmem:[#allocation7 + $0x108] sm:$0xff] }
 0x627   : > { %5140 = vmatprep.subr.bf16.mxu1 %v4824_v5  ;;  %v2505_v5 = vmul.f32 0.99, %v2441_v30  ;;  %v2512_v30 = vmul.f32 0.99, %v2448_v0  ;;  %v2587_v43 = vld [vmem:[#allocation7 + $0x118] sm:$0xff] }
 0x628   : > { %v2688_v10 = vadd.f32 %v2624_v23, %v2496_v15  ;;  %v2444_v15 = vld [vmem:[#allocation19 + $0xa0] sm:$0xff]  ;;  %v2510_v23 = vmul.f32 0.99, %v2446_v21  ;;  %3091 = vst [vmem:[#allocation26 + $0xa8] sm:$0xff] %v2701_v16  ;;  %v2649_v21 = vmul.f32 0.01, %v2585_v24 }
 0x629   : > { %5056 = vmatmul.mubr.bf16.vlgmr.msra.gmra.mrb[20].mxu1 %v5021_v17  ;;  %v2437_v17 = vld [vmem:[#allocation19 + $0x68] sm:$0xff]  ;;  %v2697_v58 = vadd.f32 %v2633_v25, %v2505_v5  ;;  %v2508_v61 = vmul.f32 0.99, %v2444_v15  ;;  %v2455_v5 = vld [vmem:[#allocation19 + $0xf8] sm:$0xff]  ;;  %v2704_v37 = vadd.f32 %v2640_v20, %v2512_v30  ;;  %v2523_v15 = vmul.f32 0.99, %v2459_v18 }
 0x62a   : > { %5141 = vmatpush1.bf16.msra.mxu1 %v4823_v27  ;;  %v2501_v63 = vmul.f32 0.99, %v2437_v17  ;;  %3078 = vst [vmem:[#allocation26 + $0x40] sm:$0xff] %v2688_v10  ;;  %v4827_v46 = vpack.c.bf16 %v2690_v51, %v2688_v10  ;;  %v2699_v27 = vadd.f32 %v2635_v3, %v2507_v50  ;;  %v2574_v17 = vld [vmem:[#allocation7 + $0xb0] sm:$0xff]  ;;  %v2513_v10 = vmul.f32 0.99, %v2449_v33 }
 0x62b   : > { %5142 = vmatprep.subr.bf16.mxu1 %v4826_v53  ;;  %3087 = vst [vmem:[#allocation26 + $0x88] sm:$0xff] %v2697_v58  ;;  %v2575_v53 = vld [vmem:[#allocation7 + $0xb8] sm:$0xff]  ;;  %v2519_v2 = vmul.f32 0.99, %v2455_v5  ;;  %v2581_v25 = vld [vmem:[#allocation7 + $0xe8] sm:$0xff]  ;;  %3094 = vst [vmem:[#allocation26 + $0xc0] sm:$0xff] %v2704_v37 }
 0x62c   : > { %v2693_v6 = vadd.f32 %v2629_v28, %v2501_v63  ;;  %3089 = vst [vmem:[#allocation26 + $0x98] sm:$0xff] %v2699_v27  ;;  %v4832_v42 = vpack.c.bf16 %v2699_v27, %v2697_v58  ;;  %v2639_v4 = vmul.f32 0.01, %v2575_v53  ;;  %v2638_v63 = vmul.f32 0.01, %v2574_v17  ;;  %v2577_v28 = vld [vmem:[#allocation7 + $0xc8] sm:$0xff] }
 0x62d   : > { %v2641_v59 = vmul.f32 0.01, %v2577_v28  ;;  %v2583_v3 = vld [vmem:[#allocation7 + $0xf8] sm:$0xff]  ;;  %v2521_v53 = vmul.f32 0.99, %v2457_v52  ;;  %v2460_v30 = vld [vmem:[#allocation19 + $0x120] sm:$0xff] }
 0x62e   : > { %5143 = vmatpush1.bf16.msra.mxu1 %v4825_v26  ;;  %3083 = vst [vmem:[#allocation26 + $0x68] sm:$0xff] %v2693_v6  ;;  %v4830_v47 = vpack.c.bf16 %v2695_v49, %v2693_v6  ;;  %v2572_v26 = vld [vmem:[#allocation7 + $0xa0] sm:$0xff]  ;;  %v2703_v29 = vadd.f32 %v2639_v4, %v2511_v12  ;;  %v2702_v39 = vadd.f32 %v2638_v63, %v2510_v23  ;;  %v2450_v6 = vld [vmem:[#allocation19 + $0xd0] sm:$0xff]  ;;  %v2647_v48 = vmul.f32 0.01, %v2583_v3 }
 0x62f   : > { %5144 = vmatprep.subr.bf16.mxu1 %v4828_v9  ;;  %v2636_v19 = vmul.f32 0.01, %v2572_v26  ;;  %v2451_v9 = vld [vmem:[#allocation19 + $0xd8] sm:$0xff]  ;;  %v2705_v62 = vadd.f32 %v2641_v59, %v2513_v10  ;;  %v2646_v12 = vmul.f32 0.01, %v2582_v13  ;;  %v2713_v63 = vadd.f32 %v2649_v21, %v2521_v53  ;;  %v2466_v13 = vld [vmem:[#allocation19 + $0x150] sm:$0xff] }
 0x630   : > { %v2515_v54 = vmul.f32 0.99, %v2451_v9  ;;  %3093 = vst [vmem:[#allocation26 + $0xb8] sm:$0xff] %v2703_v29  ;;  %v4834_v40 = vpack.c.bf16 %v2703_v29, %v2701_v16  ;;  %3092 = vst [vmem:[#allocation26 + $0xb0] sm:$0xff] %v2702_v39  ;;  %v2711_v44 = vadd.f32 %v2647_v48, %v2519_v2  ;;  %v2651_v26 = vmul.f32 0.01, %v2587_v43 }
 0x631   : > { %v2700_v51 = vadd.f32 %v2636_v19, %v2508_v61  ;;  %3095 = vst [vmem:[#allocation26 + $0xc8] sm:$0xff] %v2705_v62  ;;  %v2458_v61 = vld [vmem:[#allocation19 + $0x110] sm:$0xff]  ;;  %v2710_v23 = vadd.f32 %v2646_v12, %v2518_v35  ;;  %v2584_v29 = vld [vmem:[#allocation7 + $0x100] sm:$0xff]  ;;  %3103 = vst [vmem:[#allocation26 + $0x108] sm:$0xff] %v2713_v63  ;;  %v2524_v8 = vmul.f32 0.99, %v2460_v30 }
 0x632   : > { %5145 = vmatpush1.bf16.msra.mxu1 %v4827_v46  ;;  %v2514_v46 = vmul.f32 0.99, %v2450_v6  ;;  %v2707_v50 = vadd.f32 %v2643_v41, %v2515_v54  ;;  %3101 = vst [vmem:[#allocation26 + $0xf8] sm:$0xff] %v2711_v44  ;;  %v2522_v16 = vmul.f32 0.99, %v2458_v61  ;;  %v2586_v19 = vld [vmem:[#allocation7 + $0x110] sm:$0xff]  ;;  %v2715_v33 = vadd.f32 %v2651_v26, %v2523_v15 }
 0x633   : > { %5146 = vmatprep.subr.bf16.mxu1 %v4830_v47  ;;  %3090 = vst [vmem:[#allocation26 + $0xa0] sm:$0xff] %v2700_v51  ;;  %v4833_v49 = vpack.c.bf16 %v2702_v39, %v2700_v51  ;;  %v2517_v47 = vmul.f32 0.99, %v2453_v22  ;;  %v2648_v9 = vmul.f32 0.01, %v2584_v29  ;;  %v2461_v54 = vld [vmem:[#allocation19 + $0x128] sm:$0xff] }
 0x634   : > { %3097 = vst [vmem:[#allocation26 + $0xd8] sm:$0xff] %v2707_v50  ;;  %v4836_v58 = vpack.c.bf16 %v2707_v50, %v2705_v62  ;;  %v2706_v27 = vadd.f32 %v2642_v1, %v2514_v46  ;;  %v2650_v10 = vmul.f32 0.01, %v2586_v19  ;;  %v2463_v28 = vld [vmem:[#allocation19 + $0x138] sm:$0xff]  ;;  %3100 = vst [vmem:[#allocation26 + $0xf0] sm:$0xff] %v2710_v23  ;;  %v2589_v39 = vld [vmem:[#allocation7 + $0x128] sm:$0xff]  ;;  %v4840_v0 = vpack.c.bf16 %v2715_v33, %v2713_v63 }
 0x635   : > { %v2527_v51 = vmul.f32 0.99, %v2463_v28  ;;  %v2591_v59 = vld [vmem:[#allocation7 + $0x138] sm:$0xff]  ;;  %3105 = vst [vmem:[#allocation26 + $0x118] sm:$0xff] %v2715_v33  ;;  %v2653_v41 = vmul.f32 0.01, %v2589_v39 }
 0x636   : > { %5147 = vmatpush1.bf16.msra.mxu1 %v4829_v31  ;;  %v2452_v31 = vld [vmem:[#allocation19 + $0xe0] sm:$0xff]  ;;  %3096 = vst [vmem:[#allocation26 + $0xd0] sm:$0xff] %v2706_v27  ;;  %v4835_v60 = vpack.c.bf16 %v2706_v27, %v2704_v37  ;;  %v2714_v11 = vadd.f32 %v2650_v10, %v2522_v16  ;;  %v2462_v46 = vld [vmem:[#allocation19 + $0x130] sm:$0xff]  ;;  %v2655_v62 = vmul.f32 0.01, %v2591_v59  ;;  %v2467_v2 = vld [vmem:[#allocation19 + $0x158] sm:$0xff] }
 0x637   : > { %5148 = vmatprep.subr.bf16.mxu1 %v4832_v42  ;;  %v2645_v42 = vmul.f32 0.01, %v2581_v25  ;;  %v2516_v38 = vmul.f32 0.99, %v2452_v31  ;;  %v2526_v20 = vmul.f32 0.99, %v2462_v46 }
 0x638   : > { %3104 = vst [vmem:[#allocation26 + $0x110] sm:$0xff] %v2714_v11  ;;  %v2590_v50 = vld [vmem:[#allocation7 + $0x130] sm:$0xff]  ;;  %v2719_v37 = vadd.f32 %v2655_v62, %v2527_v51  ;;  %v2531_v31 = vmul.f32 0.99, %v2467_v2  ;;  %v2593_v27 = vld [vmem:[#allocation7 + $0x148] sm:$0xff]  ;;  %v2592_v52 = vld [vmem:[#allocation7 + $0x140] sm:$0xff] }
 0x639   : > { %v2709_v14 = vadd.f32 %v2645_v42, %v2517_v47  ;;  %v2708_v4 = vadd.f32 %v2644_v55, %v2516_v38  ;;  %v2465_v47 = vld [vmem:[#allocation19 + $0x148] sm:$0xff]  ;;  %v2654_v25 = vmul.f32 0.01, %v2590_v50  ;;  %v2595_v42 = vld [vmem:[#allocation7 + $0x158] sm:$0xff]  ;;  %v2464_v48 = vld [vmem:[#allocation19 + $0x140] sm:$0xff] }
 0x63a   : > { %5149 = vmatpush1.bf16.msra.mxu1 %v4831_v36  ;;  %v2456_v36 = vld [vmem:[#allocation19 + $0x100] sm:$0xff]  ;;  %v2529_v3 = vmul.f32 0.99, %v2465_v47  ;;  %3109 = vst [vmem:[#allocation26 + $0x138] sm:$0xff] %v2719_v37  ;;  %v2657_v38 = vmul.f32 0.01, %v2593_v27 }
 0x63b   : > { %5150 = vmatprep.subr.bf16.mxu1 %v4834_v40  ;;  %3099 = vst [vmem:[#allocation26 + $0xe8] sm:$0xff] %v2709_v14  ;;  %v4838_v7 = vpack.c.bf16 %v2711_v44, %v2709_v14  ;;  %v2520_v17 = vmul.f32 0.99, %v2456_v36  ;;  %3098 = vst [vmem:[#allocation26 + $0xe0] sm:$0xff] %v2708_v4  ;;  %v4837_v32 = vpack.c.bf16 %v2710_v23, %v2708_v4  ;;  %v2525_v40 = vmul.f32 0.99, %v2461_v54 }
 0x63c   : > { %v2718_v34 = vadd.f32 %v2654_v25, %v2526_v20  ;;  %v2659_v35 = vmul.f32 0.01, %v2595_v42  ;;  %v2530_v14 = vmul.f32 0.99, %v2466_v13  ;;  %v2594_v44 = vld [vmem:[#allocation7 + $0x150] sm:$0xff]  ;;  %v2721_v24 = vadd.f32 %v2657_v38, %v2529_v3  ;;  %v2471_v53 = vld [vmem:[#allocation19 + $0x178] sm:$0xff] }
 0x63d   : > { %v2712_v6 = vadd.f32 %v2648_v9, %v2520_v17  ;;  %v2717_v5 = vadd.f32 %v2653_v41, %v2525_v40  ;;  %v2469_v55 = vld [vmem:[#allocation19 + $0x168] sm:$0xff]  ;;  %v2656_v12 = vmul.f32 0.01, %v2592_v52  ;;  %v2658_v4 = vmul.f32 0.01, %v2594_v44  ;;  %v2468_v16 = vld [vmem:[#allocation19 + $0x160] sm:$0xff] }
 0x63e   : > { %5151 = vmatpush1.bf16.msra.mxu1 %v4833_v49  ;;  %v2588_v49 = vld [vmem:[#allocation7 + $0x120] sm:$0xff]  ;;  %3108 = vst [vmem:[#allocation26 + $0x130] sm:$0xff] %v2718_v34  ;;  %v2723_v43 = vadd.f32 %v2659_v35, %v2531_v31  ;;  %v2597_v15 = vld [vmem:[#allocation7 + $0x168] sm:$0xff]  ;;  %v2533_v21 = vmul.f32 0.99, %v2469_v55  ;;  %3111 = vst [vmem:[#allocation26 + $0x148] sm:$0xff] %v2721_v24 }
 0x63f   : > { %5152 = vmatprep.subr.bf16.mxu1 %v4836_v58  ;;  %3102 = vst [vmem:[#allocation26 + $0x100] sm:$0xff] %v2712_v6  ;;  %v4839_v22 = vpack.c.bf16 %v2714_v11, %v2712_v6  ;;  %v2652_v1 = vmul.f32 0.01, %v2588_v49  ;;  %3107 = vst [vmem:[#allocation26 + $0x128] sm:$0xff] %v2717_v5  ;;  %v4842_v45 = vpack.c.bf16 %v2719_v37, %v2717_v5  ;;  %v2535_v26 = vmul.f32 0.99, %v2471_v53 }
 0x640   : > { %3113 = vst [vmem:[#allocation26 + $0x158] sm:$0xff] %v2723_v43  ;;  %v4844_v36 = vpack.c.bf16 %v2723_v43, %v2721_v24  ;;  %v2661_v23 = vmul.f32 0.01, %v2597_v15  ;;  %v2470_v29 = vld [vmem:[#allocation19 + $0x170] sm:$0xff]  ;;  %v2722_v19 = vadd.f32 %v2658_v4, %v2530_v14  ;;  %v2532_v63 = vmul.f32 0.99, %v2468_v16 }
 0x641   : > { %v2716_v58 = vadd.f32 %v2652_v1, %v2524_v8  ;;  %v2534_v33 = vmul.f32 0.99, %v2470_v29  ;;  %v2596_v9 = vld [vmem:[#allocation7 + $0x160] sm:$0xff]  ;;  %v2598_v10 = vld [vmem:[#allocation7 + $0x170] sm:$0xff]  ;;  %v2601_v11 = vld [vmem:[#allocation7 + $0x188] sm:$0xff] }
 0x642   : > { %5153 = vmatpush1.bf16.msra.mxu1 %v4835_v60  ;;  %v2528_v60 = vmul.f32 0.99, %v2464_v48  ;;  %v2725_v54 = vadd.f32 %v2661_v23, %v2533_v21  ;;  %v2662_v40 = vmul.f32 0.01, %v2598_v10  ;;  %v2473_v51 = vld [vmem:[#allocation19 + $0x188] sm:$0xff]  ;;  %v2475_v39 = vld [vmem:[#allocation19 + $0x198] sm:$0xff] }
 0x643   : > { %5154 = vmatprep.subr.bf16.mxu1 %v4838_v7  ;;  %3106 = vst [vmem:[#allocation26 + $0x120] sm:$0xff] %v2716_v58  ;;  %v4841_v18 = vpack.c.bf16 %v2718_v34, %v2716_v58  ;;  %v2599_v7 = vld [vmem:[#allocation7 + $0x178] sm:$0xff]  ;;  %3112 = vst [vmem:[#allocation26 + $0x150] sm:$0xff] %v2722_v19  ;;  %v2539_v6 = vmul.f32 0.99, %v2475_v39  ;;  %v2472_v8 = vld [vmem:[#allocation19 + $0x180] sm:$0xff] }
 0x644   : > { %v2720_v61 = vadd.f32 %v2656_v12, %v2528_v60  ;;  %v2663_v17 = vmul.f32 0.01, %v2599_v7  ;;  %v2603_v41 = vld [vmem:[#allocation7 + $0x198] sm:$0xff]  ;;  %3115 = vst [vmem:[#allocation26 + $0x168] sm:$0xff] %v2725_v54  ;;  %v2726_v49 = vadd.f32 %v2662_v40, %v2534_v33  ;;  %v2665_v62 = vmul.f32 0.01, %v2601_v11 }
 0x645   : > { %v2474_v20 = vld [vmem:[#allocation19 + $0x190] sm:$0xff]  ;;  %v2667_v5 = vmul.f32 0.01, %v2603_v41  ;;  %v2536_v50 = vmul.f32 0.99, %v2472_v8  ;;  %v2477_v3 = vld [vmem:[#allocation19 + $0x1a8] sm:$0xff] }
 0x646   : > { %5155 = vmatpush1.bf16.msra.mxu1 %v4837_v32  ;;  %3110 = vst [vmem:[#allocation26 + $0x140] sm:$0xff] %v2720_v61  ;;  %v2727_v28 = vadd.f32 %v2663_v17, %v2535_v26  ;;  %v2660_v32 = vmul.f32 0.01, %v2596_v9  ;;  %v4843_v59 = vpack.c.bf16 %v2722_v19, %v2720_v61  ;;  %v2538_v1 = vmul.f32 0.99, %v2474_v20  ;;  %3116 = vst [vmem:[#allocation26 + $0x170] sm:$0xff] %v2726_v49 }
 0x647   : > { %5156 = vmatprep.subr.bf16.mxu1 %v4840_v0  ;;  %v2537_v0 = vmul.f32 0.99, %v2473_v51  ;;  %v2602_v37 = vld [vmem:[#allocation7 + $0x190] sm:$0xff]  ;;  %v2479_v31 = vld [vmem:[#allocation19 + $0x1b8] sm:$0xff]  ;;  %v2731_v58 = vadd.f32 %v2667_v5, %v2539_v6  ;;  %v2541_v42 = vmul.f32 0.99, %v2477_v3 }
 0x648   : > { %3117 = vst [vmem:[#allocation26 + $0x178] sm:$0xff] %v2727_v28  ;;  %v4846_v30 = vpack.c.bf16 %v2727_v28, %v2725_v54  ;;  %v2724_v46 = vadd.f32 %v2660_v32, %v2532_v63  ;;  %v2666_v27 = vmul.f32 0.01, %v2602_v37  ;;  %v2543_v48 = vmul.f32 0.99, %v2479_v31  ;;  %v2605_v34 = vld [vmem:[#allocation7 + $0x1a8] sm:$0xff] }
 0x649   : > { %v2729_v2 = vadd.f32 %v2665_v62, %v2537_v0  ;;  %v2607_v38 = vld [vmem:[#allocation7 + $0x1b8] sm:$0xff]  ;;  %v2476_v35 = vld [vmem:[#allocation19 + $0x1a0] sm:$0xff]  ;;  %3121 = vst [vmem:[#allocation26 + $0x198] sm:$0xff] %v2731_v58  ;;  %v2669_v60 = vmul.f32 0.01, %v2605_v34  ;;  %v2606_v43 = vld [vmem:[#allocation7 + $0x1b0] sm:$0xff] }
 0x64a   : > { %5157 = vmatpush1.bf16.msra.mxu1 %v4839_v22  ;;  %v2600_v22 = vld [vmem:[#allocation7 + $0x180] sm:$0xff]  ;;  %3114 = vst [vmem:[#allocation26 + $0x160] sm:$0xff] %v2724_v46  ;;  %v4845_v47 = vpack.c.bf16 %v2726_v49, %v2724_v46  ;;  %v2730_v52 = vadd.f32 %v2666_v27, %v2538_v1  ;;  %v2671_v14 = vmul.f32 0.01, %v2607_v38  ;;  %v2478_v44 = vld [vmem:[#allocation19 + $0x1b0] sm:$0xff]  ;;  %v2481_v12 = vld [vmem:[#allocation19 + $0x1c8] sm:$0xff] }
 0x64b   : > { %5158 = vmatprep.subr.bf16.mxu1 %v4842_v45  ;;  %v2664_v25 = vmul.f32 0.01, %v2600_v22  ;;  %3119 = vst [vmem:[#allocation26 + $0x188] sm:$0xff] %v2729_v2  ;;  %v4848_v13 = vpack.c.bf16 %v2731_v58, %v2729_v2  ;;  %v2604_v55 = vld [vmem:[#allocation7 + $0x1a0] sm:$0xff]  ;;  %v2542_v24 = vmul.f32 0.99, %v2478_v44  ;;  %v2733_v15 = vadd.f32 %v2669_v60, %v2541_v42 }
 0x64c   : > { %3120 = vst [vmem:[#allocation26 + $0x190] sm:$0xff] %v2730_v52  ;;  %v2735_v7 = vadd.f32 %v2671_v14, %v2543_v48  ;;  %v2483_v4 = vld [vmem:[#allocation19 + $0x1d8] sm:$0xff]  ;;  %v2609_v21 = vld [vmem:[#allocation7 + $0x1c8] sm:$0xff]  ;;  %v2670_v61 = vmul.f32 0.01, %v2606_v43  ;;  %v2482_v63 = vld [vmem:[#allocation19 + $0x1d0] sm:$0xff] }
 0x64d   : > { %v2728_v45 = vadd.f32 %v2664_v25, %v2536_v50  ;;  %v2611_v26 = vld [vmem:[#allocation7 + $0x1d8] sm:$0xff]  ;;  %v2545_v23 = vmul.f32 0.99, %v2481_v12  ;;  %3123 = vst [vmem:[#allocation26 + $0x1a8] sm:$0xff] %v2733_v15  ;;  %v2547_v16 = vmul.f32 0.99, %v2483_v4 }
 0x64e   : > { %5159 = vmatpush1.bf16.msra.mxu1 %v4841_v18  ;;  %v2540_v18 = vmul.f32 0.99, %v2476_v35  ;;  %3125 = vst [vmem:[#allocation26 + $0x1b8] sm:$0xff] %v2735_v7  ;;  %v4850_v17 = vpack.c.bf16 %v2735_v7, %v2733_v15  ;;  %v2673_v29 = vmul.f32 0.01, %v2609_v21  ;;  %v2480_v19 = vld [vmem:[#allocation19 + $0x1c0] sm:$0xff]  ;;  %v2734_v9 = vadd.f32 %v2670_v61, %v2542_v24 }
 0x64f   : > { %5160 = vmatprep.subr.bf16.mxu1 %v4844_v36  ;;  %3118 = vst [vmem:[#allocation26 + $0x180] sm:$0xff] %v2728_v45  ;;  %v4847_v53 = vpack.c.bf16 %v2730_v52, %v2728_v45  ;;  %v2668_v36 = vmul.f32 0.01, %v2604_v55  ;;  %v2675_v10 = vmul.f32 0.01, %v2611_v26  ;;  %v2608_v28 = vld [vmem:[#allocation7 + $0x1c0] sm:$0xff] }
 0x650   : > { %v2544_v54 = vmul.f32 0.99, %v2480_v19  ;;  %v2610_v32 = vld [vmem:[#allocation7 + $0x1d0] sm:$0xff]  ;;  %v2737_v40 = vadd.f32 %v2673_v29, %v2545_v23  ;;  %v2546_v51 = vmul.f32 0.99, %v2482_v63  ;;  %3124 = vst [vmem:[#allocation26 + $0x1b0] sm:$0xff] %v2734_v9 }
 0x651   : > { %v2732_v33 = vadd.f32 %v2668_v36, %v2540_v18  ;;  %v2672_v39 = vmul.f32 0.01, %v2608_v28  ;;  %v2739_v6 = vadd.f32 %v2675_v10, %v2547_v16  ;;  %v2485_v11 = vld [vmem:[#allocation19 + $0x1e8] sm:$0xff]  ;;  %v2487_v41 = vld [vmem:[#allocation19 + $0x1f8] sm:$0xff]  ;;  %v2484_v22 = vld [vmem:[#allocation19 + $0x1e0] sm:$0xff] }
 0x652   : > { %5161 = vmatpush1.bf16.msra.mxu1 %v4843_v59  ;;  %v2674_v59 = vmul.f32 0.01, %v2610_v32  ;;  %3127 = vst [vmem:[#allocation26 + $0x1c8] sm:$0xff] %v2737_v40  ;;  %v2549_v62 = vmul.f32 0.99, %v2485_v11  ;;  %v2615_v20 = vld [vmem:[#allocation7 + $0x1f8] sm:$0xff] }
 0x653   : > { %5162 = vmatprep.subr.bf16.mxu1 %v4846_v30  ;;  %3122 = vst [vmem:[#allocation26 + $0x1a0] sm:$0xff] %v2732_v33  ;;  %v4849_v0 = vpack.c.bf16 %v2734_v9, %v2732_v33  ;;  %v2613_v30 = vld [vmem:[#allocation7 + $0x1e8] sm:$0xff]  ;;  %v2736_v46 = vadd.f32 %v2672_v39, %v2544_v54  ;;  %v2551_v8 = vmul.f32 0.99, %v2487_v41  ;;  %3129 = vst [vmem:[#allocation26 + $0x1d8] sm:$0xff] %v2739_v6  ;;  %v2612_v2 = vld [vmem:[#allocation7 + $0x1e0] sm:$0xff] }
 0x654   : > { %v2738_v49 = vadd.f32 %v2674_v59, %v2546_v51  ;;  %v4852_v5 = vpack.c.bf16 %v2739_v6, %v2737_v40  ;;  %v2677_v50 = vmul.f32 0.01, %v2613_v30  ;;  %v2679_v1 = vmul.f32 0.01, %v2615_v20  ;;  %v2614_v31 = vld [vmem:[#allocation7 + $0x1f0] sm:$0xff] }
 0x655   : > { %3126 = vst [vmem:[#allocation26 + $0x1c0] sm:$0xff] %v2736_v46  ;;  %v2548_v25 = vmul.f32 0.99, %v2484_v22  ;;  %v2676_v42 = vmul.f32 0.01, %v2612_v2 }
 0x656   : > { %5163 = vmatpush1.bf16.msra.mxu1 %v4845_v47  ;;  %v2486_v47 = vld [vmem:[#allocation19 + $0x1f0] sm:$0xff]  ;;  %3128 = vst [vmem:[#allocation26 + $0x1d0] sm:$0xff] %v2738_v49  ;;  %v4851_v37 = vpack.c.bf16 %v2738_v49, %v2736_v46  ;;  %v2741_v58 = vadd.f32 %v2677_v50, %v2549_v62  ;;  %v2743_v27 = vadd.f32 %v2679_v1, %v2551_v8  ;;  %v2678_v48 = vmul.f32 0.01, %v2614_v31  ;;  %v2414_v1 = vld [vmem:[#allocation16] sm:$0x3] }
 0x657   : > { %5164 = vmatprep.subr.bf16.mxu1 %v4848_v13  ;;  %v2550_v3 = vmul.f32 0.99, %v2486_v47  ;;  %v2740_v34 = vadd.f32 %v2676_v42, %v2548_v25  ;;  %v2416_v47 = vld [vmem:[%s8064_s21] sm:$0x3]  ;;  %v2419_v25 = vld [vmem:[#allocation17] sm:$0x3] }
 0x658   : > { %3131 = vst [vmem:[#allocation26 + $0x1e8] sm:$0xff] %v2741_v58  ;;  %3133 = vst [vmem:[#allocation26 + $0x1f8] sm:$0xff] %v2743_v27  ;;  %v4854_v45 = vpack.c.bf16 %v2743_v27, %v2741_v58  ;;  %v2415_v31 = vmul.f32 0.99, %v2414_v1  ;;  %v2417_v58 = vmul.f32 0.01, %v2416_v47 }
 0x659   : > { %v2742_v38 = vadd.f32 %v2678_v48, %v2550_v3  ;;  %3130 = vst [vmem:[#allocation26 + $0x1e0] sm:$0xff] %v2740_v34  ;;  %v2421_v3 = vld [vmem:[#allocation5] sm:$0x3]  ;;  %v2420_v27 = vmul.f32 0.99, %v2419_v25 }
 0x65a   : > { %5165 = vmatpush1.bf16.msra.mxu1 %v4847_v53  ;;  %v2422_v42 = vmul.f32 0.01, %v2421_v3  ;;  %v2418_v48 = vadd.f32 %v2417_v58, %v2415_v31 }
 0x65b   : > { %5166 = vmatprep.subr.bf16.mxu1 %v4850_v17  ;;  %3132 = vst [vmem:[#allocation26 + $0x1f0] sm:$0xff] %v2742_v38  ;;  %v4853_v35 = vpack.c.bf16 %v2742_v38, %v2740_v34 }
 0x65c   : > { %v5114_v38 = vrot.slane %v2418_v48, %v7189_v56 }
 0x65e   : > { %5167 = vmatpush1.bf16.msra.mxu1 %v4849_v0 }
 0x65f   : > { %5168 = vmatprep.subr.bf16.mxu1 %v4852_v5 }
 0x662   : > { %5169 = vmatpush1.bf16.msra.mxu1 %v4851_v37 }
 0x663   : > { %5170 = vmatprep.subr.bf16.mxu1 %v4854_v45  ;;  %v2423_v45 = vadd.f32 %v2422_v42, %v2420_v27 }
 0x666   : > { %5171 = vmatpush1.bf16.msra.mxu1 %v4853_v35 }
 0x6bc   : > { %v4654_v13 = vpop.f32.mrb[16].mxu1 }
 0x6bd   : > { %4661 = vst [vmem:[%s804_s2] sm:$0xff] %v4654_v13  ;;  %v4656_v52 = vpop.f32.mrb[17].mxu1 }
 0x6be   : > { %4662 = vst [vmem:[%s804_s2 + $0x8] sm:$0xff] %v4656_v52  ;;  %v4658_v60 = vpop.f32.mrb[18].mxu1  ;;  %v5118_v52 = vrot.slane %v2418_v48, %v7192_v57 }
 0x6bf   : > { %v4659_v14 = vpop.f32.mrb[19].mxu1 }
 0x6fc   : > { %v7815_v44 = vpop.f32.mrb[20].mxu1 }
 0x6fd   : > { %v5064_v18 = vsel %vm3951_vm0, %v7815_v44, 0.0  ;;  %v7820_v24 = vpop.f32.mrb[21].mxu1 }
 0x6fe   : > { %v5066_v43 = vrot.slane %v5064_v18, 4  ;;  %v5080_v12 = vmul.f32 %v5064_v18, %v5064_v18  ;;  %v5065_v53 = vsel %vm3951_vm0, %v7820_v24, 0.0  ;;  %v5061_v15 = vpop.f32.mrb[22].mxu1 }
 0x6ff   : > { %v5072_v7 = vrot.slane %v5065_v53, 4  ;;  %v5081_v4 = vmul.f32 %v5065_v53, %v5065_v53  ;;  %v5062_v21 = vpop.f32.mrb[23].mxu1 }
 0x700   : > { %v5067_v26 = vadd.f32 %v5066_v43, %v5064_v18  ;;  %v5082_v36 = vrot.slane %v5080_v12, 4  ;;  %v5127_v18 = vrot.slane %v2423_v45, %v7189_v56 }
 0x701   : > { %v5073_v61 = vadd.f32 %v5072_v7, %v5065_v53  ;;  %v5088_v23 = vrot.slane %v5081_v4, 4 }
 0x702   : > { %v5068_v17 = vrot.slane %v5067_v26, 2  ;;  %v5083_v16 = vadd.f32 %v5082_v36, %v5080_v12  ;;  %v5131_v12 = vrot.slane %v2423_v45, %v7192_v57 }
 0x703   : > { %v5074_v29 = vrot.slane %v5073_v61, 2  ;;  %v5089_v19 = vadd.f32 %v5088_v23, %v5081_v4 }
 0x704   : > { %v5069_v63 = vadd.f32 %v5068_v17, %v5067_v26  ;;  %v5084_v33 = vrot.slane %v5083_v16, 2 }
 0x705   : > { %v5075_v9 = vadd.f32 %v5074_v29, %v5073_v61  ;;  %v5090_v10 = vrot.slane %v5089_v19, 2 }
 0x706   : > { %v5070_v54 = vrot.slane %v5069_v63, 1  ;;  %v5085_v28 = vadd.f32 %v5084_v33, %v5083_v16 }
 0x707   : > { %v5076_v32 = vrot.slane %v5075_v9, 1  ;;  %v5091_v40 = vadd.f32 %v5090_v10, %v5089_v19 }
 0x708   : > { %v5071_v51 = vadd.f32 %v5070_v54, %v5069_v63  ;;  %v5086_v39 = vrot.slane %v5085_v28, 1 }
 0x709   : > { %v5077_v59 = vadd.f32 %v5076_v32, %v5075_v9  ;;  %v5092_v0 = vrot.slane %v5091_v40, 1 }
 0x70a   : > { %v5078_v6 = vmul.f32 0.5, %v5071_v51  ;;  %v5087_v11 = vadd.f32 %v5086_v39, %v5085_v28 }
 0x70b   : > { %v5079_v41 = vmul.f32 0.5, %v5077_v59  ;;  %v5093_v30 = vadd.f32 %v5092_v0, %v5091_v40 }
 0x70c   : > { %v5094_v46 = vmul.f32 0.5, %v5087_v11  ;;  %v5096_v49 = vmul.f32 %v5078_v6, %v5078_v6  ;;  %v5102_v34 = vsub.f32 %v7815_v44, %v5078_v6 }
 0x70d   : > { %v5095_v62 = vmul.f32 0.5, %v5093_v30  ;;  %v5097_v8 = vmul.f32 %v5079_v41, %v5079_v41  ;;  %v5103_v13 = vsub.f32 %v7820_v24, %v5079_v41  ;;  %v8159_v24 = vlaneseq }
 0x70e   : > { %v5098_v20 = vsub.f32 %v5094_v46, %v5096_v49 }
 0x70f   : > { %v5099_v22 = vsub.f32 %v5095_v62, %v5097_v8  ;;  %vm3066_vm1 = vcmp.lt.s32.totalorder %v8159_v24, 256 }
 0x710   : > { %v5100_v5 = vmax.f32 %v5098_v20, 0.0  ;;  %3069 = vst.msk [vmem:[#allocation24] sm:$0x3] %vm3066_vm1, %v2423_v45  ;;  %3068 = vst.msk [vmem:[#allocation23] sm:$0x3] %vm3066_vm1, %v2418_v48 }
 0x711   : > { %v5101_v50 = vmax.f32 %v5099_v22, 0.0 }
 0x712   : > { %v5104_v2 = vadd.f32 1e-05, %v5100_v5 }
 0x713   : > { %v5105_v37 = vadd.f32 1e-05, %v5101_v50 }
 0x714   : > { %5958 = vrsqrt.f32 %v5104_v2 }
 0x715   : > { %5960 = vrsqrt.f32 %v5105_v37 }
 0x71e   : > { %v5959_v35 = vpop.eup %5958 }
 0x71f   : > { %v5961_v60 = vpop.eup %5960  ;;  %v5108_v14 = vmul.f32 %v5959_v35, %v5102_v34 }
 0x720   : > { %v5109_v43 = vmul.f32 %v5961_v60, %v5103_v13 }
 0x721   : > { %v5121_v53 = vmul.f32 %v5114_v38, %v5108_v14 }
 0x722   : > { %v5122_v15 = vmul.f32 %v5118_v52, %v5109_v43 }
 0x723   : > { %v5134_v7 = vadd.f32 %v5127_v18, %v5121_v53 }
 0x724   : > { %v5135_v4 = vadd.f32 %v5131_v12, %v5122_v15 }
 0x725   : > { %v5136_v44 = vmax.f32 %v5134_v7, 0.0 }
 0x726   : > { %v5137_v21 = vmax.f32 %v5135_v4, 0.0 }
 0x727   : > { %v5138_v36 = vpack.c.bf16 %v5136_v44, %v5136_v44 }
 0x728   : > { %v5139_v26 = vpack.c.bf16 %v5137_v21, %v5137_v21 }
 0x72a   : > { %5172 = vmatprep.mubr.bf16.mxu1 %v5139_v26 }
 0x72b   : > { %5173 = vmatmul.mubr.bf16.vlgmr.msra.gmra.mrb[24].mxu1 %v5138_v36 }
 0x72c   : > { %6319 = shalt.err (!%p6316_p10)
}
 0x72d   : > { %s6320_s9 = scalar_lea.hbm %s7977_s18, 8192 }
 0x72e   : > { %p6321_p11 = scmp.ne.s32.totalorder %s7977_s18, %s6320_s9  ;;  %p6326_p0 = scmp.lt.u32.totalorder %s6320_s9, %s7977_s18 }
 0x730   : > { %p6322_p12 = pnand %p6321_p11, %p5802_p6 }
 0x732   : > { %p6323_p13 = pneg %p6322_p12 }
 0x734   : > { %p6328_p1 = pnand %p6326_p0, %p6323_p13 }
 0x736   : > { %6331 = shalt.err (!%p6328_p1)
}
 0x737   : > { %s6497_s11 = smov 256   ;;  %s6498_s4 = smov 16  }
 0x738   : > { %5729 = dma.vmem_to_hbm [thread:$0]  (%p5802_p6), %s5265_s25, 8192, %s7977_s18, [#allocation22], %s6497_s11, %s6497_s11, %s6498_s4  }
 0x739   : > { %s6332_s16 = scalar_lea.vmem %s5290_s28, 32  ;;  %p6339_p9 = scmp.lt.s32.totalorder %s5290_s28, %s5290_s28 }
 0x73a   : > { %p6333_p4 = scmp.ne.s32.totalorder %s5290_s28, %s6332_s16  ;;  %p6340_p2 = scmp.lt.s32.totalorder %s6332_s16, %s6332_s16 }
 0x73c   : > { %p6334_p7 = pnand %p6333_p4, %p5802_p6  ;;  %p6341_p3 = por %p6340_p2, %p6339_p9 }
 0x73e   : > { %p6335_p8 = pneg %p6334_p7 }
 0x740   : > { %p6342_p5 = pnand %p6341_p3, %p6335_p8 }
 0x742   : > { %6345 = shalt.err (!%p6342_p5)
}
 0x743   : > { %s6346_s26 = scalar_lea.hbm %s7979_s20, 32 }
 0x744   : > { %p6347_p10 = scmp.ne.s32.totalorder %s7979_s20, %s6346_s26  ;;  %p6352_p13 = scmp.lt.u32.totalorder %s6346_s26, %s7979_s20 }
 0x746   : > { %p6348_p11 = pnand %p6347_p10, %p5802_p6 }
 0x748   : > { %p6349_p12 = pneg %p6348_p11 }
 0x74a   : > { %p6354_p0 = pnand %p6352_p13, %p6349_p12 }
 0x74c   : > { %6357 = shalt.err (!%p6354_p0)
}
 0x74d   : > { %5733 = dma.vmem_to_hbm [thread:$0]  (%p5802_p6), %s5290_s28, 32, %s7979_s20, [#allocation25]  }
 0x74e   : > { %s6499_s16 = smov [#allocation20]   ;;  %s6500_s9 = smov [#allocation23]  }
 0x74f   : > { %s5251_s22 = sshll.u32 %s6499_s16, 4  ;;  %s5278_s24 = sshll.u32 %s6500_s9, 4  ;;  %s5252_s22 = int_to_ptr.vmem [resolvable:$true] %s5251_s22  ;;  %s5279_s24 = int_to_ptr.vmem [resolvable:$true] %s5278_s24 }
 0x750   : > { %s6358_s2 = scalar_lea.vmem %s5252_s22, 32768  ;;  %p6365_p8 = scmp.lt.s32.totalorder %s5252_s22, %s5252_s22 }
 0x751   : > { %p6359_p1 = scmp.ne.s32.totalorder %s5252_s22, %s6358_s2  ;;  %p6366_p9 = scmp.lt.s32.totalorder %s6358_s2, %s6358_s2 }
 0x753   : > { %p6360_p4 = pnand %p6359_p1, %p5802_p6  ;;  %p6367_p2 = por %p6366_p9, %p6365_p8 }
 0x755   : > { %p6361_p7 = pneg %p6360_p4 }
 0x757   : > { %p6368_p3 = pnand %p6367_p2, %p6361_p7 }
 0x759   : > { %6371 = shalt.err (!%p6368_p3)
}
 0x75a   : > { %s6372_s28 = scalar_lea.hbm %s7976_s17, 32768 }
 0x75b   : > { %p6373_p5 = scmp.ne.s32.totalorder %s7976_s17, %s6372_s28  ;;  %p6378_p12 = scmp.lt.u32.totalorder %s6372_s28, %s7976_s17 }
 0x75d   : > { %p6374_p10 = pnand %p6373_p5, %p5802_p6 }
 0x75f   : > { %p6375_p11 = pneg %p6374_p10 }
 0x761   : > { %p6380_p13 = pnand %p6378_p12, %p6375_p11 }
 0x763   : > { %6383 = shalt.err (!%p6380_p13)
}
 0x764   : > { %5727 = dma.vmem_to_hbm [thread:$0]  (%p5802_p6), %s5252_s22, 32768, %s7976_s17, [#allocation4], %s6497_s11, %s6497_s11, %s6498_s4  }
 0x765   : > { %s6384_s26 = scalar_lea.vmem %s5279_s24, 32  ;;  %p6391_p7 = scmp.lt.s32.totalorder %s5279_s24, %s5279_s24 }
 0x766   : > { %p6385_p0 = scmp.ne.s32.totalorder %s5279_s24, %s6384_s26  ;;  %p6392_p8 = scmp.lt.s32.totalorder %s6384_s26, %s6384_s26 }
 0x768   : > { %p6386_p1 = pnand %p6385_p0, %p5802_p6  ;;  %p6393_p9 = por %p6392_p8, %p6391_p7 }
 0x76a   : > { %p6387_p4 = pneg %p6386_p1 }
 0x76c   : > { %p6394_p2 = pnand %p6393_p9, %p6387_p4 }
 0x76e   : > { %6397 = shalt.err (!%p6394_p2)
}
 0x76f   : > { %s6398_s29 = scalar_lea.hbm %s7978_s19, 32 }
 0x770   : > { %p6399_p3 = scmp.ne.s32.totalorder %s7978_s19, %s6398_s29  ;;  %p6404_p11 = scmp.lt.u32.totalorder %s6398_s29, %s7978_s19 }
 0x772   : > { %p6400_p5 = pnand %p6399_p3, %p5802_p6 }
 0x774   : > { %p6401_p10 = pneg %p6400_p5 }
 0x776   : > { %p6406_p12 = pnand %p6404_p11, %p6401_p10 }
 0x778   : > { %6409 = shalt.err (!%p6406_p12)
}
 0x779   : > { %5731 = dma.vmem_to_hbm [thread:$0]  (%p5802_p6), %s5279_s24, 32, %s7978_s19, [#allocation22]  }
 0x77a   : > { %s6501_s26 = smov [#allocation26]  }
 0x77b   : > { %s5299_s25 = sshll.u32 %s6501_s26, 4  ;;  %s5300_s25 = int_to_ptr.vmem [resolvable:$true] %s5299_s25 }
 0x77c   : > { %s6410_s28 = scalar_lea.vmem %s5300_s25, 8192  ;;  %p6417_p4 = scmp.lt.s32.totalorder %s5300_s25, %s5300_s25 }
 0x77d   : > { %p6411_p13 = scmp.ne.s32.totalorder %s5300_s25, %s6410_s28  ;;  %p6418_p7 = scmp.lt.s32.totalorder %s6410_s28, %s6410_s28 }
 0x77f   : > { %p6412_p0 = pnand %p6411_p13, %p5802_p6  ;;  %p6419_p8 = por %p6418_p7, %p6417_p4 }
 0x781   : > { %p6413_p1 = pneg %p6412_p0 }
 0x783   : > { %p6420_p9 = pnand %p6419_p8, %p6413_p1 }
 0x785   : > { %6423 = shalt.err (!%p6420_p9)
}
 0x786   : > { %s8160_s6 = sld [smem:[#allocation79_spill]] }
 0x78c   : > { %s6424_s22 = scalar_lea.hbm %s8160_s6, 8192 }
 0x78d   : > { %p6425_p2 = scmp.ne.s32.totalorder %s8160_s6, %s6424_s22  ;;  %p6430_p10 = scmp.lt.u32.totalorder %s6424_s22, %s8160_s6 }
 0x78f   : > { %p6426_p3 = pnand %p6425_p2, %p5802_p6 }
 0x791   : > { %p6427_p5 = pneg %p6426_p3 }
 0x793   : > { %p6432_p11 = pnand %p6430_p10, %p6427_p5 }
 0x795   : > { %6435 = shalt.err (!%p6432_p11)
}
 0x796   : > { %5735 = dma.vmem_to_hbm [thread:$0]  (%p5802_p6), %s5300_s25, 8192, %s8160_s6, [#allocation25], %s6497_s11, %s6497_s11, %s6498_s4  }
 0x797   : > { %s8161_s25 = sld [smem:[#allocation78_spill]] }
 0x79d   : > { %s809_s29 = scalar_lea.vmem %s8161_s25, %s5658_s5 }
 0x7fe   : > { %v5174_v56 = vpop.f32.mrb[24].mxu1 }
 0x7ff   : > { %v5181_v57 = vsel %vm3951_vm0, %v5174_v56, 0.0  ;;  %v5176_v61 = vpop.f32.mrb[25].mxu1 }
 0x800   : > { %v5183_v23 = vrot.slane %v5181_v57, 4  ;;  %v5197_v17 = vmul.f32 %v5181_v57, %v5181_v57  ;;  %v5182_v16 = vsel %vm3951_vm0, %v5176_v61, 0.0  ;;  %v5178_v29 = vpop.f32.mrb[26].mxu1 }
 0x801   : > { %v5189_v19 = vrot.slane %v5182_v16, 4  ;;  %v5198_v63 = vmul.f32 %v5182_v16, %v5182_v16  ;;  %v5179_v33 = vpop.f32.mrb[27].mxu1 }
 0x802   : > { %v5184_v9 = vadd.f32 %v5183_v23, %v5181_v57  ;;  %v5199_v10 = vrot.slane %v5197_v17, 4 }
 0x803   : > { %v5190_v54 = vadd.f32 %v5189_v19, %v5182_v16  ;;  %v5205_v28 = vrot.slane %v5198_v63, 4 }
 0x804   : > { %v5185_v32 = vrot.slane %v5184_v9, 2  ;;  %v5200_v40 = vadd.f32 %v5199_v10, %v5197_v17 }
 0x805   : > { %v5191_v51 = vrot.slane %v5190_v54, 2  ;;  %v5206_v39 = vadd.f32 %v5205_v28, %v5198_v63 }
 0x806   : > { %v5186_v59 = vadd.f32 %v5185_v32, %v5184_v9  ;;  %v5201_v0 = vrot.slane %v5200_v40, 2 }
 0x807   : > { %v5192_v6 = vadd.f32 %v5191_v51, %v5190_v54  ;;  %v5207_v11 = vrot.slane %v5206_v39, 2 }
 0x808   : > { %v5187_v41 = vrot.slane %v5186_v59, 1  ;;  %v5202_v30 = vadd.f32 %v5201_v0, %v5200_v40 }
 0x809   : > { %v5193_v55 = vrot.slane %v5192_v6, 1  ;;  %v5208_v46 = vadd.f32 %v5207_v11, %v5206_v39 }
 0x80a   : > { %v5188_v49 = vadd.f32 %v5187_v41, %v5186_v59  ;;  %v5203_v62 = vrot.slane %v5202_v30, 1 }
 0x80b   : > { %v5194_v8 = vadd.f32 %v5193_v55, %v5192_v6  ;;  %v5209_v20 = vrot.slane %v5208_v46, 1 }
 0x80c   : > { %v5195_v22 = vmul.f32 0.5, %v5188_v49  ;;  %v5204_v5 = vadd.f32 %v5203_v62, %v5202_v30 }
 0x80d   : > { %v5196_v50 = vmul.f32 0.5, %v5194_v8  ;;  %v5210_v1 = vadd.f32 %v5209_v20, %v5208_v46 }
 0x80e   : > { %v5211_v47 = vmul.f32 0.5, %v5204_v5  ;;  %v5213_v2 = vmul.f32 %v5195_v22, %v5195_v22  ;;  %v5219_v45 = vsub.f32 %v5174_v56, %v5195_v22 }
 0x80f   : > { %v5212_v37 = vmul.f32 0.5, %v5210_v1  ;;  %v5214_v25 = vmul.f32 %v5196_v50, %v5196_v50  ;;  %v5220_v38 = vsub.f32 %v5176_v61, %v5196_v50 }
 0x810   : > { %v5215_v3 = vsub.f32 %v5211_v47, %v5213_v2 }
 0x811   : > { %v5216_v31 = vsub.f32 %v5212_v37, %v5214_v25 }
 0x812   : > { %v5217_v58 = vmax.f32 %v5215_v3, 0.0 }
 0x813   : > { %v5218_v27 = vmax.f32 %v5216_v31, 0.0 }
 0x814   : > { %v5221_v42 = vadd.f32 1e-05, %v5217_v58 }
 0x815   : > { %v5222_v48 = vadd.f32 1e-05, %v5218_v27 }
 0x816   : > { %5962 = vrsqrt.f32 %v5221_v42 }
 0x817   : > { %5964 = vrsqrt.f32 %v5222_v48 }
 0x820   : > { %v5963_v34 = vpop.eup %5962 }
 0x821   : > { %v5965_v35 = vpop.eup %5964  ;;  %v5225_v13 = vmul.f32 %v5963_v34, %v5219_v45 }
 0x822   : > { %v5226_v52 = vmul.f32 %v5965_v35, %v5220_v38 }
 0x823   : > { %5227 = vst [vmem:[%s809_s29] sm:$0xff] %v5225_v13 }
 0x824   : > { %5228 = vst [vmem:[%s809_s29 + $0x8] sm:$0xff] %v5226_v52 }
 0x825   : > { %6465 = dma.done.wait (%p5802_p6), [#allocation4], 32768  }
 0x826   : > { %6467 = vsyncadd (%p5802_p6), [#allocation4], 4294934528 }
 0x827   : > { %6469 = dma.done.wait (%p5802_p6), [#allocation22], 8224  }
 0x828   : > { %6471 = vsyncadd (%p5802_p6), [#allocation22], 4294959072 }
 0x829   : > { %6473 = dma.done.wait (%p5802_p6), [#allocation25], 8224  }
 0x82a   : > { %6475 = vsyncadd (%p5802_p6), [#allocation25], 4294959072 }
 0x82b PF: > { %s8162_s3 = sld [smem:[#allocation36_spill]] }
 0x831   : > { %s41_s2 = sadd.s32 1, %s8162_s3  }
 0x832   : > { %p38_p12 = scmp.ge.s32.totalorder %s41_s2, 4  }
 0x834   :  { %40 = sbr.rel (!%p38_p12) target bundleno = 21 (0x15), region = 208 }
 0x83b   :  { %5347 = vsyncpa [#allocation3], 1 }
 0x83c   :  { %5349 = vsyncpa [#allocation3 + $0x1], 1 }
 0x83d   :  { %5350 = vsyncpa [#allocation6], 1 }
 0x83e   :  { %5351 = vsyncpa [#allocation9], 1 }
 0x83f   :  { %5352 = vsyncpa [#allocation12], 1 }
 0x840   :  { %5353 = vsyncpa [#allocation15], 1 }
 0x841   :  { %5354 = vsyncpa [#allocation18], 1 }
 0x842   :  { %5355 = vsyncpa [#allocation4], 1 }
 0x843   :  { %5357 = vsyncpa [#allocation4 + $0x1], 1 }
 0x844   :  { %5358 = vsyncpa [#allocation22], 1 }
 0x845   :  { %5359 = vsyncpa [#allocation25], 1 }

</bundles_post_ra>
